<compile_context>
chip_gen: v7x
topology: tpu7x:2x2x1
jax: 0.10.0
libtpu: 0.0.40
codegen_flags: <defaults>
</compile_context>

<pallas_src>
import functools
import math

import jax
import jax.numpy as jnp
from jax.experimental import pallas as pl
from jax.experimental.pallas import tpu as pltpu


_VMEM_LIMIT = 32 * 1024 * 1024   # explicit scoped-VMEM budget (safe on v5e/v6e/v7x)


def _cparams(*sems):
    return pltpu.CompilerParams(dimension_semantics=tuple(sems),
                                vmem_limit_bytes=_VMEM_LIMIT)


def _round_up(a, b):
    return (a + b - 1) // b * b


def _pick_tm(M, cap=512):
    """Row-tile size: >=2 grid steps when possible (v7x megacore), multiple of 8, <= cap."""
    tm = _round_up(max(M // 2, 1), 8)
    return int(max(8, min(tm, cap)))


# ----------------------------------------------------------------- in-kernel math helpers

def _erf(x):
    # TODO(synk): exact erf done via Abramowitz&Stegun 7.1.26 polynomial (|err| < 1.5e-7)
    # so we do not rely on an erf primitive lowering inside Mosaic.
    p = 0.3275911
    a1, a2, a3, a4, a5 = 0.254829592, -0.284496736, 1.421413741, -1.453152027, 1.061405429
    s = jnp.where(x >= 0.0, 1.0, -1.0)
    ax = jnp.abs(x)
    t = 1.0 / (1.0 + p * ax)
    poly = ((((a5 * t + a4) * t + a3) * t + a2) * t + a1) * t
    return s * (1.0 - poly * jnp.exp(-ax * ax))


def _gelu(x):   # exact (erf) GELU, matches nn.GELU()
    return 0.5 * x * (1.0 + _erf(x * 0.7071067811865476))


def _sigmoid(x):
    return 1.0 / (1.0 + jnp.exp(-x))


def _bf16(x):
    return x.astype(jnp.bfloat16)


# ----------------------------------------------------------------------------- kernels

def _linear_kernel(x_ref, w_ref, b_ref, o_ref):
    acc = jnp.dot(_bf16(x_ref[...]), _bf16(w_ref[...]),
                  preferred_element_type=jnp.float32)
    o_ref[...] = acc + b_ref[...]


def _linear_ln_kernel(x_ref, w_ref, b_ref, g_ref, bb_ref, o_ref, *, eps):
    y = jnp.dot(_bf16(x_ref[...]), _bf16(w_ref[...]),
                preferred_element_type=jnp.float32) + b_ref[...]
    mu = jnp.mean(y, axis=-1, keepdims=True)
    yc = y - mu
    var = jnp.mean(yc * yc, axis=-1, keepdims=True)
    o_ref[...] = yc * jax.lax.rsqrt(var + eps) * g_ref[...] + bb_ref[...]


def _cnn_attn_kernel(q_ref, k_ref, v_ref, s_ref, o_ref):
    # blocks: q/k/v (GB, hw, d) where GB = chunk of (window, head) pairs ; sigma (GB, 1, 1)
    q = q_ref[...]
    k = k_ref[...]
    v = v_ref[...]
    # F.normalize(dim=-2): x / max(||x||_2, 1e-12) == x * rsqrt(max(sum x^2, 1e-24))
    qn = q * jax.lax.rsqrt(jnp.maximum(jnp.sum(q * q, axis=-2, keepdims=True), 1e-24))
    kn = k * jax.lax.rsqrt(jnp.maximum(jnp.sum(k * k, axis=-2, keepdims=True), 1e-24))
    attn = jnp.einsum('ghd,ghe->gde', _bf16(kn), _bf16(qn),
                      preferred_element_type=jnp.float32)
    attn = attn * s_ref[...]
    attn = attn - jnp.max(attn, axis=-2, keepdims=True)   # softmax over dh1 (axis=-2)
    p = jnp.exp(attn)
    p = p * pl.reciprocal(jnp.sum(p, axis=-2, keepdims=True), approx=True)
    o_ref[...] = jnp.einsum('ghd,gde->ghe', _bf16(v), _bf16(p),
                            preferred_element_type=jnp.float32)


def _win_attn_kernel(q_ref, k_ref, v_ref, pe_ref, o_ref, *, scale):
    WB, nh, hw, d = q_ref.shape
    q = (q_ref[...] * scale).reshape(WB * nh, hw, d)
    k = k_ref[...].reshape(WB * nh, hw, d)
    v = v_ref[...].reshape(WB * nh, hw, d)
    sim = jnp.einsum('gid,gjd->gij', _bf16(q), _bf16(k),
                     preferred_element_type=jnp.float32)
    sim = sim.reshape(WB, nh, hw, hw) + pe_ref[...]
    sim = sim - jnp.max(sim, axis=-1, keepdims=True)
    p = jnp.exp(sim)
    p = p * pl.reciprocal(jnp.sum(p, axis=-1, keepdims=True), approx=True)
    out = jnp.einsum('gij,gjd->gid', _bf16(p.reshape(WB * nh, hw, hw)), _bf16(v),
                     preferred_element_type=jnp.float32)
    o_ref[...] = out.reshape(WB, nh, hw, d)


def _dw_taps(xs, w, H):
    # xs: (3, H+2, W, C) — axis 0 is the pre-shifted column (dx) copy (wrapper-materialized),
    # so only leading axes are sliced here (no lane/sublane-crossing slices).  w: (3, 3, 1, C).
    acc = None
    for dy in range(3):
        for dx in range(3):
            t = xs[dx, dy:dy + H] * w[dy, dx]
            acc = t if acc is None else acc + t
    return acc   # (H, W, C) float32


def _dwconv_gelu_kernel(xs_ref, w_ref, o_ref, *, H):
    o_ref[0] = _gelu(_dw_taps(xs_ref[0], w_ref[...], H))


def _dwconv_add_kernel(xs_ref, w_ref, add_ref, o_ref, *, H):
    o_ref[0] = _dw_taps(xs_ref[0], w_ref[...], H) + add_ref[0]


def _dwconv_bias_proj_kernel(xs_ref, w_ref, b_ref, pw_ref, pb_ref, o_ref, *, H):
    acc = _dw_taps(xs_ref[0], w_ref[...], H) + b_ref[...]            # (H, W, C)
    _, W, C = acc.shape
    y = acc.reshape(H * W, C)
    proj = jnp.dot(_bf16(y), _bf16(pw_ref[...]),
                   preferred_element_type=jnp.float32) + pb_ref[...]
    o_ref[0] = proj.reshape(H, W, pw_ref.shape[1])


def _si_gate_kernel(a_ref, x_ref, w1_ref, b1_ref, w2_ref, b2_ref, o_ref):
    # spatial interaction MLP + sigmoid + gate, fused: output stays lane-dense (TM, C);
    # the N=1 intermediate never touches HBM.
    h = jnp.dot(_bf16(a_ref[...]), _bf16(w1_ref[...]),
                preferred_element_type=jnp.float32) + b1_ref[...]
    h = _gelu(h)
    si = jnp.sum(h * w2_ref[...], axis=-1, keepdims=True) + b2_ref[...]   # (TM, 1)
    o_ref[...] = _sigmoid(si) * x_ref[...]


def _ci_gate_kernel(p_ref, w1_ref, b1_ref, w2_ref, b2_ref, o_ref):
    h = jnp.dot(_bf16(p_ref[...]), _bf16(w1_ref[...]),
                preferred_element_type=jnp.float32) + b1_ref[...]
    h = _gelu(h)
    g = jnp.dot(_bf16(h), _bf16(w2_ref[...]),
                preferred_element_type=jnp.float32) + b2_ref[...]
    o_ref[...] = _sigmoid(g)


def _gate_linear_kernel(x_ref, g_ref, w_ref, b_ref, o_ref):
    x = x_ref[0] * g_ref[0]
    o_ref[0] = jnp.dot(_bf16(x), _bf16(w_ref[...]),
                       preferred_element_type=jnp.float32) + b_ref[...]


# ----------------------------------------------------------------------------- wrappers

def linear(x, w, b=None, *, tm=512):
    """(..., K) @ (K, N) + (N,): row-tiled, bf16 MXU operands, f32 accumulation."""
    orig = x.shape
    K = orig[-1]
    N = w.shape[1]
    M = int(math.prod(orig[:-1]))
    x2 = x.reshape(M, K)
    TM = _pick_tm(M, tm)
    Mp = _round_up(M, TM)
    if Mp != M:
        x2 = jnp.pad(x2, ((0, Mp - M), (0, 0)))
    b2 = (jnp.zeros((N,), jnp.float32) if b is None else b).reshape(1, N)
    out = pl.pallas_call(
        _linear_kernel,
        out_shape=jax.ShapeDtypeStruct((Mp, N), jnp.float32),
        grid=(Mp // TM,),
        in_specs=[pl.BlockSpec((TM, K), lambda i: (i, 0)),
                  pl.BlockSpec((K, N), lambda i: (0, 0)),
                  pl.BlockSpec((1, N), lambda i: (0, 0))],
        out_specs=pl.BlockSpec((TM, N), lambda i: (i, 0)),
        compiler_params=_cparams("parallel"),
    )(x2, w, b2)
    if Mp != M:
        out = out[:M]
    return out.reshape(orig[:-1] + (N,))


def linear_layernorm(x, w, b, g, beta, eps=1e-5, *, tm=512):
    """Fused nn.Linear + LayerNorm (proj_cnn_norm(proj_cnn(x)) / proj_attn_norm(proj_attn(x)))."""
    orig = x.shape
    K = orig[-1]
    N = w.shape[1]
    M = int(math.prod(orig[:-1]))
    x2 = x.reshape(M, K)
    TM = _pick_tm(M, tm)
    Mp = _round_up(M, TM)
    if Mp != M:
        x2 = jnp.pad(x2, ((0, Mp - M), (0, 0)))
    out = pl.pallas_call(
        functools.partial(_linear_ln_kernel, eps=eps),
        out_shape=jax.ShapeDtypeStruct((Mp, N), jnp.float32),
        grid=(Mp // TM,),
        in_specs=[pl.BlockSpec((TM, K), lambda i: (i, 0)),
                  pl.BlockSpec((K, N), lambda i: (0, 0)),
                  pl.BlockSpec((1, N), lambda i: (0, 0)),
                  pl.BlockSpec((1, N), lambda i: (0, 0)),
                  pl.BlockSpec((1, N), lambda i: (0, 0))],
        out_specs=pl.BlockSpec((TM, N), lambda i: (i, 0)),
        compiler_params=_cparams("parallel"),
    )(x2, w, b.reshape(1, N), g.reshape(1, N), beta.reshape(1, N))
    if Mp != M:
        out = out[:M]
    return out.reshape(orig[:-1] + (N,))


def cnn_attention(q, k, v, sigma, *, win_block=64):
    """q,k,v: (G, hw, d) with G = Bp2*nh (windows x heads merged); sigma: (G, 1, 1)."""
    G, hw, d = q.shape
    GB = max(1, min(win_block, max(G // 2, 1)))      # batch many windows per grid step
    Gp = _round_up(G, GB)
    if Gp != G:
        pad3 = ((0, Gp - G), (0, 0), (0, 0))
        q = jnp.pad(q, pad3)
        k = jnp.pad(k, pad3)
        v = jnp.pad(v, pad3)
        sigma = jnp.pad(sigma, pad3, constant_values=1.0)
    spec = pl.BlockSpec((GB, hw, d), lambda i: (i, 0, 0))
    out = pl.pallas_call(
        _cnn_attn_kernel,
        out_shape=jax.ShapeDtypeStruct((Gp, hw, d), jnp.float32),
        grid=(Gp // GB,),
        in_specs=[spec, spec, spec,
                  pl.BlockSpec((GB, 1, 1), lambda i: (i, 0, 0))],
        out_specs=spec,
        compiler_params=_cparams("parallel"),
    )(q, k, v, sigma)
    return out[:G]


def window_attention(q, k, v, pos_emb, scale, *, win_block=64):
    """q,k,v: (NW, nh, hw, d) flattened windows; pos_emb: (nh, hw, hw)."""
    NW, nh, hw, d = q.shape
    WB = max(1, min(win_block, max(NW // 2, 1)))
    NWp = _round_up(NW, WB)
    if NWp != NW:
        pad4 = ((0, NWp - NW), (0, 0), (0, 0), (0, 0))
        q = jnp.pad(q, pad4)
        k = jnp.pad(k, pad4)
        v = jnp.pad(v, pad4)
    spec = pl.BlockSpec((WB, nh, hw, d), lambda i: (i, 0, 0, 0))
    out = pl.pallas_call(
        functools.partial(_win_attn_kernel, scale=scale),
        out_shape=jax.ShapeDtypeStruct((NWp, nh, hw, d), jnp.float32),
        grid=(NWp // WB,),
        in_specs=[spec, spec, spec,
                  pl.BlockSpec((nh, hw, hw), lambda i: (0, 0, 0))],
        out_specs=spec,
        compiler_params=_cparams("parallel"),
    )(q, k, v, pos_emb)
    return out[:NW]


def _shifted_stack(x):
    """(B, H, W, C) -> (B, 3, H+2, W, C): zero-padded with the 3 dx column shifts pre-applied."""
    B, H, W, C = x.shape
    xp = jnp.pad(x, ((0, 0), (1, 1), (1, 1), (0, 0)))
    return jnp.stack([xp[:, :, 0:W, :], xp[:, :, 1:W + 1, :], xp[:, :, 2:W + 2, :]], axis=1)


def dwconv3x3_gelu(x, w):
    """Depthwise 3x3 conv (no bias) + exact GELU.  x: (B, H, W, C), w: (3, 3, C)."""
    B, H, W, C = x.shape
    xs = _shifted_stack(x)
    return pl.pallas_call(
        functools.partial(_dwconv_gelu_kernel, H=H),
        out_shape=jax.ShapeDtypeStruct((B, H, W, C), jnp.float32),
        grid=(B,),
        in_specs=[pl.BlockSpec((1, 3, H + 2, W, C), lambda i: (i, 0, 0, 0, 0)),
                  pl.BlockSpec((3, 3, 1, C), lambda i: (0, 0, 0, 0))],
        out_specs=pl.BlockSpec((1, H, W, C), lambda i: (i, 0, 0, 0)),
        compiler_params=_cparams("parallel"),
    )(xs, w.reshape(3, 3, 1, C))


def dwconv3x3_add(x, w, add):
    """Depthwise 3x3 conv (no bias) + residual add.  x, add: (B, H, W, C)."""
    B, H, W, C = x.shape
    xs = _shifted_stack(x)
    return pl.pallas_call(
        functools.partial(_dwconv_add_kernel, H=H),
        out_shape=jax.ShapeDtypeStruct((B, H, W, C), jnp.float32),
        grid=(B,),
        in_specs=[pl.BlockSpec((1, 3, H + 2, W, C), lambda i: (i, 0, 0, 0, 0)),
                  pl.BlockSpec((3, 3, 1, C), lambda i: (0, 0, 0, 0)),
                  pl.BlockSpec((1, H, W, C), lambda i: (i, 0, 0, 0))],
        out_specs=pl.BlockSpec((1, H, W, C), lambda i: (i, 0, 0, 0)),
        compiler_params=_cparams("parallel"),
    )(xs, w.reshape(3, 3, 1, C), add)


def dwconv3x3_bias_proj(x, w, b, pw, pb):
    """Depthwise 3x3 conv + bias, fused with the following 1x1 projection (C -> C//2)."""
    B, H, W, C = x.shape
    N = pw.shape[1]
    xs = _shifted_stack(x)
    return pl.pallas_call(
        functools.partial(_dwconv_bias_proj_kernel, H=H),
        out_shape=jax.ShapeDtypeStruct((B, H, W, N), jnp.float32),
        grid=(B,),
        in_specs=[pl.BlockSpec((1, 3, H + 2, W, C), lambda i: (i, 0, 0, 0, 0)),
                  pl.BlockSpec((3, 3, 1, C), lambda i: (0, 0, 0, 0)),
                  pl.BlockSpec((1, C), lambda i: (0, 0)),
                  pl.BlockSpec((C, N), lambda i: (0, 0)),
                  pl.BlockSpec((1, N), lambda i: (0, 0))],
        out_specs=pl.BlockSpec((1, H, W, N), lambda i: (i, 0, 0, 0)),
        compiler_params=_cparams("parallel"),
    )(xs, w.reshape(3, 3, 1, C), b.reshape(1, C), pw, pb.reshape(1, N))


def si_gate_mul(attn_sp, cnn_sp, w1, b1, w2, b2, *, tm=512):
    """sigmoid(spatial_interaction(attn_sp)) * cnn_sp, fully fused, lane-dense (.., C) output."""
    B, H, W, C = attn_sp.shape
    C8 = w1.shape[1]
    M = B * H * W
    a2 = attn_sp.reshape(M, C)
    x2 = cnn_sp.reshape(M, C)
    TM = _pick_tm(M, tm)
    Mp = _round_up(M, TM)
    if Mp != M:
        a2 = jnp.pad(a2, ((0, Mp - M), (0, 0)))
        x2 = jnp.pad(x2, ((0, Mp - M), (0, 0)))
    out = pl.pallas_call(
        _si_gate_kernel,
        out_shape=jax.ShapeDtypeStruct((Mp, C), jnp.float32),
        grid=(Mp // TM,),
        in_specs=[pl.BlockSpec((TM, C), lambda i: (i, 0)),
                  pl.BlockSpec((TM, C), lambda i: (i, 0)),
                  pl.BlockSpec((C, C8), lambda i: (0, 0)),
                  pl.BlockSpec((1, C8), lambda i: (0, 0)),
                  pl.BlockSpec((1, C8), lambda i: (0, 0)),
                  pl.BlockSpec((1, 1), lambda i: (0, 0))],
        out_specs=pl.BlockSpec((TM, C), lambda i: (i, 0)),
        compiler_params=_cparams("parallel"),
    )(a2, x2, w1, b1.reshape(1, C8), w2.reshape(1, C8), b2.reshape(1, 1))
    if Mp != M:
        out = out[:M]
    return out.reshape(B, H, W, C)


def channel_gate(pooled, w1, b1, w2, b2):
    """sigmoid(channel_interaction(pooled)) : (B, C) -> (B, C)."""
    B, C = pooled.shape
    C4 = w1.shape[1]
    return pl.pallas_call(
        _ci_gate_kernel,
        out_shape=jax.ShapeDtypeStruct((B, C), jnp.float32),
        grid=(1,),
        in_specs=[pl.BlockSpec((B, C), lambda i: (0, 0)),
                  pl.BlockSpec((C, C4), lambda i: (0, 0)),
                  pl.BlockSpec((1, C4), lambda i: (0, 0)),
                  pl.BlockSpec((C4, C), lambda i: (0, 0)),
                  pl.BlockSpec((1, C), lambda i: (0, 0))],
        out_specs=pl.BlockSpec((B, C), lambda i: (0, 0)),
        compiler_params=_cparams("arbitrary"),
    )(pooled, w1, b1.reshape(1, C4), w2, b2.reshape(1, C))


def gate_mul_linear(x, gate, w, b, *, thw=512):
    """(x * gate) @ w + b with per-batch channel gate.  x: (B, HW, C), gate: (B, 1, C)."""
    B, HW, C = x.shape
    N = w.shape[1]
    THW = _pick_tm(HW, thw)
    HWp = _round_up(HW, THW)
    if HWp != HW:
        x = jnp.pad(x, ((0, 0), (0, HWp - HW), (0, 0)))
    out = pl.pallas_call(
        _gate_linear_kernel,
        out_shape=jax.ShapeDtypeStruct((B, HWp, N), jnp.float32),
        grid=(B, HWp // THW),
        in_specs=[pl.BlockSpec((1, THW, C), lambda bi, mi: (bi, mi, 0)),
                  pl.BlockSpec((1, 1, C), lambda bi, mi: (bi, 0, 0)),
                  pl.BlockSpec((C, N), lambda bi, mi: (0, 0)),
                  pl.BlockSpec((1, N), lambda bi, mi: (0, 0))],
        out_specs=pl.BlockSpec((1, THW, N), lambda bi, mi: (bi, mi, 0)),
        compiler_params=_cparams("parallel", "parallel"),
    )(x, gate, w, b.reshape(1, N))
    if HWp != HW:
        out = out[:, :HW]
    return out


# ----------------------------------------------------------------------------- params

def init_params(key, C, nh, win, num_win):
    hw = win * win
    p2 = num_win * num_win
    D = 28 * nh
    ks = iter(jax.random.split(key, 40))

    def w_(shape, scale=0.02):
        return scale * jax.random.normal(next(ks), shape, jnp.float32)

    P = {}
    P['pos_emb'] = jax.random.truncated_normal(next(ks), -2.0, 2.0, (nh, hw, hw), jnp.float32)
    P['proj_cnn_w'] = w_((C, C));               P['proj_cnn_b'] = jnp.zeros((C,), jnp.float32)
    P['ln_cnn_g'] = jnp.ones((C,), jnp.float32); P['ln_cnn_b'] = jnp.zeros((C,), jnp.float32)
    P['to_qkv_cnn_w'] = w_((C, 3 * D))
    P['sigma_cnn'] = jnp.ones((p2, nh), jnp.float32)
    P['to_out_cnn_w'] = w_((D, C));             P['to_out_cnn_b'] = jnp.zeros((C,), jnp.float32)
    P['pe_cnn_w1'] = w_((3, 3, C));             P['pe_cnn_w2'] = w_((3, 3, C))
    P['dw_cnn_w'] = w_((3, 3, C));              P['dw_cnn_b'] = jnp.zeros((C,), jnp.float32)
    P['projection_w'] = w_((C, C // 2));        P['projection_b'] = jnp.zeros((C // 2,), jnp.float32)
    P['proj_attn_w'] = w_((C, C));              P['proj_attn_b'] = jnp.zeros((C,), jnp.float32)
    P['ln_attn_g'] = jnp.ones((C,), jnp.float32); P['ln_attn_b'] = jnp.zeros((C,), jnp.float32)
    P['to_qkv_w'] = w_((C, 3 * D))
    P['to_out_w'] = w_((D, C));                 P['to_out_b'] = jnp.zeros((C,), jnp.float32)
    P['projection_attn_w'] = w_((C, C // 2));   P['projection_attn_b'] = jnp.zeros((C // 2,), jnp.float32)
    P['ci_w1'] = w_((C, C // 4));               P['ci_b1'] = jnp.zeros((C // 4,), jnp.float32)
    P['ci_w2'] = w_((C // 4, C));               P['ci_b2'] = jnp.zeros((C,), jnp.float32)
    P['si_w1'] = w_((C, C // 8));               P['si_b1'] = jnp.zeros((C // 8,), jnp.float32)
    P['si_w2'] = w_((C // 8, 1));               P['si_b2'] = jnp.zeros((1,), jnp.float32)
    P['proj_w'] = w_((C, C));                   P['proj_b'] = jnp.zeros((C,), jnp.float32)
    return P


# ----------------------------------------------------------------------------- forward

def mix_attention_forward(P, x, H, W, *, C, nh, win, num_win):
    """x: (B*num_win^2, win^2, C) windowed input (same convention as the PyTorch module)."""
    Bp2, hw, _ = x.shape
    p2 = num_win * num_win
    B = Bp2 // p2
    d = 28
    D = 28 * nh
    assert D == C, "Pos_Emb_cnn (depthwise conv with num_channel groups) requires 28*num_head == num_channel"

    x_flat = x.reshape(Bp2 * hw, C)

    # ---------------- CNN branch ----------------
    x_cnn = linear_layernorm(x_flat, P['proj_cnn_w'], P['proj_cnn_b'],
                             P['ln_cnn_g'], P['ln_cnn_b'])
    qkv = linear(x_cnn, P['to_qkv_cnn_w'], None).reshape(Bp2, hw, 3 * D)
    q_inp, k_inp, v_inp = jnp.split(qkv, 3, axis=-1)

    def split_heads_cnn(t):  # 'bsp2 hw (dh nh) -> (bsp2 nh) hw dh'
        return t.reshape(Bp2, hw, d, nh).transpose(0, 3, 1, 2).reshape(Bp2 * nh, hw, d)

    q = split_heads_cnn(q_inp)
    k = split_heads_cnn(k_inp)
    v = split_heads_cnn(v_inp)

    sigma = jnp.tile(P['sigma_cnn'][None], (B, 1, 1)).reshape(Bp2 * nh, 1, 1)
    xc = cnn_attention(q, k, v, sigma)                               # (Bp2*nh, hw, d)

    # '(bs ph pw) nh (h w) dh -> bs (ph h) (pw w) (dh nh)'
    xc = xc.reshape(B, num_win, num_win, nh, win, win, d)
    xc = xc.transpose(0, 1, 4, 2, 5, 6, 3).reshape(B, H, W, D)
    x_cnn_sp = linear(xc, P['to_out_cnn_w'], P['to_out_cnn_b'])      # (B, H, W, C)

    # v_inp: '(bs ph pw) (h w) dhnh -> bs (ph h) (pw w) dhnh'
    v_sp = v_inp.reshape(B, num_win, num_win, win, win, D).transpose(0, 1, 3, 2, 4, 5).reshape(B, H, W, D)
    # Pos_Emb_cnn: dwconv3x3 -> GELU -> dwconv3x3 (+ residual fused)
    xp = dwconv3x3_gelu(v_sp, P['pe_cnn_w1'])
    x_cnn_sp = dwconv3x3_add(xp, P['pe_cnn_w2'], x_cnn_sp)

    # channel interaction: AdaptiveAvgPool2d(1) -> conv1x1 -> GELU -> conv1x1 -> sigmoid (fused)
    pooled = jnp.mean(x_cnn_sp, axis=(1, 2))                          # (B, C)
    ci_gate = channel_gate(pooled, P['ci_w1'], P['ci_b1'], P['ci_w2'], P['ci_b2'])

    # ---------------- window-attention branch ----------------
    x_attn = linear_layernorm(x_flat, P['proj_attn_w'], P['proj_attn_b'],
                              P['ln_attn_g'], P['ln_attn_b']).reshape(Bp2, hw, C)
    # window_reverse2 -> NHWC
    x_attn_sp = x_attn.reshape(B, num_win, num_win, win, win, C).transpose(0, 1, 3, 2, 4, 5).reshape(B, H, W, C)
    qkv_a = linear(x_attn_sp, P['to_qkv_w'], None)                    # (B, H, W, 3D)
    qa, ka, va = jnp.split(qkv_a, 3, axis=-1)

    def to_windows_attn(t):  # 'bs (ph h) (pw w) (nh c) -> (bs ph pw) nh (h w) c'
        t = t.reshape(B, num_win, win, num_win, win, D).transpose(0, 1, 3, 2, 4, 5).reshape(B, p2, hw, D)
        return t.reshape(B, p2, hw, nh, d).transpose(0, 1, 3, 2, 4).reshape(B * p2, nh, hw, d)

    qa, ka, va = map(to_windows_attn, (qa, ka, va))
    out = window_attention(qa, ka, va, P['pos_emb'], scale=28 ** (-0.5))   # (B*p2, nh, hw, d)
    out = out.reshape(B, p2, nh, hw, d).transpose(0, 1, 3, 2, 4).reshape(B, p2, hw, D)
    out = linear(out, P['to_out_w'], P['to_out_b'])                   # (B, p2, hw, C)
    # 'bs (ph pw) (h w) c -> bs (ph h) (pw w) c'
    out_sp = out.reshape(B, num_win, num_win, win, win, C).transpose(0, 1, 3, 2, 4, 5).reshape(B, H, W, C)

    # ---------------- mixing ----------------
    # sigmoid(spatial_interaction(out)) * x_cnn  (fused), then dw_cnn + projection (fused)
    gated_cnn = si_gate_mul(out_sp, x_cnn_sp, P['si_w1'], P['si_b1'], P['si_w2'], P['si_b2'])
    x_cnn_final = dwconv3x3_bias_proj(gated_cnn, P['dw_cnn_w'], P['dw_cnn_b'],
                                      P['projection_w'], P['projection_b'])   # (B, H, W, C//2)

    # sigmoid(channel_interaction) * out, fused with projection_attn
    out_final = gate_mul_linear(out_sp.reshape(B, H * W, C), ci_gate.reshape(B, 1, C),
                                P['projection_attn_w'], P['projection_attn_b'])
    out_final = out_final.reshape(B, H, W, C // 2)

    y = jnp.concatenate([out_final, x_cnn_final], axis=-1)            # (B, H, W, C)
    y = linear(y, P['proj_w'], P['proj_b'])
    # window_partition2
    y = y.reshape(B, num_win, win, num_win, win, C).transpose(0, 1, 3, 2, 4, 5).reshape(B * p2, hw, C)
    return y


# ----------------------------------------------------------------------------- main

if __name__ == "__main__":
    num_head = 1
    num_channel = 28 * num_head        # forward requires num_channel == 28 * num_head
    win_size = 4
    num_win = 2
    resol = win_size * num_win         # 8
    B = 2
    H = W = resol
    p2 = num_win * num_win
    hw = win_size * win_size

    key = jax.random.PRNGKey(0)
    x = jax.random.normal(key, (B * p2, hw, num_channel), jnp.float32)
    params = init_params(jax.random.PRNGKey(1), num_channel, num_head, win_size, num_win)

    fwd = jax.jit(lambda P_, x_: mix_attention_forward(
        P_, x_, H, W, C=num_channel, nh=num_head, win=win_size, num_win=num_win))

    y = fwd(params, x)
    y = jax.block_until_ready(y)
    assert y.shape == (B * p2, hw, num_channel), y.shape
    assert bool(jnp.all(jnp.isfinite(y)))
    print("KERNEL_OK")
</pallas_src>

<mosaic_0001>
module attributes {stable_mosaic.version = 11 : i64} {
  func.func @_linear_kernel(%arg0: i32, %arg1: memref<64x28xf32, #tpu.memory_space<vmem>>, %arg2: memref<28x84xf32, #tpu.memory_space<vmem>>, %arg3: memref<1x84xf32, #tpu.memory_space<vmem>>, %arg4: memref<64x84xf32, #tpu.memory_space<vmem>>) attributes {dimension_semantics = [#tpu.dimension_semantics<parallel>], iteration_bounds = array<i64: 2>, scalar_prefetch = 0 : i64, scratch_operands = 0 : i64, tpu.core_type = #tpu.core_type<tc>, window_params = [{transform_indices = @transform_0, window_bounds = array<i64: 64, 28>}, {pipeline_mode = #tpu.pipeline_mode<synchronous>, transform_indices = @transform_1, window_bounds = array<i64: 28, 84>}, {pipeline_mode = #tpu.pipeline_mode<synchronous>, transform_indices = @transform_2, window_bounds = array<i64: 1, 84>}, {transform_indices = @transform_3, window_bounds = array<i64: 64, 84>}]} {
    %c0 = arith.constant 0 : index
    %c0_0 = arith.constant 0 : index
    %0 = vector.load %arg1[%c0, %c0_0] : memref<64x28xf32, #tpu.memory_space<vmem>>, vector<64x28xf32>
    %1 = arith.truncf %0 : vector<64x28xf32> to vector<64x28xbf16>
    %c0_1 = arith.constant 0 : index
    %c0_2 = arith.constant 0 : index
    %2 = vector.load %arg2[%c0_1, %c0_2] : memref<28x84xf32, #tpu.memory_space<vmem>>, vector<28x84xf32>
    %3 = arith.truncf %2 : vector<28x84xf32> to vector<28x84xbf16>
    %cst = arith.constant dense<0.000000e+00> : vector<64x84xf32>
    %4 = tpu.matmul %1, %3, %cst {dimension_numbers = #tpu.dot_dimension_numbers<[1], [0], [0], [1], [0, 0, 1, 1], [], []>} : vector<64x28xbf16>, vector<28x84xbf16>, vector<64x84xf32> -> vector<64x84xf32>
    %c0_3 = arith.constant 0 : index
    %c0_4 = arith.constant 0 : index
    %5 = vector.load %arg3[%c0_3, %c0_4] : memref<1x84xf32, #tpu.memory_space<vmem>>, vector<1x84xf32>
    %6 = vector.broadcast %5 : vector<1x84xf32> to vector<64x84xf32>
    %7 = arith.addf %4, %6 : vector<64x84xf32>
    %c0_5 = arith.constant 0 : index
    %c0_6 = arith.constant 0 : index
    %8 = vector.load %arg4[%c0_5, %c0_6] : memref<64x84xf32, #tpu.memory_space<vmem>>, vector<64x84xf32>
    tpu.vector_store %arg4[%c0_5, %c0_6], %7 {strides = array<i32>} : memref<64x84xf32, #tpu.memory_space<vmem>>, vector<64x84xf32>,
    return
  }
  func.func @transform_0(%arg0: i32) -> (i32, i32) {
    %c0_i32 = arith.constant 0 : i32
    %c0_i32_0 = arith.constant 0 : i32
    return %arg0, %c0_i32 : i32, i32
  }
  func.func @transform_1(%arg0: i32) -> (i32, i32) {
    %c0_i32 = arith.constant 0 : i32
    %c0_i32_0 = arith.constant 0 : i32
    %c0_i32_1 = arith.constant 0 : i32
    return %c0_i32, %c0_i32_0 : i32, i32
  }
  func.func @transform_2(%arg0: i32) -> (i32, i32) {
    %c0_i32 = arith.constant 0 : i32
    %c0_i32_0 = arith.constant 0 : i32
    %c0_i32_1 = arith.constant 0 : i32
    return %c0_i32, %c0_i32_0 : i32, i32
  }
  func.func @transform_3(%arg0: i32) -> (i32, i32) {
    %c0_i32 = arith.constant 0 : i32
    %c0_i32_0 = arith.constant 0 : i32
    return %arg0, %c0_i32 : i32, i32
  }
}

module attributes {stable_mosaic.version = 11 : i64} {
  func.func @_linear_ln_kernel(%arg0: i32, %arg1: memref<64x28xf32, #tpu.memory_space<vmem>>, %arg2: memref<28x28xf32, #tpu.memory_space<vmem>>, %arg3: memref<1x28xf32, #tpu.memory_space<vmem>>, %arg4: memref<1x28xf32, #tpu.memory_space<vmem>>, %arg5: memref<1x28xf32, #tpu.memory_space<vmem>>, %arg6: memref<64x28xf32, #tpu.memory_space<vmem>>) attributes {dimension_semantics = [#tpu.dimension_semantics<parallel>], iteration_bounds = array<i64: 2>, scalar_prefetch = 0 : i64, scratch_operands = 0 : i64, tpu.core_type = #tpu.core_type<tc>, window_params = [{transform_indices = @transform_0, window_bounds = array<i64: 64, 28>}, {pipeline_mode = #tpu.pipeline_mode<synchronous>, transform_indices = @transform_1, window_bounds = array<i64: 28, 28>}, {pipeline_mode = #tpu.pipeline_mode<synchronous>, transform_indices = @transform_2, window_bounds = array<i64: 1, 28>}, {pipeline_mode = #tpu.pipeline_mode<synchronous>, transform_indices = @transform_3, window_bounds = array<i64: 1, 28>}, {pipeline_mode = #tpu.pipeline_mode<synchronous>, transform_indices = @transform_4, window_bounds = array<i64: 1, 28>}, {transform_indices = @transform_5, window_bounds = array<i64: 64, 28>}]} {
    %c0 = arith.constant 0 : index
    %c0_0 = arith.constant 0 : index
    %0 = vector.load %arg1[%c0, %c0_0] : memref<64x28xf32, #tpu.memory_space<vmem>>, vector<64x28xf32>
    %1 = arith.truncf %0 : vector<64x28xf32> to vector<64x28xbf16>
    %c0_1 = arith.constant 0 : index
    %c0_2 = arith.constant 0 : index
    %2 = vector.load %arg2[%c0_1, %c0_2] : memref<28x28xf32, #tpu.memory_space<vmem>>, vector<28x28xf32>
    %3 = arith.truncf %2 : vector<28x28xf32> to vector<28x28xbf16>
    %cst = arith.constant dense<0.000000e+00> : vector<64x28xf32>
    %4 = tpu.matmul %1, %3, %cst {dimension_numbers = #tpu.dot_dimension_numbers<[1], [0], [0], [1], [0, 0, 1, 1], [], []>} : vector<64x28xbf16>, vector<28x28xbf16>, vector<64x28xf32> -> vector<64x28xf32>
    %c0_3 = arith.constant 0 : index
    %c0_4 = arith.constant 0 : index
    %5 = vector.load %arg3[%c0_3, %c0_4] : memref<1x28xf32, #tpu.memory_space<vmem>>, vector<1x28xf32>
    %6 = vector.broadcast %5 : vector<1x28xf32> to vector<64x28xf32>
    %7 = arith.addf %4, %6 : vector<64x28xf32>
    %cst_5 = arith.constant dense<0.000000e+00> : vector<64xf32>
    %8 = vector.multi_reduction <add>, %7, %cst_5 [1] : vector<64x28xf32> to vector<64xf32>
    %9 = vector.shape_cast %8 : vector<64xf32> to vector<64x1xf32>
    %cst_6 = arith.constant 2.800000e+01 : f32
    %10 = vector.broadcast %cst_6 : f32 to vector<64x1xf32>
    %11 = arith.divf %9, %10 : vector<64x1xf32>
    %12 = vector.broadcast %11 : vector<64x1xf32> to vector<64x28xf32>
    %13 = arith.subf %7, %12 : vector<64x28xf32>
    %14 = arith.mulf %13, %13 : vector<64x28xf32>
    %cst_7 = arith.constant dense<0.000000e+00> : vector<64xf32>
    %15 = vector.multi_reduction <add>, %14, %cst_7 [1] : vector<64x28xf32> to vector<64xf32>
    %16 = vector.shape_cast %15 : vector<64xf32> to vector<64x1xf32>
    %cst_8 = arith.constant 2.800000e+01 : f32
    %17 = vector.broadcast %cst_8 : f32 to vector<64x1xf32>
    %18 = arith.divf %16, %17 : vector<64x1xf32>
    %cst_9 = arith.constant 9.99999974E-6 : f32
    %19 = vector.broadcast %cst_9 : f32 to vector<64x1xf32>
    %20 = arith.addf %18, %19 : vector<64x1xf32>
    %21 = math.rsqrt %20 : vector<64x1xf32>
    %22 = vector.broadcast %21 : vector<64x1xf32> to vector<64x28xf32>
    %23 = arith.mulf %13, %22 : vector<64x28xf32>
    %c0_10 = arith.constant 0 : index
    %c0_11 = arith.constant 0 : index
    %24 = vector.load %arg4[%c0_10, %c0_11] : memref<1x28xf32, #tpu.memory_space<vmem>>, vector<1x28xf32>
    %25 = vector.broadcast %24 : vector<1x28xf32> to vector<64x28xf32>
    %26 = arith.mulf %23, %25 : vector<64x28xf32>
    %c0_12 = arith.constant 0 : index
    %c0_13 = arith.constant 0 : index
    %27 = vector.load %arg5[%c0_12, %c0_13] : memref<1x28xf32, #tpu.memory_space<vmem>>, vector<1x28xf32>
    %28 = vector.broadcast %27 : vector<1x28xf32> to vector<64x28xf32>
    %29 = arith.addf %26, %28 : vector<64x28xf32>
    %c0_14 = arith.constant 0 : index
    %c0_15 = arith.constant 0 : index
    %30 = vector.load %arg6[%c0_14, %c0_15] : memref<64x28xf32, #tpu.memory_space<vmem>>, vector<64x28xf32>
    tpu.vector_store %arg6[%c0_14, %c0_15], %29 {strides = array<i32>} : memref<64x28xf32, #tpu.memory_space<vmem>>, vector<64x28xf32>,
    return
  }
  func.func @transform_0(%arg0: i32) -> (i32, i32) {
    %c0_i32 = arith.constant 0 : i32
    %c0_i32_0 = arith.constant 0 : i32
    return %arg0, %c0_i32 : i32, i32
  }
  func.func @transform_1(%arg0: i32) -> (i32, i32) {
    %c0_i32 = arith.constant 0 : i32
    %c0_i32_0 = arith.constant 0 : i32
    %c0_i32_1 = arith.constant 0 : i32
    return %c0_i32, %c0_i32_0 : i32, i32
  }
  func.func @transform_2(%arg0: i32) -> (i32, i32) {
    %c0_i32 = arith.constant 0 : i32
    %c0_i32_0 = arith.constant 0 : i32
    %c0_i32_1 = arith.constant 0 : i32
    return %c0_i32, %c0_i32_0 : i32, i32
  }
  func.func @transform_3(%arg0: i32) -> (i32, i32) {
    %c0_i32 = arith.constant 0 : i32
    %c0_i32_0 = arith.constant 0 : i32
    %c0_i32_1 = arith.constant 0 : i32
    return %c0_i32, %c0_i32_0 : i32, i32
  }
  func.func @transform_4(%arg0: i32) -> (i32, i32) {
    %c0_i32 = arith.constant 0 : i32
    %c0_i32_0 = arith.constant 0 : i32
    %c0_i32_1 = arith.constant 0 : i32
    return %c0_i32, %c0_i32_0 : i32, i32
  }
  func.func @transform_5(%arg0: i32) -> (i32, i32) {
    %c0_i32 = arith.constant 0 : i32
    %c0_i32_0 = arith.constant 0 : i32
    return %arg0, %c0_i32 : i32, i32
  }
}

module attributes {stable_mosaic.version = 11 : i64} {
  func.func @_dwconv_gelu_kernel(%arg0: i32, %arg1: memref<1x3x10x8x28xf32, #tpu.memory_space<vmem>>, %arg2: memref<3x3x1x28xf32, #tpu.memory_space<vmem>>, %arg3: memref<1x8x8x28xf32, #tpu.memory_space<vmem>>) attributes {dimension_semantics = [#tpu.dimension_semantics<parallel>], iteration_bounds = array<i64: 2>, scalar_prefetch = 0 : i64, scratch_operands = 0 : i64, tpu.core_type = #tpu.core_type<tc>, window_params = [{transform_indices = @transform_0, window_bounds = array<i64: 1, 3, 10, 8, 28>}, {pipeline_mode = #tpu.pipeline_mode<synchronous>, transform_indices = @transform_1, window_bounds = array<i64: 3, 3, 1, 28>}, {transform_indices = @transform_2, window_bounds = array<i64: 1, 8, 8, 28>}]} {
    %c0 = arith.constant 0 : index
    %c0_0 = arith.constant 0 : index
    %c0_1 = arith.constant 0 : index
    %c0_2 = arith.constant 0 : index
    %c0_3 = arith.constant 0 : index
    %0 = vector.load %arg1[%c0, %c0_0, %c0_1, %c0_2, %c0_3] : memref<1x3x10x8x28xf32, #tpu.memory_space<vmem>>, vector<1x3x10x8x28xf32>
    %1 = vector.shape_cast %0 : vector<1x3x10x8x28xf32> to vector<3x10x8x28xf32>
    %c0_4 = arith.constant 0 : index
    %c0_5 = arith.constant 0 : index
    %c0_6 = arith.constant 0 : index
    %c0_7 = arith.constant 0 : index
    %2 = vector.load %arg2[%c0_4, %c0_5, %c0_6, %c0_7] : memref<3x3x1x28xf32, #tpu.memory_space<vmem>>, vector<3x3x1x28xf32>
    %3 = vector.extract_strided_slice %1 {offsets = [0, 0, 0, 0], sizes = [1, 8, 8, 28], strides = [1, 1, 1, 1]} : vector<3x10x8x28xf32> to vector<1x8x8x28xf32>
    %4 = vector.shape_cast %3 : vector<1x8x8x28xf32> to vector<8x8x28xf32>
    %5 = vector.extract_strided_slice %2 {offsets = [0, 0, 0, 0], sizes = [1, 1, 1, 28], strides = [1, 1, 1, 1]} : vector<3x3x1x28xf32> to vector<1x1x1x28xf32>
    %6 = vector.shape_cast %5 : vector<1x1x1x28xf32> to vector<1x28xf32>
    %7 = vector.shape_cast %6 : vector<1x28xf32> to vector<1x1x28xf32>
    %8 = vector.broadcast %7 : vector<1x1x28xf32> to vector<8x8x28xf32>
    %9 = arith.mulf %4, %8 : vector<8x8x28xf32>
    %10 = vector.extract_strided_slice %1 {offsets = [1, 0, 0, 0], sizes = [1, 8, 8, 28], strides = [1, 1, 1, 1]} : vector<3x10x8x28xf32> to vector<1x8x8x28xf32>
    %11 = vector.shape_cast %10 : vector<1x8x8x28xf32> to vector<8x8x28xf32>
    %12 = vector.extract_strided_slice %2 {offsets = [0, 1, 0, 0], sizes = [1, 1, 1, 28], strides = [1, 1, 1, 1]} : vector<3x3x1x28xf32> to vector<1x1x1x28xf32>
    %13 = vector.shape_cast %12 : vector<1x1x1x28xf32> to vector<1x28xf32>
    %14 = vector.shape_cast %13 : vector<1x28xf32> to vector<1x1x28xf32>
    %15 = vector.broadcast %14 : vector<1x1x28xf32> to vector<8x8x28xf32>
    %16 = arith.mulf %11, %15 : vector<8x8x28xf32>
    %17 = arith.addf %9, %16 : vector<8x8x28xf32>
    %18 = vector.extract_strided_slice %1 {offsets = [2, 0, 0, 0], sizes = [1, 8, 8, 28], strides = [1, 1, 1, 1]} : vector<3x10x8x28xf32> to vector<1x8x8x28xf32>
    %19 = vector.shape_cast %18 : vector<1x8x8x28xf32> to vector<8x8x28xf32>
    %20 = vector.extract_strided_slice %2 {offsets = [0, 2, 0, 0], sizes = [1, 1, 1, 28], strides = [1, 1, 1, 1]} : vector<3x3x1x28xf32> to vector<1x1x1x28xf32>
    %21 = vector.shape_cast %20 : vector<1x1x1x28xf32> to vector<1x28xf32>
    %22 = vector.shape_cast %21 : vector<1x28xf32> to vector<1x1x28xf32>
    %23 = vector.broadcast %22 : vector<1x1x28xf32> to vector<8x8x28xf32>
    %24 = arith.mulf %19, %23 : vector<8x8x28xf32>
    %25 = arith.addf %17, %24 : vector<8x8x28xf32>
    %26 = vector.extract_strided_slice %1 {offsets = [0, 1, 0, 0], sizes = [1, 8, 8, 28], strides = [1, 1, 1, 1]} : vector<3x10x8x28xf32> to vector<1x8x8x28xf32>
    %27 = vector.shape_cast %26 : vector<1x8x8x28xf32> to vector<8x8x28xf32>
    %28 = vector.extract_strided_slice %2 {offsets = [1, 0, 0, 0], sizes = [1, 1, 1, 28], strides = [1, 1, 1, 1]} : vector<3x3x1x28xf32> to vector<1x1x1x28xf32>
    %29 = vector.shape_cast %28 : vector<1x1x1x28xf32> to vector<1x28xf32>
    %30 = vector.shape_cast %29 : vector<1x28xf32> to vector<1x1x28xf32>
    %31 = vector.broadcast %30 : vector<1x1x28xf32> to vector<8x8x28xf32>
    %32 = arith.mulf %27, %31 : vector<8x8x28xf32>
    %33 = arith.addf %25, %32 : vector<8x8x28xf32>
    %34 = vector.extract_strided_slice %1 {offsets = [1, 1, 0, 0], sizes = [1, 8, 8, 28], strides = [1, 1, 1, 1]} : vector<3x10x8x28xf32> to vector<1x8x8x28xf32>
    %35 = vector.shape_cast %34 : vector<1x8x8x28xf32> to vector<8x8x28xf32>
    %36 = vector.extract_strided_slice %2 {offsets = [1, 1, 0, 0], sizes = [1, 1, 1, 28], strides = [1, 1, 1, 1]} : vector<3x3x1x28xf32> to vector<1x1x1x28xf32>
    %37 = vector.shape_cast %36 : vector<1x1x1x28xf32> to vector<1x28xf32>
    %38 = vector.shape_cast %37 : vector<1x28xf32> to vector<1x1x28xf32>
    %39 = vector.broadcast %38 : vector<1x1x28xf32> to vector<8x8x28xf32>
    %40 = arith.mulf %35, %39 : vector<8x8x28xf32>
    %41 = arith.addf %33, %40 : vector<8x8x28xf32>
    %42 = vector.extract_strided_slice %1 {offsets = [2, 1, 0, 0], sizes = [1, 8, 8, 28], strides = [1, 1, 1, 1]} : vector<3x10x8x28xf32> to vector<1x8x8x28xf32>
    %43 = vector.shape_cast %42 : vector<1x8x8x28xf32> to vector<8x8x28xf32>
    %44 = vector.extract_strided_slice %2 {offsets = [1, 2, 0, 0], sizes = [1, 1, 1, 28], strides = [1, 1, 1, 1]} : vector<3x3x1x28xf32> to vector<1x1x1x28xf32>
    %45 = vector.shape_cast %44 : vector<1x1x1x28xf32> to vector<1x28xf32>
    %46 = vector.shape_cast %45 : vector<1x28xf32> to vector<1x1x28xf32>
    %47 = vector.broadcast %46 : vector<1x1x28xf32> to vector<8x8x28xf32>
    %48 = arith.mulf %43, %47 : vector<8x8x28xf32>
    %49 = arith.addf %41, %48 : vector<8x8x28xf32>
    %50 = vector.extract_strided_slice %1 {offsets = [0, 2, 0, 0], sizes = [1, 8, 8, 28], strides = [1, 1, 1, 1]} : vector<3x10x8x28xf32> to vector<1x8x8x28xf32>
    %51 = vector.shape_cast %50 : vector<1x8x8x28xf32> to vector<8x8x28xf32>
    %52 = vector.extract_strided_slice %2 {offsets = [2, 0, 0, 0], sizes = [1, 1, 1, 28], strides = [1, 1, 1, 1]} : vector<3x3x1x28xf32> to vector<1x1x1x28xf32>
    %53 = vector.shape_cast %52 : vector<1x1x1x28xf32> to vector<1x28xf32>
    %54 = vector.shape_cast %53 : vector<1x28xf32> to vector<1x1x28xf32>
    %55 = vector.broadcast %54 : vector<1x1x28xf32> to vector<8x8x28xf32>
    %56 = arith.mulf %51, %55 : vector<8x8x28xf32>
    %57 = arith.addf %49, %56 : vector<8x8x28xf32>
    %58 = vector.extract_strided_slice %1 {offsets = [1, 2, 0, 0], sizes = [1, 8, 8, 28], strides = [1, 1, 1, 1]} : vector<3x10x8x28xf32> to vector<1x8x8x28xf32>
    %59 = vector.shape_cast %58 : vector<1x8x8x28xf32> to vector<8x8x28xf32>
    %60 = vector.extract_strided_slice %2 {offsets = [2, 1, 0, 0], sizes = [1, 1, 1, 28], strides = [1, 1, 1, 1]} : vector<3x3x1x28xf32> to vector<1x1x1x28xf32>
    %61 = vector.shape_cast %60 : vector<1x1x1x28xf32> to vector<1x28xf32>
    %62 = vector.shape_cast %61 : vector<1x28xf32> to vector<1x1x28xf32>
    %63 = vector.broadcast %62 : vector<1x1x28xf32> to vector<8x8x28xf32>
    %64 = arith.mulf %59, %63 : vector<8x8x28xf32>
    %65 = arith.addf %57, %64 : vector<8x8x28xf32>
    %66 = vector.extract_strided_slice %1 {offsets = [2, 2, 0, 0], sizes = [1, 8, 8, 28], strides = [1, 1, 1, 1]} : vector<3x10x8x28xf32> to vector<1x8x8x28xf32>
    %67 = vector.shape_cast %66 : vector<1x8x8x28xf32> to vector<8x8x28xf32>
    %68 = vector.extract_strided_slice %2 {offsets = [2, 2, 0, 0], sizes = [1, 1, 1, 28], strides = [1, 1, 1, 1]} : vector<3x3x1x28xf32> to vector<1x1x1x28xf32>
    %69 = vector.shape_cast %68 : vector<1x1x1x28xf32> to vector<1x28xf32>
    %70 = vector.shape_cast %69 : vector<1x28xf32> to vector<1x1x28xf32>
    %71 = vector.broadcast %70 : vector<1x1x28xf32> to vector<8x8x28xf32>
    %72 = arith.mulf %67, %71 : vector<8x8x28xf32>
    %73 = arith.addf %65, %72 : vector<8x8x28xf32>
    %cst = arith.constant 5.000000e-01 : f32
    %74 = vector.broadcast %cst : f32 to vector<8x8x28xf32>
    %75 = arith.mulf %74, %73 : vector<8x8x28xf32>
    %cst_8 = arith.constant 0.707106769 : f32
    %76 = vector.broadcast %cst_8 : f32 to vector<8x8x28xf32>
    %77 = arith.mulf %73, %76 : vector<8x8x28xf32>
    %cst_9 = arith.constant 0.000000e+00 : f32
    %78 = vector.broadcast %cst_9 : f32 to vector<8x8x28xf32>
    %79 = arith.cmpf oge, %77, %78 : vector<8x8x28xf32>
    %cst_10 = arith.constant 1.000000e+00 : f32
    %cst_11 = arith.constant -1.000000e+00 : f32
    %80 = vector.broadcast %cst_10 : f32 to vector<8x8x28xf32>
    %81 = vector.broadcast %cst_11 : f32 to vector<8x8x28xf32>
    %82 = arith.select %79, %80, %81 : vector<8x8x28xi1>, vector<8x8x28xf32>
    %83 = math.absf %77 : vector<8x8x28xf32>
    %cst_12 = arith.constant 0.327591091 : f32
    %84 = vector.broadcast %cst_12 : f32 to vector<8x8x28xf32>
    %85 = arith.mulf %84, %83 : vector<8x8x28xf32>
    %cst_13 = arith.constant 1.000000e+00 : f32
    %86 = vector.broadcast %cst_13 : f32 to vector<8x8x28xf32>
    %87 = arith.addf %86, %85 : vector<8x8x28xf32>
    %cst_14 = arith.constant 1.000000e+00 : f32
    %88 = vector.broadcast %cst_14 : f32 to vector<8x8x28xf32>
    %89 = arith.divf %88, %87 : vector<8x8x28xf32>
    %cst_15 = arith.constant 1.06140542 : f32
    %90 = vector.broadcast %cst_15 : f32 to vector<8x8x28xf32>
    %91 = arith.mulf %90, %89 : vector<8x8x28xf32>
    %cst_16 = arith.constant -1.45315206 : f32
    %92 = vector.broadcast %cst_16 : f32 to vector<8x8x28xf32>
    %93 = arith.addf %91, %92 : vector<8x8x28xf32>
    %94 = arith.mulf %93, %89 : vector<8x8x28xf32>
    %cst_17 = arith.constant 1.42141378 : f32
    %95 = vector.broadcast %cst_17 : f32 to vector<8x8x28xf32>
    %96 = arith.addf %94, %95 : vector<8x8x28xf32>
    %97 = arith.mulf %96, %89 : vector<8x8x28xf32>
    %cst_18 = arith.constant -0.284496725 : f32
    %98 = vector.broadcast %cst_18 : f32 to vector<8x8x28xf32>
    %99 = arith.addf %97, %98 : vector<8x8x28xf32>
    %100 = arith.mulf %99, %89 : vector<8x8x28xf32>
    %cst_19 = arith.constant 0.254829586 : f32
    %101 = vector.broadcast %cst_19 : f32 to vector<8x8x28xf32>
    %102 = arith.addf %100, %101 : vector<8x8x28xf32>
    %103 = arith.mulf %102, %89 : vector<8x8x28xf32>
    %cst_20 = arith.constant 0.000000e+00 : f32
    %104 = vector.broadcast %cst_20 : f32 to vector<8x8x28xf32>
    %105 = arith.subf %104, %83 : vector<8x8x28xf32>
    %106 = arith.mulf %105, %83 : vector<8x8x28xf32>
    %107 = math.exp %106 : vector<8x8x28xf32>
    %108 = arith.mulf %103, %107 : vector<8x8x28xf32>
    %cst_21 = arith.constant 1.000000e+00 : f32
    %109 = vector.broadcast %cst_21 : f32 to vector<8x8x28xf32>
    %110 = arith.subf %109, %108 : vector<8x8x28xf32>
    %111 = arith.mulf %82, %110 : vector<8x8x28xf32>
    %cst_22 = arith.constant 1.000000e+00 : f32
    %112 = vector.broadcast %cst_22 : f32 to vector<8x8x28xf32>
    %113 = arith.addf %112, %111 : vector<8x8x28xf32>
    %114 = arith.mulf %75, %113 : vector<8x8x28xf32>
    %c0_23 = arith.constant 0 : index
    %c0_24 = arith.constant 0 : index
    %c0_25 = arith.constant 0 : index
    %c0_26 = arith.constant 0 : index
    %115 = vector.load %arg3[%c0_23, %c0_24, %c0_25, %c0_26] : memref<1x8x8x28xf32, #tpu.memory_space<vmem>>, vector<1x8x8x28xf32>
    %116 = vector.shape_cast %115 : vector<1x8x8x28xf32> to vector<8x8x28xf32>
    %117 = vector.shape_cast %114 : vector<8x8x28xf32> to vector<1x8x8x28xf32>
    tpu.vector_store %arg3[%c0_23, %c0_24, %c0_25, %c0_26], %117 {strides = array<i32>} : memref<1x8x8x28xf32, #tpu.memory_space<vmem>>, vector<1x8x8x28xf32>,
    return
  }
  func.func @transform_0(%arg0: i32) -> (i32, i32, i32, i32, i32) {
    %c0_i32 = arith.constant 0 : i32
    %c0_i32_0 = arith.constant 0 : i32
    %c0_i32_1 = arith.constant 0 : i32
    %c0_i32_2 = arith.constant 0 : i32
    %c0_i32_3 = arith.constant 0 : i32
    return %arg0, %c0_i32, %c0_i32_0, %c0_i32_1, %c0_i32_2 : i32, i32, i32, i32, i32
  }
  func.func @transform_1(%arg0: i32) -> (i32, i32, i32, i32) {
    %c0_i32 = arith.constant 0 : i32
    %c0_i32_0 = arith.constant 0 : i32
    %c0_i32_1 = arith.constant 0 : i32
    %c0_i32_2 = arith.constant 0 : i32
    %c0_i32_3 = arith.constant 0 : i32
    return %c0_i32, %c0_i32_0, %c0_i32_1, %c0_i32_2 : i32, i32, i32, i32
  }
  func.func @transform_2(%arg0: i32) -> (i32, i32, i32, i32) {
    %c0_i32 = arith.constant 0 : i32
    %c0_i32_0 = arith.constant 0 : i32
    %c0_i32_1 = arith.constant 0 : i32
    %c0_i32_2 = arith.constant 0 : i32
    return %arg0, %c0_i32, %c0_i32_0, %c0_i32_1 : i32, i32, i32, i32
  }
}

module attributes {stable_mosaic.version = 11 : i64} {
  func.func @_cnn_attn_kernel(%arg0: i32, %arg1: memref<4x16x28xf32, #tpu.memory_space<vmem>>, %arg2: memref<4x16x28xf32, #tpu.memory_space<vmem>>, %arg3: memref<4x16x28xf32, #tpu.memory_space<vmem>>, %arg4: memref<4x1x1xf32, #tpu.memory_space<vmem>>, %arg5: memref<4x16x28xf32, #tpu.memory_space<vmem>>) attributes {dimension_semantics = [#tpu.dimension_semantics<parallel>], iteration_bounds = array<i64: 2>, scalar_prefetch = 0 : i64, scratch_operands = 0 : i64, tpu.core_type = #tpu.core_type<tc>, window_params = [{transform_indices = @transform_0, window_bounds = array<i64: 4, 16, 28>}, {transform_indices = @transform_1, window_bounds = array<i64: 4, 16, 28>}, {transform_indices = @transform_2, window_bounds = array<i64: 4, 16, 28>}, {transform_indices = @transform_3, window_bounds = array<i64: 4, 1, 1>}, {transform_indices = @transform_4, window_bounds = array<i64: 4, 16, 28>}]} {
    %c0 = arith.constant 0 : index
    %c0_0 = arith.constant 0 : index
    %c0_1 = arith.constant 0 : index
    %0 = vector.load %arg1[%c0, %c0_0, %c0_1] : memref<4x16x28xf32, #tpu.memory_space<vmem>>, vector<4x16x28xf32>
    %c0_2 = arith.constant 0 : index
    %c0_3 = arith.constant 0 : index
    %c0_4 = arith.constant 0 : index
    %1 = vector.load %arg2[%c0_2, %c0_3, %c0_4] : memref<4x16x28xf32, #tpu.memory_space<vmem>>, vector<4x16x28xf32>
    %c0_5 = arith.constant 0 : index
    %c0_6 = arith.constant 0 : index
    %c0_7 = arith.constant 0 : index
    %2 = vector.load %arg3[%c0_5, %c0_6, %c0_7] : memref<4x16x28xf32, #tpu.memory_space<vmem>>, vector<4x16x28xf32>
    %3 = arith.mulf %0, %0 : vector<4x16x28xf32>
    %cst = arith.constant dense<0.000000e+00> : vector<4x28xf32>
    %4 = vector.multi_reduction <add>, %3, %cst [1] : vector<4x16x28xf32> to vector<4x28xf32>
    %5 = vector.shape_cast %4 : vector<4x28xf32> to vector<4x1x28xf32>
    %cst_8 = arith.constant 1.000000e-24 : f32
    %6 = vector.broadcast %cst_8 : f32 to vector<4x1x28xf32>
    %7 = arith.maximumf %5, %6 : vector<4x1x28xf32>
    %8 = math.rsqrt %7 : vector<4x1x28xf32>
    %9 = vector.broadcast %8 : vector<4x1x28xf32> to vector<4x16x28xf32>
    %10 = arith.mulf %0, %9 : vector<4x16x28xf32>
    %11 = arith.mulf %1, %1 : vector<4x16x28xf32>
    %cst_9 = arith.constant dense<0.000000e+00> : vector<4x28xf32>
    %12 = vector.multi_reduction <add>, %11, %cst_9 [1] : vector<4x16x28xf32> to vector<4x28xf32>
    %13 = vector.shape_cast %12 : vector<4x28xf32> to vector<4x1x28xf32>
    %cst_10 = arith.constant 1.000000e-24 : f32
    %14 = vector.broadcast %cst_10 : f32 to vector<4x1x28xf32>
    %15 = arith.maximumf %13, %14 : vector<4x1x28xf32>
    %16 = math.rsqrt %15 : vector<4x1x28xf32>
    %17 = vector.broadcast %16 : vector<4x1x28xf32> to vector<4x16x28xf32>
    %18 = arith.mulf %1, %17 : vector<4x16x28xf32>
    %19 = arith.truncf %18 : vector<4x16x28xf32> to vector<4x16x28xbf16>
    %20 = arith.truncf %10 : vector<4x16x28xf32> to vector<4x16x28xbf16>
    "tpu.trace_start"() <{level = 10 : i32, message = "ghd,ghe->gde"}> : () -> ()
    %cst_11 = arith.constant dense<0.000000e+00> : vector<4x28x28xf32>
    %21 = tpu.matmul %19, %20, %cst_11 {dimension_numbers = #tpu.dot_dimension_numbers<[1], [1], [2], [2], [0, 0, 0, 2, 1, 2], [0], [0]>} : vector<4x16x28xbf16>, vector<4x16x28xbf16>, vector<4x28x28xf32> -> vector<4x28x28xf32>
    "tpu.trace_stop"() : () -> ()
    %c0_12 = arith.constant 0 : index
    %c0_13 = arith.constant 0 : index
    %c0_14 = arith.constant 0 : index
    %22 = vector.load %arg4[%c0_12, %c0_13, %c0_14] : memref<4x1x1xf32, #tpu.memory_space<vmem>>, vector<4x1x1xf32>
    %23 = vector.broadcast %22 : vector<4x1x1xf32> to vector<4x28x28xf32>
    %24 = arith.mulf %21, %23 : vector<4x28x28xf32>
    %cst_15 = arith.constant dense<0xFF800000> : vector<4x28xf32>
    %25 = vector.multi_reduction <maximumf>, %24, %cst_15 [1] : vector<4x28x28xf32> to vector<4x28xf32>
    %26 = vector.shape_cast %25 : vector<4x28xf32> to vector<4x1x28xf32>
    %27 = vector.broadcast %26 : vector<4x1x28xf32> to vector<4x28x28xf32>
    %28 = arith.subf %24, %27 : vector<4x28x28xf32>
    %29 = math.exp %28 : vector<4x28x28xf32>
    %cst_16 = arith.constant dense<0.000000e+00> : vector<4x28xf32>
    %30 = vector.multi_reduction <add>, %29, %cst_16 [1] : vector<4x28x28xf32> to vector<4x28xf32>
    %31 = vector.shape_cast %30 : vector<4x28xf32> to vector<4x1x28xf32>
    %32 = tpu.reciprocal %31 {approx = true} : vector<4x1x28xf32> -> vector<4x1x28xf32>
    %33 = vector.broadcast %32 : vector<4x1x28xf32> to vector<4x28x28xf32>
    %34 = arith.mulf %29, %33 : vector<4x28x28xf32>
    %35 = arith.truncf %2 : vector<4x16x28xf32> to vector<4x16x28xbf16>
    %36 = arith.truncf %34 : vector<4x28x28xf32> to vector<4x28x28xbf16>
    "tpu.trace_start"() <{level = 10 : i32, message = "ghd,gde->ghe"}> : () -> ()
    %cst_17 = arith.constant dense<0.000000e+00> : vector<4x16x28xf32>
    %37 = tpu.matmul %35, %36, %cst_17 {dimension_numbers = #tpu.dot_dimension_numbers<[2], [1], [1], [2], [0, 0, 0, 1, 1, 2], [0], [0]>} : vector<4x16x28xbf16>, vector<4x28x28xbf16>, vector<4x16x28xf32> -> vector<4x16x28xf32>
    "tpu.trace_stop"() : () -> ()
    %c0_18 = arith.constant 0 : index
    %c0_19 = arith.constant 0 : index
    %c0_20 = arith.constant 0 : index
    %38 = vector.load %arg5[%c0_18, %c0_19, %c0_20] : memref<4x16x28xf32, #tpu.memory_space<vmem>>, vector<4x16x28xf32>
    tpu.vector_store %arg5[%c0_18, %c0_19, %c0_20], %37 {strides = array<i32>} : memref<4x16x28xf32, #tpu.memory_space<vmem>>, vector<4x16x28xf32>,
    return
  }
  func.func @transform_0(%arg0: i32) -> (i32, i32, i32) {
    %c0_i32 = arith.constant 0 : i32
    %c0_i32_0 = arith.constant 0 : i32
    %c0_i32_1 = arith.constant 0 : i32
    return %arg0, %c0_i32, %c0_i32_0 : i32, i32, i32
  }
  func.func @transform_1(%arg0: i32) -> (i32, i32, i32) {
    %c0_i32 = arith.constant 0 : i32
    %c0_i32_0 = arith.constant 0 : i32
    %c0_i32_1 = arith.constant 0 : i32
    return %arg0, %c0_i32, %c0_i32_0 : i32, i32, i32
  }
  func.func @transform_2(%arg0: i32) -> (i32, i32, i32) {
    %c0_i32 = arith.constant 0 : i32
    %c0_i32_0 = arith.constant 0 : i32
    %c0_i32_1 = arith.constant 0 : i32
    return %arg0, %c0_i32, %c0_i32_0 : i32, i32, i32
  }
  func.func @transform_3(%arg0: i32) -> (i32, i32, i32) {
    %c0_i32 = arith.constant 0 : i32
    %c0_i32_0 = arith.constant 0 : i32
    %c0_i32_1 = arith.constant 0 : i32
    return %arg0, %c0_i32, %c0_i32_0 : i32, i32, i32
  }
  func.func @transform_4(%arg0: i32) -> (i32, i32, i32) {
    %c0_i32 = arith.constant 0 : i32
    %c0_i32_0 = arith.constant 0 : i32
    %c0_i32_1 = arith.constant 0 : i32
    return %arg0, %c0_i32, %c0_i32_0 : i32, i32, i32
  }
}

module attributes {stable_mosaic.version = 11 : i64} {
  func.func @_linear_kernel(%arg0: i32, %arg1: memref<64x28xf32, #tpu.memory_space<vmem>>, %arg2: memref<28x28xf32, #tpu.memory_space<vmem>>, %arg3: memref<1x28xf32, #tpu.memory_space<vmem>>, %arg4: memref<64x28xf32, #tpu.memory_space<vmem>>) attributes {dimension_semantics = [#tpu.dimension_semantics<parallel>], iteration_bounds = array<i64: 2>, scalar_prefetch = 0 : i64, scratch_operands = 0 : i64, tpu.core_type = #tpu.core_type<tc>, window_params = [{transform_indices = @transform_0, window_bounds = array<i64: 64, 28>}, {pipeline_mode = #tpu.pipeline_mode<synchronous>, transform_indices = @transform_1, window_bounds = array<i64: 28, 28>}, {pipeline_mode = #tpu.pipeline_mode<synchronous>, transform_indices = @transform_2, window_bounds = array<i64: 1, 28>}, {transform_indices = @transform_3, window_bounds = array<i64: 64, 28>}]} {
    %c0 = arith.constant 0 : index
    %c0_0 = arith.constant 0 : index
    %0 = vector.load %arg1[%c0, %c0_0] : memref<64x28xf32, #tpu.memory_space<vmem>>, vector<64x28xf32>
    %1 = arith.truncf %0 : vector<64x28xf32> to vector<64x28xbf16>
    %c0_1 = arith.constant 0 : index
    %c0_2 = arith.constant 0 : index
    %2 = vector.load %arg2[%c0_1, %c0_2] : memref<28x28xf32, #tpu.memory_space<vmem>>, vector<28x28xf32>
    %3 = arith.truncf %2 : vector<28x28xf32> to vector<28x28xbf16>
    %cst = arith.constant dense<0.000000e+00> : vector<64x28xf32>
    %4 = tpu.matmul %1, %3, %cst {dimension_numbers = #tpu.dot_dimension_numbers<[1], [0], [0], [1], [0, 0, 1, 1], [], []>} : vector<64x28xbf16>, vector<28x28xbf16>, vector<64x28xf32> -> vector<64x28xf32>
    %c0_3 = arith.constant 0 : index
    %c0_4 = arith.constant 0 : index
    %5 = vector.load %arg3[%c0_3, %c0_4] : memref<1x28xf32, #tpu.memory_space<vmem>>, vector<1x28xf32>
    %6 = vector.broadcast %5 : vector<1x28xf32> to vector<64x28xf32>
    %7 = arith.addf %4, %6 : vector<64x28xf32>
    %c0_5 = arith.constant 0 : index
    %c0_6 = arith.constant 0 : index
    %8 = vector.load %arg4[%c0_5, %c0_6] : memref<64x28xf32, #tpu.memory_space<vmem>>, vector<64x28xf32>
    tpu.vector_store %arg4[%c0_5, %c0_6], %7 {strides = array<i32>} : memref<64x28xf32, #tpu.memory_space<vmem>>, vector<64x28xf32>,
    return
  }
  func.func @transform_0(%arg0: i32) -> (i32, i32) {
    %c0_i32 = arith.constant 0 : i32
    %c0_i32_0 = arith.constant 0 : i32
    return %arg0, %c0_i32 : i32, i32
  }
  func.func @transform_1(%arg0: i32) -> (i32, i32) {
    %c0_i32 = arith.constant 0 : i32
    %c0_i32_0 = arith.constant 0 : i32
    %c0_i32_1 = arith.constant 0 : i32
    return %c0_i32, %c0_i32_0 : i32, i32
  }
  func.func @transform_2(%arg0: i32) -> (i32, i32) {
    %c0_i32 = arith.constant 0 : i32
    %c0_i32_0 = arith.constant 0 : i32
    %c0_i32_1 = arith.constant 0 : i32
    return %c0_i32, %c0_i32_0 : i32, i32
  }
  func.func @transform_3(%arg0: i32) -> (i32, i32) {
    %c0_i32 = arith.constant 0 : i32
    %c0_i32_0 = arith.constant 0 : i32
    return %arg0, %c0_i32 : i32, i32
  }
}

module attributes {stable_mosaic.version = 11 : i64} {
  func.func @_dwconv_add_kernel(%arg0: i32, %arg1: memref<1x3x10x8x28xf32, #tpu.memory_space<vmem>>, %arg2: memref<3x3x1x28xf32, #tpu.memory_space<vmem>>, %arg3: memref<1x8x8x28xf32, #tpu.memory_space<vmem>>, %arg4: memref<1x8x8x28xf32, #tpu.memory_space<vmem>>) attributes {dimension_semantics = [#tpu.dimension_semantics<parallel>], iteration_bounds = array<i64: 2>, scalar_prefetch = 0 : i64, scratch_operands = 0 : i64, tpu.core_type = #tpu.core_type<tc>, window_params = [{transform_indices = @transform_0, window_bounds = array<i64: 1, 3, 10, 8, 28>}, {pipeline_mode = #tpu.pipeline_mode<synchronous>, transform_indices = @transform_1, window_bounds = array<i64: 3, 3, 1, 28>}, {transform_indices = @transform_2, window_bounds = array<i64: 1, 8, 8, 28>}, {transform_indices = @transform_3, window_bounds = array<i64: 1, 8, 8, 28>}]} {
    %c0 = arith.constant 0 : index
    %c0_0 = arith.constant 0 : index
    %c0_1 = arith.constant 0 : index
    %c0_2 = arith.constant 0 : index
    %c0_3 = arith.constant 0 : index
    %0 = vector.load %arg1[%c0, %c0_0, %c0_1, %c0_2, %c0_3] : memref<1x3x10x8x28xf32, #tpu.memory_space<vmem>>, vector<1x3x10x8x28xf32>
    %1 = vector.shape_cast %0 : vector<1x3x10x8x28xf32> to vector<3x10x8x28xf32>
    %c0_4 = arith.constant 0 : index
    %c0_5 = arith.constant 0 : index
    %c0_6 = arith.constant 0 : index
    %c0_7 = arith.constant 0 : index
    %2 = vector.load %arg2[%c0_4, %c0_5, %c0_6, %c0_7] : memref<3x3x1x28xf32, #tpu.memory_space<vmem>>, vector<3x3x1x28xf32>
    %3 = vector.extract_strided_slice %1 {offsets = [0, 0, 0, 0], sizes = [1, 8, 8, 28], strides = [1, 1, 1, 1]} : vector<3x10x8x28xf32> to vector<1x8x8x28xf32>
    %4 = vector.shape_cast %3 : vector<1x8x8x28xf32> to vector<8x8x28xf32>
    %5 = vector.extract_strided_slice %2 {offsets = [0, 0, 0, 0], sizes = [1, 1, 1, 28], strides = [1, 1, 1, 1]} : vector<3x3x1x28xf32> to vector<1x1x1x28xf32>
    %6 = vector.shape_cast %5 : vector<1x1x1x28xf32> to vector<1x28xf32>
    %7 = vector.shape_cast %6 : vector<1x28xf32> to vector<1x1x28xf32>
    %8 = vector.broadcast %7 : vector<1x1x28xf32> to vector<8x8x28xf32>
    %9 = arith.mulf %4, %8 : vector<8x8x28xf32>
    %10 = vector.extract_strided_slice %1 {offsets = [1, 0, 0, 0], sizes = [1, 8, 8, 28], strides = [1, 1, 1, 1]} : vector<3x10x8x28xf32> to vector<1x8x8x28xf32>
    %11 = vector.shape_cast %10 : vector<1x8x8x28xf32> to vector<8x8x28xf32>
    %12 = vector.extract_strided_slice %2 {offsets = [0, 1, 0, 0], sizes = [1, 1, 1, 28], strides = [1, 1, 1, 1]} : vector<3x3x1x28xf32> to vector<1x1x1x28xf32>
    %13 = vector.shape_cast %12 : vector<1x1x1x28xf32> to vector<1x28xf32>
    %14 = vector.shape_cast %13 : vector<1x28xf32> to vector<1x1x28xf32>
    %15 = vector.broadcast %14 : vector<1x1x28xf32> to vector<8x8x28xf32>
    %16 = arith.mulf %11, %15 : vector<8x8x28xf32>
    %17 = arith.addf %9, %16 : vector<8x8x28xf32>
    %18 = vector.extract_strided_slice %1 {offsets = [2, 0, 0, 0], sizes = [1, 8, 8, 28], strides = [1, 1, 1, 1]} : vector<3x10x8x28xf32> to vector<1x8x8x28xf32>
    %19 = vector.shape_cast %18 : vector<1x8x8x28xf32> to vector<8x8x28xf32>
    %20 = vector.extract_strided_slice %2 {offsets = [0, 2, 0, 0], sizes = [1, 1, 1, 28], strides = [1, 1, 1, 1]} : vector<3x3x1x28xf32> to vector<1x1x1x28xf32>
    %21 = vector.shape_cast %20 : vector<1x1x1x28xf32> to vector<1x28xf32>
    %22 = vector.shape_cast %21 : vector<1x28xf32> to vector<1x1x28xf32>
    %23 = vector.broadcast %22 : vector<1x1x28xf32> to vector<8x8x28xf32>
    %24 = arith.mulf %19, %23 : vector<8x8x28xf32>
    %25 = arith.addf %17, %24 : vector<8x8x28xf32>
    %26 = vector.extract_strided_slice %1 {offsets = [0, 1, 0, 0], sizes = [1, 8, 8, 28], strides = [1, 1, 1, 1]} : vector<3x10x8x28xf32> to vector<1x8x8x28xf32>
    %27 = vector.shape_cast %26 : vector<1x8x8x28xf32> to vector<8x8x28xf32>
    %28 = vector.extract_strided_slice %2 {offsets = [1, 0, 0, 0], sizes = [1, 1, 1, 28], strides = [1, 1, 1, 1]} : vector<3x3x1x28xf32> to vector<1x1x1x28xf32>
    %29 = vector.shape_cast %28 : vector<1x1x1x28xf32> to vector<1x28xf32>
    %30 = vector.shape_cast %29 : vector<1x28xf32> to vector<1x1x28xf32>
    %31 = vector.broadcast %30 : vector<1x1x28xf32> to vector<8x8x28xf32>
    %32 = arith.mulf %27, %31 : vector<8x8x28xf32>
    %33 = arith.addf %25, %32 : vector<8x8x28xf32>
    %34 = vector.extract_strided_slice %1 {offsets = [1, 1, 0, 0], sizes = [1, 8, 8, 28], strides = [1, 1, 1, 1]} : vector<3x10x8x28xf32> to vector<1x8x8x28xf32>
    %35 = vector.shape_cast %34 : vector<1x8x8x28xf32> to vector<8x8x28xf32>
    %36 = vector.extract_strided_slice %2 {offsets = [1, 1, 0, 0], sizes = [1, 1, 1, 28], strides = [1, 1, 1, 1]} : vector<3x3x1x28xf32> to vector<1x1x1x28xf32>
    %37 = vector.shape_cast %36 : vector<1x1x1x28xf32> to vector<1x28xf32>
    %38 = vector.shape_cast %37 : vector<1x28xf32> to vector<1x1x28xf32>
    %39 = vector.broadcast %38 : vector<1x1x28xf32> to vector<8x8x28xf32>
    %40 = arith.mulf %35, %39 : vector<8x8x28xf32>
    %41 = arith.addf %33, %40 : vector<8x8x28xf32>
    %42 = vector.extract_strided_slice %1 {offsets = [2, 1, 0, 0], sizes = [1, 8, 8, 28], strides = [1, 1, 1, 1]} : vector<3x10x8x28xf32> to vector<1x8x8x28xf32>
    %43 = vector.shape_cast %42 : vector<1x8x8x28xf32> to vector<8x8x28xf32>
    %44 = vector.extract_strided_slice %2 {offsets = [1, 2, 0, 0], sizes = [1, 1, 1, 28], strides = [1, 1, 1, 1]} : vector<3x3x1x28xf32> to vector<1x1x1x28xf32>
    %45 = vector.shape_cast %44 : vector<1x1x1x28xf32> to vector<1x28xf32>
    %46 = vector.shape_cast %45 : vector<1x28xf32> to vector<1x1x28xf32>
    %47 = vector.broadcast %46 : vector<1x1x28xf32> to vector<8x8x28xf32>
    %48 = arith.mulf %43, %47 : vector<8x8x28xf32>
    %49 = arith.addf %41, %48 : vector<8x8x28xf32>
    %50 = vector.extract_strided_slice %1 {offsets = [0, 2, 0, 0], sizes = [1, 8, 8, 28], strides = [1, 1, 1, 1]} : vector<3x10x8x28xf32> to vector<1x8x8x28xf32>
    %51 = vector.shape_cast %50 : vector<1x8x8x28xf32> to vector<8x8x28xf32>
    %52 = vector.extract_strided_slice %2 {offsets = [2, 0, 0, 0], sizes = [1, 1, 1, 28], strides = [1, 1, 1, 1]} : vector<3x3x1x28xf32> to vector<1x1x1x28xf32>
    %53 = vector.shape_cast %52 : vector<1x1x1x28xf32> to vector<1x28xf32>
    %54 = vector.shape_cast %53 : vector<1x28xf32> to vector<1x1x28xf32>
    %55 = vector.broadcast %54 : vector<1x1x28xf32> to vector<8x8x28xf32>
    %56 = arith.mulf %51, %55 : vector<8x8x28xf32>
    %57 = arith.addf %49, %56 : vector<8x8x28xf32>
    %58 = vector.extract_strided_slice %1 {offsets = [1, 2, 0, 0], sizes = [1, 8, 8, 28], strides = [1, 1, 1, 1]} : vector<3x10x8x28xf32> to vector<1x8x8x28xf32>
    %59 = vector.shape_cast %58 : vector<1x8x8x28xf32> to vector<8x8x28xf32>
    %60 = vector.extract_strided_slice %2 {offsets = [2, 1, 0, 0], sizes = [1, 1, 1, 28], strides = [1, 1, 1, 1]} : vector<3x3x1x28xf32> to vector<1x1x1x28xf32>
    %61 = vector.shape_cast %60 : vector<1x1x1x28xf32> to vector<1x28xf32>
    %62 = vector.shape_cast %61 : vector<1x28xf32> to vector<1x1x28xf32>
    %63 = vector.broadcast %62 : vector<1x1x28xf32> to vector<8x8x28xf32>
    %64 = arith.mulf %59, %63 : vector<8x8x28xf32>
    %65 = arith.addf %57, %64 : vector<8x8x28xf32>
    %66 = vector.extract_strided_slice %1 {offsets = [2, 2, 0, 0], sizes = [1, 8, 8, 28], strides = [1, 1, 1, 1]} : vector<3x10x8x28xf32> to vector<1x8x8x28xf32>
    %67 = vector.shape_cast %66 : vector<1x8x8x28xf32> to vector<8x8x28xf32>
    %68 = vector.extract_strided_slice %2 {offsets = [2, 2, 0, 0], sizes = [1, 1, 1, 28], strides = [1, 1, 1, 1]} : vector<3x3x1x28xf32> to vector<1x1x1x28xf32>
    %69 = vector.shape_cast %68 : vector<1x1x1x28xf32> to vector<1x28xf32>
    %70 = vector.shape_cast %69 : vector<1x28xf32> to vector<1x1x28xf32>
    %71 = vector.broadcast %70 : vector<1x1x28xf32> to vector<8x8x28xf32>
    %72 = arith.mulf %67, %71 : vector<8x8x28xf32>
    %73 = arith.addf %65, %72 : vector<8x8x28xf32>
    %c0_8 = arith.constant 0 : index
    %c0_9 = arith.constant 0 : index
    %c0_10 = arith.constant 0 : index
    %c0_11 = arith.constant 0 : index
    %74 = vector.load %arg3[%c0_8, %c0_9, %c0_10, %c0_11] : memref<1x8x8x28xf32, #tpu.memory_space<vmem>>, vector<1x8x8x28xf32>
    %75 = vector.shape_cast %74 : vector<1x8x8x28xf32> to vector<8x8x28xf32>
    %76 = arith.addf %73, %75 : vector<8x8x28xf32>
    %c0_12 = arith.constant 0 : index
    %c0_13 = arith.constant 0 : index
    %c0_14 = arith.constant 0 : index
    %c0_15 = arith.constant 0 : index
    %77 = vector.load %arg4[%c0_12, %c0_13, %c0_14, %c0_15] : memref<1x8x8x28xf32, #tpu.memory_space<vmem>>, vector<1x8x8x28xf32>
    %78 = vector.shape_cast %77 : vector<1x8x8x28xf32> to vector<8x8x28xf32>
    %79 = vector.shape_cast %76 : vector<8x8x28xf32> to vector<1x8x8x28xf32>
    tpu.vector_store %arg4[%c0_12, %c0_13, %c0_14, %c0_15], %79 {strides = array<i32>} : memref<1x8x8x28xf32, #tpu.memory_space<vmem>>, vector<1x8x8x28xf32>,
    return
  }
  func.func @transform_0(%arg0: i32) -> (i32, i32, i32, i32, i32) {
    %c0_i32 = arith.constant 0 : i32
    %c0_i32_0 = arith.constant 0 : i32
    %c0_i32_1 = arith.constant 0 : i32
    %c0_i32_2 = arith.constant 0 : i32
    %c0_i32_3 = arith.constant 0 : i32
    return %arg0, %c0_i32, %c0_i32_0, %c0_i32_1, %c0_i32_2 : i32, i32, i32, i32, i32
  }
  func.func @transform_1(%arg0: i32) -> (i32, i32, i32, i32) {
    %c0_i32 = arith.constant 0 : i32
    %c0_i32_0 = arith.constant 0 : i32
    %c0_i32_1 = arith.constant 0 : i32
    %c0_i32_2 = arith.constant 0 : i32
    %c0_i32_3 = arith.constant 0 : i32
    return %c0_i32, %c0_i32_0, %c0_i32_1, %c0_i32_2 : i32, i32, i32, i32
  }
  func.func @transform_2(%arg0: i32) -> (i32, i32, i32, i32) {
    %c0_i32 = arith.constant 0 : i32
    %c0_i32_0 = arith.constant 0 : i32
    %c0_i32_1 = arith.constant 0 : i32
    %c0_i32_2 = arith.constant 0 : i32
    return %arg0, %c0_i32, %c0_i32_0, %c0_i32_1 : i32, i32, i32, i32
  }
  func.func @transform_3(%arg0: i32) -> (i32, i32, i32, i32) {
    %c0_i32 = arith.constant 0 : i32
    %c0_i32_0 = arith.constant 0 : i32
    %c0_i32_1 = arith.constant 0 : i32
    %c0_i32_2 = arith.constant 0 : i32
    return %arg0, %c0_i32, %c0_i32_0, %c0_i32_1 : i32, i32, i32, i32
  }
}

module attributes {stable_mosaic.version = 11 : i64} {
  func.func @_linear_ln_kernel(%arg0: i32, %arg1: memref<64x28xf32, #tpu.memory_space<vmem>>, %arg2: memref<28x28xf32, #tpu.memory_space<vmem>>, %arg3: memref<1x28xf32, #tpu.memory_space<vmem>>, %arg4: memref<1x28xf32, #tpu.memory_space<vmem>>, %arg5: memref<1x28xf32, #tpu.memory_space<vmem>>, %arg6: memref<64x28xf32, #tpu.memory_space<vmem>>) attributes {dimension_semantics = [#tpu.dimension_semantics<parallel>], iteration_bounds = array<i64: 2>, scalar_prefetch = 0 : i64, scratch_operands = 0 : i64, tpu.core_type = #tpu.core_type<tc>, window_params = [{transform_indices = @transform_0, window_bounds = array<i64: 64, 28>}, {pipeline_mode = #tpu.pipeline_mode<synchronous>, transform_indices = @transform_1, window_bounds = array<i64: 28, 28>}, {pipeline_mode = #tpu.pipeline_mode<synchronous>, transform_indices = @transform_2, window_bounds = array<i64: 1, 28>}, {pipeline_mode = #tpu.pipeline_mode<synchronous>, transform_indices = @transform_3, window_bounds = array<i64: 1, 28>}, {pipeline_mode = #tpu.pipeline_mode<synchronous>, transform_indices = @transform_4, window_bounds = array<i64: 1, 28>}, {transform_indices = @transform_5, window_bounds = array<i64: 64, 28>}]} {
    %c0 = arith.constant 0 : index
    %c0_0 = arith.constant 0 : index
    %0 = vector.load %arg1[%c0, %c0_0] : memref<64x28xf32, #tpu.memory_space<vmem>>, vector<64x28xf32>
    %1 = arith.truncf %0 : vector<64x28xf32> to vector<64x28xbf16>
    %c0_1 = arith.constant 0 : index
    %c0_2 = arith.constant 0 : index
    %2 = vector.load %arg2[%c0_1, %c0_2] : memref<28x28xf32, #tpu.memory_space<vmem>>, vector<28x28xf32>
    %3 = arith.truncf %2 : vector<28x28xf32> to vector<28x28xbf16>
    %cst = arith.constant dense<0.000000e+00> : vector<64x28xf32>
    %4 = tpu.matmul %1, %3, %cst {dimension_numbers = #tpu.dot_dimension_numbers<[1], [0], [0], [1], [0, 0, 1, 1], [], []>} : vector<64x28xbf16>, vector<28x28xbf16>, vector<64x28xf32> -> vector<64x28xf32>
    %c0_3 = arith.constant 0 : index
    %c0_4 = arith.constant 0 : index
    %5 = vector.load %arg3[%c0_3, %c0_4] : memref<1x28xf32, #tpu.memory_space<vmem>>, vector<1x28xf32>
    %6 = vector.broadcast %5 : vector<1x28xf32> to vector<64x28xf32>
    %7 = arith.addf %4, %6 : vector<64x28xf32>
    %cst_5 = arith.constant dense<0.000000e+00> : vector<64xf32>
    %8 = vector.multi_reduction <add>, %7, %cst_5 [1] : vector<64x28xf32> to vector<64xf32>
    %9 = vector.shape_cast %8 : vector<64xf32> to vector<64x1xf32>
    %cst_6 = arith.constant 2.800000e+01 : f32
    %10 = vector.broadcast %cst_6 : f32 to vector<64x1xf32>
    %11 = arith.divf %9, %10 : vector<64x1xf32>
    %12 = vector.broadcast %11 : vector<64x1xf32> to vector<64x28xf32>
    %13 = arith.subf %7, %12 : vector<64x28xf32>
    %14 = arith.mulf %13, %13 : vector<64x28xf32>
    %cst_7 = arith.constant dense<0.000000e+00> : vector<64xf32>
    %15 = vector.multi_reduction <add>, %14, %cst_7 [1] : vector<64x28xf32> to vector<64xf32>
    %16 = vector.shape_cast %15 : vector<64xf32> to vector<64x1xf32>
    %cst_8 = arith.constant 2.800000e+01 : f32
    %17 = vector.broadcast %cst_8 : f32 to vector<64x1xf32>
    %18 = arith.divf %16, %17 : vector<64x1xf32>
    %cst_9 = arith.constant 9.99999974E-6 : f32
    %19 = vector.broadcast %cst_9 : f32 to vector<64x1xf32>
    %20 = arith.addf %18, %19 : vector<64x1xf32>
    %21 = math.rsqrt %20 : vector<64x1xf32>
    %22 = vector.broadcast %21 : vector<64x1xf32> to vector<64x28xf32>
    %23 = arith.mulf %13, %22 : vector<64x28xf32>
    %c0_10 = arith.constant 0 : index
    %c0_11 = arith.constant 0 : index
    %24 = vector.load %arg4[%c0_10, %c0_11] : memref<1x28xf32, #tpu.memory_space<vmem>>, vector<1x28xf32>
    %25 = vector.broadcast %24 : vector<1x28xf32> to vector<64x28xf32>
    %26 = arith.mulf %23, %25 : vector<64x28xf32>
    %c0_12 = arith.constant 0 : index
    %c0_13 = arith.constant 0 : index
    %27 = vector.load %arg5[%c0_12, %c0_13] : memref<1x28xf32, #tpu.memory_space<vmem>>, vector<1x28xf32>
    %28 = vector.broadcast %27 : vector<1x28xf32> to vector<64x28xf32>
    %29 = arith.addf %26, %28 : vector<64x28xf32>
    %c0_14 = arith.constant 0 : index
    %c0_15 = arith.constant 0 : index
    %30 = vector.load %arg6[%c0_14, %c0_15] : memref<64x28xf32, #tpu.memory_space<vmem>>, vector<64x28xf32>
    tpu.vector_store %arg6[%c0_14, %c0_15], %29 {strides = array<i32>} : memref<64x28xf32, #tpu.memory_space<vmem>>, vector<64x28xf32>,
    return
  }
  func.func @transform_0(%arg0: i32) -> (i32, i32) {
    %c0_i32 = arith.constant 0 : i32
    %c0_i32_0 = arith.constant 0 : i32
    return %arg0, %c0_i32 : i32, i32
  }
  func.func @transform_1(%arg0: i32) -> (i32, i32) {
    %c0_i32 = arith.constant 0 : i32
    %c0_i32_0 = arith.constant 0 : i32
    %c0_i32_1 = arith.constant 0 : i32
    return %c0_i32, %c0_i32_0 : i32, i32
  }
  func.func @transform_2(%arg0: i32) -> (i32, i32) {
    %c0_i32 = arith.constant 0 : i32
    %c0_i32_0 = arith.constant 0 : i32
    %c0_i32_1 = arith.constant 0 : i32
    return %c0_i32, %c0_i32_0 : i32, i32
  }
  func.func @transform_3(%arg0: i32) -> (i32, i32) {
    %c0_i32 = arith.constant 0 : i32
    %c0_i32_0 = arith.constant 0 : i32
    %c0_i32_1 = arith.constant 0 : i32
    return %c0_i32, %c0_i32_0 : i32, i32
  }
  func.func @transform_4(%arg0: i32) -> (i32, i32) {
    %c0_i32 = arith.constant 0 : i32
    %c0_i32_0 = arith.constant 0 : i32
    %c0_i32_1 = arith.constant 0 : i32
    return %c0_i32, %c0_i32_0 : i32, i32
  }
  func.func @transform_5(%arg0: i32) -> (i32, i32) {
    %c0_i32 = arith.constant 0 : i32
    %c0_i32_0 = arith.constant 0 : i32
    return %arg0, %c0_i32 : i32, i32
  }
}

module attributes {stable_mosaic.version = 11 : i64} {
  func.func @_win_attn_kernel(%arg0: i32, %arg1: memref<4x1x16x28xf32, #tpu.memory_space<vmem>>, %arg2: memref<4x1x16x28xf32, #tpu.memory_space<vmem>>, %arg3: memref<4x1x16x28xf32, #tpu.memory_space<vmem>>, %arg4: memref<1x16x16xf32, #tpu.memory_space<vmem>>, %arg5: memref<4x1x16x28xf32, #tpu.memory_space<vmem>>) attributes {dimension_semantics = [#tpu.dimension_semantics<parallel>], iteration_bounds = array<i64: 2>, scalar_prefetch = 0 : i64, scratch_operands = 0 : i64, tpu.core_type = #tpu.core_type<tc>, window_params = [{transform_indices = @transform_0, window_bounds = array<i64: 4, 1, 16, 28>}, {transform_indices = @transform_1, window_bounds = array<i64: 4, 1, 16, 28>}, {transform_indices = @transform_2, window_bounds = array<i64: 4, 1, 16, 28>}, {pipeline_mode = #tpu.pipeline_mode<synchronous>, transform_indices = @transform_3, window_bounds = array<i64: 1, 16, 16>}, {transform_indices = @transform_4, window_bounds = array<i64: 4, 1, 16, 28>}]} {
    %c0 = arith.constant 0 : index
    %c0_0 = arith.constant 0 : index
    %c0_1 = arith.constant 0 : index
    %c0_2 = arith.constant 0 : index
    %0 = vector.load %arg1[%c0, %c0_0, %c0_1, %c0_2] : memref<4x1x16x28xf32, #tpu.memory_space<vmem>>, vector<4x1x16x28xf32>
    %cst = arith.constant 0.188982233 : f32
    %1 = vector.broadcast %cst : f32 to vector<4x1x16x28xf32>
    %2 = arith.mulf %0, %1 : vector<4x1x16x28xf32>
    %3 = vector.shape_cast %2 : vector<4x1x16x28xf32> to vector<4x16x28xf32>
    %c0_3 = arith.constant 0 : index
    %c0_4 = arith.constant 0 : index
    %c0_5 = arith.constant 0 : index
    %c0_6 = arith.constant 0 : index
    %4 = vector.load %arg2[%c0_3, %c0_4, %c0_5, %c0_6] : memref<4x1x16x28xf32, #tpu.memory_space<vmem>>, vector<4x1x16x28xf32>
    %5 = vector.shape_cast %4 : vector<4x1x16x28xf32> to vector<4x16x28xf32>
    %c0_7 = arith.constant 0 : index
    %c0_8 = arith.constant 0 : index
    %c0_9 = arith.constant 0 : index
    %c0_10 = arith.constant 0 : index
    %6 = vector.load %arg3[%c0_7, %c0_8, %c0_9, %c0_10] : memref<4x1x16x28xf32, #tpu.memory_space<vmem>>, vector<4x1x16x28xf32>
    %7 = vector.shape_cast %6 : vector<4x1x16x28xf32> to vector<4x16x28xf32>
    %8 = arith.truncf %3 : vector<4x16x28xf32> to vector<4x16x28xbf16>
    %9 = arith.truncf %5 : vector<4x16x28xf32> to vector<4x16x28xbf16>
    "tpu.trace_start"() <{level = 10 : i32, message = "gid,gjd->gij"}> : () -> ()
    %cst_11 = arith.constant dense<0.000000e+00> : vector<4x16x16xf32>
    %10 = tpu.matmul %8, %9, %cst_11 {dimension_numbers = #tpu.dot_dimension_numbers<[2], [2], [1], [1], [0, 0, 0, 1, 1, 1], [0], [0]>} : vector<4x16x28xbf16>, vector<4x16x28xbf16>, vector<4x16x16xf32> -> vector<4x16x16xf32>
    "tpu.trace_stop"() : () -> ()
    %11 = vector.shape_cast %10 : vector<4x16x16xf32> to vector<4x1x16x16xf32>
    %c0_12 = arith.constant 0 : index
    %c0_13 = arith.constant 0 : index
    %c0_14 = arith.constant 0 : index
    %12 = vector.load %arg4[%c0_12, %c0_13, %c0_14] : memref<1x16x16xf32, #tpu.memory_space<vmem>>, vector<1x16x16xf32>
    %13 = vector.shape_cast %12 : vector<1x16x16xf32> to vector<1x1x16x16xf32>
    %14 = vector.broadcast %13 : vector<1x1x16x16xf32> to vector<4x1x16x16xf32>
    %15 = arith.addf %11, %14 : vector<4x1x16x16xf32>
    %cst_15 = arith.constant dense<0xFF800000> : vector<4x1x16xf32>
    %16 = vector.multi_reduction <maximumf>, %15, %cst_15 [3] : vector<4x1x16x16xf32> to vector<4x1x16xf32>
    %17 = vector.shape_cast %16 : vector<4x1x16xf32> to vector<4x1x16x1xf32>
    %18 = vector.broadcast %17 : vector<4x1x16x1xf32> to vector<4x1x16x16xf32>
    %19 = arith.subf %15, %18 : vector<4x1x16x16xf32>
    %20 = math.exp %19 : vector<4x1x16x16xf32>
    %cst_16 = arith.constant dense<0.000000e+00> : vector<4x1x16xf32>
    %21 = vector.multi_reduction <add>, %20, %cst_16 [3] : vector<4x1x16x16xf32> to vector<4x1x16xf32>
    %22 = vector.shape_cast %21 : vector<4x1x16xf32> to vector<4x1x16x1xf32>
    %23 = tpu.reciprocal %22 {approx = true} : vector<4x1x16x1xf32> -> vector<4x1x16x1xf32>
    %24 = vector.broadcast %23 : vector<4x1x16x1xf32> to vector<4x1x16x16xf32>
    %25 = arith.mulf %20, %24 : vector<4x1x16x16xf32>
    %26 = vector.shape_cast %25 : vector<4x1x16x16xf32> to vector<4x16x16xf32>
    %27 = arith.truncf %26 : vector<4x16x16xf32> to vector<4x16x16xbf16>
    %28 = arith.truncf %7 : vector<4x16x28xf32> to vector<4x16x28xbf16>
    "tpu.trace_start"() <{level = 10 : i32, message = "gij,gjd->gid"}> : () -> ()
    %cst_17 = arith.constant dense<0.000000e+00> : vector<4x16x28xf32>
    %29 = tpu.matmul %27, %28, %cst_17 {dimension_numbers = #tpu.dot_dimension_numbers<[2], [1], [1], [2], [0, 0, 0, 1, 1, 2], [0], [0]>} : vector<4x16x16xbf16>, vector<4x16x28xbf16>, vector<4x16x28xf32> -> vector<4x16x28xf32>
    "tpu.trace_stop"() : () -> ()
    %30 = vector.shape_cast %29 : vector<4x16x28xf32> to vector<4x1x16x28xf32>
    %c0_18 = arith.constant 0 : index
    %c0_19 = arith.constant 0 : index
    %c0_20 = arith.constant 0 : index
    %c0_21 = arith.constant 0 : index
    %31 = vector.load %arg5[%c0_18, %c0_19, %c0_20, %c0_21] : memref<4x1x16x28xf32, #tpu.memory_space<vmem>>, vector<4x1x16x28xf32>
    tpu.vector_store %arg5[%c0_18, %c0_19, %c0_20, %c0_21], %30 {strides = array<i32>} : memref<4x1x16x28xf32, #tpu.memory_space<vmem>>, vector<4x1x16x28xf32>,
    return
  }
  func.func @transform_0(%arg0: i32) -> (i32, i32, i32, i32) {
    %c0_i32 = arith.constant 0 : i32
    %c0_i32_0 = arith.constant 0 : i32
    %c0_i32_1 = arith.constant 0 : i32
    %c0_i32_2 = arith.constant 0 : i32
    return %arg0, %c0_i32, %c0_i32_0, %c0_i32_1 : i32, i32, i32, i32
  }
  func.func @transform_1(%arg0: i32) -> (i32, i32, i32, i32) {
    %c0_i32 = arith.constant 0 : i32
    %c0_i32_0 = arith.constant 0 : i32
    %c0_i32_1 = arith.constant 0 : i32
    %c0_i32_2 = arith.constant 0 : i32
    return %arg0, %c0_i32, %c0_i32_0, %c0_i32_1 : i32, i32, i32, i32
  }
  func.func @transform_2(%arg0: i32) -> (i32, i32, i32, i32) {
    %c0_i32 = arith.constant 0 : i32
    %c0_i32_0 = arith.constant 0 : i32
    %c0_i32_1 = arith.constant 0 : i32
    %c0_i32_2 = arith.constant 0 : i32
    return %arg0, %c0_i32, %c0_i32_0, %c0_i32_1 : i32, i32, i32, i32
  }
  func.func @transform_3(%arg0: i32) -> (i32, i32, i32) {
    %c0_i32 = arith.constant 0 : i32
    %c0_i32_0 = arith.constant 0 : i32
    %c0_i32_1 = arith.constant 0 : i32
    %c0_i32_2 = arith.constant 0 : i32
    return %c0_i32, %c0_i32_0, %c0_i32_1 : i32, i32, i32
  }
  func.func @transform_4(%arg0: i32) -> (i32, i32, i32, i32) {
    %c0_i32 = arith.constant 0 : i32
    %c0_i32_0 = arith.constant 0 : i32
    %c0_i32_1 = arith.constant 0 : i32
    %c0_i32_2 = arith.constant 0 : i32
    return %arg0, %c0_i32, %c0_i32_0, %c0_i32_1 : i32, i32, i32, i32
  }
}

module attributes {stable_mosaic.version = 11 : i64} {
  func.func @_si_gate_kernel(%arg0: i32, %arg1: memref<64x28xf32, #tpu.memory_space<vmem>>, %arg2: memref<64x28xf32, #tpu.memory_space<vmem>>, %arg3: memref<28x3xf32, #tpu.memory_space<vmem>>, %arg4: memref<1x3xf32, #tpu.memory_space<vmem>>, %arg5: memref<1x3xf32, #tpu.memory_space<vmem>>, %arg6: memref<1x1xf32, #tpu.memory_space<vmem>>, %arg7: memref<64x28xf32, #tpu.memory_space<vmem>>) attributes {dimension_semantics = [#tpu.dimension_semantics<parallel>], iteration_bounds = array<i64: 2>, scalar_prefetch = 0 : i64, scratch_operands = 0 : i64, tpu.core_type = #tpu.core_type<tc>, window_params = [{transform_indices = @transform_0, window_bounds = array<i64: 64, 28>}, {transform_indices = @transform_1, window_bounds = array<i64: 64, 28>}, {pipeline_mode = #tpu.pipeline_mode<synchronous>, transform_indices = @transform_2, window_bounds = array<i64: 28, 3>}, {pipeline_mode = #tpu.pipeline_mode<synchronous>, transform_indices = @transform_3, window_bounds = array<i64: 1, 3>}, {pipeline_mode = #tpu.pipeline_mode<synchronous>, transform_indices = @transform_4, window_bounds = array<i64: 1, 3>}, {pipeline_mode = #tpu.pipeline_mode<synchronous>, transform_indices = @transform_5, window_bounds = array<i64: 1, 1>}, {transform_indices = @transform_6, window_bounds = array<i64: 64, 28>}]} {
    %c0 = arith.constant 0 : index
    %c0_0 = arith.constant 0 : index
    %0 = vector.load %arg1[%c0, %c0_0] : memref<64x28xf32, #tpu.memory_space<vmem>>, vector<64x28xf32>
    %1 = arith.truncf %0 : vector<64x28xf32> to vector<64x28xbf16>
    %c0_1 = arith.constant 0 : index
    %c0_2 = arith.constant 0 : index
    %2 = vector.load %arg3[%c0_1, %c0_2] : memref<28x3xf32, #tpu.memory_space<vmem>>, vector<28x3xf32>
    %3 = arith.truncf %2 : vector<28x3xf32> to vector<28x3xbf16>
    %cst = arith.constant dense<0.000000e+00> : vector<64x3xf32>
    %4 = tpu.matmul %1, %3, %cst {dimension_numbers = #tpu.dot_dimension_numbers<[1], [0], [0], [1], [0, 0, 1, 1], [], []>} : vector<64x28xbf16>, vector<28x3xbf16>, vector<64x3xf32> -> vector<64x3xf32>
    %c0_3 = arith.constant 0 : index
    %c0_4 = arith.constant 0 : index
    %5 = vector.load %arg4[%c0_3, %c0_4] : memref<1x3xf32, #tpu.memory_space<vmem>>, vector<1x3xf32>
    %6 = vector.broadcast %5 : vector<1x3xf32> to vector<64x3xf32>
    %7 = arith.addf %4, %6 : vector<64x3xf32>
    %cst_5 = arith.constant 5.000000e-01 : f32
    %8 = vector.broadcast %cst_5 : f32 to vector<64x3xf32>
    %9 = arith.mulf %8, %7 : vector<64x3xf32>
    %cst_6 = arith.constant 0.707106769 : f32
    %10 = vector.broadcast %cst_6 : f32 to vector<64x3xf32>
    %11 = arith.mulf %7, %10 : vector<64x3xf32>
    %cst_7 = arith.constant 0.000000e+00 : f32
    %12 = vector.broadcast %cst_7 : f32 to vector<64x3xf32>
    %13 = arith.cmpf oge, %11, %12 : vector<64x3xf32>
    %cst_8 = arith.constant 1.000000e+00 : f32
    %cst_9 = arith.constant -1.000000e+00 : f32
    %14 = vector.broadcast %cst_8 : f32 to vector<64x3xf32>
    %15 = vector.broadcast %cst_9 : f32 to vector<64x3xf32>
    %16 = arith.select %13, %14, %15 : vector<64x3xi1>, vector<64x3xf32>
    %17 = math.absf %11 : vector<64x3xf32>
    %cst_10 = arith.constant 0.327591091 : f32
    %18 = vector.broadcast %cst_10 : f32 to vector<64x3xf32>
    %19 = arith.mulf %18, %17 : vector<64x3xf32>
    %cst_11 = arith.constant 1.000000e+00 : f32
    %20 = vector.broadcast %cst_11 : f32 to vector<64x3xf32>
    %21 = arith.addf %20, %19 : vector<64x3xf32>
    %cst_12 = arith.constant 1.000000e+00 : f32
    %22 = vector.broadcast %cst_12 : f32 to vector<64x3xf32>
    %23 = arith.divf %22, %21 : vector<64x3xf32>
    %cst_13 = arith.constant 1.06140542 : f32
    %24 = vector.broadcast %cst_13 : f32 to vector<64x3xf32>
    %25 = arith.mulf %24, %23 : vector<64x3xf32>
    %cst_14 = arith.constant -1.45315206 : f32
    %26 = vector.broadcast %cst_14 : f32 to vector<64x3xf32>
    %27 = arith.addf %25, %26 : vector<64x3xf32>
    %28 = arith.mulf %27, %23 : vector<64x3xf32>
    %cst_15 = arith.constant 1.42141378 : f32
    %29 = vector.broadcast %cst_15 : f32 to vector<64x3xf32>
    %30 = arith.addf %28, %29 : vector<64x3xf32>
    %31 = arith.mulf %30, %23 : vector<64x3xf32>
    %cst_16 = arith.constant -0.284496725 : f32
    %32 = vector.broadcast %cst_16 : f32 to vector<64x3xf32>
    %33 = arith.addf %31, %32 : vector<64x3xf32>
    %34 = arith.mulf %33, %23 : vector<64x3xf32>
    %cst_17 = arith.constant 0.254829586 : f32
    %35 = vector.broadcast %cst_17 : f32 to vector<64x3xf32>
    %36 = arith.addf %34, %35 : vector<64x3xf32>
    %37 = arith.mulf %36, %23 : vector<64x3xf32>
    %cst_18 = arith.constant 0.000000e+00 : f32
    %38 = vector.broadcast %cst_18 : f32 to vector<64x3xf32>
    %39 = arith.subf %38, %17 : vector<64x3xf32>
    %40 = arith.mulf %39, %17 : vector<64x3xf32>
    %41 = math.exp %40 : vector<64x3xf32>
    %42 = arith.mulf %37, %41 : vector<64x3xf32>
    %cst_19 = arith.constant 1.000000e+00 : f32
    %43 = vector.broadcast %cst_19 : f32 to vector<64x3xf32>
    %44 = arith.subf %43, %42 : vector<64x3xf32>
    %45 = arith.mulf %16, %44 : vector<64x3xf32>
    %cst_20 = arith.constant 1.000000e+00 : f32
    %46 = vector.broadcast %cst_20 : f32 to vector<64x3xf32>
    %47 = arith.addf %46, %45 : vector<64x3xf32>
    %48 = arith.mulf %9, %47 : vector<64x3xf32>
    %c0_21 = arith.constant 0 : index
    %c0_22 = arith.constant 0 : index
    %49 = vector.load %arg5[%c0_21, %c0_22] : memref<1x3xf32, #tpu.memory_space<vmem>>, vector<1x3xf32>
    %50 = vector.broadcast %49 : vector<1x3xf32> to vector<64x3xf32>
    %51 = arith.mulf %48, %50 : vector<64x3xf32>
    %cst_23 = arith.constant dense<0.000000e+00> : vector<64xf32>
    %52 = vector.multi_reduction <add>, %51, %cst_23 [1] : vector<64x3xf32> to vector<64xf32>
    %53 = vector.shape_cast %52 : vector<64xf32> to vector<64x1xf32>
    %c0_24 = arith.constant 0 : index
    %c0_25 = arith.constant 0 : index
    %54 = vector.load %arg6[%c0_24, %c0_25] : memref<1x1xf32, #tpu.memory_space<vmem>>, vector<1x1xf32>
    %55 = vector.broadcast %54 : vector<1x1xf32> to vector<64x1xf32>
    %56 = arith.addf %53, %55 : vector<64x1xf32>
    %cst_26 = arith.constant 0.000000e+00 : f32
    %57 = vector.broadcast %cst_26 : f32 to vector<64x1xf32>
    %58 = arith.subf %57, %56 : vector<64x1xf32>
    %59 = math.exp %58 : vector<64x1xf32>
    %cst_27 = arith.constant 1.000000e+00 : f32
    %60 = vector.broadcast %cst_27 : f32 to vector<64x1xf32>
    %61 = arith.addf %60, %59 : vector<64x1xf32>
    %cst_28 = arith.constant 1.000000e+00 : f32
    %62 = vector.broadcast %cst_28 : f32 to vector<64x1xf32>
    %63 = arith.divf %62, %61 : vector<64x1xf32>
    %c0_29 = arith.constant 0 : index
    %c0_30 = arith.constant 0 : index
    %64 = vector.load %arg2[%c0_29, %c0_30] : memref<64x28xf32, #tpu.memory_space<vmem>>, vector<64x28xf32>
    %65 = vector.broadcast %63 : vector<64x1xf32> to vector<64x28xf32>
    %66 = arith.mulf %65, %64 : vector<64x28xf32>
    %c0_31 = arith.constant 0 : index
    %c0_32 = arith.constant 0 : index
    %67 = vector.load %arg7[%c0_31, %c0_32] : memref<64x28xf32, #tpu.memory_space<vmem>>, vector<64x28xf32>
    tpu.vector_store %arg7[%c0_31, %c0_32], %66 {strides = array<i32>} : memref<64x28xf32, #tpu.memory_space<vmem>>, vector<64x28xf32>,
    return
  }
  func.func @transform_0(%arg0: i32) -> (i32, i32) {
    %c0_i32 = arith.constant 0 : i32
    %c0_i32_0 = arith.constant 0 : i32
    return %arg0, %c0_i32 : i32, i32
  }
  func.func @transform_1(%arg0: i32) -> (i32, i32) {
    %c0_i32 = arith.constant 0 : i32
    %c0_i32_0 = arith.constant 0 : i32
    return %arg0, %c0_i32 : i32, i32
  }
  func.func @transform_2(%arg0: i32) -> (i32, i32) {
    %c0_i32 = arith.constant 0 : i32
    %c0_i32_0 = arith.constant 0 : i32
    %c0_i32_1 = arith.constant 0 : i32
    return %c0_i32, %c0_i32_0 : i32, i32
  }
  func.func @transform_3(%arg0: i32) -> (i32, i32) {
    %c0_i32 = arith.constant 0 : i32
    %c0_i32_0 = arith.constant 0 : i32
    %c0_i32_1 = arith.constant 0 : i32
    return %c0_i32, %c0_i32_0 : i32, i32
  }
  func.func @transform_4(%arg0: i32) -> (i32, i32) {
    %c0_i32 = arith.constant 0 : i32
    %c0_i32_0 = arith.constant 0 : i32
    %c0_i32_1 = arith.constant 0 : i32
    return %c0_i32, %c0_i32_0 : i32, i32
  }
  func.func @transform_5(%arg0: i32) -> (i32, i32) {
    %c0_i32 = arith.constant 0 : i32
    %c0_i32_0 = arith.constant 0 : i32
    %c0_i32_1 = arith.constant 0 : i32
    return %c0_i32, %c0_i32_0 : i32, i32
  }
  func.func @transform_6(%arg0: i32) -> (i32, i32) {
    %c0_i32 = arith.constant 0 : i32
    %c0_i32_0 = arith.constant 0 : i32
    return %arg0, %c0_i32 : i32, i32
  }
}

module attributes {stable_mosaic.version = 11 : i64} {
  func.func @_dwconv_bias_proj_kernel(%arg0: i32, %arg1: memref<1x3x10x8x28xf32, #tpu.memory_space<vmem>>, %arg2: memref<3x3x1x28xf32, #tpu.memory_space<vmem>>, %arg3: memref<1x28xf32, #tpu.memory_space<vmem>>, %arg4: memref<28x14xf32, #tpu.memory_space<vmem>>, %arg5: memref<1x14xf32, #tpu.memory_space<vmem>>, %arg6: memref<1x8x8x14xf32, #tpu.memory_space<vmem>>) attributes {dimension_semantics = [#tpu.dimension_semantics<parallel>], iteration_bounds = array<i64: 2>, scalar_prefetch = 0 : i64, scratch_operands = 0 : i64, tpu.core_type = #tpu.core_type<tc>, window_params = [{transform_indices = @transform_0, window_bounds = array<i64: 1, 3, 10, 8, 28>}, {pipeline_mode = #tpu.pipeline_mode<synchronous>, transform_indices = @transform_1, window_bounds = array<i64: 3, 3, 1, 28>}, {pipeline_mode = #tpu.pipeline_mode<synchronous>, transform_indices = @transform_2, window_bounds = array<i64: 1, 28>}, {pipeline_mode = #tpu.pipeline_mode<synchronous>, transform_indices = @transform_3, window_bounds = array<i64: 28, 14>}, {pipeline_mode = #tpu.pipeline_mode<synchronous>, transform_indices = @transform_4, window_bounds = array<i64: 1, 14>}, {transform_indices = @transform_5, window_bounds = array<i64: 1, 8, 8, 14>}]} {
    %c0 = arith.constant 0 : index
    %c0_0 = arith.constant 0 : index
    %c0_1 = arith.constant 0 : index
    %c0_2 = arith.constant 0 : index
    %c0_3 = arith.constant 0 : index
    %0 = vector.load %arg1[%c0, %c0_0, %c0_1, %c0_2, %c0_3] : memref<1x3x10x8x28xf32, #tpu.memory_space<vmem>>, vector<1x3x10x8x28xf32>
    %1 = vector.shape_cast %0 : vector<1x3x10x8x28xf32> to vector<3x10x8x28xf32>
    %c0_4 = arith.constant 0 : index
    %c0_5 = arith.constant 0 : index
    %c0_6 = arith.constant 0 : index
    %c0_7 = arith.constant 0 : index
    %2 = vector.load %arg2[%c0_4, %c0_5, %c0_6, %c0_7] : memref<3x3x1x28xf32, #tpu.memory_space<vmem>>, vector<3x3x1x28xf32>
    %3 = vector.extract_strided_slice %1 {offsets = [0, 0, 0, 0], sizes = [1, 8, 8, 28], strides = [1, 1, 1, 1]} : vector<3x10x8x28xf32> to vector<1x8x8x28xf32>
    %4 = vector.shape_cast %3 : vector<1x8x8x28xf32> to vector<8x8x28xf32>
    %5 = vector.extract_strided_slice %2 {offsets = [0, 0, 0, 0], sizes = [1, 1, 1, 28], strides = [1, 1, 1, 1]} : vector<3x3x1x28xf32> to vector<1x1x1x28xf32>
    %6 = vector.shape_cast %5 : vector<1x1x1x28xf32> to vector<1x28xf32>
    %7 = vector.shape_cast %6 : vector<1x28xf32> to vector<1x1x28xf32>
    %8 = vector.broadcast %7 : vector<1x1x28xf32> to vector<8x8x28xf32>
    %9 = arith.mulf %4, %8 : vector<8x8x28xf32>
    %10 = vector.extract_strided_slice %1 {offsets = [1, 0, 0, 0], sizes = [1, 8, 8, 28], strides = [1, 1, 1, 1]} : vector<3x10x8x28xf32> to vector<1x8x8x28xf32>
    %11 = vector.shape_cast %10 : vector<1x8x8x28xf32> to vector<8x8x28xf32>
    %12 = vector.extract_strided_slice %2 {offsets = [0, 1, 0, 0], sizes = [1, 1, 1, 28], strides = [1, 1, 1, 1]} : vector<3x3x1x28xf32> to vector<1x1x1x28xf32>
    %13 = vector.shape_cast %12 : vector<1x1x1x28xf32> to vector<1x28xf32>
    %14 = vector.shape_cast %13 : vector<1x28xf32> to vector<1x1x28xf32>
    %15 = vector.broadcast %14 : vector<1x1x28xf32> to vector<8x8x28xf32>
    %16 = arith.mulf %11, %15 : vector<8x8x28xf32>
    %17 = arith.addf %9, %16 : vector<8x8x28xf32>
    %18 = vector.extract_strided_slice %1 {offsets = [2, 0, 0, 0], sizes = [1, 8, 8, 28], strides = [1, 1, 1, 1]} : vector<3x10x8x28xf32> to vector<1x8x8x28xf32>
    %19 = vector.shape_cast %18 : vector<1x8x8x28xf32> to vector<8x8x28xf32>
    %20 = vector.extract_strided_slice %2 {offsets = [0, 2, 0, 0], sizes = [1, 1, 1, 28], strides = [1, 1, 1, 1]} : vector<3x3x1x28xf32> to vector<1x1x1x28xf32>
    %21 = vector.shape_cast %20 : vector<1x1x1x28xf32> to vector<1x28xf32>
    %22 = vector.shape_cast %21 : vector<1x28xf32> to vector<1x1x28xf32>
    %23 = vector.broadcast %22 : vector<1x1x28xf32> to vector<8x8x28xf32>
    %24 = arith.mulf %19, %23 : vector<8x8x28xf32>
    %25 = arith.addf %17, %24 : vector<8x8x28xf32>
    %26 = vector.extract_strided_slice %1 {offsets = [0, 1, 0, 0], sizes = [1, 8, 8, 28], strides = [1, 1, 1, 1]} : vector<3x10x8x28xf32> to vector<1x8x8x28xf32>
    %27 = vector.shape_cast %26 : vector<1x8x8x28xf32> to vector<8x8x28xf32>
    %28 = vector.extract_strided_slice %2 {offsets = [1, 0, 0, 0], sizes = [1, 1, 1, 28], strides = [1, 1, 1, 1]} : vector<3x3x1x28xf32> to vector<1x1x1x28xf32>
    %29 = vector.shape_cast %28 : vector<1x1x1x28xf32> to vector<1x28xf32>
    %30 = vector.shape_cast %29 : vector<1x28xf32> to vector<1x1x28xf32>
    %31 = vector.broadcast %30 : vector<1x1x28xf32> to vector<8x8x28xf32>
    %32 = arith.mulf %27, %31 : vector<8x8x28xf32>
    %33 = arith.addf %25, %32 : vector<8x8x28xf32>
    %34 = vector.extract_strided_slice %1 {offsets = [1, 1, 0, 0], sizes = [1, 8, 8, 28], strides = [1, 1, 1, 1]} : vector<3x10x8x28xf32> to vector<1x8x8x28xf32>
    %35 = vector.shape_cast %34 : vector<1x8x8x28xf32> to vector<8x8x28xf32>
    %36 = vector.extract_strided_slice %2 {offsets = [1, 1, 0, 0], sizes = [1, 1, 1, 28], strides = [1, 1, 1, 1]} : vector<3x3x1x28xf32> to vector<1x1x1x28xf32>
    %37 = vector.shape_cast %36 : vector<1x1x1x28xf32> to vector<1x28xf32>
    %38 = vector.shape_cast %37 : vector<1x28xf32> to vector<1x1x28xf32>
    %39 = vector.broadcast %38 : vector<1x1x28xf32> to vector<8x8x28xf32>
    %40 = arith.mulf %35, %39 : vector<8x8x28xf32>
    %41 = arith.addf %33, %40 : vector<8x8x28xf32>
    %42 = vector.extract_strided_slice %1 {offsets = [2, 1, 0, 0], sizes = [1, 8, 8, 28], strides = [1, 1, 1, 1]} : vector<3x10x8x28xf32> to vector<1x8x8x28xf32>
    %43 = vector.shape_cast %42 : vector<1x8x8x28xf32> to vector<8x8x28xf32>
    %44 = vector.extract_strided_slice %2 {offsets = [1, 2, 0, 0], sizes = [1, 1, 1, 28], strides = [1, 1, 1, 1]} : vector<3x3x1x28xf32> to vector<1x1x1x28xf32>
    %45 = vector.shape_cast %44 : vector<1x1x1x28xf32> to vector<1x28xf32>
    %46 = vector.shape_cast %45 : vector<1x28xf32> to vector<1x1x28xf32>
    %47 = vector.broadcast %46 : vector<1x1x28xf32> to vector<8x8x28xf32>
    %48 = arith.mulf %43, %47 : vector<8x8x28xf32>
    %49 = arith.addf %41, %48 : vector<8x8x28xf32>
    %50 = vector.extract_strided_slice %1 {offsets = [0, 2, 0, 0], sizes = [1, 8, 8, 28], strides = [1, 1, 1, 1]} : vector<3x10x8x28xf32> to vector<1x8x8x28xf32>
    %51 = vector.shape_cast %50 : vector<1x8x8x28xf32> to vector<8x8x28xf32>
    %52 = vector.extract_strided_slice %2 {offsets = [2, 0, 0, 0], sizes = [1, 1, 1, 28], strides = [1, 1, 1, 1]} : vector<3x3x1x28xf32> to vector<1x1x1x28xf32>
    %53 = vector.shape_cast %52 : vector<1x1x1x28xf32> to vector<1x28xf32>
    %54 = vector.shape_cast %53 : vector<1x28xf32> to vector<1x1x28xf32>
    %55 = vector.broadcast %54 : vector<1x1x28xf32> to vector<8x8x28xf32>
    %56 = arith.mulf %51, %55 : vector<8x8x28xf32>
    %57 = arith.addf %49, %56 : vector<8x8x28xf32>
    %58 = vector.extract_strided_slice %1 {offsets = [1, 2, 0, 0], sizes = [1, 8, 8, 28], strides = [1, 1, 1, 1]} : vector<3x10x8x28xf32> to vector<1x8x8x28xf32>
    %59 = vector.shape_cast %58 : vector<1x8x8x28xf32> to vector<8x8x28xf32>
    %60 = vector.extract_strided_slice %2 {offsets = [2, 1, 0, 0], sizes = [1, 1, 1, 28], strides = [1, 1, 1, 1]} : vector<3x3x1x28xf32> to vector<1x1x1x28xf32>
    %61 = vector.shape_cast %60 : vector<1x1x1x28xf32> to vector<1x28xf32>
    %62 = vector.shape_cast %61 : vector<1x28xf32> to vector<1x1x28xf32>
    %63 = vector.broadcast %62 : vector<1x1x28xf32> to vector<8x8x28xf32>
    %64 = arith.mulf %59, %63 : vector<8x8x28xf32>
    %65 = arith.addf %57, %64 : vector<8x8x28xf32>
    %66 = vector.extract_strided_slice %1 {offsets = [2, 2, 0, 0], sizes = [1, 8, 8, 28], strides = [1, 1, 1, 1]} : vector<3x10x8x28xf32> to vector<1x8x8x28xf32>
    %67 = vector.shape_cast %66 : vector<1x8x8x28xf32> to vector<8x8x28xf32>
    %68 = vector.extract_strided_slice %2 {offsets = [2, 2, 0, 0], sizes = [1, 1, 1, 28], strides = [1, 1, 1, 1]} : vector<3x3x1x28xf32> to vector<1x1x1x28xf32>
    %69 = vector.shape_cast %68 : vector<1x1x1x28xf32> to vector<1x28xf32>
    %70 = vector.shape_cast %69 : vector<1x28xf32> to vector<1x1x28xf32>
    %71 = vector.broadcast %70 : vector<1x1x28xf32> to vector<8x8x28xf32>
    %72 = arith.mulf %67, %71 : vector<8x8x28xf32>
    %73 = arith.addf %65, %72 : vector<8x8x28xf32>
    %c0_8 = arith.constant 0 : index
    %c0_9 = arith.constant 0 : index
    %74 = vector.load %arg3[%c0_8, %c0_9] : memref<1x28xf32, #tpu.memory_space<vmem>>, vector<1x28xf32>
    %75 = vector.shape_cast %74 : vector<1x28xf32> to vector<1x1x28xf32>
    %76 = vector.broadcast %75 : vector<1x1x28xf32> to vector<8x8x28xf32>
    %77 = arith.addf %73, %76 : vector<8x8x28xf32>
    %78 = vector.shape_cast %77 : vector<8x8x28xf32> to vector<64x28xf32>
    %79 = arith.truncf %78 : vector<64x28xf32> to vector<64x28xbf16>
    %c0_10 = arith.constant 0 : index
    %c0_11 = arith.constant 0 : index
    %80 = vector.load %arg4[%c0_10, %c0_11] : memref<28x14xf32, #tpu.memory_space<vmem>>, vector<28x14xf32>
    %81 = arith.truncf %80 : vector<28x14xf32> to vector<28x14xbf16>
    %cst = arith.constant dense<0.000000e+00> : vector<64x14xf32>
    %82 = tpu.matmul %79, %81, %cst {dimension_numbers = #tpu.dot_dimension_numbers<[1], [0], [0], [1], [0, 0, 1, 1], [], []>} : vector<64x28xbf16>, vector<28x14xbf16>, vector<64x14xf32> -> vector<64x14xf32>
    %c0_12 = arith.constant 0 : index
    %c0_13 = arith.constant 0 : index
    %83 = vector.load %arg5[%c0_12, %c0_13] : memref<1x14xf32, #tpu.memory_space<vmem>>, vector<1x14xf32>
    %84 = vector.broadcast %83 : vector<1x14xf32> to vector<64x14xf32>
    %85 = arith.addf %82, %84 : vector<64x14xf32>
    %86 = vector.shape_cast %85 : vector<64x14xf32> to vector<8x8x14xf32>
    %c0_14 = arith.constant 0 : index
    %c0_15 = arith.constant 0 : index
    %c0_16 = arith.constant 0 : index
    %c0_17 = arith.constant 0 : index
    %87 = vector.load %arg6[%c0_14, %c0_15, %c0_16, %c0_17] : memref<1x8x8x14xf32, #tpu.memory_space<vmem>>, vector<1x8x8x14xf32>
    %88 = vector.shape_cast %87 : vector<1x8x8x14xf32> to vector<8x8x14xf32>
    %89 = vector.shape_cast %86 : vector<8x8x14xf32> to vector<1x8x8x14xf32>
    tpu.vector_store %arg6[%c0_14, %c0_15, %c0_16, %c0_17], %89 {strides = array<i32>} : memref<1x8x8x14xf32, #tpu.memory_space<vmem>>, vector<1x8x8x14xf32>,
    return
  }
  func.func @transform_0(%arg0: i32) -> (i32, i32, i32, i32, i32) {
    %c0_i32 = arith.constant 0 : i32
    %c0_i32_0 = arith.constant 0 : i32
    %c0_i32_1 = arith.constant 0 : i32
    %c0_i32_2 = arith.constant 0 : i32
    %c0_i32_3 = arith.constant 0 : i32
    return %arg0, %c0_i32, %c0_i32_0, %c0_i32_1, %c0_i32_2 : i32, i32, i32, i32, i32
  }
  func.func @transform_1(%arg0: i32) -> (i32, i32, i32, i32) {
    %c0_i32 = arith.constant 0 : i32
    %c0_i32_0 = arith.constant 0 : i32
    %c0_i32_1 = arith.constant 0 : i32
    %c0_i32_2 = arith.constant 0 : i32
    %c0_i32_3 = arith.constant 0 : i32
    return %c0_i32, %c0_i32_0, %c0_i32_1, %c0_i32_2 : i32, i32, i32, i32
  }
  func.func @transform_2(%arg0: i32) -> (i32, i32) {
    %c0_i32 = arith.constant 0 : i32
    %c0_i32_0 = arith.constant 0 : i32
    %c0_i32_1 = arith.constant 0 : i32
    return %c0_i32, %c0_i32_0 : i32, i32
  }
  func.func @transform_3(%arg0: i32) -> (i32, i32) {
    %c0_i32 = arith.constant 0 : i32
    %c0_i32_0 = arith.constant 0 : i32
    %c0_i32_1 = arith.constant 0 : i32
    return %c0_i32, %c0_i32_0 : i32, i32
  }
  func.func @transform_4(%arg0: i32) -> (i32, i32) {
    %c0_i32 = arith.constant 0 : i32
    %c0_i32_0 = arith.constant 0 : i32
    %c0_i32_1 = arith.constant 0 : i32
    return %c0_i32, %c0_i32_0 : i32, i32
  }
  func.func @transform_5(%arg0: i32) -> (i32, i32, i32, i32) {
    %c0_i32 = arith.constant 0 : i32
    %c0_i32_0 = arith.constant 0 : i32
    %c0_i32_1 = arith.constant 0 : i32
    %c0_i32_2 = arith.constant 0 : i32
    return %arg0, %c0_i32, %c0_i32_0, %c0_i32_1 : i32, i32, i32, i32
  }
}

module attributes {stable_mosaic.version = 11 : i64} {
  func.func @_gate_linear_kernel(%arg0: i32, %arg1: i32, %arg2: memref<1x32x28xf32, #tpu.memory_space<vmem>>, %arg3: memref<1x1x28xf32, #tpu.memory_space<vmem>>, %arg4: memref<28x14xf32, #tpu.memory_space<vmem>>, %arg5: memref<1x14xf32, #tpu.memory_space<vmem>>, %arg6: memref<1x32x14xf32, #tpu.memory_space<vmem>>) attributes {dimension_semantics = [#tpu.dimension_semantics<parallel>, #tpu.dimension_semantics<parallel>], iteration_bounds = array<i64: 2, 2>, scalar_prefetch = 0 : i64, scratch_operands = 0 : i64, tpu.core_type = #tpu.core_type<tc>, window_params = [{transform_indices = @transform_0, window_bounds = array<i64: 1, 32, 28>}, {transform_indices = @transform_1, window_bounds = array<i64: 1, 1, 28>}, {pipeline_mode = #tpu.pipeline_mode<synchronous>, transform_indices = @transform_2, window_bounds = array<i64: 28, 14>}, {pipeline_mode = #tpu.pipeline_mode<synchronous>, transform_indices = @transform_3, window_bounds = array<i64: 1, 14>}, {transform_indices = @transform_4, window_bounds = array<i64: 1, 32, 14>}]} {
    %c0 = arith.constant 0 : index
    %c0_0 = arith.constant 0 : index
    %c0_1 = arith.constant 0 : index
    %0 = vector.load %arg2[%c0, %c0_0, %c0_1] : memref<1x32x28xf32, #tpu.memory_space<vmem>>, vector<1x32x28xf32>
    %1 = vector.shape_cast %0 : vector<1x32x28xf32> to vector<32x28xf32>
    %c0_2 = arith.constant 0 : index
    %c0_3 = arith.constant 0 : index
    %c0_4 = arith.constant 0 : index
    %2 = vector.load %arg3[%c0_2, %c0_3, %c0_4] : memref<1x1x28xf32, #tpu.memory_space<vmem>>, vector<1x1x28xf32>
    %3 = vector.shape_cast %2 : vector<1x1x28xf32> to vector<1x28xf32>
    %4 = vector.broadcast %3 : vector<1x28xf32> to vector<32x28xf32>
    %5 = arith.mulf %1, %4 : vector<32x28xf32>
    %6 = arith.truncf %5 : vector<32x28xf32> to vector<32x28xbf16>
    %c0_5 = arith.constant 0 : index
    %c0_6 = arith.constant 0 : index
    %7 = vector.load %arg4[%c0_5, %c0_6] : memref<28x14xf32, #tpu.memory_space<vmem>>, vector<28x14xf32>
    %8 = arith.truncf %7 : vector<28x14xf32> to vector<28x14xbf16>
    %cst = arith.constant dense<0.000000e+00> : vector<32x14xf32>
    %9 = tpu.matmul %6, %8, %cst {dimension_numbers = #tpu.dot_dimension_numbers<[1], [0], [0], [1], [0, 0, 1, 1], [], []>} : vector<32x28xbf16>, vector<28x14xbf16>, vector<32x14xf32> -> vector<32x14xf32>
    %c0_7 = arith.constant 0 : index
    %c0_8 = arith.constant 0 : index
    %10 = vector.load %arg5[%c0_7, %c0_8] : memref<1x14xf32, #tpu.memory_space<vmem>>, vector<1x14xf32>
    %11 = vector.broadcast %10 : vector<1x14xf32> to vector<32x14xf32>
    %12 = arith.addf %9, %11 : vector<32x14xf32>
    %c0_9 = arith.constant 0 : index
    %c0_10 = arith.constant 0 : index
    %c0_11 = arith.constant 0 : index
    %13 = vector.load %arg6[%c0_9, %c0_10, %c0_11] : memref<1x32x14xf32, #tpu.memory_space<vmem>>, vector<1x32x14xf32>
    %14 = vector.shape_cast %13 : vector<1x32x14xf32> to vector<32x14xf32>
    %15 = vector.shape_cast %12 : vector<32x14xf32> to vector<1x32x14xf32>
    tpu.vector_store %arg6[%c0_9, %c0_10, %c0_11], %15 {strides = array<i32>} : memref<1x32x14xf32, #tpu.memory_space<vmem>>, vector<1x32x14xf32>,
    return
  }
  func.func @transform_0(%arg0: i32, %arg1: i32) -> (i32, i32, i32) {
    %c0_i32 = arith.constant 0 : i32
    %c0_i32_0 = arith.constant 0 : i32
    return %arg0, %arg1, %c0_i32 : i32, i32, i32
  }
  func.func @transform_1(%arg0: i32, %arg1: i32) -> (i32, i32, i32) {
    %c0_i32 = arith.constant 0 : i32
    %c0_i32_0 = arith.constant 0 : i32
    %c0_i32_1 = arith.constant 0 : i32
    return %arg0, %c0_i32, %c0_i32_0 : i32, i32, i32
  }
  func.func @transform_2(%arg0: i32, %arg1: i32) -> (i32, i32) {
    %c0_i32 = arith.constant 0 : i32
    %c0_i32_0 = arith.constant 0 : i32
    %c0_i32_1 = arith.constant 0 : i32
    return %c0_i32, %c0_i32_0 : i32, i32
  }
  func.func @transform_3(%arg0: i32, %arg1: i32) -> (i32, i32) {
    %c0_i32 = arith.constant 0 : i32
    %c0_i32_0 = arith.constant 0 : i32
    %c0_i32_1 = arith.constant 0 : i32
    return %c0_i32, %c0_i32_0 : i32, i32
  }
  func.func @transform_4(%arg0: i32, %arg1: i32) -> (i32, i32, i32) {
    %c0_i32 = arith.constant 0 : i32
    %c0_i32_0 = arith.constant 0 : i32
    return %arg0, %arg1, %c0_i32 : i32, i32, i32
  }
}

module attributes {stable_mosaic.version = 11 : i64} {
  func.func @_ci_gate_kernel(%arg0: i32, %arg1: memref<2x28xf32, #tpu.memory_space<vmem>>, %arg2: memref<28x7xf32, #tpu.memory_space<vmem>>, %arg3: memref<1x7xf32, #tpu.memory_space<vmem>>, %arg4: memref<7x28xf32, #tpu.memory_space<vmem>>, %arg5: memref<1x28xf32, #tpu.memory_space<vmem>>, %arg6: memref<2x28xf32, #tpu.memory_space<vmem>>) attributes {dimension_semantics = [#tpu.dimension_semantics<arbitrary>], iteration_bounds = array<i64: 1>, scalar_prefetch = 0 : i64, scratch_operands = 0 : i64, tpu.core_type = #tpu.core_type<tc>, window_params = [{pipeline_mode = #tpu.pipeline_mode<synchronous>, transform_indices = @transform_0, window_bounds = array<i64: 2, 28>}, {pipeline_mode = #tpu.pipeline_mode<synchronous>, transform_indices = @transform_1, window_bounds = array<i64: 28, 7>}, {pipeline_mode = #tpu.pipeline_mode<synchronous>, transform_indices = @transform_2, window_bounds = array<i64: 1, 7>}, {pipeline_mode = #tpu.pipeline_mode<synchronous>, transform_indices = @transform_3, window_bounds = array<i64: 7, 28>}, {pipeline_mode = #tpu.pipeline_mode<synchronous>, transform_indices = @transform_4, window_bounds = array<i64: 1, 28>}, {pipeline_mode = #tpu.pipeline_mode<synchronous>, transform_indices = @transform_5, window_bounds = array<i64: 2, 28>}]} {
    %c0 = arith.constant 0 : index
    %c0_0 = arith.constant 0 : index
    %0 = vector.load %arg1[%c0, %c0_0] : memref<2x28xf32, #tpu.memory_space<vmem>>, vector<2x28xf32>
    %1 = arith.truncf %0 : vector<2x28xf32> to vector<2x28xbf16>
    %c0_1 = arith.constant 0 : index
    %c0_2 = arith.constant 0 : index
    %2 = vector.load %arg2[%c0_1, %c0_2] : memref<28x7xf32, #tpu.memory_space<vmem>>, vector<28x7xf32>
    %3 = arith.truncf %2 : vector<28x7xf32> to vector<28x7xbf16>
    %cst = arith.constant dense<0.000000e+00> : vector<2x7xf32>
    %4 = tpu.matmul %1, %3, %cst {dimension_numbers = #tpu.dot_dimension_numbers<[1], [0], [0], [1], [0, 0, 1, 1], [], []>} : vector<2x28xbf16>, vector<28x7xbf16>, vector<2x7xf32> -> vector<2x7xf32>
    %c0_3 = arith.constant 0 : index
    %c0_4 = arith.constant 0 : index
    %5 = vector.load %arg3[%c0_3, %c0_4] : memref<1x7xf32, #tpu.memory_space<vmem>>, vector<1x7xf32>
    %6 = vector.broadcast %5 : vector<1x7xf32> to vector<2x7xf32>
    %7 = arith.addf %4, %6 : vector<2x7xf32>
    %cst_5 = arith.constant 5.000000e-01 : f32
    %8 = vector.broadcast %cst_5 : f32 to vector<2x7xf32>
    %9 = arith.mulf %8, %7 : vector<2x7xf32>
    %cst_6 = arith.constant 0.707106769 : f32
    %10 = vector.broadcast %cst_6 : f32 to vector<2x7xf32>
    %11 = arith.mulf %7, %10 : vector<2x7xf32>
    %cst_7 = arith.constant 0.000000e+00 : f32
    %12 = vector.broadcast %cst_7 : f32 to vector<2x7xf32>
    %13 = arith.cmpf oge, %11, %12 : vector<2x7xf32>
    %cst_8 = arith.constant 1.000000e+00 : f32
    %cst_9 = arith.constant -1.000000e+00 : f32
    %14 = vector.broadcast %cst_8 : f32 to vector<2x7xf32>
    %15 = vector.broadcast %cst_9 : f32 to vector<2x7xf32>
    %16 = arith.select %13, %14, %15 : vector<2x7xi1>, vector<2x7xf32>
    %17 = math.absf %11 : vector<2x7xf32>
    %cst_10 = arith.constant 0.327591091 : f32
    %18 = vector.broadcast %cst_10 : f32 to vector<2x7xf32>
    %19 = arith.mulf %18, %17 : vector<2x7xf32>
    %cst_11 = arith.constant 1.000000e+00 : f32
    %20 = vector.broadcast %cst_11 : f32 to vector<2x7xf32>
    %21 = arith.addf %20, %19 : vector<2x7xf32>
    %cst_12 = arith.constant 1.000000e+00 : f32
    %22 = vector.broadcast %cst_12 : f32 to vector<2x7xf32>
    %23 = arith.divf %22, %21 : vector<2x7xf32>
    %cst_13 = arith.constant 1.06140542 : f32
    %24 = vector.broadcast %cst_13 : f32 to vector<2x7xf32>
    %25 = arith.mulf %24, %23 : vector<2x7xf32>
    %cst_14 = arith.constant -1.45315206 : f32
    %26 = vector.broadcast %cst_14 : f32 to vector<2x7xf32>
    %27 = arith.addf %25, %26 : vector<2x7xf32>
    %28 = arith.mulf %27, %23 : vector<2x7xf32>
    %cst_15 = arith.constant 1.42141378 : f32
    %29 = vector.broadcast %cst_15 : f32 to vector<2x7xf32>
    %30 = arith.addf %28, %29 : vector<2x7xf32>
    %31 = arith.mulf %30, %23 : vector<2x7xf32>
    %cst_16 = arith.constant -0.284496725 : f32
    %32 = vector.broadcast %cst_16 : f32 to vector<2x7xf32>
    %33 = arith.addf %31, %32 : vector<2x7xf32>
    %34 = arith.mulf %33, %23 : vector<2x7xf32>
    %cst_17 = arith.constant 0.254829586 : f32
    %35 = vector.broadcast %cst_17 : f32 to vector<2x7xf32>
    %36 = arith.addf %34, %35 : vector<2x7xf32>
    %37 = arith.mulf %36, %23 : vector<2x7xf32>
    %cst_18 = arith.constant 0.000000e+00 : f32
    %38 = vector.broadcast %cst_18 : f32 to vector<2x7xf32>
    %39 = arith.subf %38, %17 : vector<2x7xf32>
    %40 = arith.mulf %39, %17 : vector<2x7xf32>
    %41 = math.exp %40 : vector<2x7xf32>
    %42 = arith.mulf %37, %41 : vector<2x7xf32>
    %cst_19 = arith.constant 1.000000e+00 : f32
    %43 = vector.broadcast %cst_19 : f32 to vector<2x7xf32>
    %44 = arith.subf %43, %42 : vector<2x7xf32>
    %45 = arith.mulf %16, %44 : vector<2x7xf32>
    %cst_20 = arith.constant 1.000000e+00 : f32
    %46 = vector.broadcast %cst_20 : f32 to vector<2x7xf32>
    %47 = arith.addf %46, %45 : vector<2x7xf32>
    %48 = arith.mulf %9, %47 : vector<2x7xf32>
    %49 = arith.truncf %48 : vector<2x7xf32> to vector<2x7xbf16>
    %c0_21 = arith.constant 0 : index
    %c0_22 = arith.constant 0 : index
    %50 = vector.load %arg4[%c0_21, %c0_22] : memref<7x28xf32, #tpu.memory_space<vmem>>, vector<7x28xf32>
    %51 = arith.truncf %50 : vector<7x28xf32> to vector<7x28xbf16>
    %cst_23 = arith.constant dense<0.000000e+00> : vector<2x28xf32>
    %52 = tpu.matmul %49, %51, %cst_23 {dimension_numbers = #tpu.dot_dimension_numbers<[1], [0], [0], [1], [0, 0, 1, 1], [], []>} : vector<2x7xbf16>, vector<7x28xbf16>, vector<2x28xf32> -> vector<2x28xf32>
    %c0_24 = arith.constant 0 : index
    %c0_25 = arith.constant 0 : index
    %53 = vector.load %arg5[%c0_24, %c0_25] : memref<1x28xf32, #tpu.memory_space<vmem>>, vector<1x28xf32>
    %54 = vector.broadcast %53 : vector<1x28xf32> to vector<2x28xf32>
    %55 = arith.addf %52, %54 : vector<2x28xf32>
    %cst_26 = arith.constant 0.000000e+00 : f32
    %56 = vector.broadcast %cst_26 : f32 to vector<2x28xf32>
    %57 = arith.subf %56, %55 : vector<2x28xf32>
    %58 = math.exp %57 : vector<2x28xf32>
    %cst_27 = arith.constant 1.000000e+00 : f32
    %59 = vector.broadcast %cst_27 : f32 to vector<2x28xf32>
    %60 = arith.addf %59, %58 : vector<2x28xf32>
    %cst_28 = arith.constant 1.000000e+00 : f32
    %61 = vector.broadcast %cst_28 : f32 to vector<2x28xf32>
    %62 = arith.divf %61, %60 : vector<2x28xf32>
    %c0_29 = arith.constant 0 : index
    %c0_30 = arith.constant 0 : index
    %63 = vector.load %arg6[%c0_29, %c0_30] : memref<2x28xf32, #tpu.memory_space<vmem>>, vector<2x28xf32>
    tpu.vector_store %arg6[%c0_29, %c0_30], %62 {strides = array<i32>} : memref<2x28xf32, #tpu.memory_space<vmem>>, vector<2x28xf32>,
    return
  }
  func.func @transform_0(%arg0: i32) -> (i32, i32) {
    %c0_i32 = arith.constant 0 : i32
    %c0_i32_0 = arith.constant 0 : i32
    %c0_i32_1 = arith.constant 0 : i32
    return %c0_i32, %c0_i32_0 : i32, i32
  }
  func.func @transform_1(%arg0: i32) -> (i32, i32) {
    %c0_i32 = arith.constant 0 : i32
    %c0_i32_0 = arith.constant 0 : i32
    %c0_i32_1 = arith.constant 0 : i32
    return %c0_i32, %c0_i32_0 : i32, i32
  }
  func.func @transform_2(%arg0: i32) -> (i32, i32) {
    %c0_i32 = arith.constant 0 : i32
    %c0_i32_0 = arith.constant 0 : i32
    %c0_i32_1 = arith.constant 0 : i32
    return %c0_i32, %c0_i32_0 : i32, i32
  }
  func.func @transform_3(%arg0: i32) -> (i32, i32) {
    %c0_i32 = arith.constant 0 : i32
    %c0_i32_0 = arith.constant 0 : i32
    %c0_i32_1 = arith.constant 0 : i32
    return %c0_i32, %c0_i32_0 : i32, i32
  }
  func.func @transform_4(%arg0: i32) -> (i32, i32) {
    %c0_i32 = arith.constant 0 : i32
    %c0_i32_0 = arith.constant 0 : i32
    %c0_i32_1 = arith.constant 0 : i32
    return %c0_i32, %c0_i32_0 : i32, i32
  }
  func.func @transform_5(%arg0: i32) -> (i32, i32) {
    %c0_i32 = arith.constant 0 : i32
    %c0_i32_0 = arith.constant 0 : i32
    %c0_i32_1 = arith.constant 0 : i32
    return %c0_i32, %c0_i32_0 : i32, i32
  }
}

</mosaic_0001>

<bundles_post_ra>
// kernel: _lambda_.16
= control target key start
LH: loop header
LB: loop body
LE: loop exit
PB: predicated region body
PF: predicated region fallthrough
CT: control target
= control target key end

     0   :  { %s423_s12 = smov 0   ;;  %s470_s0 = inlined_call_operand.vmem [shape: f32[128,28], index: 0, kind: input, shape index: {}]   ;;  %s471_s1 = inlined_call_operand.vmem [shape: f32[28,84], index: 1, kind: input, shape index: {}]   ;;  %s472_s2 = inlined_call_operand.vmem [shape: f32[1,84], index: 2, kind: input, shape index: {}]   ;;  %s473_s3 = inlined_call_operand.vmem [shape: f32[128,84], index: 3, kind: output, shape index: {}]  }
   0x1 LB: > { %s347_s13 = sadd.s32 4294967295, %s401_s12   ;;  %p351_p0 = scmp.ge.s32.totalorder %s401_s12, 1  ;;  %s401_s12 = sphi %s423_s12, %s13_s12  }
   0x2   : > { %p138_p1 = scmp.lt.s32.totalorder %s401_s12, 3 }
   0x4   : > { %p139_p2 = pnand %p351_p0, %p138_p1 }
   0x5   : > { %v187_v0 = vld [vmem:[%s471_s1] sm:$0xff] (!%p139_p2)  ;;  %v188_v1 = vld [vmem:[%s471_s1 + $0x8] sm:$0xff] (!%p139_p2)  ;;  %v189_v2 = vld [vmem:[%s471_s1 + $0x10] sm:$0xff] (!%p139_p2)  ;;  %s352_s20 = sshll.u32 (!%p139_p2), %s347_s13, 3  ;;  %vm213_vm0 = vcmask (!%p139_p2), 1045504   ;;  %vm200_vm1 = vcmask (!%p139_p2), 228352  }
   0x6   : > { %142 = sbr.rel (%p139_p2) target bundleno = 239 (0xef), region = 32  ;;  %v191_v3 = vpack.c.bf16 (!%p139_p2), %v188_v1, %v187_v0  ;;  %v190_v4 = vld [vmem:[%s471_s1 + $0x18] sm:$0xf] (!%p139_p2)  ;;  %p163_p3 = scmp.lt.s32.totalorder (!%p139_p2), %s352_s20, 15  ;;  %v356_v19 = vld [vmem:[%s472_s2] ss:$0 sm:$0xff] (!%p139_p2) }
   0x7   : > { %v192_v5 = vpack.c.bf16 (!%p139_p2), %v190_v4, %v189_v2  ;;  %vm282_vm2 = vcmask (!%p139_p2), 687104  }
   0x8   : > { %369 = vmatprep.subr.bf16.mxu0 (!%p139_p2), %v191_v3  ;;  %381 = vmatprep.subr.bf16.mxu1 (!%p139_p2), %v191_v3 }
   0x9   : > { %370 = vmatpush3.bf16.msra.mxu0 (!%p139_p2), %v191_v3  ;;  %383 = vmatpush3.bf16.msra.mxu1 (!%p139_p2), %v191_v3  ;;  %v215_v6 = vsel (!%p139_p2), %vm213_vm0, %v192_v5, 0 }
   0xa   : > { %385 = vmatprep.subr.msk.bf16.mxu0 (!%p139_p2), %vm213_vm0, %v192_v5  ;;  %386 = vmatprep.subr.msk.bf16.mxu1 (!%p139_p2), %vm213_vm0, %v192_v5 }
   0xd   : > { %s475_s20 = smov (!%p163_p3, %s352_s20), 15  ;;  %372 = vmatpush3.bf16.msra.mxu0 %v215_v6  ;;  %384 = vmatpush3.bf16.msra.mxu1 %v215_v6 }
   0xe   : > { %s353_s23 = sshll.u32 %s475_s20, 3 }
   0xf   : > { %s166_s26 = scalar_lea.vmem %s470_s0, %s353_s23  ;;  %s172_s4 = scalar_lea.vmem %s473_s3, %s353_s23 }
  0x10   : > { %v175_v7 = vld [vmem:[%s166_s26] sm:$0xff]  ;;  %v176_v8 = vld [vmem:[%s166_s26 + $0x8] sm:$0xff]  ;;  %v177_v12 = vld [vmem:[%s166_s26 + $0x10] sm:$0xff] }
  0x11   : > { %v179_v9 = vld [vmem:[%s166_s26 + $0x20] sm:$0xff]  ;;  %v183_v10 = vpack.c.bf16 %v176_v8, %v175_v7  ;;  %v180_v11 = vld [vmem:[%s166_s26 + $0x28] sm:$0xff]  ;;  %v178_v13 = vld [vmem:[%s166_s26 + $0x18] sm:$0xff] }
  0x12   : > { %v185_v14 = vpack.c.bf16 %v180_v11, %v179_v9  ;;  %v184_v15 = vpack.c.bf16 %v178_v13, %v177_v12  ;;  %v181_v16 = vld [vmem:[%s166_s26 + $0x30] sm:$0xff]  ;;  %v182_v17 = vld [vmem:[%s166_s26 + $0x38] sm:$0xff] }
  0x13   : > { %373 = vmatprep.mubr.msk.bf16.mxu0 %vm200_vm1, %v183_v10  ;;  %v186_v18 = vpack.c.bf16 %v182_v17, %v181_v16 }
  0x14   : > { %377 = vmatprep.mubr.msk.bf16.mxu1 %vm200_vm1, %v185_v14  ;;  %374 = vmatmul.mubr.msk.bf16.vlgmr.msra.gmra.mrb[0].mxu0 %vm200_vm1, %v184_v15 }
  0x15   : > { %378 = vmatmul.mubr.msk.bf16.vlgmr.msra.gmra.mrb[0].mxu1 %vm200_vm1, %v186_v18 }
  0xe7   : > { %v375_v20 = vpop.f32.mrb[0].mxu0 }
  0xe8   : > { %v260_v21 = vadd.f32 %v375_v20, %v356_v19  ;;  %v379_v22 = vpop.f32.mrb[0].mxu1  ;;  %v251_v23 = vpop.f32.mrb[1].mxu0 }
  0xe9   : > { %v276_v24 = vadd.f32 %v379_v22, %v356_v19  ;;  %v252_v25 = vadd.f32 %v356_v19, %v251_v23  ;;  %v267_v26 = vpop.f32.mrb[1].mxu1  ;;  %v376_v27 = vpop.f32.mrb[2].mxu0 }
  0xea   : > { %285 = vst.msk [vmem:[%s172_s4 + $0x10] sm:$0xff] %vm282_vm2, %v260_v21  ;;  %v268_v28 = vadd.f32 %v356_v19, %v267_v26  ;;  %v263_v29 = vadd.f32 %v376_v27, %v356_v19  ;;  %v380_v30 = vpop.f32.mrb[2].mxu1  ;;  %v254_v31 = vpop.f32.mrb[3].mxu0 }
  0xeb   : > { %289 = vst.msk [vmem:[%s172_s4 + $0x30] sm:$0xff] %vm282_vm2, %v276_v24  ;;  %283 = vst.msk [vmem:[%s172_s4] sm:$0xff] %vm282_vm2, %v252_v25  ;;  %v279_v32 = vadd.f32 %v380_v30, %v356_v19  ;;  %v255_v33 = vadd.f32 %v356_v19, %v254_v31  ;;  %v270_v34 = vpop.f32.mrb[3].mxu1 }
  0xec   : > { %287 = vst.msk [vmem:[%s172_s4 + $0x20] sm:$0xff] %vm282_vm2, %v268_v28  ;;  %286 = vst.msk [vmem:[%s172_s4 + $0x18] sm:$0xff] %vm282_vm2, %v263_v29  ;;  %v271_v35 = vadd.f32 %v356_v19, %v270_v34 }
  0xed   : > { %290 = vst.msk [vmem:[%s172_s4 + $0x38] sm:$0xff] %vm282_vm2, %v279_v32  ;;  %284 = vst.msk [vmem:[%s172_s4 + $0x8] sm:$0xff] %vm282_vm2, %v255_v33 }
  0xee   : > { %288 = vst.msk [vmem:[%s172_s4 + $0x28] sm:$0xff] %vm282_vm2, %v271_v35 }
  0xef PF: > { %s13_s12 = sadd.s32 1, %s401_s12  }
  0xf0   : > { %p10_p4 = scmp.ge.s32.totalorder %s13_s12, 4  }
  0xf2   :  { %12 = sbr.rel (!%p10_p4) target bundleno = 1 (0x1), region = 62 }

// kernel: _lambda_.15
= control target key start
LH: loop header
LB: loop body
LE: loop exit
PB: predicated region body
PF: predicated region fallthrough
CT: control target
= control target key end

     0   :  { %10 = vsyncpa [#allocation3], 0  ;;  %s716_s18 = smov 0   ;;  %s872_s0 = inlined_call_operand.vmem [shape: f32[128,28], index: 0, kind: input, shape index: {}]   ;;  %s873_s1 = inlined_call_operand.hbm [shape: f32[28,28], index: 1, kind: input, shape index: {}]   ;;  %s874_s2 = inlined_call_operand.vmem [shape: f32[1,28], index: 2, kind: input, shape index: {}]   ;;  %s875_s3 = inlined_call_operand.vmem [shape: f32[1,28], index: 3, kind: input, shape index: {}]   ;;  %s876_s4 = inlined_call_operand.vmem [shape: f32[1,28], index: 4, kind: input, shape index: {}]   ;;  %s877_s5 = inlined_call_operand.vmem [shape: f32[128,28], index: 5, kind: output, shape index: {}]  }
   0x1 LB: > { %s562_s19 = sadd.s32 4294967295, %s681_s18   ;;  %p564_p0 = scmp.ge.s32.totalorder %s681_s18, 1  ;;  %s681_s18 = sphi %s716_s18, %s16_s18  }
   0x2   : > { %p157_p1 = scmp.lt.s32.totalorder %s681_s18, 3  ;;  %s683_s20 = smov [#allocation2]  }
   0x3   : > { %s169_s21 = sshll.u32 %s683_s20, 4  ;;  %p730_p3 = scmp.eq.s32.totalorder %s562_s19, 0  ;;  %s170_s21 = int_to_ptr.vmem [resolvable:$true] %s169_s21 }
   0x4   : > { %p724_p2 = pnand %p564_p0, %p157_p1  ;;  %s643_s27 = scalar_lea.hbm %s873_s1, 512 }
   0x5   : > { %s882_s23 = scalar_select %p730_p3, 1, 0 }
   0x6   : > { %s881_s22 = scalar_select %p724_p2, 1, 0 }
   0x7   : > { %p610_p4 = pneg %p724_p2  ;;  %p644_p6 = scmp.ne.s32.totalorder %s873_s1, %s643_s27 }
   0x8   : > { %p650_p10 = scmp.lt.u32.totalorder %s643_s27, %s873_s1 }
   0x9   : > { %p738_p5 = pnand %p730_p3, %p610_p4 }
   0xb   : > { %p645_p7 = pneg %p738_p5 }
   0xd   : > { %p646_p8 = pnand %p645_p7, %p644_p6 }
   0xf   : > { %p647_p9 = pneg %p646_p8 }
  0x11   : > { %p652_p11 = pnand %p650_p10, %p647_p9 }
  0x13   : > { %655 = shalt.err (!%p652_p11)
}
  0x14   : > { %s656_s7 = scalar_lea.vmem %s170_s21, 512  ;;  %p664_p1 = scmp.lt.s32.totalorder %s170_s21, %s170_s21 }
  0x15   : > { %p657_p12 = scmp.ne.s32.totalorder %s170_s21, %s656_s7  ;;  %p665_p4 = scmp.lt.s32.totalorder %s656_s7, %s656_s7 }
  0x17   : > { %p659_p13 = pnand %p657_p12, %p645_p7  ;;  %p666_p3 = por %p665_p4, %p664_p1 }
  0x19   : > { %p660_p0 = pneg %p659_p13 }
  0x1b   : > { %p667_p2 = pnand %p666_p3, %p660_p0 }
  0x1d   : > { %670 = shalt.err (!%p667_p2)
}
  0x1e   : > { %s684_s8 = smov 128   ;;  %s685_s9 = smov 8  }
  0x1f   : > { %613 = dma.hbm_to_vmem [thread:$0]  (!%p738_p5), %s873_s1, 512, %s170_s21, [#allocation3], %s684_s8, %s684_s8, %s685_s9  }
  0x20   : > { %p884_p6 = scmp.ne.s32.totalorder %s881_s22, 0 }
  0x21   : > { %p885_p8 = scmp.ne.s32.totalorder (!%p884_p6), %s882_s23, 0 }
  0x22   : > { %203 = sbr.rel (%p884_p6) target bundleno = 598 (0x256), region = 40 }
  0x29   : > { %676 = dma.done.wait (%p885_p8), [#allocation3], 512  }
  0x2a   : > { %678 = vsyncadd (%p885_p8), [#allocation3], 4294966784  ;;  %s569_s12 = sshll.u32 %s562_s19, 3  ;;  %v256_v0 = vld [vmem:[#allocation2] sm:$0xff]  ;;  %v257_v1 = vld [vmem:[#allocation2 + $0x8] sm:$0xff]  ;;  %vm282_vm0 = vcmask 1045504  }
  0x2b   : > { %p232_p2 = scmp.lt.s32.totalorder %s569_s12, 15  ;;  %v258_v2 = vld [vmem:[#allocation2 + $0x10] sm:$0xff]  ;;  %v260_v3 = vpack.c.bf16 %v257_v1, %v256_v0  ;;  %v259_v4 = vld [vmem:[#allocation2 + $0x18] sm:$0xf]  ;;  %vm269_vm1 = vcmask 228352  }
  0x2c   : > { %v261_v7 = vpack.c.bf16 %v259_v4, %v258_v2  ;;  %v573_v19 = vld [vmem:[%s874_s2] ss:$0 sm:$0xff] }
  0x2d   : > { %s887_s12 = smov (!%p232_p2, %s569_s12), 15  ;;  %588 = vmatprep.subr.bf16.mxu0 %v260_v3  ;;  %600 = vmatprep.subr.bf16.mxu1 %v260_v3 }
  0x2e   : > { %s570_s13 = sshll.u32 %s887_s12, 3  ;;  %589 = vmatpush3.bf16.msra.mxu0 %v260_v3  ;;  %602 = vmatpush3.bf16.msra.mxu1 %v260_v3  ;;  %v284_v16 = vsel %vm282_vm0, %v261_v7, 0 }
  0x2f   : > { %s235_s16 = scalar_lea.vmem %s872_s0, %s570_s13  ;;  %604 = vmatprep.subr.msk.bf16.mxu0 %vm282_vm0, %v261_v7  ;;  %605 = vmatprep.subr.msk.bf16.mxu1 %vm282_vm0, %v261_v7  ;;  %s844_s26 = scalar_lea.vmem %s877_s5, %s570_s13 }
  0x30   : > { %v244_v5 = vld [vmem:[%s235_s16] sm:$0xff]  ;;  %v245_v6 = vld [vmem:[%s235_s16 + $0x8] sm:$0xff]  ;;  %v246_v10 = vld [vmem:[%s235_s16 + $0x10] sm:$0xff] }
  0x31   : > { %v252_v8 = vpack.c.bf16 %v245_v6, %v244_v5  ;;  %v248_v9 = vld [vmem:[%s235_s16 + $0x20] sm:$0xff]  ;;  %v249_v11 = vld [vmem:[%s235_s16 + $0x28] sm:$0xff]  ;;  %v247_v12 = vld [vmem:[%s235_s16 + $0x18] sm:$0xff] }
  0x32   : > { %v254_v13 = vpack.c.bf16 %v249_v11, %v248_v9  ;;  %v250_v14 = vld [vmem:[%s235_s16 + $0x30] sm:$0xff]  ;;  %v251_v15 = vld [vmem:[%s235_s16 + $0x38] sm:$0xff]  ;;  %v253_v17 = vpack.c.bf16 %v247_v12, %v246_v10  ;;  %591 = vmatpush3.bf16.msra.mxu0 %v284_v16  ;;  %603 = vmatpush3.bf16.msra.mxu1 %v284_v16 }
  0x33   : > { %592 = vmatprep.mubr.msk.bf16.mxu0 %vm269_vm1, %v252_v8  ;;  %v255_v18 = vpack.c.bf16 %v251_v15, %v250_v14 }
  0x34   : > { %596 = vmatprep.mubr.msk.bf16.mxu1 %vm269_vm1, %v254_v13 }
  0x35   : > { %593 = vmatmul.mubr.msk.bf16.vlgmr.msra.gmra.mrb[0].mxu0 %vm269_vm1, %v253_v17  ;;  %597 = vmatmul.mubr.msk.bf16.vlgmr.msra.gmra.mrb[0].mxu1 %vm269_vm1, %v255_v18 }
 0x108   : > { %v594_v20 = vpop.f32.mrb[0].mxu0  ;;  %v598_v21 = vpop.f32.mrb[0].mxu1 }
 0x109   : > { %v329_v22 = vadd.f32 %v594_v20, %v573_v19  ;;  %v320_v23 = vpop.f32.mrb[1].mxu0  ;;  %v336_v24 = vpop.f32.mrb[1].mxu1  ;;  %v345_v40 = vadd.f32 %v598_v21, %v573_v19 }
 0x10a   : > { %v321_v25 = vadd.f32 %v573_v19, %v320_v23  ;;  %v595_v26 = vpop.f32.mrb[2].mxu0  ;;  %v337_v27 = vadd.f32 %v573_v19, %v336_v24  ;;  %v599_v28 = vpop.f32.mrb[2].mxu1 }
 0x10b   : > { %v332_v29 = vadd.f32 %v595_v26, %v573_v19  ;;  %v323_v30 = vpop.f32.mrb[3].mxu0  ;;  %v339_v31 = vpop.f32.mrb[3].mxu1  ;;  %v357_v32 = vsel %vm269_vm1, %v329_v22, 0.0  ;;  %v348_v38 = vadd.f32 %v599_v28, %v573_v19  ;;  %v369_v43 = vsel %vm269_vm1, %v345_v40, 0.0 }
 0x10c   : > { %358 = vadd.xlane.f32.xlu1 %v357_v32  ;;  %v351_v33 = vsel %vm269_vm1, %v321_v25, 0.0  ;;  %v363_v34 = vsel %vm269_vm1, %v337_v27, 0.0  ;;  %v340_v35 = vadd.f32 %v573_v19, %v339_v31  ;;  %v324_v37 = vadd.f32 %v573_v19, %v323_v30 }
 0x10d   : > { %352 = vadd.xlane.f32.xlu0 %v351_v33  ;;  %v360_v36 = vsel %vm269_vm1, %v332_v29, 0.0  ;;  %v372_v42 = vsel %vm269_vm1, %v348_v38, 0.0 }
 0x10e   : > { %v366_v39 = vsel %vm269_vm1, %v340_v35, 0.0  ;;  %v354_v41 = vsel %vm269_vm1, %v324_v37, 0.0 }
 0x110   : > { %361 = vadd.xlane.f32.xlu1 %v360_v36 }
 0x111   : > { %364 = vadd.xlane.f32.xlu0 %v363_v34 }
 0x114   : > { %367 = vadd.xlane.f32.xlu1 %v366_v39 }
 0x115   : > { %355 = vadd.xlane.f32.xlu0 %v354_v41 }
 0x118   : > { %373 = vadd.xlane.f32.xlu1 %v372_v42 }
 0x119   : > { %370 = vadd.xlane.f32.xlu0 %v369_v43 }
 0x199   : > { %v359_v44 = vpop.xlane.xlu1 %358 }
 0x19a   : > { %v378_v45 = vmul.f32 0.035714287, %v359_v44  ;;  %v353_v46 = vpop.xlane.xlu0 %352  ;;  %v579_v44 = vld [vmem:[%s876_s4] ss:$0 sm:$0xff] }
 0x19b   : > { %v376_v47 = vmul.f32 0.035714287, %v353_v46 }
 0x19c   : > { %v792_v48 = vsub.f32 %v329_v22, %v378_v45 }
 0x19d   : > { %v794_v49 = vsub.f32 %v321_v25, %v376_v47  ;;  %v362_v50 = vpop.xlane.xlu1 %361 }
 0x19e   : > { %v379_v51 = vmul.f32 0.035714287, %v362_v50  ;;  %v365_v52 = vpop.xlane.xlu0 %364  ;;  %v394_v53 = vmul.f32 %v792_v48, %v792_v48 }
 0x19f   : > { %v380_v54 = vmul.f32 0.035714287, %v365_v52  ;;  %v392_v57 = vmul.f32 %v794_v49, %v794_v49 }
 0x1a0   : > { %v798_v55 = vsub.f32 %v332_v29, %v379_v51  ;;  %v406_v56 = vsel %vm269_vm1, %v394_v53, 0.0 }
 0x1a1   : > { %v803_v58 = vsub.f32 %v337_v27, %v380_v54  ;;  %v368_v59 = vpop.xlane.xlu1 %367  ;;  %407 = vadd.xlane.f32.xlu0 %v406_v56  ;;  %v400_v1 = vsel %vm269_vm1, %v392_v57, 0.0 }
 0x1a2   : > { %v381_v60 = vmul.f32 0.035714287, %v368_v59  ;;  %v356_v61 = vpop.xlane.xlu0 %355  ;;  %v395_v62 = vmul.f32 %v798_v55, %v798_v55 }
 0x1a3   : > { %v377_v63 = vmul.f32 0.035714287, %v356_v61  ;;  %v396_v2 = vmul.f32 %v803_v58, %v803_v58 }
 0x1a4   : > { %v409_v0 = vsel %vm269_vm1, %v395_v62, 0.0  ;;  %v811_v3 = vsub.f32 %v340_v35, %v381_v60 }
 0x1a5   : > { %v813_v4 = vsub.f32 %v324_v37, %v377_v63  ;;  %410 = vadd.xlane.f32.xlu1 %v409_v0  ;;  %v374_v5 = vpop.xlane.xlu1 %373  ;;  %401 = vadd.xlane.f32.xlu0 %v400_v1  ;;  %v412_v10 = vsel %vm269_vm1, %v396_v2, 0.0 }
 0x1a6   : > { %v383_v6 = vmul.f32 0.035714287, %v374_v5  ;;  %v371_v7 = vpop.xlane.xlu0 %370  ;;  %v397_v14 = vmul.f32 %v811_v3, %v811_v3 }
 0x1a7   : > { %v382_v8 = vmul.f32 0.035714287, %v371_v7  ;;  %v393_v9 = vmul.f32 %v813_v4, %v813_v4 }
 0x1a8   : > { %v818_v11 = vsub.f32 %v348_v38, %v383_v6  ;;  %v415_v16 = vsel %vm269_vm1, %v397_v14, 0.0 }
 0x1a9   : > { %v820_v12 = vsub.f32 %v345_v40, %v382_v8  ;;  %413 = vadd.xlane.f32.xlu0 %v412_v10  ;;  %v403_v13 = vsel %vm269_vm1, %v393_v9, 0.0  ;;  %v578_v40 = vld [vmem:[%s875_s3] ss:$0 sm:$0xff] }
 0x1aa   : > { %404 = vadd.xlane.f32.xlu1 %v403_v13  ;;  %v399_v18 = vmul.f32 %v818_v11, %v818_v11 }
 0x1ab   : > { %v398_v15 = vmul.f32 %v820_v12, %v820_v12 }
 0x1ac   : > { %v421_v19 = vsel %vm269_vm1, %v399_v18, 0.0 }
 0x1ad   : > { %v418_v17 = vsel %vm269_vm1, %v398_v15, 0.0 }
 0x1ae   : > { %416 = vadd.xlane.f32.xlu1 %v415_v16  ;;  %419 = vadd.xlane.f32.xlu0 %v418_v17 }
 0x1b2   : > { %422 = vadd.xlane.f32.xlu1 %v421_v19 }
 0x22e   : > { %v408_v20 = vpop.xlane.xlu0 %407 }
 0x22f   : > { %v426_v21 = vmul.f32 0.035714287, %v408_v20 }
 0x231   : > { %v434_v22 = vadd.f32 1e-05, %v426_v21 }
 0x232   : > { %v411_v23 = vpop.xlane.xlu1 %410  ;;  %v402_v24 = vpop.xlane.xlu0 %401 }
 0x233   : > { %627 = vrsqrt.f32 %v434_v22  ;;  %v427_v25 = vmul.f32 0.035714287, %v411_v23  ;;  %v424_v26 = vmul.f32 0.035714287, %v402_v24 }
 0x235   : > { %v435_v27 = vadd.f32 1e-05, %v427_v25  ;;  %v432_v28 = vadd.f32 1e-05, %v424_v26 }
 0x236   : > { %v414_v29 = vpop.xlane.xlu0 %413 }
 0x237   : > { %629 = vrsqrt.f32 %v435_v27  ;;  %v428_v30 = vmul.f32 0.035714287, %v414_v29  ;;  %v405_v31 = vpop.xlane.xlu1 %404 }
 0x238   : > { %631 = vrsqrt.f32 %v432_v28  ;;  %v425_v32 = vmul.f32 0.035714287, %v405_v31 }
 0x239   : > { %v436_v33 = vadd.f32 1e-05, %v428_v30 }
 0x23a   : > { %v433_v34 = vadd.f32 1e-05, %v425_v32 }
 0x23b   : > { %633 = vrsqrt.f32 %v436_v33  ;;  %v417_v35 = vpop.xlane.xlu1 %416  ;;  %v420_v36 = vpop.xlane.xlu0 %419 }
 0x23c   : > { %635 = vrsqrt.f32 %v433_v34  ;;  %v429_v37 = vmul.f32 0.035714287, %v417_v35  ;;  %v430_v38 = vmul.f32 0.035714287, %v420_v36 }
 0x23d   : > { %v628_v39 = vpop.eup %627 }
 0x23e   : > { %v450_v41 = vmul.f32 %v628_v39, %v792_v48  ;;  %v437_v42 = vadd.f32 1e-05, %v429_v37  ;;  %v438_v43 = vadd.f32 1e-05, %v430_v38 }
 0x23f   : > { %v423_v45 = vpop.xlane.xlu1 %422 }
 0x240   : > { %v465_v46 = vmul.f32 %v578_v40, %v450_v41  ;;  %637 = vrsqrt.f32 %v437_v42  ;;  %v431_v47 = vmul.f32 0.035714287, %v423_v45 }
 0x241   : > { %v630_v50 = vpop.eup %629  ;;  %639 = vrsqrt.f32 %v438_v43 }
 0x242   : > { %v632_v48 = vpop.eup %631  ;;  %v480_v51 = vadd.f32 %v579_v44, %v465_v46  ;;  %v451_v52 = vmul.f32 %v630_v50, %v798_v55  ;;  %v439_v53 = vadd.f32 1e-05, %v431_v47 }
 0x243   : > { %v448_v54 = vmul.f32 %v632_v48, %v794_v49 }
 0x244   : > { %488 = vst.msk [vmem:[%s844_s26 + $0x10] sm:$0xff] %vm269_vm1, %v480_v51  ;;  %v466_v56 = vmul.f32 %v578_v40, %v451_v52  ;;  %641 = vrsqrt.f32 %v439_v53 }
 0x245   : > { %v634_v57 = vpop.eup %633  ;;  %v463_v59 = vmul.f32 %v578_v40, %v448_v54 }
 0x246   : > { %v636_v60 = vpop.eup %635  ;;  %v481_v61 = vadd.f32 %v579_v44, %v466_v56  ;;  %v452_v62 = vmul.f32 %v634_v57, %v803_v58 }
 0x247   : > { %v478_v63 = vadd.f32 %v579_v44, %v463_v59  ;;  %v449_v0 = vmul.f32 %v636_v60, %v813_v4 }
 0x248   : > { %489 = vst.msk [vmem:[%s844_s26 + $0x18] sm:$0xff] %vm269_vm1, %v481_v61  ;;  %v467_v55 = vmul.f32 %v578_v40, %v452_v62 }
 0x249   : > { %486 = vst.msk [vmem:[%s844_s26] sm:$0xff] %vm269_vm1, %v478_v63  ;;  %v464_v49 = vmul.f32 %v578_v40, %v449_v0 }
 0x24a   : > { %v638_v1 = vpop.eup %637  ;;  %v482_v2 = vadd.f32 %v579_v44, %v467_v55 }
 0x24b   : > { %v640_v5 = vpop.eup %639  ;;  %v479_v6 = vadd.f32 %v579_v44, %v464_v49  ;;  %v453_v7 = vmul.f32 %v638_v1, %v811_v3 }
 0x24c   : > { %490 = vst.msk [vmem:[%s844_s26 + $0x20] sm:$0xff] %vm269_vm1, %v482_v2  ;;  %v454_v58 = vmul.f32 %v640_v5, %v820_v12 }
 0x24d   : > { %487 = vst.msk [vmem:[%s844_s26 + $0x8] sm:$0xff] %vm269_vm1, %v479_v6  ;;  %v468_v4 = vmul.f32 %v578_v40, %v453_v7 }
 0x24e   : > { %v642_v8 = vpop.eup %641  ;;  %v469_v9 = vmul.f32 %v578_v40, %v454_v58 }
 0x24f   : > { %v483_v10 = vadd.f32 %v579_v44, %v468_v4  ;;  %v455_v13 = vmul.f32 %v642_v8, %v818_v11 }
 0x250   : > { %v484_v14 = vadd.f32 %v579_v44, %v469_v9 }
 0x251   : > { %491 = vst.msk [vmem:[%s844_s26 + $0x28] sm:$0xff] %vm269_vm1, %v483_v10  ;;  %v470_v15 = vmul.f32 %v578_v40, %v455_v13 }
 0x252   : > { %492 = vst.msk [vmem:[%s844_s26 + $0x30] sm:$0xff] %vm269_vm1, %v484_v14 }
 0x253   : > { %v485_v16 = vadd.f32 %v579_v44, %v470_v15 }
 0x255   : > { %493 = vst.msk [vmem:[%s844_s26 + $0x38] sm:$0xff] %vm269_vm1, %v485_v16 }
 0x256 PF: > { %s16_s18 = sadd.s32 1, %s681_s18  }
 0x257   : > { %p13_p3 = scmp.ge.s32.totalorder %s16_s18, 4  }
 0x259   :  { %15 = sbr.rel (!%p13_p3) target bundleno = 1 (0x1), region = 75 }
 0x260   :  { %516 = vsyncpa [#allocation3], 1 }
 0x261   :  { %518 = vsyncpa [#allocation3 + $0x1], 1 }

// kernel: _lambda_.19
= control target key start
LH: loop header
LB: loop body
LE: loop exit
PB: predicated region body
PF: predicated region fallthrough
CT: control target
= control target key end

     0   :  { %s739_s9 = smov 0   ;;  %s1046_s0 = inlined_call_operand.vmem [shape: f32[2,3,10,8,28], index: 0, kind: input, shape index: {}]   ;;  %s1047_s1 = inlined_call_operand.vmem [shape: f32[3,3,1,28], index: 1, kind: input, shape index: {}]   ;;  %s1048_s2 = inlined_call_operand.vmem [shape: f32[2,8,8,28], index: 2, kind: output, shape index: {}]  }
   0x1 LB: > { %s653_s10 = sadd.s32 4294967295, %s721_s9   ;;  %p657_p0 = scmp.ge.s32.totalorder %s721_s9, 1  ;;  %s721_s9 = sphi %s739_s9, %s12_s9  }
   0x2   : > { %p112_p1 = scmp.lt.s32.totalorder %s721_s9, 3 }
   0x4   : > { %p113_p2 = pnand %p657_p0, %p112_p1 }
   0x5   : > { %p134_p3 = scmp.lt.s32.totalorder (!%p113_p2), %s653_s10, 1  ;;  %v753_v0 = vld [vmem:[%s1047_s1] ss:$0 sm:$0xff] (!%p113_p2)  ;;  %v763_v1 = vld [vmem:[%s1047_s1 + $0x1] ss:$0 sm:$0xff] (!%p113_p2)  ;;  %vm589_vm3 = vcmask (!%p113_p2), 228352  }
   0x6   : > { %116 = sbr.rel (%p113_p2) target bundleno = 134 (0x86), region = 28  ;;  %v768_v2 = vld [vmem:[%s1047_s1 + $0x2] ss:$0 sm:$0xff] (!%p113_p2)  ;;  %v773_v3 = vld [vmem:[%s1047_s1 + $0x3] ss:$0 sm:$0xff] (!%p113_p2) }
   0x7   : > { %v791_v17 = vld [vmem:[%s1047_s1 + $0x4] ss:$0 sm:$0xff] (!%p113_p2)  ;;  %v803_v27 = vld [vmem:[%s1047_s1 + $0x5] ss:$0 sm:$0xff] (!%p113_p2)  ;;  %v813_v34 = vld [vmem:[%s1047_s1 + $0x6] ss:$0 sm:$0xff] (!%p113_p2) }
   0x8   : > { %v820_v39 = vld [vmem:[%s1047_s1 + $0x7] ss:$0 sm:$0xff] (!%p113_p2)  ;;  %v827_v44 = vld [vmem:[%s1047_s1 + $0x8] ss:$0 sm:$0xff] (!%p113_p2) }
   0xd   : > { %s1050_s10 = smov (!%p134_p3, %s653_s10), 1 }
   0xe   : > { %s673_s11 = smul.u32 240, %s1050_s10  ;;  %s672_s5 = sshll.u32 %s1050_s10, 6 }
   0xf   : > { %s990_s8 = scalar_lea.vmem %s1048_s2, %s672_s5 }
  0x10   : > { %s758_s16 = scalar_lea.vmem %s1046_s0, %s673_s11 }
  0x11   : > { %v144_v4 = vld [vmem:[%s758_s16] sm:$0xff]  ;;  %v145_v5 = vld [vmem:[%s758_s16 + $0x8] sm:$0xff]  ;;  %v146_v6 = vld [vmem:[%s758_s16 + $0x10] sm:$0xff] }
  0x12   : > { %v154_v7 = vld [vmem:[%s758_s16 + $0x50] sm:$0xff]  ;;  %v155_v8 = vld [vmem:[%s758_s16 + $0x58] sm:$0xff]  ;;  %v156_v9 = vld [vmem:[%s758_s16 + $0x60] sm:$0xff]  ;;  %v189_v10 = vmul.f32 %v753_v0, %v144_v4  ;;  %v191_v11 = vmul.f32 %v753_v0, %v146_v6  ;;  %v190_v18 = vmul.f32 %v753_v0, %v145_v5  ;;  %v247_v26 = vmul.f32 %v773_v3, %v145_v5 }
  0x13   : > { %v164_v12 = vld [vmem:[%s758_s16 + $0xa0] sm:$0xff]  ;;  %v165_v13 = vld [vmem:[%s758_s16 + $0xa8] sm:$0xff]  ;;  %v166_v14 = vld [vmem:[%s758_s16 + $0xb0] sm:$0xff]  ;;  %v203_v15 = vmul.f32 %v763_v1, %v154_v7  ;;  %v205_v16 = vmul.f32 %v763_v1, %v156_v9  ;;  %v204_v19 = vmul.f32 %v763_v1, %v155_v8  ;;  %v269_v31 = vmul.f32 %v791_v17, %v155_v8 }
  0x14   : > { %v225_v20 = vmul.f32 %v768_v2, %v164_v12  ;;  %v227_v21 = vmul.f32 %v768_v2, %v166_v14  ;;  %v147_v22 = vld [vmem:[%s758_s16 + $0x18] sm:$0xff]  ;;  %v157_v23 = vld [vmem:[%s758_s16 + $0x68] sm:$0xff]  ;;  %v226_v28 = vmul.f32 %v768_v2, %v165_v13  ;;  %v248_v36 = vmul.f32 %v773_v3, %v146_v6  ;;  %v148_v54 = vld [vmem:[%s758_s16 + $0x20] sm:$0xff] }
  0x15   : > { %v211_v24 = vadd.f32 %v203_v15, %v189_v10  ;;  %v213_v25 = vadd.f32 %v205_v16, %v191_v11  ;;  %v167_v29 = vld [vmem:[%s758_s16 + $0xb8] sm:$0xff]  ;;  %v192_v32 = vmul.f32 %v753_v0, %v147_v22  ;;  %v206_v33 = vmul.f32 %v763_v1, %v157_v23  ;;  %v158_v55 = vld [vmem:[%s758_s16 + $0x70] sm:$0xff] }
  0x16   : > { %v212_v37 = vadd.f32 %v204_v19, %v190_v18  ;;  %v249_v38 = vmul.f32 %v773_v3, %v147_v22  ;;  %v291_v41 = vmul.f32 %v803_v27, %v165_v13  ;;  %v228_v43 = vmul.f32 %v768_v2, %v167_v29  ;;  %v149_v18 = vld [vmem:[%s758_s16 + $0x28] sm:$0xff]  ;;  %v159_v19 = vld [vmem:[%s758_s16 + $0x78] sm:$0xff] }
  0x17   : > { %v233_v30 = vadd.f32 %v225_v20, %v211_v24  ;;  %v235_v35 = vadd.f32 %v227_v21, %v213_v25  ;;  %v214_v42 = vadd.f32 %v206_v33, %v192_v32  ;;  %v270_v45 = vmul.f32 %v791_v17, %v156_v9 }
  0x18   : > { %v234_v46 = vadd.f32 %v226_v28, %v212_v37  ;;  %v271_v47 = vmul.f32 %v791_v17, %v157_v23  ;;  %v292_v49 = vmul.f32 %v803_v27, %v166_v14  ;;  %v313_v50 = vmul.f32 %v813_v34, %v146_v6  ;;  %v168_v6 = vld [vmem:[%s758_s16 + $0xc0] sm:$0xff] }
  0x19   : > { %v255_v40 = vadd.f32 %v247_v26, %v233_v30  ;;  %v335_v51 = vmul.f32 %v820_v39, %v156_v9  ;;  %v293_v53 = vmul.f32 %v803_v27, %v167_v29  ;;  %v257_v56 = vadd.f32 %v249_v38, %v235_v35 }
  0x1a   : > { %v256_v52 = vadd.f32 %v248_v36, %v234_v46  ;;  %v357_v58 = vmul.f32 %v827_v44, %v166_v14  ;;  %v236_v59 = vadd.f32 %v228_v43, %v214_v42  ;;  %v250_v60 = vmul.f32 %v773_v3, %v148_v54  ;;  %v169_v36 = vld [vmem:[%s758_s16 + $0xc8] sm:$0xff] }
  0x1b   : > { %v277_v48 = vadd.f32 %v269_v31, %v255_v40  ;;  %v314_v62 = vmul.f32 %v813_v34, %v147_v22  ;;  %v279_v63 = vadd.f32 %v271_v47, %v257_v56  ;;  %v315_v4 = vmul.f32 %v813_v34, %v148_v54 }
  0x1c   : > { %v278_v61 = vadd.f32 %v270_v45, %v256_v52  ;;  %v193_v7 = vmul.f32 %v753_v0, %v148_v54  ;;  %v207_v8 = vmul.f32 %v763_v1, %v158_v55  ;;  %v272_v9 = vmul.f32 %v791_v17, %v158_v55 }
  0x1d   : > { %v299_v57 = vadd.f32 %v291_v41, %v277_v48  ;;  %v336_v11 = vmul.f32 %v820_v39, %v157_v23  ;;  %v301_v12 = vadd.f32 %v293_v53, %v279_v63  ;;  %v337_v13 = vmul.f32 %v820_v39, %v158_v55 }
  0x1e   : > { %v300_v10 = vadd.f32 %v292_v49, %v278_v61  ;;  %v358_v15 = vmul.f32 %v827_v44, %v167_v29  ;;  %v294_v16 = vmul.f32 %v803_v27, %v168_v6  ;;  %v258_v20 = vadd.f32 %v250_v60, %v236_v59 }
  0x1f   : > { %v321_v5 = vadd.f32 %v313_v50, %v299_v57  ;;  %v229_v22 = vmul.f32 %v768_v2, %v168_v6  ;;  %v323_v24 = vadd.f32 %v315_v4, %v301_v12  ;;  %v359_v25 = vmul.f32 %v827_v44, %v168_v6  ;;  %v160_v4 = vld [vmem:[%s758_s16 + $0x80] sm:$0xff] }
  0x20   : > { %v322_v21 = vadd.f32 %v314_v62, %v300_v10  ;;  %v215_v23 = vadd.f32 %v207_v8, %v193_v7  ;;  %v280_v28 = vadd.f32 %v272_v9, %v258_v20  ;;  %v316_v30 = vmul.f32 %v813_v34, %v149_v18 }
  0x21   : > { %v343_v14 = vadd.f32 %v335_v51, %v321_v5  ;;  %v345_v32 = vadd.f32 %v337_v13, %v323_v24  ;;  %v194_v29 = vmul.f32 %v753_v0, %v149_v18  ;;  %v208_v33 = vmul.f32 %v763_v1, %v159_v19  ;;  %v170_v13 = vld [vmem:[%s758_s16 + $0xd0] sm:$0xff] }
  0x22   : > { %v344_v31 = vadd.f32 %v336_v11, %v322_v21  ;;  %v302_v37 = vadd.f32 %v294_v16, %v280_v28  ;;  %v338_v38 = vmul.f32 %v820_v39, %v159_v19  ;;  %v237_v43 = vadd.f32 %v229_v22, %v215_v23 }
  0x23   : > { %v365_v26 = vadd.f32 %v357_v58, %v343_v14  ;;  %v858_v41 = vadd.f32 %v359_v25, %v345_v32  ;;  %v251_v45 = vmul.f32 %v773_v3, %v149_v18  ;;  %v216_v48 = vadd.f32 %v208_v33, %v194_v29  ;;  %v150_v58 = vld [vmem:[%s758_s16 + $0x30] sm:$0xff] }
  0x24   : > { %v366_v40 = vadd.f32 %v358_v15, %v344_v31  ;;  %v324_v46 = vadd.f32 %v316_v30, %v302_v37  ;;  %v230_v49 = vmul.f32 %v768_v2, %v169_v36  ;;  %v360_v50 = vmul.f32 %v827_v44, %v169_v36 }
  0x25   : > { %v381_v35 = vmul.f32 0.70710677, %v365_v26  ;;  %v866_v53 = vmul.f32 0.70710677, %v858_v41  ;;  %v273_v57 = vmul.f32 %v791_v17, %v159_v19  ;;  %v259_v59 = vadd.f32 %v251_v45, %v237_v43 }
  0x26   : > { %v861_v47 = vmul.f32 0.70710677, %v366_v40  ;;  %v346_v54 = vadd.f32 %v338_v38, %v324_v46  ;;  %v295_v63 = vmul.f32 %v803_v27, %v169_v36  ;;  %v238_v6 = vadd.f32 %v230_v49, %v216_v48  ;;  %v151_v49 = vld [vmem:[%s758_s16 + $0x38] sm:$0xff] }
  0x27   : > { %v405_v42 = vand.u32 2147483647, %v381_v35  ;;  %v407_v62 = vand.u32 2147483647, %v866_v53  ;;  %v195_v14 = vmul.f32 %v753_v0, %v150_v58  ;;  %v209_v15 = vmul.f32 %v763_v1, %v160_v4 }
  0x28   : > { %v406_v55 = vand.u32 2147483647, %v861_v47  ;;  %v874_v7 = vadd.f32 %v360_v50, %v346_v54  ;;  %v281_v16 = vadd.f32 %v273_v57, %v259_v59  ;;  %v882_v18 = vmul.f32 0.5, %v365_v26 }
  0x29   : > { %v413_v51 = vmul.f32 0.3275911, %v405_v42  ;;  %v517_v52 = vsub.f32 0.0, %v405_v42  ;;  %v415_v10 = vmul.f32 0.3275911, %v407_v62  ;;  %v519_v11 = vsub.f32 0.0, %v407_v62 }
  0x2a   : > { %v414_v60 = vmul.f32 0.3275911, %v406_v55  ;;  %v518_v61 = vsub.f32 0.0, %v406_v55  ;;  %v877_v12 = vmul.f32 0.70710677, %v874_v7  ;;  %vm389_vm0 = vcmp.ge.f32.partialorder %v381_v35, 0.0 }
  0x2b   : > { %v421_v56 = vadd.f32 1.0, %v413_v51  ;;  %v525_v5 = vmul.f32 %v517_v52, %v405_v42  ;;  %v423_v19 = vadd.f32 1.0, %v415_v10  ;;  %v527_v21 = vmul.f32 %v519_v11, %v407_v62 }
  0x2c   : > { %v422_v8 = vadd.f32 1.0, %v414_v60  ;;  %v526_v9 = vmul.f32 %v518_v61, %v406_v55  ;;  %v408_v22 = vand.u32 2147483647, %v877_v12  ;;  %v303_v24 = vadd.f32 %v295_v63, %v281_v16 }
  0x2d   : > { %683 = vrcp.f32 %v421_v56  ;;  %v533_v20 = vmul.f32 1.442695, %v525_v5  ;;  %v231_v23 = vmul.f32 %v768_v2, %v170_v13  ;;  %v252_v28 = vmul.f32 %v773_v3, %v150_v58  ;;  %v161_v56 = vld [vmem:[%s758_s16 + $0x88] sm:$0xff] }
  0x2e   : > { %685 = vrcp.f32 %v422_v8  ;;  %v535_v25 = vmul.f32 1.442695, %v526_v9  ;;  %v317_v30 = vmul.f32 %v813_v34, %v150_v58  ;;  %v416_v31 = vmul.f32 0.3275911, %v408_v22 }
  0x2f   : > { %687 = vrcp.f32 %v423_v19  ;;  %v217_v26 = vadd.f32 %v209_v15, %v195_v14  ;;  %v339_v32 = vmul.f32 %v820_v39, %v160_v4  ;;  %v723_v29 = vmov -1.0  }
  0x30   : > { %v891_v33 = vsel %vm389_vm0, 1.0, %v723_v29  ;;  %v274_v36 = vmul.f32 %v791_v17, %v160_v4  ;;  %v325_v37 = vadd.f32 %v317_v30, %v303_v24  ;;  %v361_v38 = vmul.f32 %v827_v44, %v170_v13  ;;  %v171_v4 = vld [vmem:[%s758_s16 + $0xd8] sm:$0xff]  ;;  %v152_v24 = vld [vmem:[%s758_s16 + $0x40] sm:$0xff] }
  0x31   : > { %689 = vpow2.f32 %v533_v20  ;;  %v895_v42 = vmul.f32 0.5, %v366_v40  ;;  %v537_v43 = vmul.f32 1.442695, %v527_v21  ;;  %v424_v45 = vadd.f32 1.0, %v416_v31 }
  0x32   : > { %691 = vpow2.f32 %v535_v25  ;;  %v296_v46 = vmul.f32 %v803_v27, %v170_v13  ;;  %v347_v48 = vadd.f32 %v339_v32, %v325_v37  ;;  %v260_v50 = vadd.f32 %v252_v28, %v238_v6 }
  0x33   : > { %v902_v51 = vmul.f32 0.5, %v858_v41  ;;  %693 = vrcp.f32 %v424_v45  ;;  %v239_v52 = vadd.f32 %v231_v23, %v217_v26  ;;  %v253_v54 = vmul.f32 %v773_v3, %v151_v49 }
  0x34   : > { %v906_v55 = vadd.f32 %v361_v38, %v347_v48  ;;  %v282_v57 = vadd.f32 %v274_v36, %v260_v50  ;;  %v318_v58 = vmul.f32 %v813_v34, %v151_v49  ;;  %695 = vpow2.f32 %v537_v43 }
  0x35   : > { %v520_v59 = vsub.f32 0.0, %v408_v22  ;;  %v196_v60 = vmul.f32 %v753_v0, %v151_v49  ;;  %v275_v41 = vmul.f32 %v791_v17, %v161_v56  ;;  %v340_v6 = vmul.f32 %v820_v39, %v161_v56 }
  0x36   : > { %v915_v63 = vmul.f32 0.70710677, %v906_v55  ;;  %v304_v5 = vadd.f32 %v296_v46, %v282_v57  ;;  %v210_v9 = vmul.f32 %v763_v1, %v161_v56  ;;  %v297_v10 = vmul.f32 %v803_v27, %v171_v4  ;;  %v162_v46 = vld [vmem:[%s758_s16 + $0x90] sm:$0xff] }
  0x37   : > { %v899_v35 = vpop.eup %683  ;;  %v261_v0 = vadd.f32 %v253_v54, %v239_v52  ;;  %v362_v15 = vmul.f32 %v827_v44, %v171_v4  ;;  %v528_v20 = vmul.f32 %v520_v59, %v408_v22  ;;  %v232_v21 = vmul.f32 %v768_v2, %v171_v4 }
  0x38   : > { %v445_v40 = vmul.f32 1.0614054, %v899_v35  ;;  %v912_v61 = vpop.eup %685  ;;  %v409_v13 = vand.u32 2147483647, %v915_v63  ;;  %v326_v14 = vadd.f32 %v318_v58, %v304_v5  ;;  %v218_v32 = vadd.f32 %v210_v9, %v196_v60 }
  0x39   : > { %v446_v8 = vmul.f32 1.0614054, %v912_v61  ;;  %v925_v16 = vpop.eup %687  ;;  %v283_v25 = vadd.f32 %v275_v41, %v261_v0  ;;  %v319_v37 = vmul.f32 %v813_v34, %v152_v24  ;;  %vm390_vm1 = vcmp.ge.f32.partialorder %v861_v47, 0.0 }
  0x3a   : > { %v453_v62 = vadd.f32 -1.4531521, %v445_v40  ;;  %v447_v23 = vmul.f32 1.0614054, %v925_v16  ;;  %v417_v28 = vmul.f32 0.3275911, %v409_v13  ;;  %v348_v30 = vadd.f32 %v340_v6, %v326_v14 }
  0x3b   : > { %v454_v19 = vadd.f32 -1.4531521, %v446_v8  ;;  %v690_v31 = vpop.eup %689  ;;  %v305_v36 = vadd.f32 %v297_v10, %v283_v25  ;;  %vm391_vm2 = vcmp.ge.f32.partialorder %v866_v53, 0.0  ;;  %v539_v50 = vmul.f32 1.442695, %v528_v20 }
  0x3c   : > { %v461_v11 = vmul.f32 %v899_v35, %v453_v62  ;;  %v692_v38 = vpop.eup %691  ;;  %v455_v2 = vadd.f32 -1.4531521, %v447_v23  ;;  %v425_v43 = vadd.f32 1.0, %v417_v28  ;;  %v934_v45 = vadd.f32 %v362_v15, %v348_v30 }
  0x3d   : > { %v462_v26 = vmul.f32 %v912_v61, %v454_v19  ;;  %v937_v48 = vpop.eup %693  ;;  %v327_v52 = vadd.f32 %v319_v37, %v305_v36  ;;  %v341_v54 = vmul.f32 %v820_v39, %v162_v46  ;;  %v521_v60 = vsub.f32 0.0, %v409_v13  ;;  %v172_v19 = vld [vmem:[%s758_s16 + $0xe0] sm:$0xff] }
  0x3e   : > { %v469_v1 = vadd.f32 1.4214138, %v461_v11  ;;  %v463_v56 = vmul.f32 %v925_v16, %v455_v2  ;;  %v448_v57 = vmul.f32 1.0614054, %v937_v48  ;;  %697 = vrcp.f32 %v425_v43  ;;  %v696_v58 = vpop.eup %695 }
  0x3f   : > { %v470_v49 = vadd.f32 1.4214138, %v462_v26  ;;  %v240_v41 = vadd.f32 %v232_v21, %v218_v32  ;;  %v945_v62 = vmul.f32 0.70710677, %v934_v45  ;;  %v254_v8 = vmul.f32 %v773_v3, %v152_v24 }
  0x40   : > { %v477_v22 = vmul.f32 %v899_v35, %v469_v1  ;;  %v471_v5 = vadd.f32 1.4214138, %v463_v56  ;;  %v456_v6 = vadd.f32 -1.4531521, %v448_v57  ;;  %699 = vpow2.f32 %v539_v50 }
  0x41   : > { %v478_v59 = vmul.f32 %v912_v61, %v470_v49  ;;  %v950_v10 = vand.u32 2147483647, %v945_v62  ;;  %v349_v0 = vadd.f32 %v341_v54, %v327_v52  ;;  %v276_v20 = vmul.f32 %v791_v17, %v162_v46  ;;  %v153_v49 = vld [vmem:[%s758_s16 + $0x48] sm:$0xff] }
  0x42   : > { %v485_v40 = vadd.f32 -0.28449672, %v477_v22  ;;  %v479_v14 = vmul.f32 %v925_v16, %v471_v5  ;;  %v464_v15 = vmul.f32 %v937_v48, %v456_v6  ;;  %v529_v25 = vmul.f32 %v521_v60, %v409_v13 }
  0x43   : > { %v486_v9 = vadd.f32 -0.28449672, %v478_v59  ;;  %v418_v1 = vmul.f32 0.3275911, %v950_v10  ;;  %v363_v3 = vmul.f32 %v827_v44, %v172_v19  ;;  %v262_v30 = vadd.f32 %v254_v8, %v240_v41 }
  0x44   : > { %v493_v4 = vmul.f32 %v899_v35, %v485_v40  ;;  %v487_v23 = vadd.f32 -0.28449672, %v479_v14  ;;  %v472_v28 = vadd.f32 1.4214138, %v464_v15  ;;  %v298_v36 = vmul.f32 %v803_v27, %v172_v19  ;;  %v173_v14 = vld [vmem:[%s758_s16 + $0xe8] sm:$0xff] }
  0x45   : > { %v494_v21 = vmul.f32 %v912_v61, %v486_v9  ;;  %v426_v32 = vadd.f32 1.0, %v418_v1  ;;  %v961_v37 = vadd.f32 %v363_v3, %v349_v0  ;;  %v284_v2 = vadd.f32 %v276_v20, %v262_v30 }
  0x46   : > { %v501_v11 = vadd.f32 0.2548296, %v493_v4  ;;  %v495_v13 = vmul.f32 %v925_v16, %v487_v23  ;;  %v480_v22 = vmul.f32 %v937_v48, %v472_v28  ;;  %v541_v46 = vmul.f32 1.442695, %v529_v25 }
  0x47   : > { %v502_v26 = vadd.f32 0.2548296, %v494_v21  ;;  %701 = vrcp.f32 %v426_v32  ;;  %v977_v47 = vmul.f32 0.70710677, %v961_v37  ;;  %v306_v57 = vadd.f32 %v298_v36, %v284_v2 }
  0x48   : > { %v509_v24 = vmul.f32 %v899_v35, %v501_v11  ;;  %v398_v35 = vsel %vm390_vm1, 1.0, %v723_v29  ;;  %v970_v50 = vpop.eup %697  ;;  %v503_v52 = vadd.f32 0.2548296, %v495_v13  ;;  %v488_v54 = vadd.f32 -0.28449672, %v480_v22  ;;  %v163_v11 = vld [vmem:[%s758_s16 + $0x98] sm:$0xff] }
  0x49   : > { %v510_v43 = vmul.f32 %v912_v61, %v502_v26  ;;  %v449_v56 = vmul.f32 1.0614054, %v970_v50  ;;  %v320_v53 = vmul.f32 %v813_v34, %v153_v49  ;;  %v522_v5 = vsub.f32 0.0, %v950_v10 }
  0x4a   : > { %v549_v17 = vmul.f32 %v690_v31, %v509_v24  ;;  %v399_v31 = vsel %vm391_vm2, 1.0, %v723_v29  ;;  %v511_v59 = vmul.f32 %v925_v16, %v503_v52  ;;  %v496_v60 = vmul.f32 %v937_v48, %v488_v54  ;;  %v700_v41 = vpop.eup %699 }
  0x4b   : > { %v550_v40 = vmul.f32 %v692_v38, %v510_v43  ;;  %v457_v38 = vadd.f32 -1.4531521, %v449_v56  ;;  %v411_v6 = vand.u32 2147483647, %v977_v47  ;;  %vm392_vm4 = vcmp.ge.f32.partialorder %v877_v12, 0.0 }
  0x4c   : > { %v557_v27 = vsub.f32 1.0, %v549_v17  ;;  %v551_v9 = vmul.f32 %v696_v58, %v511_v59  ;;  %703 = vpow2.f32 %v541_v46  ;;  %v328_v20 = vadd.f32 %v320_v53, %v306_v57 }
  0x4d   : > { %v558_v4 = vsub.f32 1.0, %v550_v40  ;;  %v465_v16 = vmul.f32 %v970_v50, %v457_v38  ;;  %v419_v0 = vmul.f32 0.3275911, %v411_v6  ;;  %v530_v1 = vmul.f32 %v522_v5, %v950_v10 }
  0x4e   : > { %v565_v61 = vmul.f32 %v557_v27, %v891_v33  ;;  %v504_v33 = vadd.f32 0.2548296, %v496_v60  ;;  %v559_v19 = vsub.f32 1.0, %v551_v9  ;;  %v342_v28 = vmul.f32 %v820_v39, %v163_v11 }
  0x4f   : > { %v566_v34 = vmul.f32 %v558_v4, %v398_v35  ;;  %v473_v25 = vadd.f32 1.4214138, %v465_v16  ;;  %v427_v3 = vadd.f32 1.0, %v419_v0  ;;  %v364_v30 = vmul.f32 %v827_v44, %v173_v14 }
  0x50   : > { %v573_v8 = vadd.f32 1.0, %v565_v61  ;;  %v512_v58 = vmul.f32 %v937_v48, %v504_v33  ;;  %v567_v24 = vmul.f32 %v559_v19, %v399_v31  ;;  %v400_v48 = vsel %vm392_vm4, 1.0, %v723_v29 }
  0x51   : > { %v574_v21 = vadd.f32 1.0, %v566_v34  ;;  %v702_v26 = vpop.eup %701  ;;  %v481_v32 = vmul.f32 %v970_v50, %v473_v25  ;;  %705 = vrcp.f32 %v427_v3  ;;  %v350_v13 = vadd.f32 %v342_v28, %v328_v20 }
  0x52   : > { %v581_v15 = vmul.f32 %v573_v8, %v882_v18  ;;  %v552_v23 = vmul.f32 %v700_v41, %v512_v58  ;;  %v575_v10 = vadd.f32 1.0, %v567_v24  ;;  %v450_v17 = vmul.f32 1.0614054, %v702_v26 }
  0x53   : > { %v582_v18 = vmul.f32 %v574_v21, %v895_v42  ;;  %v376_v39 = vmul.f32 0.5, %v874_v7  ;;  %v489_v44 = vadd.f32 -0.28449672, %v481_v32  ;;  %v543_v22 = vmul.f32 1.442695, %v530_v1 }
  0x54   : > { %590 = vst.msk [vmem:[%s990_s8] sm:$0xff] %vm589_vm3, %v581_v15  ;;  %v560_v36 = vsub.f32 1.0, %v552_v23  ;;  %v583_v42 = vmul.f32 %v575_v10, %v902_v51  ;;  %v458_v35 = vadd.f32 -1.4531521, %v450_v17  ;;  %v1011_v12 = vadd.f32 %v364_v30, %v350_v13 }
  0x55   : > { %591 = vst.msk [vmem:[%s990_s8 + $0x8] sm:$0xff] %vm589_vm3, %v582_v18  ;;  %v497_v43 = vmul.f32 %v970_v50, %v489_v44  ;;  %v523_v46 = vsub.f32 0.0, %v411_v6  ;;  %707 = vpow2.f32 %v543_v22  ;;  %vm393_vm5 = vcmp.ge.f32.partialorder %v915_v63, 0.0 }
  0x56   : > { %v568_v2 = vmul.f32 %v560_v36, %v400_v48  ;;  %592 = vst.msk [vmem:[%s990_s8 + $0x10] sm:$0xff] %vm589_vm3, %v583_v42  ;;  %v466_v27 = vmul.f32 %v702_v26, %v458_v35  ;;  %v1017_v31 = vmul.f32 0.70710677, %v1011_v12  ;;  %v704_v7 = vpop.eup %703  ;;  %v401_v41 = vsel %vm393_vm5, 1.0, %v723_v29 }
  0x57   : > { %v505_v52 = vadd.f32 0.2548296, %v497_v43  ;;  %v531_v57 = vmul.f32 %v523_v46, %v411_v6  ;;  %v377_v63 = vmul.f32 0.5, %v906_v55  ;;  %vm394_vm6 = vcmp.ge.f32.partialorder %v945_v62, 0.0 }
  0x58   : > { %v576_v49 = vadd.f32 1.0, %v568_v2  ;;  %v474_v51 = vadd.f32 1.4214138, %v466_v27  ;;  %v412_v40 = vand.u32 2147483647, %v1017_v31  ;;  %v402_v25 = vsel %vm394_vm6, 1.0, %v723_v29 }
  0x59   : > { %v513_v56 = vmul.f32 %v970_v50, %v505_v52  ;;  %v545_v9 = vmul.f32 1.442695, %v531_v57  ;;  %v378_v23 = vmul.f32 0.5, %v934_v45  ;;  %vm395_vm7 = vcmp.ge.f32.partialorder %v977_v47, 0.0 }
  0x5a   : > { %v584_v54 = vmul.f32 %v576_v49, %v376_v39  ;;  %v482_v61 = vmul.f32 %v702_v26, %v474_v51  ;;  %v420_v59 = vmul.f32 0.3275911, %v412_v40  ;;  %v524_v19 = vsub.f32 0.0, %v412_v40 }
  0x5b   : > { %v706_v60 = vpop.eup %705  ;;  %v553_v53 = vmul.f32 %v704_v7, %v513_v56  ;;  %v403_v45 = vsel %vm395_vm7, 1.0, %v723_v29  ;;  %v379_v2 = vmul.f32 0.5, %v961_v37  ;;  %vm396_vm8 = vcmp.ge.f32.partialorder %v1017_v31, 0.0 }
  0x5c   : > { %593 = vst.msk [vmem:[%s990_s8 + $0x18] sm:$0xff] %vm589_vm3, %v584_v54  ;;  %v490_v4 = vadd.f32 -0.28449672, %v482_v61  ;;  %v451_v38 = vmul.f32 1.0614054, %v706_v60  ;;  %v428_v5 = vadd.f32 1.0, %v420_v59  ;;  %v532_v3 = vmul.f32 %v524_v19, %v412_v40 }
  0x5d   : > { %v561_v8 = vsub.f32 1.0, %v553_v53  ;;  %v404_v51 = vsel %vm396_vm8, 1.0, %v723_v29  ;;  %v380_v56 = vmul.f32 0.5, %v1011_v12 }
  0x5e   : > { %v498_v33 = vmul.f32 %v702_v26, %v490_v4  ;;  %v459_v34 = vadd.f32 -1.4531521, %v451_v38  ;;  %709 = vrcp.f32 %v428_v5  ;;  %v547_v48 = vmul.f32 1.442695, %v532_v3 }
  0x5f   : > { %v569_v50 = vmul.f32 %v561_v8, %v401_v41  ;;  %v708_v0 = vpop.eup %707  ;;  %711 = vpow2.f32 %v545_v9 }
  0x60   : > { %v506_v6 = vadd.f32 0.2548296, %v498_v33  ;;  %v467_v16 = vmul.f32 %v706_v60, %v459_v34  ;;  %713 = vpow2.f32 %v547_v48 }
  0x61   : > { %v577_v11 = vadd.f32 1.0, %v569_v50 }
  0x62   : > { %v514_v14 = vmul.f32 %v702_v26, %v506_v6  ;;  %v475_v15 = vadd.f32 1.4214138, %v467_v16 }
  0x63   : > { %v585_v58 = vmul.f32 %v577_v11, %v377_v63 }
  0x64   : > { %v554_v20 = vmul.f32 %v708_v0, %v514_v14  ;;  %v483_v21 = vmul.f32 %v706_v60, %v475_v15 }
  0x65   : > { %594 = vst.msk [vmem:[%s990_s8 + $0x20] sm:$0xff] %vm589_vm3, %v585_v58 }
  0x66   : > { %v562_v1 = vsub.f32 1.0, %v554_v20  ;;  %v491_v55 = vadd.f32 -0.28449672, %v483_v21 }
  0x68   : > { %v710_v24 = vpop.eup %709  ;;  %v570_v28 = vmul.f32 %v562_v1, %v402_v25  ;;  %v499_v30 = vmul.f32 %v706_v60, %v491_v55 }
  0x69   : > { %v452_v62 = vmul.f32 1.0614054, %v710_v24  ;;  %v712_v32 = vpop.eup %711 }
  0x6a   : > { %v578_v26 = vadd.f32 1.0, %v570_v28  ;;  %v507_v18 = vadd.f32 0.2548296, %v499_v30  ;;  %v714_v7 = vpop.eup %713 }
  0x6b   : > { %v460_v10 = vadd.f32 -1.4531521, %v452_v62 }
  0x6c   : > { %v586_v36 = vmul.f32 %v578_v26, %v378_v23  ;;  %v515_v17 = vmul.f32 %v706_v60, %v507_v18 }
  0x6d   : > { %v468_v13 = vmul.f32 %v710_v24, %v460_v10 }
  0x6e   : > { %595 = vst.msk [vmem:[%s990_s8 + $0x28] sm:$0xff] %vm589_vm3, %v586_v36  ;;  %v555_v39 = vmul.f32 %v712_v32, %v515_v17 }
  0x6f   : > { %v476_v44 = vadd.f32 1.4214138, %v468_v13 }
  0x70   : > { %v563_v22 = vsub.f32 1.0, %v555_v39 }
  0x71   : > { %v484_v42 = vmul.f32 %v710_v24, %v476_v44 }
  0x72   : > { %v571_v35 = vmul.f32 %v563_v22, %v403_v45 }
  0x73   : > { %v492_v43 = vadd.f32 -0.28449672, %v484_v42 }
  0x74   : > { %v579_v46 = vadd.f32 1.0, %v571_v35 }
  0x75   : > { %v500_v49 = vmul.f32 %v710_v24, %v492_v43 }
  0x76   : > { %v587_v47 = vmul.f32 %v579_v46, %v379_v2 }
  0x77   : > { %v508_v27 = vadd.f32 0.2548296, %v500_v49 }
  0x78   : > { %596 = vst.msk [vmem:[%s990_s8 + $0x30] sm:$0xff] %vm589_vm3, %v587_v47 }
  0x79   : > { %v516_v52 = vmul.f32 %v710_v24, %v508_v27 }
  0x7b   : > { %v556_v54 = vmul.f32 %v714_v7, %v516_v52 }
  0x7d   : > { %v564_v40 = vsub.f32 1.0, %v556_v54 }
  0x7f   : > { %v572_v37 = vmul.f32 %v564_v40, %v404_v51 }
  0x81   : > { %v580_v57 = vadd.f32 1.0, %v572_v37 }
  0x83   : > { %v588_v61 = vmul.f32 %v580_v57, %v380_v56 }
  0x85   : > { %597 = vst.msk [vmem:[%s990_s8 + $0x38] sm:$0xff] %vm589_vm3, %v588_v61 }
  0x86 PF: > { %s12_s9 = sadd.s32 1, %s721_s9  }
  0x87   : > { %p9_p4 = scmp.ge.s32.totalorder %s12_s9, 4  }
  0x89   :  { %11 = sbr.rel (!%p9_p4) target bundleno = 1 (0x1), region = 58 }

// kernel: _lambda_.18
= control target key start
LH: loop header
LB: loop body
LE: loop exit
PB: predicated region body
PF: predicated region fallthrough
CT: control target
= control target key end

     0   :  { %s422_s12 = smov 0   ;;  %s469_s0 = inlined_call_operand.vmem [shape: f32[128,28], index: 0, kind: input, shape index: {}]   ;;  %s470_s1 = inlined_call_operand.vmem [shape: f32[28,28], index: 1, kind: input, shape index: {}]   ;;  %s471_s2 = inlined_call_operand.vmem [shape: f32[1,28], index: 2, kind: input, shape index: {}]   ;;  %s472_s3 = inlined_call_operand.vmem [shape: f32[128,28], index: 3, kind: output, shape index: {}]  }
   0x1 LB: > { %s346_s13 = sadd.s32 4294967295, %s400_s12   ;;  %p350_p0 = scmp.ge.s32.totalorder %s400_s12, 1  ;;  %s400_s12 = sphi %s422_s12, %s13_s12  }
   0x2   : > { %p138_p1 = scmp.lt.s32.totalorder %s400_s12, 3 }
   0x4   : > { %p139_p2 = pnand %p350_p0, %p138_p1 }
   0x5   : > { %v187_v0 = vld [vmem:[%s470_s1] sm:$0xff] (!%p139_p2)  ;;  %v188_v1 = vld [vmem:[%s470_s1 + $0x8] sm:$0xff] (!%p139_p2)  ;;  %v189_v2 = vld [vmem:[%s470_s1 + $0x10] sm:$0xff] (!%p139_p2)  ;;  %s351_s20 = sshll.u32 (!%p139_p2), %s346_s13, 3  ;;  %vm213_vm0 = vcmask (!%p139_p2), 1045504   ;;  %vm200_vm1 = vcmask (!%p139_p2), 228352  }
   0x6   : > { %142 = sbr.rel (%p139_p2) target bundleno = 239 (0xef), region = 32  ;;  %v191_v3 = vpack.c.bf16 (!%p139_p2), %v188_v1, %v187_v0  ;;  %v190_v4 = vld [vmem:[%s470_s1 + $0x18] sm:$0xf] (!%p139_p2)  ;;  %p163_p3 = scmp.lt.s32.totalorder (!%p139_p2), %s351_s20, 15  ;;  %v355_v19 = vld [vmem:[%s471_s2] ss:$0 sm:$0xff] (!%p139_p2) }
   0x7   : > { %v192_v5 = vpack.c.bf16 (!%p139_p2), %v190_v4, %v189_v2 }
   0x8   : > { %368 = vmatprep.subr.bf16.mxu0 (!%p139_p2), %v191_v3  ;;  %380 = vmatprep.subr.bf16.mxu1 (!%p139_p2), %v191_v3 }
   0x9   : > { %369 = vmatpush3.bf16.msra.mxu0 (!%p139_p2), %v191_v3  ;;  %382 = vmatpush3.bf16.msra.mxu1 (!%p139_p2), %v191_v3  ;;  %v215_v6 = vsel (!%p139_p2), %vm213_vm0, %v192_v5, 0 }
   0xa   : > { %384 = vmatprep.subr.msk.bf16.mxu0 (!%p139_p2), %vm213_vm0, %v192_v5  ;;  %385 = vmatprep.subr.msk.bf16.mxu1 (!%p139_p2), %vm213_vm0, %v192_v5 }
   0xd   : > { %s474_s20 = smov (!%p163_p3, %s351_s20), 15  ;;  %371 = vmatpush3.bf16.msra.mxu0 %v215_v6  ;;  %383 = vmatpush3.bf16.msra.mxu1 %v215_v6 }
   0xe   : > { %s352_s23 = sshll.u32 %s474_s20, 3 }
   0xf   : > { %s166_s26 = scalar_lea.vmem %s469_s0, %s352_s23  ;;  %s172_s4 = scalar_lea.vmem %s472_s3, %s352_s23 }
  0x10   : > { %v175_v7 = vld [vmem:[%s166_s26] sm:$0xff]  ;;  %v176_v8 = vld [vmem:[%s166_s26 + $0x8] sm:$0xff]  ;;  %v177_v12 = vld [vmem:[%s166_s26 + $0x10] sm:$0xff] }
  0x11   : > { %v179_v9 = vld [vmem:[%s166_s26 + $0x20] sm:$0xff]  ;;  %v183_v10 = vpack.c.bf16 %v176_v8, %v175_v7  ;;  %v180_v11 = vld [vmem:[%s166_s26 + $0x28] sm:$0xff]  ;;  %v178_v13 = vld [vmem:[%s166_s26 + $0x18] sm:$0xff] }
  0x12   : > { %v185_v14 = vpack.c.bf16 %v180_v11, %v179_v9  ;;  %v184_v15 = vpack.c.bf16 %v178_v13, %v177_v12  ;;  %v181_v16 = vld [vmem:[%s166_s26 + $0x30] sm:$0xff]  ;;  %v182_v17 = vld [vmem:[%s166_s26 + $0x38] sm:$0xff] }
  0x13   : > { %372 = vmatprep.mubr.msk.bf16.mxu0 %vm200_vm1, %v183_v10  ;;  %v186_v18 = vpack.c.bf16 %v182_v17, %v181_v16 }
  0x14   : > { %376 = vmatprep.mubr.msk.bf16.mxu1 %vm200_vm1, %v185_v14  ;;  %373 = vmatmul.mubr.msk.bf16.vlgmr.msra.gmra.mrb[0].mxu0 %vm200_vm1, %v184_v15 }
  0x15   : > { %377 = vmatmul.mubr.msk.bf16.vlgmr.msra.gmra.mrb[0].mxu1 %vm200_vm1, %v186_v18 }
  0xe7   : > { %v374_v20 = vpop.f32.mrb[0].mxu0 }
  0xe8   : > { %v260_v21 = vadd.f32 %v374_v20, %v355_v19  ;;  %v378_v22 = vpop.f32.mrb[0].mxu1  ;;  %v251_v23 = vpop.f32.mrb[1].mxu0 }
  0xe9   : > { %v276_v24 = vadd.f32 %v378_v22, %v355_v19  ;;  %v252_v25 = vadd.f32 %v355_v19, %v251_v23  ;;  %v267_v26 = vpop.f32.mrb[1].mxu1  ;;  %v375_v27 = vpop.f32.mrb[2].mxu0 }
  0xea   : > { %284 = vst.msk [vmem:[%s172_s4 + $0x10] sm:$0xff] %vm200_vm1, %v260_v21  ;;  %v268_v28 = vadd.f32 %v355_v19, %v267_v26  ;;  %v263_v29 = vadd.f32 %v375_v27, %v355_v19  ;;  %v379_v30 = vpop.f32.mrb[2].mxu1  ;;  %v254_v31 = vpop.f32.mrb[3].mxu0 }
  0xeb   : > { %288 = vst.msk [vmem:[%s172_s4 + $0x30] sm:$0xff] %vm200_vm1, %v276_v24  ;;  %282 = vst.msk [vmem:[%s172_s4] sm:$0xff] %vm200_vm1, %v252_v25  ;;  %v279_v32 = vadd.f32 %v379_v30, %v355_v19  ;;  %v255_v33 = vadd.f32 %v355_v19, %v254_v31  ;;  %v270_v34 = vpop.f32.mrb[3].mxu1 }
  0xec   : > { %286 = vst.msk [vmem:[%s172_s4 + $0x20] sm:$0xff] %vm200_vm1, %v268_v28  ;;  %285 = vst.msk [vmem:[%s172_s4 + $0x18] sm:$0xff] %vm200_vm1, %v263_v29  ;;  %v271_v35 = vadd.f32 %v355_v19, %v270_v34 }
  0xed   : > { %289 = vst.msk [vmem:[%s172_s4 + $0x38] sm:$0xff] %vm200_vm1, %v279_v32  ;;  %283 = vst.msk [vmem:[%s172_s4 + $0x8] sm:$0xff] %vm200_vm1, %v255_v33 }
  0xee   : > { %287 = vst.msk [vmem:[%s172_s4 + $0x28] sm:$0xff] %vm200_vm1, %v271_v35 }
  0xef PF: > { %s13_s12 = sadd.s32 1, %s400_s12  }
  0xf0   : > { %p10_p4 = scmp.ge.s32.totalorder %s13_s12, 4  }
  0xf2   :  { %12 = sbr.rel (!%p10_p4) target bundleno = 1 (0x1), region = 62 }

// kernel: _lambda_.17
= control target key start
LH: loop header
LB: loop body
LE: loop exit
PB: predicated region body
PF: predicated region fallthrough
CT: control target
= control target key end

     0   :  { %s1468_s15 = smov 0   ;;  %s1820_s0 = inlined_call_operand.vmem [shape: f32[8,16,28], index: 0, kind: input, shape index: {}]   ;;  %s1821_s1 = inlined_call_operand.vmem [shape: f32[8,16,28], index: 1, kind: input, shape index: {}]   ;;  %s1822_s2 = inlined_call_operand.vmem [shape: f32[8,16,28], index: 2, kind: input, shape index: {}]   ;;  %s1823_s3 = inlined_call_operand.vmem [shape: f32[8,1,1], index: 3, kind: input, shape index: {}]   ;;  %s1824_s4 = inlined_call_operand.vmem [shape: f32[8,16,28], index: 4, kind: output, shape index: {}]  }
   0x1 LB: > { %s1243_s16 = sadd.s32 4294967295, %s1438_s15   ;;  %p1247_p0 = scmp.ge.s32.totalorder %s1438_s15, 1  ;;  %s1438_s15 = sphi %s1468_s15, %s14_s15  }
   0x2   : > { %p198_p1 = scmp.lt.s32.totalorder %s1438_s15, 3 }
   0x4   : > { %p199_p2 = pnand %p1247_p0, %p198_p1 }
   0x5   : > { %s1248_s17 = sshll.u32 (!%p199_p2), %s1243_s16, 2  ;;  %vm308_vm0 = vcmask (!%p199_p2), 228352   ;;  %vm445_vm1 = vcmask (!%p199_p2), 130048   ;;  %vm1442_vm2 = vmmov (!%p199_p2), 0   ;;  %vm775_vm3 = vcmask (!%p199_p2), 224256  }
   0x6   : > { %202 = sbr.rel (%p199_p2) target bundleno = 687 (0x2af), region = 36  ;;  %p243_p3 = scmp.lt.s32.totalorder (!%p199_p2), %s1248_s17, 7  ;;  %vm958_vm4 = vcmask (!%p199_p2), 1045504  }
   0xd   : > { %s1826_s17 = smov (!%p243_p3, %s1248_s17), 7 }
   0xe   : > { %s1479_s18 = sshll.u32 %s1826_s17, 4  ;;  %s266_s27 = scalar_lea.vmem %s1823_s3, %s1826_s17 }
   0xf   : > { %s254_s21 = scalar_lea.vmem %s1821_s1, %s1479_s18  ;;  %s1495_s24 = scalar_lea.vmem %s1820_s0, %s1479_s18 }
  0x10   : > { %v1485_v0 = vld [vmem:[%s254_s21] sm:$0xff]  ;;  %v1487_v1 = vld [vmem:[%s254_s21 + $0x8] sm:$0xff]  ;;  %v1505_v7 = vld [vmem:[%s254_s21 + $0x10] sm:$0xff]  ;;  %s1763_s30 = scalar_lea.vmem %s1822_s2, %s1479_s18  ;;  %s273_s7 = scalar_lea.vmem %s1824_s4, %s1479_s18 }
  0x11   : > { %v1489_v2 = vld [vmem:[%s254_s21 + $0x20] sm:$0xff]  ;;  %v361_v3 = vmul.f32 %v1485_v0, %v1485_v0  ;;  %v362_v4 = vmul.f32 %v1487_v1, %v1487_v1  ;;  %v1501_v5 = vld [vmem:[%s254_s21 + $0x28] sm:$0xff]  ;;  %v1507_v8 = vld [vmem:[%s254_s21 + $0x18] sm:$0xff]  ;;  %v363_v10 = vmul.f32 %v1505_v7, %v1505_v7 }
  0x12   : > { %v365_v6 = vmul.f32 %v1489_v2, %v1489_v2  ;;  %v366_v9 = vmul.f32 %v1501_v5, %v1501_v5  ;;  %v364_v11 = vmul.f32 %v1507_v8, %v1507_v8  ;;  %v1515_v12 = vld [vmem:[%s254_s21 + $0x30] sm:$0xff]  ;;  %v1517_v13 = vld [vmem:[%s254_s21 + $0x38] sm:$0xff]  ;;  %v1525_v18 = vld [vmem:[%s1495_s24] sm:$0xff] }
  0x13   : > { %v369_v14 = vsel %vm308_vm0, %v361_v3, 0.0  ;;  %v370_v15 = vsel %vm308_vm0, %v362_v4, 0.0  ;;  %v367_v17 = vmul.f32 %v1515_v12, %v1515_v12  ;;  %v1528_v19 = vld [vmem:[%s1495_s24 + $0x8] sm:$0xff]  ;;  %v1531_v20 = vld [vmem:[%s1495_s24 + $0x10] sm:$0xff]  ;;  %v378_v23 = vsel %vm308_vm0, %v363_v10, 0.0  ;;  %v1537_v25 = vld [vmem:[%s1495_s24 + $0x18] sm:$0xff] }
  0x14   : > { %v387_v16 = vsel %vm308_vm0, %v365_v6, 0.0  ;;  %v371_v21 = vadd.f32 %v370_v15, %v369_v14  ;;  %v388_v22 = vsel %vm308_vm0, %v366_v9, 0.0  ;;  %v379_v24 = vsel %vm308_vm0, %v364_v11, 0.0  ;;  %v1554_v45 = vld [vmem:[%s1495_s24 + $0x20] sm:$0xff]  ;;  %v1557_v46 = vld [vmem:[%s1495_s24 + $0x28] sm:$0xff]  ;;  %v1566_v63 = vld [vmem:[%s1495_s24 + $0x30] sm:$0xff] }
  0x15   : > { %v389_v26 = vadd.f32 %v388_v22, %v387_v16  ;;  %v380_v27 = vadd.f32 %v379_v24, %v378_v23  ;;  %v368_v28 = vmul.f32 %v1517_v13, %v1517_v13  ;;  %v396_v29 = vsel %vm308_vm0, %v367_v17, 0.0  ;;  %v1571_v16 = vld [vmem:[%s1495_s24 + $0x38] sm:$0xff] }
  0x16   : > { %v372_v30 = vrot.slane %v371_v21, 4  ;;  %v300_v31 = vmul.f32 %v1525_v18, %v1525_v18  ;;  %v301_v32 = vmul.f32 %v1528_v19, %v1528_v19  ;;  %v302_v33 = vmul.f32 %v1531_v20, %v1531_v20 }
  0x17   : > { %v390_v34 = vrot.slane %v389_v26, 4  ;;  %v381_v35 = vrot.slane %v380_v27, 4  ;;  %v397_v36 = vsel %vm308_vm0, %v368_v28, 0.0  ;;  %v303_v37 = vmul.f32 %v1537_v25, %v1537_v25 }
  0x18   : > { %v373_v38 = vadd.f32 %v372_v30, %v371_v21  ;;  %v398_v39 = vadd.f32 %v397_v36, %v396_v29  ;;  %v309_v40 = vsel %vm308_vm0, %v300_v31, 0.0  ;;  %v310_v41 = vsel %vm308_vm0, %v301_v32, 0.0 }
  0x19   : > { %v391_v42 = vadd.f32 %v390_v34, %v389_v26  ;;  %v382_v43 = vadd.f32 %v381_v35, %v380_v27  ;;  %v311_v44 = vadd.f32 %v310_v41, %v309_v40  ;;  %v318_v49 = vsel %vm308_vm0, %v302_v33, 0.0 }
  0x1a   : > { %v374_v47 = vrot.slane %v373_v38, 2  ;;  %v399_v48 = vrot.slane %v398_v39, 4  ;;  %v319_v50 = vsel %vm308_vm0, %v303_v37, 0.0  ;;  %v304_v57 = vmul.f32 %v1554_v45, %v1554_v45 }
  0x1b   : > { %v392_v51 = vrot.slane %v391_v42, 2  ;;  %v383_v52 = vrot.slane %v382_v43, 2  ;;  %v312_v53 = vrot.slane %v311_v44, 4  ;;  %v320_v54 = vadd.f32 %v319_v50, %v318_v49 }
  0x1c   : > { %v375_v55 = vadd.f32 %v374_v47, %v373_v38  ;;  %v400_v56 = vadd.f32 %v399_v48, %v398_v39  ;;  %v305_v58 = vmul.f32 %v1557_v46, %v1557_v46  ;;  %v327_v6 = vsel %vm308_vm0, %v304_v57, 0.0 }
  0x1d   : > { %v393_v59 = vadd.f32 %v392_v51, %v391_v42  ;;  %v384_v60 = vadd.f32 %v383_v52, %v382_v43  ;;  %v313_v61 = vadd.f32 %v312_v53, %v311_v44  ;;  %v321_v62 = vrot.slane %v320_v54, 4 }
  0x1e   : > { %v376_v3 = vrot.slane %v375_v55, 1  ;;  %v401_v4 = vrot.slane %v400_v56, 2  ;;  %v328_v9 = vsel %vm308_vm0, %v305_v58, 0.0  ;;  %v306_v23 = vmul.f32 %v1566_v63, %v1566_v63 }
  0x1f   : > { %v394_v10 = vrot.slane %v393_v59, 1  ;;  %v385_v11 = vrot.slane %v384_v60, 1  ;;  %v314_v14 = vrot.slane %v313_v61, 2  ;;  %v322_v15 = vadd.f32 %v321_v62, %v320_v54 }
  0x20   : > { %v377_v17 = vadd.f32 %v376_v3, %v375_v55  ;;  %v402_v21 = vadd.f32 %v401_v4, %v400_v56  ;;  %v329_v22 = vadd.f32 %v328_v9, %v327_v6  ;;  %v307_v32 = vmul.f32 %v1571_v16, %v1571_v16 }
  0x21   : > { %v395_v24 = vadd.f32 %v394_v10, %v393_v59  ;;  %v386_v26 = vadd.f32 %v385_v11, %v384_v60  ;;  %v315_v27 = vadd.f32 %v314_v14, %v313_v61  ;;  %v323_v28 = vrot.slane %v322_v15, 2 }
  0x22   : > { %v405_v29 = vmax.f32 %v377_v17, 1e-24  ;;  %v403_v30 = vrot.slane %v402_v21, 1  ;;  %v330_v31 = vrot.slane %v329_v22, 4  ;;  %v336_v39 = vsel %vm308_vm0, %v306_v23, 0.0 }
  0x23   : > { %v407_v33 = vmax.f32 %v395_v24, 1e-24  ;;  %v406_v34 = vmax.f32 %v386_v26, 1e-24  ;;  %v316_v35 = vrot.slane %v315_v27, 1  ;;  %v324_v36 = vadd.f32 %v323_v28, %v322_v15 }
  0x24   : > { %1376 = vrsqrt.f32 %v405_v29  ;;  %v404_v37 = vadd.f32 %v403_v30, %v402_v21  ;;  %v331_v38 = vadd.f32 %v330_v31, %v329_v22  ;;  %v337_v42 = vsel %vm308_vm0, %v307_v32, 0.0 }
  0x25   : > { %1378 = vrsqrt.f32 %v407_v33  ;;  %v317_v40 = vadd.f32 %v316_v35, %v315_v27  ;;  %v325_v41 = vrot.slane %v324_v36, 1  ;;  %v338_v47 = vadd.f32 %v337_v42, %v336_v39 }
  0x26   : > { %1380 = vrsqrt.f32 %v406_v34  ;;  %v408_v43 = vmax.f32 %v404_v37, 1e-24  ;;  %v332_v44 = vrot.slane %v331_v38, 2  ;;  %v1272_v34 = vld [vmem:[%s266_s27 + $0x3] ss:$0 sm:$0xff] }
  0x27   : > { %v345_v48 = vmax.f32 %v317_v40, 1e-24  ;;  %v326_v49 = vadd.f32 %v325_v41, %v324_v36  ;;  %v339_v51 = vrot.slane %v338_v47, 4  ;;  %v1441_v41 = vmov 0.0  }
  0x28   : > { %1382 = vrsqrt.f32 %v408_v43  ;;  %v333_v50 = vadd.f32 %v332_v44, %v331_v38 }
  0x29   : > { %1384 = vrsqrt.f32 %v345_v48  ;;  %v346_v52 = vmax.f32 %v326_v49, 1e-24  ;;  %v340_v54 = vadd.f32 %v339_v51, %v338_v47 }
  0x2a   : > { %v334_v53 = vrot.slane %v333_v50, 1 }
  0x2b   : > { %1386 = vrsqrt.f32 %v346_v52  ;;  %v341_v56 = vrot.slane %v340_v54, 2 }
  0x2c   : > { %v335_v55 = vadd.f32 %v334_v53, %v333_v50 }
  0x2d   : > { %v342_v59 = vadd.f32 %v341_v56, %v340_v54 }
  0x2e   : > { %v1377_v57 = vpop.eup %1376  ;;  %v347_v58 = vmax.f32 %v335_v55, 1e-24 }
  0x2f   : > { %v1379_v60 = vpop.eup %1378  ;;  %v413_v61 = vmul.f32 %v1377_v57, %v1485_v0  ;;  %v414_v62 = vmul.f32 %v1377_v57, %v1487_v1  ;;  %v343_v9 = vrot.slane %v342_v59, 1 }
  0x30   : > { %v1381_v3 = vpop.eup %1380  ;;  %v417_v4 = vmul.f32 %v1379_v60, %v1489_v2  ;;  %v418_v6 = vmul.f32 %v1379_v60, %v1501_v5  ;;  %1388 = vrsqrt.f32 %v347_v58 }
  0x31   : > { %v421_v10 = vpack.c.bf16 %v414_v62, %v413_v61  ;;  %v415_v11 = vmul.f32 %v1381_v3, %v1505_v7  ;;  %v416_v14 = vmul.f32 %v1381_v3, %v1507_v8  ;;  %v344_v21 = vadd.f32 %v343_v9, %v342_v59 }
  0x32   : > { %v1383_v15 = vpop.eup %1382  ;;  %v423_v17 = vpack.c.bf16 %v418_v6, %v417_v4 }
  0x33   : > { %v1385_v22 = vpop.eup %1384  ;;  %429 = vxpose.xlu0.c.b16.start.end [1/1] (short) (narrow) %v421_v10, 32  ;;  %v419_v0 = vmul.f32 %v1383_v15, %v1515_v12  ;;  %v420_v1 = vmul.f32 %v1383_v15, %v1517_v13  ;;  %v422_v2 = vpack.c.bf16 %v416_v14, %v415_v11  ;;  %v348_v24 = vmax.f32 %v344_v21, 1e-24 }
  0x34   : > { %572 = vxpose.xlu1.c.b16.start.end [1/1] (short) (narrow) %v423_v17, 32  ;;  %v353_v5 = vmul.f32 %v1385_v22, %v1525_v18  ;;  %v354_v23 = vmul.f32 %v1385_v22, %v1528_v19 }
  0x35   : > { %v1387_v26 = vpop.eup %1386  ;;  %v424_v7 = vpack.c.bf16 %v420_v1, %v419_v0  ;;  %1390 = vrsqrt.f32 %v348_v24 }
  0x36   : > { %v425_v8 = vpack.c.bf16 %v354_v23, %v353_v5  ;;  %v355_v27 = vmul.f32 %v1387_v26, %v1531_v20  ;;  %v356_v28 = vmul.f32 %v1387_v26, %v1537_v25  ;;  %v1440_v20 = vmov 0   ;;  %v1270_v25 = vld [vmem:[%s266_s27 + $0x1] ss:$0 sm:$0xff] }
  0x38   : > { %501 = vxpose.xlu0.c.b16.start.end [1/1] (short) (narrow) %v422_v2, 32  ;;  %1307 = vmatprep.subr.bf16.mxu0 %v425_v8  ;;  %v426_v12 = vpack.c.bf16 %v356_v28, %v355_v27 }
  0x39   : > { %643 = vxpose.xlu1.c.b16.start.end [1/1] (short) (narrow) %v424_v7, 32  ;;  %1308 = vmatpush3.bf16.msra.mxu0 %v425_v8 }
  0x3a   : > { %v1389_v13 = vpop.eup %1388  ;;  %1313 = vmatprep.subr.bf16.mxu1 %v426_v12 }
  0x3b   : > { %v357_v18 = vmul.f32 %v1389_v13, %v1554_v45  ;;  %v358_v19 = vmul.f32 %v1389_v13, %v1557_v46  ;;  %1314 = vmatpush3.bf16.msra.mxu1 %v426_v12  ;;  %v1269_v45 = vld [vmem:[%s266_s27] ss:$0 sm:$0xff]  ;;  %v1271_v46 = vld [vmem:[%s266_s27 + $0x2] ss:$0 sm:$0xff] }
  0x3d   : > { %v427_v29 = vpack.c.bf16 %v358_v19, %v357_v18  ;;  %1375 = vset.pattern.permute.xlu1 %v1440_v20 }
  0x3f   : > { %1319 = vmatprep.subr.bf16.mxu0 %v427_v29  ;;  %v1391_v30 = vpop.eup %1390 }
  0x40   : > { %v359_v31 = vmul.f32 %v1391_v30, %v1566_v63  ;;  %v360_v32 = vmul.f32 %v1391_v30, %v1571_v16 }
  0x41   : > { %1374 = vset.pattern.permute.xlu0 %v1440_v20  ;;  %743 = vperm.xlu1 %1375, %v1270_v25  }
  0x42   : > { %v428_v33 = vpack.c.bf16 %v360_v32, %v359_v31 }
  0x44   : > { %1325 = vmatprep.subr.bf16.mxu1 %v428_v33 }
  0x45   : > { %739 = vperm.xlu0 %1374, %v1269_v45   ;;  %747 = vperm.xlu1 %1375, %v1271_v46  }
  0x49   : > { %751 = vperm.xlu1 %1375, %v1272_v34  }
  0x99   : > { %v437_v35 = vpop.trf.xlu0 }
  0x9a   : > { %1309 = vmatprep.mubr.msk.bf16.mxu0 %vm445_vm1, %v437_v35  ;;  %v580_v36 = vpop.trf.xlu1 }
  0x9d   : > { %v438_v37 = vpop.trf.xlu0 }
  0x9e   : > { %1310 = vmatmul.mubr.msk.bf16.vlgmr.msra.gmra.mrb[0].mxu0 %vm445_vm1, %v438_v37  ;;  %v581_v63 = vpop.trf.xlu1 }
  0x9f   : > { %1321 = vmatprep.mubr.msk.bf16.mxu0 %vm445_vm1, %v580_v36  ;;  %1320 = vmatpush3.bf16.msra.mxu0 %v427_v29 }
  0xa0   : > { %1331 = vmatprep.subr.bf16.mxu0 %v1441_v41 }
  0xa1   : > { %v509_v16 = vpop.trf.xlu0 }
  0xa2   : > { %1315 = vmatprep.mubr.msk.bf16.mxu1 %vm445_vm1, %v509_v16  ;;  %v651_v38 = vpop.trf.xlu1 }
  0xa5   : > { %v510_v39 = vpop.trf.xlu0 }
  0xa6   : > { %1316 = vmatmul.mubr.msk.bf16.vlgmr.msra.gmra.mrb[0].mxu1 %vm445_vm1, %v510_v39  ;;  %1322 = vmatmul.mubr.msk.bf16.vlgmr.msra.gmra.mrb[4].mxu0 %vm445_vm1, %v581_v63  ;;  %v652_v40 = vpop.trf.xlu1 }
  0xa7   : > { %1326 = vmatpush3.bf16.msra.mxu1 %v428_v33  ;;  %1327 = vmatprep.mubr.msk.bf16.mxu1 %vm445_vm1, %v651_v38 }
  0xa8   : > { %1339 = vmatprep.subr.bf16.mxu1 %v1441_v41  ;;  %1335 = vmatprep.mubr.msk.bf16.mxu0 %vm1442_vm2, %v1441_v41 }
  0xae   : > { %1328 = vmatmul.mubr.msk.bf16.vlgmr.msra.gmra.mrb[4].mxu1 %vm445_vm1, %v652_v40 }
  0xaf   : > { %1343 = vmatprep.mubr.msk.bf16.mxu1 %vm1442_vm2, %v1441_v41 }
  0xc0   : > { %v744_v47 = vpop.permute.xlu1 %743 }
  0xc4   : > { %v740_v42 = vpop.permute.xlu0 %739  ;;  %v748_v57 = vpop.permute.xlu1 %747 }
  0xc8   : > { %v752_v20 = vpop.permute.xlu1 %751 }
 0x171   : > { %v1311_v43 = vpop.f32.mrb[0].mxu0 }
 0x172   : > { %v486_v44 = vpop.f32.mrb[1].mxu0  ;;  %v1615_v51 = vmul.f32 %v1311_v43, %v740_v42 }
 0x173   : > { %v1613_v48 = vmul.f32 %v740_v42, %v486_v44  ;;  %v1312_v49 = vpop.f32.mrb[2].mxu0 }
 0x174   : > { %v489_v50 = vpop.f32.mrb[3].mxu0  ;;  %v1621_v54 = vmul.f32 %v1312_v49, %v740_v42  ;;  %v773_v58 = vsel %vm308_vm0, %v1615_v51, -inf }
 0x175   : > { %v1617_v52 = vmul.f32 %v740_v42, %v489_v50  ;;  %v770_v53 = vsel %vm308_vm0, %v1613_v48, -inf }
 0x176   : > { %v776_v4 = vsel %vm775_vm3, %v1621_v54, -inf }
 0x177   : > { %v771_v55 = vsel %vm308_vm0, %v1617_v52, -inf }
 0x178   : > { %v772_v56 = vmax.f32 %v770_v53, %v771_v55 }
 0x179   : > { %v1317_v59 = vpop.f32.mrb[0].mxu1  ;;  %v1323_v60 = vpop.f32.mrb[4].mxu0 }
 0x17a   : > { %v774_v61 = vmax.f32 %v772_v56, %v773_v58  ;;  %v557_v62 = vpop.f32.mrb[1].mxu1  ;;  %v628_v3 = vpop.f32.mrb[5].mxu0  ;;  %v1633_v21 = vmul.f32 %v1317_v59, %v744_v47  ;;  %v1637_v1 = vmul.f32 %v1323_v60, %v748_v57 }
 0x17b   : > { %v1629_v6 = vmul.f32 %v744_v47, %v557_v62  ;;  %v1631_v9 = vmul.f32 %v748_v57, %v628_v3  ;;  %v1318_v10 = vpop.f32.mrb[2].mxu1  ;;  %v1324_v11 = vpop.f32.mrb[6].mxu0 }
 0x17c   : > { %v777_v14 = vmax.f32 %v774_v61, %v776_v4  ;;  %v560_v15 = vpop.f32.mrb[3].mxu1  ;;  %v631_v17 = vpop.f32.mrb[7].mxu0  ;;  %v1645_v24 = vmul.f32 %v1318_v10, %v744_v47  ;;  %v1649_v8 = vmul.f32 %v1324_v11, %v748_v57  ;;  %v787_v12 = vsel %vm308_vm0, %v1633_v21, -inf }
 0x17d   : > { %v1635_v22 = vmul.f32 %v744_v47, %v560_v15  ;;  %v1639_v2 = vmul.f32 %v748_v57, %v631_v17  ;;  %v784_v5 = vsel %vm308_vm0, %v1629_v6, -inf  ;;  %v797_v23 = vsel %vm308_vm0, %v1631_v9, -inf }
 0x17e   : > { %v778_v0 = vrot.slane %v777_v14, 4  ;;  %v800_v29 = vsel %vm308_vm0, %v1637_v1, -inf  ;;  %v789_v31 = vsel %vm775_vm3, %v1645_v24, -inf  ;;  %v802_v34 = vsel %vm775_vm3, %v1649_v8, -inf }
 0x17f   : > { %v785_v26 = vsel %vm308_vm0, %v1635_v22, -inf  ;;  %v798_v28 = vsel %vm308_vm0, %v1639_v2, -inf }
 0x180   : > { %v779_v7 = vmax.f32 %v777_v14, %v778_v0  ;;  %v786_v27 = vmax.f32 %v784_v5, %v785_v26  ;;  %v799_v13 = vmax.f32 %v797_v23, %v798_v28 }
 0x181   : > { %v1329_v18 = vpop.f32.mrb[4].mxu1 }
 0x182   : > { %v780_v19 = vrot.slane %v779_v7, 2  ;;  %v788_v25 = vmax.f32 %v786_v27, %v787_v12  ;;  %v699_v30 = vpop.f32.mrb[5].mxu1  ;;  %v801_v32 = vmax.f32 %v799_v13, %v800_v29  ;;  %v1663_v63 = vmul.f32 %v1329_v18, %v752_v20 }
 0x183   : > { %v1659_v45 = vmul.f32 %v752_v20, %v699_v30  ;;  %v1330_v33 = vpop.f32.mrb[6].mxu1 }
 0x184   : > { %v781_v46 = vmax.f32 %v779_v7, %v780_v19  ;;  %v790_v35 = vmax.f32 %v788_v25, %v789_v31  ;;  %v702_v36 = vpop.f32.mrb[7].mxu1  ;;  %v803_v37 = vmax.f32 %v801_v32, %v802_v34  ;;  %v1669_v43 = vmul.f32 %v1330_v33, %v752_v20 }
 0x185   : > { %v1665_v16 = vmul.f32 %v752_v20, %v702_v36  ;;  %v810_v42 = vsel %vm308_vm0, %v1659_v45, -inf  ;;  %v813_v55 = vsel %vm308_vm0, %v1663_v63, -inf }
 0x186   : > { %v782_v38 = vrot.slane %v781_v46, 1  ;;  %v791_v39 = vrot.slane %v790_v35, 4  ;;  %v804_v40 = vrot.slane %v803_v37, 4  ;;  %v815_v62 = vsel %vm775_vm3, %v1669_v43, -inf }
 0x187   : > { %v811_v44 = vsel %vm308_vm0, %v1665_v16, -inf }
 0x188   : > { %v783_v47 = vmax.f32 %v781_v46, %v782_v38  ;;  %v792_v49 = vmax.f32 %v790_v35, %v791_v39  ;;  %v812_v50 = vmax.f32 %v810_v42, %v811_v44  ;;  %v805_v53 = vmax.f32 %v803_v37, %v804_v40 }
 0x18a   : > { %v823_v56 = vsub.f32 %v1613_v48, %v783_v47  ;;  %v824_v57 = vsub.f32 %v1617_v52, %v783_v47  ;;  %v825_v58 = vsub.f32 %v1615_v51, %v783_v47  ;;  %v826_v59 = vsub.f32 %v1621_v54, %v783_v47 }
 0x18b   : > { %v793_v60 = vrot.slane %v792_v49, 2  ;;  %v806_v61 = vrot.slane %v805_v53, 2  ;;  %v814_v3 = vmax.f32 %v812_v50, %v813_v55 }
 0x18c   : > { %v839_v4 = vmul.f32 1.442695, %v823_v56  ;;  %v841_v10 = vmul.f32 1.442695, %v824_v57  ;;  %v843_v11 = vmul.f32 1.442695, %v825_v58 }
 0x18d   : > { %v845_v14 = vmul.f32 1.442695, %v826_v59  ;;  %v794_v15 = vmax.f32 %v792_v49, %v793_v60  ;;  %v807_v17 = vmax.f32 %v805_v53, %v806_v61  ;;  %v816_v0 = vmax.f32 %v814_v3, %v815_v62 }
 0x18e   : > { %1392 = vpow2.f32 %v839_v4 }
 0x18f   : > { %1394 = vpow2.f32 %v841_v10  ;;  %v795_v48 = vrot.slane %v794_v15, 1  ;;  %v808_v52 = vrot.slane %v807_v17, 1  ;;  %v817_v51 = vrot.slane %v816_v0, 4 }
 0x190   : > { %1396 = vpow2.f32 %v843_v11 }
 0x191   : > { %1398 = vpow2.f32 %v845_v14  ;;  %v796_v54 = vmax.f32 %v794_v15, %v795_v48  ;;  %v809_v5 = vmax.f32 %v807_v17, %v808_v52  ;;  %v818_v23 = vmax.f32 %v816_v0, %v817_v51 }
 0x193   : > { %v827_v26 = vsub.f32 %v1629_v6, %v796_v54  ;;  %v828_v7 = vsub.f32 %v1635_v22, %v796_v54  ;;  %v829_v27 = vsub.f32 %v1633_v21, %v796_v54  ;;  %v830_v28 = vsub.f32 %v1645_v24, %v796_v54 }
 0x194   : > { %v831_v12 = vsub.f32 %v1631_v9, %v809_v5  ;;  %v832_v13 = vsub.f32 %v1639_v2, %v809_v5  ;;  %v833_v18 = vsub.f32 %v1637_v1, %v809_v5  ;;  %v834_v19 = vsub.f32 %v1649_v8, %v809_v5 }
 0x195   : > { %v847_v29 = vmul.f32 1.442695, %v827_v26  ;;  %v849_v20 = vmul.f32 1.442695, %v828_v7  ;;  %v851_v25 = vmul.f32 1.442695, %v829_v27 }
 0x196   : > { %v853_v30 = vmul.f32 1.442695, %v830_v28  ;;  %v855_v6 = vmul.f32 1.442695, %v831_v12  ;;  %v819_v31 = vrot.slane %v818_v23, 2 }
 0x197   : > { %1400 = vpow2.f32 %v847_v29  ;;  %v857_v21 = vmul.f32 1.442695, %v832_v13  ;;  %v859_v1 = vmul.f32 1.442695, %v833_v18  ;;  %v861_v33 = vmul.f32 1.442695, %v834_v19 }
 0x198   : > { %v1689_v22 = vpop.eup %1392  ;;  %1402 = vpow2.f32 %v849_v20  ;;  %v820_v2 = vmax.f32 %v818_v23, %v819_v31 }
 0x199   : > { %v1691_v24 = vpop.eup %1394  ;;  %v871_v9 = vsel %vm308_vm0, %v1689_v22, 0.0  ;;  %1404 = vpow2.f32 %v851_v25 }
 0x19a   : > { %v1695_v8 = vpop.eup %1396  ;;  %v872_v32 = vsel %vm308_vm0, %v1691_v24, 0.0  ;;  %1406 = vpow2.f32 %v853_v30  ;;  %v821_v35 = vrot.slane %v820_v2, 1 }
 0x19b   : > { %v1699_v46 = vpop.eup %1398  ;;  %v873_v34 = vadd.f32 %v872_v32, %v871_v9  ;;  %1408 = vpow2.f32 %v855_v6  ;;  %v874_v36 = vsel %vm308_vm0, %v1695_v8, 0.0 }
 0x19c   : > { %1410 = vpow2.f32 %v857_v21  ;;  %v822_v38 = vmax.f32 %v820_v2, %v821_v35  ;;  %v876_v39 = vsel %vm775_vm3, %v1699_v46, 0.0 }
 0x19d   : > { %v875_v37 = vadd.f32 %v874_v36, %v873_v34  ;;  %1412 = vpow2.f32 %v859_v1 }
 0x19e   : > { %1414 = vpow2.f32 %v861_v33  ;;  %v835_v42 = vsub.f32 %v1659_v45, %v822_v38  ;;  %v836_v44 = vsub.f32 %v1665_v16, %v822_v38  ;;  %v837_v47 = vsub.f32 %v1663_v63, %v822_v38 }
 0x19f   : > { %v877_v40 = vadd.f32 %v876_v39, %v875_v37  ;;  %v838_v49 = vsub.f32 %v1669_v43, %v822_v38 }
 0x1a0   : > { %v863_v55 = vmul.f32 1.442695, %v835_v42  ;;  %v865_v56 = vmul.f32 1.442695, %v836_v44  ;;  %v867_v59 = vmul.f32 1.442695, %v837_v47 }
 0x1a1   : > { %v1709_v50 = vpop.eup %1400  ;;  %v878_v53 = vrot.slane %v877_v40, 4  ;;  %v869_v60 = vmul.f32 1.442695, %v838_v49 }
 0x1a2   : > { %v1711_v57 = vpop.eup %1402  ;;  %v884_v58 = vsel %vm308_vm0, %v1709_v50, 0.0  ;;  %1416 = vpow2.f32 %v863_v55 }
 0x1a3   : > { %v1715_v61 = vpop.eup %1404  ;;  %v879_v45 = vadd.f32 %v878_v53, %v877_v40  ;;  %v885_v63 = vsel %vm308_vm0, %v1711_v57, 0.0  ;;  %1418 = vpow2.f32 %v865_v56 }
 0x1a4   : > { %v1719_v16 = vpop.eup %1406  ;;  %v886_v43 = vadd.f32 %v885_v63, %v884_v58  ;;  %v887_v4 = vsel %vm308_vm0, %v1715_v61, 0.0  ;;  %1420 = vpow2.f32 %v867_v59 }
 0x1a5   : > { %v1721_v62 = vpop.eup %1408  ;;  %v880_v3 = vrot.slane %v879_v45, 2  ;;  %1422 = vpow2.f32 %v869_v60  ;;  %v889_v0 = vsel %vm775_vm3, %v1719_v16, 0.0 }
 0x1a6   : > { %v1725_v10 = vpop.eup %1410  ;;  %v888_v11 = vadd.f32 %v887_v4, %v886_v43  ;;  %v897_v14 = vsel %vm308_vm0, %v1721_v62, 0.0 }
 0x1a7   : > { %v1729_v15 = vpop.eup %1412  ;;  %v881_v17 = vadd.f32 %v880_v3, %v879_v45  ;;  %v898_v48 = vsel %vm308_vm0, %v1725_v10, 0.0 }
 0x1a8   : > { %v1735_v52 = vpop.eup %1414  ;;  %v890_v51 = vadd.f32 %v889_v0, %v888_v11  ;;  %v899_v54 = vadd.f32 %v898_v48, %v897_v14  ;;  %v900_v23 = vsel %vm308_vm0, %v1729_v15, 0.0 }
 0x1a9   : > { %v882_v5 = vrot.slane %v881_v17, 1  ;;  %v902_v28 = vsel %vm775_vm3, %v1735_v52, 0.0 }
 0x1aa   : > { %v891_v26 = vrot.slane %v890_v51, 4  ;;  %v901_v7 = vadd.f32 %v900_v23, %v899_v54  ;;  %v294_v54 = vld [vmem:[%s1763_s30 + $0x10] sm:$0xff] }
 0x1ab   : > { %v883_v27 = vadd.f32 %v882_v5, %v881_v17 }
 0x1ac   : > { %v892_v12 = vadd.f32 %v891_v26, %v890_v51  ;;  %v903_v13 = vadd.f32 %v902_v28, %v901_v7  ;;  %v1741_v18 = vpop.eup %1416  ;;  %v296_v28 = vld [vmem:[%s1763_s30 + $0x20] sm:$0xff] }
 0x1ad   : > { %1424 = vrcp.f32 %v883_v27  ;;  %v1743_v19 = vpop.eup %1418  ;;  %v910_v25 = vsel %vm308_vm0, %v1741_v18, 0.0 }
 0x1ae   : > { %v893_v29 = vrot.slane %v892_v12, 2  ;;  %v904_v20 = vrot.slane %v903_v13, 4  ;;  %v1747_v30 = vpop.eup %1420  ;;  %v911_v6 = vsel %vm308_vm0, %v1743_v19, 0.0 }
 0x1af   : > { %v1751_v31 = vpop.eup %1422  ;;  %v912_v1 = vadd.f32 %v911_v6, %v910_v25  ;;  %v913_v2 = vsel %vm308_vm0, %v1747_v30, 0.0 }
 0x1b0   : > { %v894_v21 = vadd.f32 %v893_v29, %v892_v12  ;;  %v905_v9 = vadd.f32 %v904_v20, %v903_v13  ;;  %v915_v35 = vsel %vm775_vm3, %v1751_v31, 0.0  ;;  %v297_v12 = vld [vmem:[%s1763_s30 + $0x28] sm:$0xff] }
 0x1b1   : > { %v914_v34 = vadd.f32 %v913_v2, %v912_v1 }
 0x1b2   : > { %v895_v32 = vrot.slane %v894_v21, 1  ;;  %v906_v33 = vrot.slane %v905_v9, 2 }
 0x1b3   : > { %v916_v38 = vadd.f32 %v915_v35, %v914_v34 }
 0x1b4   : > { %v896_v36 = vadd.f32 %v895_v32, %v894_v21  ;;  %v907_v37 = vadd.f32 %v906_v33, %v905_v9  ;;  %v298_v21 = vld [vmem:[%s1763_s30 + $0x30] sm:$0xff]  ;;  %v299_v9 = vld [vmem:[%s1763_s30 + $0x38] sm:$0xff] }
 0x1b5   : > { %v917_v40 = vrot.slane %v916_v38, 4  ;;  %v946_v1 = vpack.c.bf16 %v299_v9, %v298_v21 }
 0x1b6   : > { %1426 = vrcp.f32 %v896_v36  ;;  %v908_v39 = vrot.slane %v907_v37, 1 }
 0x1b7   : > { %v1425_v42 = vpop.eup %1424  ;;  %v918_v47 = vadd.f32 %v917_v40, %v916_v38 }
 0x1b8   : > { %v909_v44 = vadd.f32 %v908_v39, %v907_v37  ;;  %v927_v49 = vmul.f32 %v1425_v42, %v1689_v22  ;;  %v928_v53 = vmul.f32 %v1425_v42, %v1691_v24  ;;  %v929_v55 = vmul.f32 %v1425_v42, %v1695_v8  ;;  %v292_v22 = vld [vmem:[%s1763_s30] sm:$0xff]  ;;  %v293_v24 = vld [vmem:[%s1763_s30 + $0x8] sm:$0xff] }
 0x1b9   : > { %v930_v56 = vmul.f32 %v1425_v42, %v1699_v46  ;;  %v919_v58 = vrot.slane %v918_v47, 2  ;;  %v943_v3 = vpack.c.bf16 %v293_v24, %v292_v22 }
 0x1ba   : > { %1428 = vrcp.f32 %v909_v44  ;;  %v947_v59 = vpack.c.bf16 %v928_v53, %v927_v49 }
 0x1bb   : > { %v948_v60 = vpack.c.bf16 %v930_v56, %v929_v55  ;;  %v920_v45 = vadd.f32 %v919_v58, %v918_v47 }
 0x1bc   : > { %1332 = vmatpush3.bf16.msra.mxu0 %v947_v59 }
 0x1bd   : > { %1333 = vmatprep.subr.bf16.mxu0 %v1441_v41  ;;  %v921_v63 = vrot.slane %v920_v45, 1  ;;  %v960_v43 = vsel %vm958_vm4, %v948_v60, 0 }
 0x1bf   : > { %v922_v11 = vadd.f32 %v921_v63, %v920_v45 }
 0x1c0   : > { %v1427_v4 = vpop.eup %1426  ;;  %1334 = vmatpush3.bf16.msra.mxu0 %v960_v43 }
 0x1c1   : > { %1347 = vmatprep.subr.bf16.mxu0 %v1441_v41  ;;  %v931_v8 = vmul.f32 %v1427_v4, %v1709_v50  ;;  %v932_v46 = vmul.f32 %v1427_v4, %v1711_v57  ;;  %v933_v14 = vmul.f32 %v1427_v4, %v1715_v61  ;;  %v934_v17 = vmul.f32 %v1427_v4, %v1719_v16  ;;  %v295_v16 = vld [vmem:[%s1763_s30 + $0x18] sm:$0xff] }
 0x1c2   : > { %1430 = vrcp.f32 %v922_v11  ;;  %v944_v27 = vpack.c.bf16 %v295_v16, %v294_v54 }
 0x1c3   : > { %1336 = vmatmul.mubr.msk.bf16.vlgmr.msra.gmra.mrb[8].mxu0 %vm308_vm0, %v943_v3  ;;  %v949_v0 = vpack.c.bf16 %v932_v46, %v931_v8  ;;  %v950_v48 = vpack.c.bf16 %v934_v17, %v933_v14 }
 0x1c4   : > { %v1429_v51 = vpop.eup %1428  ;;  %1351 = vmatprep.mubr.msk.bf16.mxu0 %vm1442_vm2, %v1441_v41 }
 0x1c5   : > { %1340 = vmatpush3.bf16.msra.mxu1 %v949_v0  ;;  %v935_v50 = vmul.f32 %v1429_v51, %v1721_v62  ;;  %v936_v57 = vmul.f32 %v1429_v51, %v1725_v10  ;;  %v937_v61 = vmul.f32 %v1429_v51, %v1729_v15  ;;  %v938_v5 = vmul.f32 %v1429_v51, %v1735_v52 }
 0x1c6   : > { %1341 = vmatprep.subr.bf16.mxu1 %v1441_v41  ;;  %v1007_v26 = vsel %vm958_vm4, %v950_v48, 0  ;;  %v945_v15 = vpack.c.bf16 %v297_v12, %v296_v28 }
 0x1c7   : > { %v951_v23 = vpack.c.bf16 %v936_v57, %v935_v50  ;;  %v952_v7 = vpack.c.bf16 %v938_v5, %v937_v61 }
 0x1c9   : > { %1348 = vmatpush3.bf16.msra.mxu0 %v951_v23  ;;  %1342 = vmatpush3.bf16.msra.mxu1 %v1007_v26  ;;  %v1054_v10 = vsel %vm958_vm4, %v952_v7, 0 }
 0x1ca   : > { %1349 = vmatprep.subr.bf16.mxu0 %v1441_v41  ;;  %1355 = vmatprep.subr.bf16.mxu1 %v1441_v41 }
 0x1cc   : > { %v1431_v62 = vpop.eup %1430  ;;  %1344 = vmatmul.mubr.msk.bf16.vlgmr.msra.gmra.mrb[8].mxu1 %vm308_vm0, %v944_v27 }
 0x1cd   : > { %1350 = vmatpush3.bf16.msra.mxu0 %v1054_v10  ;;  %v939_v52 = vmul.f32 %v1431_v62, %v1741_v18  ;;  %v940_v13 = vmul.f32 %v1431_v62, %v1743_v19  ;;  %v941_v29 = vmul.f32 %v1431_v62, %v1747_v30  ;;  %v942_v20 = vmul.f32 %v1431_v62, %v1751_v31 }
 0x1ce   : > { %1359 = vmatprep.mubr.msk.bf16.mxu1 %vm1442_vm2, %v1441_v41 }
 0x1cf   : > { %v953_v25 = vpack.c.bf16 %v940_v13, %v939_v52  ;;  %v954_v6 = vpack.c.bf16 %v942_v20, %v941_v29 }
 0x1d0   : > { %1352 = vmatmul.mubr.msk.bf16.vlgmr.msra.gmra.mrb[12].mxu0 %vm308_vm0, %v945_v15 }
 0x1d1   : > { %1356 = vmatpush3.bf16.msra.mxu1 %v953_v25  ;;  %v1101_v18 = vsel %vm958_vm4, %v954_v6, 0 }
 0x1d2   : > { %1357 = vmatprep.subr.bf16.mxu1 %v1441_v41 }
 0x1d5   : > { %1358 = vmatpush3.bf16.msra.mxu1 %v1101_v18 }
 0x1d8   : > { %1360 = vmatmul.mubr.msk.bf16.vlgmr.msra.gmra.mrb[12].mxu1 %vm308_vm0, %v946_v1 }
 0x296   : > { %v996_v19 = vpop.f32.mrb[8].mxu0 }
 0x297   : > { %1144 = vst.msk [vmem:[%s273_s7] sm:$0xff] %vm308_vm0, %v996_v19  ;;  %v1337_v30 = vpop.f32.mrb[9].mxu0 }
 0x298   : > { %v999_v31 = vpop.f32.mrb[10].mxu0 }
 0x299   : > { %1145 = vst.msk [vmem:[%s273_s7 + $0x8] sm:$0xff] %vm308_vm0, %v999_v31  ;;  %v1338_v2 = vpop.f32.mrb[11].mxu0 }
 0x29f   : > { %v1043_v32 = vpop.f32.mrb[8].mxu1 }
 0x2a0   : > { %1146 = vst.msk [vmem:[%s273_s7 + $0x10] sm:$0xff] %vm308_vm0, %v1043_v32  ;;  %v1345_v41 = vpop.f32.mrb[9].mxu1 }
 0x2a1   : > { %v1046_v33 = vpop.f32.mrb[10].mxu1 }
 0x2a2   : > { %1147 = vst.msk [vmem:[%s273_s7 + $0x18] sm:$0xff] %vm308_vm0, %v1046_v33  ;;  %v1346_v34 = vpop.f32.mrb[11].mxu1 }
 0x2a3   : > { %v1090_v35 = vpop.f32.mrb[12].mxu0 }
 0x2a4   : > { %1148 = vst.msk [vmem:[%s273_s7 + $0x20] sm:$0xff] %vm308_vm0, %v1090_v35  ;;  %v1353_v36 = vpop.f32.mrb[13].mxu0 }
 0x2a5   : > { %v1093_v37 = vpop.f32.mrb[14].mxu0 }
 0x2a6   : > { %1149 = vst.msk [vmem:[%s273_s7 + $0x28] sm:$0xff] %vm308_vm0, %v1093_v37  ;;  %v1354_v38 = vpop.f32.mrb[15].mxu0 }
 0x2ab   : > { %v1137_v39 = vpop.f32.mrb[12].mxu1 }
 0x2ac   : > { %1150 = vst.msk [vmem:[%s273_s7 + $0x30] sm:$0xff] %vm308_vm0, %v1137_v39  ;;  %v1361_v40 = vpop.f32.mrb[13].mxu1 }
 0x2ad   : > { %v1140_v42 = vpop.f32.mrb[14].mxu1 }
 0x2ae   : > { %1151 = vst.msk [vmem:[%s273_s7 + $0x38] sm:$0xff] %vm308_vm0, %v1140_v42  ;;  %v1362_v44 = vpop.f32.mrb[15].mxu1 }
 0x2af PF: > { %s14_s15 = sadd.s32 1, %s1438_s15  }
 0x2b0   : > { %p11_p4 = scmp.ge.s32.totalorder %s14_s15, 4  }
 0x2b2   :  { %13 = sbr.rel (!%p11_p4) target bundleno = 1 (0x1), region = 75 }

// kernel: _lambda_.20
= control target key start
LH: loop header
LB: loop body
LE: loop exit
PB: predicated region body
PF: predicated region fallthrough
CT: control target
= control target key end

     0   :  { %s572_s12 = smov 0   ;;  %s777_s0 = inlined_call_operand.vmem [shape: f32[2,3,10,8,28], index: 0, kind: input, shape index: {}]   ;;  %s778_s1 = inlined_call_operand.vmem [shape: f32[3,3,1,28], index: 1, kind: input, shape index: {}]   ;;  %s779_s2 = inlined_call_operand.vmem [shape: f32[2,8,8,28], index: 2, kind: input, shape index: {}]   ;;  %s780_s3 = inlined_call_operand.vmem [shape: f32[2,8,8,28], index: 3, kind: output, shape index: {}]  }
   0x1 LB: > { %s512_s13 = sadd.s32 4294967295, %s550_s12   ;;  %p516_p0 = scmp.ge.s32.totalorder %s550_s12, 1  ;;  %s550_s12 = sphi %s572_s12, %s13_s12  }
   0x2   : > { %p147_p1 = scmp.lt.s32.totalorder %s550_s12, 3 }
   0x4   : > { %p148_p2 = pnand %p516_p0, %p147_p1 }
   0x5   : > { %p176_p3 = scmp.lt.s32.totalorder (!%p148_p2), %s512_s13, 1  ;;  %v586_v0 = vld [vmem:[%s778_s1] ss:$0 sm:$0xff] (!%p148_p2)  ;;  %v591_v1 = vld [vmem:[%s778_s1 + $0x1] ss:$0 sm:$0xff] (!%p148_p2)  ;;  %vm436_vm0 = vcmask (!%p148_p2), 228352  }
   0x6   : > { %151 = sbr.rel (%p148_p2) target bundleno = 63 (0x3f), region = 32  ;;  %v601_v2 = vld [vmem:[%s778_s1 + $0x2] ss:$0 sm:$0xff] (!%p148_p2)  ;;  %v606_v3 = vld [vmem:[%s778_s1 + $0x3] ss:$0 sm:$0xff] (!%p148_p2) }
   0x7   : > { %v611_v4 = vld [vmem:[%s778_s1 + $0x4] ss:$0 sm:$0xff] (!%p148_p2)  ;;  %v619_v8 = vld [vmem:[%s778_s1 + $0x5] ss:$0 sm:$0xff] (!%p148_p2)  ;;  %v624_v9 = vld [vmem:[%s778_s1 + $0x6] ss:$0 sm:$0xff] (!%p148_p2) }
   0x8   : > { %v641_v22 = vld [vmem:[%s778_s1 + $0x7] ss:$0 sm:$0xff] (!%p148_p2)  ;;  %v655_v34 = vld [vmem:[%s778_s1 + $0x8] ss:$0 sm:$0xff] (!%p148_p2) }
   0xd   : > { %s782_s13 = smov (!%p176_p3, %s512_s13), 1 }
   0xe   : > { %s535_s14 = smul.u32 240, %s782_s13  ;;  %s533_s9 = sshll.u32 %s782_s13, 6 }
   0xf   : > { %s711_s17 = scalar_lea.vmem %s780_s3, %s533_s9 }
  0x10   : > { %s596_s21 = scalar_lea.vmem %s777_s0, %s535_s14  ;;  %s691_s14 = scalar_lea.vmem %s779_s2, %s533_s9 }
  0x11   : > { %v191_v5 = vld [vmem:[%s596_s21] sm:$0xff]  ;;  %v192_v6 = vld [vmem:[%s596_s21 + $0x8] sm:$0xff]  ;;  %v193_v7 = vld [vmem:[%s596_s21 + $0x10] sm:$0xff] }
  0x12   : > { %v201_v10 = vld [vmem:[%s596_s21 + $0x50] sm:$0xff]  ;;  %v202_v11 = vld [vmem:[%s596_s21 + $0x58] sm:$0xff]  ;;  %v203_v12 = vld [vmem:[%s596_s21 + $0x60] sm:$0xff]  ;;  %v236_v13 = vmul.f32 %v586_v0, %v191_v5  ;;  %v238_v14 = vmul.f32 %v586_v0, %v193_v7  ;;  %v237_v18 = vmul.f32 %v586_v0, %v192_v6  ;;  %v294_v21 = vmul.f32 %v606_v3, %v192_v6 }
  0x13   : > { %v211_v15 = vld [vmem:[%s596_s21 + $0xa0] sm:$0xff]  ;;  %v212_v16 = vld [vmem:[%s596_s21 + $0xa8] sm:$0xff]  ;;  %v213_v17 = vld [vmem:[%s596_s21 + $0xb0] sm:$0xff]  ;;  %v250_v19 = vmul.f32 %v591_v1, %v201_v10  ;;  %v252_v20 = vmul.f32 %v591_v1, %v203_v12  ;;  %v251_v23 = vmul.f32 %v591_v1, %v202_v11  ;;  %v295_v26 = vmul.f32 %v606_v3, %v193_v7 }
  0x14   : > { %v272_v24 = vmul.f32 %v601_v2, %v211_v15  ;;  %v274_v25 = vmul.f32 %v601_v2, %v213_v17  ;;  %v194_v27 = vld [vmem:[%s596_s21 + $0x18] sm:$0xff]  ;;  %v204_v28 = vld [vmem:[%s596_s21 + $0x68] sm:$0xff]  ;;  %v273_v31 = vmul.f32 %v601_v2, %v212_v16  ;;  %v316_v32 = vmul.f32 %v611_v4, %v202_v11  ;;  %v195_v43 = vld [vmem:[%s596_s21 + $0x20] sm:$0xff] }
  0x15   : > { %v258_v29 = vadd.f32 %v250_v19, %v236_v13  ;;  %v260_v30 = vadd.f32 %v252_v20, %v238_v14  ;;  %v214_v33 = vld [vmem:[%s596_s21 + $0xb8] sm:$0xff]  ;;  %v317_v35 = vmul.f32 %v611_v4, %v203_v12  ;;  %v338_v36 = vmul.f32 %v619_v8, %v212_v16  ;;  %v205_v48 = vld [vmem:[%s596_s21 + $0x70] sm:$0xff]  ;;  %v215_v53 = vld [vmem:[%s596_s21 + $0xc0] sm:$0xff] }
  0x16   : > { %v339_v37 = vmul.f32 %v619_v8, %v213_v17  ;;  %v360_v38 = vmul.f32 %v624_v9, %v193_v7  ;;  %v382_v40 = vmul.f32 %v641_v22, %v203_v12  ;;  %v239_v41 = vmul.f32 %v586_v0, %v194_v27  ;;  %v196_v7 = vld [vmem:[%s596_s21 + $0x28] sm:$0xff]  ;;  %v206_v10 = vld [vmem:[%s596_s21 + $0x78] sm:$0xff] }
  0x17   : > { %v280_v39 = vadd.f32 %v272_v24, %v258_v29  ;;  %v253_v42 = vmul.f32 %v591_v1, %v204_v28  ;;  %v282_v44 = vadd.f32 %v274_v25, %v260_v30  ;;  %v259_v45 = vadd.f32 %v251_v23, %v237_v18  ;;  %v216_v19 = vld [vmem:[%s596_s21 + $0xc8] sm:$0xff] }
  0x18   : > { %v275_v46 = vmul.f32 %v601_v2, %v214_v33  ;;  %v296_v47 = vmul.f32 %v606_v3, %v194_v27  ;;  %v404_v50 = vmul.f32 %v655_v34, %v213_v17  ;;  %v318_v52 = vmul.f32 %v611_v4, %v204_v28 }
  0x19   : > { %v302_v49 = vadd.f32 %v294_v21, %v280_v39  ;;  %v261_v51 = vadd.f32 %v253_v42, %v239_v41  ;;  %v281_v54 = vadd.f32 %v273_v31, %v259_v45  ;;  %v340_v55 = vmul.f32 %v619_v8, %v214_v33  ;;  %v207_v41 = vld [vmem:[%s596_s21 + $0x80] sm:$0xff]  ;;  %v217_v42 = vld [vmem:[%s596_s21 + $0xd0] sm:$0xff] }
  0x1a   : > { %v361_v56 = vmul.f32 %v624_v9, %v194_v27  ;;  %v240_v57 = vmul.f32 %v586_v0, %v195_v43  ;;  %v383_v59 = vmul.f32 %v641_v22, %v204_v28  ;;  %v405_v60 = vmul.f32 %v655_v34, %v214_v33  ;;  %v197_v33 = vld [vmem:[%s596_s21 + $0x30] sm:$0xff] }
  0x1b   : > { %v324_v58 = vadd.f32 %v316_v32, %v302_v49  ;;  %v254_v61 = vmul.f32 %v591_v1, %v205_v48  ;;  %v283_v62 = vadd.f32 %v275_v46, %v261_v51  ;;  %v303_v63 = vadd.f32 %v295_v26, %v281_v54  ;;  %v421_v51 = vld [vmem:[%s691_s14 + $0x8] sm:$0xff] }
  0x1c   : > { %v276_v5 = vmul.f32 %v601_v2, %v215_v53  ;;  %v304_v6 = vadd.f32 %v296_v47, %v282_v44  ;;  %v297_v13 = vmul.f32 %v606_v3, %v195_v43  ;;  %v319_v14 = vmul.f32 %v611_v4, %v205_v48 }
  0x1d   : > { %v346_v11 = vadd.f32 %v338_v36, %v324_v58  ;;  %v262_v12 = vadd.f32 %v254_v61, %v240_v57  ;;  %v325_v15 = vadd.f32 %v317_v35, %v303_v63  ;;  %v341_v17 = vmul.f32 %v619_v8, %v215_v53  ;;  %v420_v35 = vld [vmem:[%s691_s14] sm:$0xff] }
  0x1e   : > { %v326_v16 = vadd.f32 %v318_v52, %v304_v6  ;;  %v362_v18 = vmul.f32 %v624_v9, %v195_v43  ;;  %v384_v21 = vmul.f32 %v641_v22, %v205_v48  ;;  %v241_v23 = vmul.f32 %v586_v0, %v196_v7  ;;  %v422_v52 = vld [vmem:[%s691_s14 + $0x10] sm:$0xff]  ;;  %v198_v6 = vld [vmem:[%s596_s21 + $0x38] sm:$0xff] }
  0x1f   : > { %v368_v20 = vadd.f32 %v360_v38, %v346_v11  ;;  %v255_v24 = vmul.f32 %v591_v1, %v206_v10  ;;  %v347_v25 = vadd.f32 %v339_v37, %v325_v15  ;;  %v284_v26 = vadd.f32 %v276_v5, %v262_v12 }
  0x20   : > { %v348_v27 = vadd.f32 %v340_v55, %v326_v16  ;;  %v406_v28 = vmul.f32 %v655_v34, %v215_v53  ;;  %v277_v30 = vmul.f32 %v601_v2, %v216_v19  ;;  %v298_v31 = vmul.f32 %v606_v3, %v196_v7 }
  0x21   : > { %v390_v29 = vadd.f32 %v382_v40, %v368_v20  ;;  %v305_v32 = vadd.f32 %v297_v13, %v283_v62  ;;  %v369_v36 = vadd.f32 %v361_v56, %v347_v25  ;;  %v263_v39 = vadd.f32 %v255_v24, %v241_v23 }
  0x22   : > { %v370_v38 = vadd.f32 %v362_v18, %v348_v27  ;;  %v320_v37 = vmul.f32 %v611_v4, %v206_v10  ;;  %v342_v40 = vmul.f32 %v619_v8, %v216_v19  ;;  %v363_v45 = vmul.f32 %v624_v9, %v196_v7  ;;  %v208_v7 = vld [vmem:[%s596_s21 + $0x88] sm:$0xff]  ;;  %v423_v18 = vld [vmem:[%s691_s14 + $0x18] sm:$0xff] }
  0x23   : > { %v412_v43 = vadd.f32 %v404_v50, %v390_v29  ;;  %v327_v44 = vadd.f32 %v319_v14, %v305_v32  ;;  %v391_v46 = vadd.f32 %v383_v59, %v369_v36  ;;  %v385_v48 = vmul.f32 %v641_v22, %v206_v10  ;;  %v218_v10 = vld [vmem:[%s596_s21 + $0xd8] sm:$0xff]  ;;  %v209_v32 = vld [vmem:[%s596_s21 + $0x90] sm:$0xff] }
  0x24   : > { %v392_v47 = vadd.f32 %v384_v21, %v370_v38  ;;  %v242_v49 = vmul.f32 %v586_v0, %v197_v33  ;;  %v256_v54 = vmul.f32 %v591_v1, %v207_v41  ;;  %v278_v55 = vmul.f32 %v601_v2, %v217_v42 }
  0x25   : > { %v428_v50 = vadd.f32 %v420_v35, %v412_v43  ;;  %v349_v53 = vadd.f32 %v341_v17, %v327_v44  ;;  %v413_v56 = vadd.f32 %v405_v60, %v391_v46  ;;  %v285_v58 = vadd.f32 %v277_v30, %v263_v39  ;;  %v219_v39 = vld [vmem:[%s596_s21 + $0xe0] sm:$0xff] }
  0x26   : > { %v414_v57 = vadd.f32 %v406_v28, %v392_v47  ;;  %v306_v59 = vadd.f32 %v298_v31, %v284_v26  ;;  %v407_v62 = vmul.f32 %v655_v34, %v216_v19  ;;  %v264_v63 = vadd.f32 %v256_v54, %v242_v49  ;;  %v199_v28 = vld [vmem:[%s596_s21 + $0x40] sm:$0xff] }
  0x27   : > { %437 = vst.msk [vmem:[%s711_s17] sm:$0xff] %vm436_vm0, %v428_v50  ;;  %v371_v61 = vadd.f32 %v363_v45, %v349_v53  ;;  %v299_v5 = vmul.f32 %v606_v3, %v197_v33  ;;  %v429_v11 = vadd.f32 %v421_v51, %v413_v56  ;;  %v364_v13 = vmul.f32 %v624_v9, %v197_v33 }
  0x28   : > { %v430_v12 = vadd.f32 %v422_v52, %v414_v57  ;;  %v328_v60 = vadd.f32 %v320_v37, %v306_v59  ;;  %v286_v15 = vadd.f32 %v278_v55, %v264_v63  ;;  %v321_v16 = vmul.f32 %v611_v4, %v207_v41 }
  0x29   : > { %v393_v14 = vadd.f32 %v385_v48, %v371_v61  ;;  %v386_v17 = vmul.f32 %v641_v22, %v207_v41  ;;  %438 = vst.msk [vmem:[%s711_s17 + $0x8] sm:$0xff] %vm436_vm0, %v429_v11  ;;  %v243_v20 = vmul.f32 %v586_v0, %v198_v6  ;;  %v257_v21 = vmul.f32 %v591_v1, %v208_v7  ;;  %v200_v48 = vld [vmem:[%s596_s21 + $0x48] sm:$0xff] }
  0x2a   : > { %439 = vst.msk [vmem:[%s711_s17 + $0x10] sm:$0xff] %vm436_vm0, %v430_v12  ;;  %v350_v19 = vadd.f32 %v342_v40, %v328_v60  ;;  %v279_v23 = vmul.f32 %v601_v2, %v218_v10  ;;  %v343_v25 = vmul.f32 %v619_v8, %v217_v42  ;;  %v300_v26 = vmul.f32 %v606_v3, %v198_v6 }
  0x2b   : > { %v415_v24 = vadd.f32 %v407_v62, %v393_v14  ;;  %v307_v27 = vadd.f32 %v299_v5, %v285_v58  ;;  %v408_v30 = vmul.f32 %v655_v34, %v217_v42  ;;  %v265_v31 = vadd.f32 %v257_v21, %v243_v20  ;;  %v424_v42 = vld [vmem:[%s691_s14 + $0x20] sm:$0xff]  ;;  %v425_v58 = vld [vmem:[%s691_s14 + $0x28] sm:$0xff]  ;;  %v427_v14 = vld [vmem:[%s691_s14 + $0x38] sm:$0xff] }
  0x2c   : > { %v372_v29 = vadd.f32 %v364_v13, %v350_v19  ;;  %v322_v0 = vmul.f32 %v611_v4, %v208_v7  ;;  %v344_v2 = vmul.f32 %v619_v8, %v218_v10  ;;  %v365_v35 = vmul.f32 %v624_v9, %v198_v6 }
  0x2d   : > { %v431_v1 = vadd.f32 %v423_v18, %v415_v24  ;;  %v329_v33 = vadd.f32 %v321_v16, %v307_v27  ;;  %v287_v38 = vadd.f32 %v279_v23, %v265_v31  ;;  %v301_v37 = vmul.f32 %v606_v3, %v199_v28 }
  0x2e   : > { %v394_v36 = vadd.f32 %v386_v17, %v372_v29  ;;  %v308_v41 = vadd.f32 %v300_v26, %v286_v15  ;;  %v387_v44 = vmul.f32 %v641_v22, %v208_v7  ;;  %v323_v40 = vmul.f32 %v611_v4, %v209_v32  ;;  %v210_v4 = vld [vmem:[%s596_s21 + $0x98] sm:$0xff] }
  0x2f   : > { %440 = vst.msk [vmem:[%s711_s17 + $0x18] sm:$0xff] %vm436_vm0, %v431_v1  ;;  %v351_v43 = vadd.f32 %v343_v25, %v329_v33  ;;  %v366_v47 = vmul.f32 %v624_v9, %v199_v28  ;;  %v409_v3 = vmul.f32 %v655_v34, %v218_v10  ;;  %v345_v50 = vmul.f32 %v619_v8, %v219_v39  ;;  %v220_v8 = vld [vmem:[%s596_s21 + $0xe8] sm:$0xff]  ;;  %v426_v10 = vld [vmem:[%s691_s14 + $0x30] sm:$0xff] }
  0x30   : > { %v416_v45 = vadd.f32 %v408_v30, %v394_v36  ;;  %v330_v46 = vadd.f32 %v322_v0, %v308_v41  ;;  %v309_v51 = vadd.f32 %v301_v37, %v287_v38  ;;  %v388_v54 = vmul.f32 %v641_v22, %v209_v32 }
  0x31   : > { %v373_v49 = vadd.f32 %v365_v35, %v351_v43  ;;  %v367_v57 = vmul.f32 %v624_v9, %v200_v48  ;;  %v410_v61 = vmul.f32 %v655_v34, %v219_v39  ;;  %v389_v5 = vmul.f32 %v641_v22, %v210_v4 }
  0x32   : > { %v432_v52 = vadd.f32 %v424_v42, %v416_v45  ;;  %v352_v53 = vadd.f32 %v344_v2, %v330_v46  ;;  %v331_v56 = vadd.f32 %v323_v40, %v309_v51  ;;  %v411_v9 = vmul.f32 %v655_v34, %v220_v8 }
  0x33   : > { %v395_v55 = vadd.f32 %v387_v44, %v373_v49 }
  0x34   : > { %441 = vst.msk [vmem:[%s711_s17 + $0x20] sm:$0xff] %vm436_vm0, %v432_v52  ;;  %v374_v59 = vadd.f32 %v366_v47, %v352_v53  ;;  %v353_v63 = vadd.f32 %v345_v50, %v331_v56 }
  0x35   : > { %v417_v62 = vadd.f32 %v409_v3, %v395_v55 }
  0x36   : > { %v396_v6 = vadd.f32 %v388_v54, %v374_v59  ;;  %v375_v11 = vadd.f32 %v367_v57, %v353_v63 }
  0x37   : > { %v433_v7 = vadd.f32 %v425_v58, %v417_v62 }
  0x38   : > { %v418_v12 = vadd.f32 %v410_v61, %v396_v6  ;;  %v397_v60 = vadd.f32 %v389_v5, %v375_v11 }
  0x39   : > { %442 = vst.msk [vmem:[%s711_s17 + $0x28] sm:$0xff] %vm436_vm0, %v433_v7 }
  0x3a   : > { %v434_v13 = vadd.f32 %v426_v10, %v418_v12  ;;  %v419_v15 = vadd.f32 %v411_v9, %v397_v60 }
  0x3c   : > { %443 = vst.msk [vmem:[%s711_s17 + $0x30] sm:$0xff] %vm436_vm0, %v434_v13  ;;  %v435_v16 = vadd.f32 %v427_v14, %v419_v15 }
  0x3e   : > { %444 = vst.msk [vmem:[%s711_s17 + $0x38] sm:$0xff] %vm436_vm0, %v435_v16 }
  0x3f PF: > { %s13_s12 = sadd.s32 1, %s550_s12  }
  0x40   : > { %p10_p4 = scmp.ge.s32.totalorder %s13_s12, 4  }
  0x42   :  { %12 = sbr.rel (!%p10_p4) target bundleno = 1 (0x1), region = 65 }

// kernel: _lambda_.22
= control target key start
LH: loop header
LB: loop body
LE: loop exit
PB: predicated region body
PF: predicated region fallthrough
CT: control target
= control target key end

     0   :  { %s639_s18 = smov 0   ;;  %s762_s0 = inlined_call_operand.vmem [shape: f32[128,28], index: 0, kind: input, shape index: {}]   ;;  %s763_s1 = inlined_call_operand.vmem [shape: f32[28,28], index: 1, kind: input, shape index: {}]   ;;  %s764_s2 = inlined_call_operand.vmem [shape: f32[1,28], index: 2, kind: input, shape index: {}]   ;;  %s765_s3 = inlined_call_operand.vmem [shape: f32[1,28], index: 3, kind: input, shape index: {}]   ;;  %s766_s4 = inlined_call_operand.vmem [shape: f32[1,28], index: 4, kind: input, shape index: {}]   ;;  %s767_s5 = inlined_call_operand.vmem [shape: f32[128,28], index: 5, kind: output, shape index: {}]  }
   0x1 LB: > { %s535_s19 = sadd.s32 4294967295, %s607_s18   ;;  %p539_p0 = scmp.ge.s32.totalorder %s607_s18, 1  ;;  %s607_s18 = sphi %s639_s18, %s15_s18  }
   0x2   : > { %p188_p1 = scmp.lt.s32.totalorder %s607_s18, 3 }
   0x4   : > { %p189_p2 = pnand %p539_p0, %p188_p1 }
   0x5   : > { %v241_v0 = vld [vmem:[%s763_s1] sm:$0xff] (!%p189_p2)  ;;  %v242_v1 = vld [vmem:[%s763_s1 + $0x8] sm:$0xff] (!%p189_p2)  ;;  %v243_v2 = vld [vmem:[%s763_s1 + $0x10] sm:$0xff] (!%p189_p2)  ;;  %s540_s26 = sshll.u32 (!%p189_p2), %s535_s19, 3  ;;  %vm267_vm0 = vcmask (!%p189_p2), 1045504   ;;  %vm254_vm1 = vcmask (!%p189_p2), 228352  }
   0x6   : > { %192 = sbr.rel (%p189_p2) target bundleno = 565 (0x235), region = 40  ;;  %v245_v3 = vpack.c.bf16 (!%p189_p2), %v242_v1, %v241_v0  ;;  %v244_v4 = vld [vmem:[%s763_s1 + $0x18] sm:$0xf] (!%p189_p2)  ;;  %p217_p3 = scmp.lt.s32.totalorder (!%p189_p2), %s540_s26, 15  ;;  %v544_v19 = vld [vmem:[%s764_s2] ss:$0 sm:$0xff] (!%p189_p2) }
   0x7   : > { %v246_v5 = vpack.c.bf16 (!%p189_p2), %v244_v4, %v243_v2 }
   0x8   : > { %559 = vmatprep.subr.bf16.mxu0 (!%p189_p2), %v245_v3  ;;  %571 = vmatprep.subr.bf16.mxu1 (!%p189_p2), %v245_v3 }
   0x9   : > { %560 = vmatpush3.bf16.msra.mxu0 (!%p189_p2), %v245_v3  ;;  %573 = vmatpush3.bf16.msra.mxu1 (!%p189_p2), %v245_v3  ;;  %v269_v6 = vsel (!%p189_p2), %vm267_vm0, %v246_v5, 0 }
   0xa   : > { %575 = vmatprep.subr.msk.bf16.mxu0 (!%p189_p2), %vm267_vm0, %v246_v5  ;;  %576 = vmatprep.subr.msk.bf16.mxu1 (!%p189_p2), %vm267_vm0, %v246_v5 }
   0xd   : > { %s769_s26 = smov (!%p217_p3, %s540_s26), 15  ;;  %562 = vmatpush3.bf16.msra.mxu0 %v269_v6  ;;  %574 = vmatpush3.bf16.msra.mxu1 %v269_v6 }
   0xe   : > { %s541_s29 = sshll.u32 %s769_s26, 3 }
   0xf   : > { %s220_s7 = scalar_lea.vmem %s762_s0, %s541_s29  ;;  %s734_s16 = scalar_lea.vmem %s767_s5, %s541_s29 }
  0x10   : > { %v229_v7 = vld [vmem:[%s220_s7] sm:$0xff]  ;;  %v230_v8 = vld [vmem:[%s220_s7 + $0x8] sm:$0xff]  ;;  %v231_v9 = vld [vmem:[%s220_s7 + $0x10] sm:$0xff] }
  0x11   : > { %v237_v10 = vpack.c.bf16 %v230_v8, %v229_v7  ;;  %v232_v11 = vld [vmem:[%s220_s7 + $0x18] sm:$0xff]  ;;  %v233_v12 = vld [vmem:[%s220_s7 + $0x20] sm:$0xff]  ;;  %v234_v13 = vld [vmem:[%s220_s7 + $0x28] sm:$0xff] }
  0x12   : > { %v238_v14 = vpack.c.bf16 %v232_v11, %v231_v9  ;;  %v239_v15 = vpack.c.bf16 %v234_v13, %v233_v12  ;;  %v235_v16 = vld [vmem:[%s220_s7 + $0x30] sm:$0xff]  ;;  %v236_v17 = vld [vmem:[%s220_s7 + $0x38] sm:$0xff] }
  0x13   : > { %563 = vmatprep.mubr.msk.bf16.mxu0 %vm254_vm1, %v237_v10  ;;  %v240_v18 = vpack.c.bf16 %v236_v17, %v235_v16 }
  0x14   : > { %564 = vmatmul.mubr.msk.bf16.vlgmr.msra.gmra.mrb[0].mxu0 %vm254_vm1, %v238_v14  ;;  %567 = vmatprep.mubr.msk.bf16.mxu1 %vm254_vm1, %v239_v15 }
  0x15   : > { %568 = vmatmul.mubr.msk.bf16.vlgmr.msra.gmra.mrb[0].mxu1 %vm254_vm1, %v240_v18 }
  0xe7   : > { %v565_v20 = vpop.f32.mrb[0].mxu0 }
  0xe8   : > { %v314_v21 = vadd.f32 %v565_v20, %v544_v19  ;;  %v305_v22 = vpop.f32.mrb[1].mxu0  ;;  %v569_v23 = vpop.f32.mrb[0].mxu1 }
  0xe9   : > { %v306_v24 = vadd.f32 %v544_v19, %v305_v22  ;;  %v566_v25 = vpop.f32.mrb[2].mxu0  ;;  %v321_v26 = vpop.f32.mrb[1].mxu1  ;;  %v330_v40 = vadd.f32 %v569_v23, %v544_v19 }
  0xea   : > { %v317_v27 = vadd.f32 %v566_v25, %v544_v19  ;;  %v322_v28 = vadd.f32 %v544_v19, %v321_v26  ;;  %v308_v29 = vpop.f32.mrb[3].mxu0  ;;  %v570_v30 = vpop.f32.mrb[2].mxu1  ;;  %v342_v31 = vsel %vm254_vm1, %v314_v21, 0.0 }
  0xeb   : > { %v324_v32 = vpop.f32.mrb[3].mxu1  ;;  %343 = vadd.xlane.f32.xlu1 %v342_v31  ;;  %v336_v33 = vsel %vm254_vm1, %v306_v24, 0.0  ;;  %v309_v37 = vadd.f32 %v544_v19, %v308_v29  ;;  %v333_v38 = vadd.f32 %v570_v30, %v544_v19  ;;  %v354_v43 = vsel %vm254_vm1, %v330_v40, 0.0 }
  0xec   : > { %337 = vadd.xlane.f32.xlu0 %v336_v33  ;;  %v348_v34 = vsel %vm254_vm1, %v322_v28, 0.0  ;;  %v325_v35 = vadd.f32 %v544_v19, %v324_v32  ;;  %v345_v36 = vsel %vm254_vm1, %v317_v27, 0.0 }
  0xed   : > { %v339_v41 = vsel %vm254_vm1, %v309_v37, 0.0  ;;  %v357_v42 = vsel %vm254_vm1, %v333_v38, 0.0 }
  0xee   : > { %v351_v39 = vsel %vm254_vm1, %v325_v35, 0.0 }
  0xef   : > { %346 = vadd.xlane.f32.xlu1 %v345_v36 }
  0xf0   : > { %349 = vadd.xlane.f32.xlu0 %v348_v34 }
  0xf3   : > { %352 = vadd.xlane.f32.xlu1 %v351_v39 }
  0xf4   : > { %340 = vadd.xlane.f32.xlu0 %v339_v41 }
  0xf7   : > { %358 = vadd.xlane.f32.xlu1 %v357_v42 }
  0xf8   : > { %355 = vadd.xlane.f32.xlu0 %v354_v43 }
 0x178   : > { %v344_v44 = vpop.xlane.xlu1 %343 }
 0x179   : > { %v363_v45 = vmul.f32 0.035714287, %v344_v44  ;;  %v338_v46 = vpop.xlane.xlu0 %337  ;;  %v550_v44 = vld [vmem:[%s766_s4] ss:$0 sm:$0xff] }
 0x17a   : > { %v361_v47 = vmul.f32 0.035714287, %v338_v46 }
 0x17b   : > { %v682_v48 = vsub.f32 %v314_v21, %v363_v45 }
 0x17c   : > { %v684_v49 = vsub.f32 %v306_v24, %v361_v47  ;;  %v347_v50 = vpop.xlane.xlu1 %346 }
 0x17d   : > { %v364_v51 = vmul.f32 0.035714287, %v347_v50  ;;  %v350_v52 = vpop.xlane.xlu0 %349  ;;  %v379_v53 = vmul.f32 %v682_v48, %v682_v48 }
 0x17e   : > { %v365_v54 = vmul.f32 0.035714287, %v350_v52  ;;  %v377_v57 = vmul.f32 %v684_v49, %v684_v49 }
 0x17f   : > { %v688_v55 = vsub.f32 %v317_v27, %v364_v51  ;;  %v391_v56 = vsel %vm254_vm1, %v379_v53, 0.0 }
 0x180   : > { %v693_v58 = vsub.f32 %v322_v28, %v365_v54  ;;  %v353_v59 = vpop.xlane.xlu1 %352  ;;  %392 = vadd.xlane.f32.xlu0 %v391_v56  ;;  %v385_v1 = vsel %vm254_vm1, %v377_v57, 0.0 }
 0x181   : > { %v366_v60 = vmul.f32 0.035714287, %v353_v59  ;;  %v341_v61 = vpop.xlane.xlu0 %340  ;;  %v380_v62 = vmul.f32 %v688_v55, %v688_v55 }
 0x182   : > { %v362_v63 = vmul.f32 0.035714287, %v341_v61  ;;  %v381_v2 = vmul.f32 %v693_v58, %v693_v58 }
 0x183   : > { %v394_v0 = vsel %vm254_vm1, %v380_v62, 0.0  ;;  %v701_v3 = vsub.f32 %v325_v35, %v366_v60 }
 0x184   : > { %v703_v4 = vsub.f32 %v309_v37, %v362_v63  ;;  %395 = vadd.xlane.f32.xlu1 %v394_v0  ;;  %v359_v5 = vpop.xlane.xlu1 %358  ;;  %386 = vadd.xlane.f32.xlu0 %v385_v1  ;;  %v397_v10 = vsel %vm254_vm1, %v381_v2, 0.0 }
 0x185   : > { %v368_v6 = vmul.f32 0.035714287, %v359_v5  ;;  %v356_v7 = vpop.xlane.xlu0 %355  ;;  %v382_v14 = vmul.f32 %v701_v3, %v701_v3 }
 0x186   : > { %v367_v8 = vmul.f32 0.035714287, %v356_v7  ;;  %v378_v9 = vmul.f32 %v703_v4, %v703_v4 }
 0x187   : > { %v708_v11 = vsub.f32 %v333_v38, %v368_v6  ;;  %v400_v16 = vsel %vm254_vm1, %v382_v14, 0.0 }
 0x188   : > { %v710_v12 = vsub.f32 %v330_v40, %v367_v8  ;;  %398 = vadd.xlane.f32.xlu0 %v397_v10  ;;  %v388_v13 = vsel %vm254_vm1, %v378_v9, 0.0  ;;  %v549_v40 = vld [vmem:[%s765_s3] ss:$0 sm:$0xff] }
 0x189   : > { %389 = vadd.xlane.f32.xlu1 %v388_v13  ;;  %v384_v18 = vmul.f32 %v708_v11, %v708_v11 }
 0x18a   : > { %v383_v15 = vmul.f32 %v710_v12, %v710_v12 }
 0x18b   : > { %v406_v19 = vsel %vm254_vm1, %v384_v18, 0.0 }
 0x18c   : > { %v403_v17 = vsel %vm254_vm1, %v383_v15, 0.0 }
 0x18d   : > { %401 = vadd.xlane.f32.xlu1 %v400_v16  ;;  %404 = vadd.xlane.f32.xlu0 %v403_v17 }
 0x191   : > { %407 = vadd.xlane.f32.xlu1 %v406_v19 }
 0x20d   : > { %v393_v20 = vpop.xlane.xlu0 %392 }
 0x20e   : > { %v411_v21 = vmul.f32 0.035714287, %v393_v20 }
 0x210   : > { %v419_v22 = vadd.f32 1e-05, %v411_v21 }
 0x211   : > { %v396_v23 = vpop.xlane.xlu1 %395  ;;  %v387_v24 = vpop.xlane.xlu0 %386 }
 0x212   : > { %585 = vrsqrt.f32 %v419_v22  ;;  %v412_v25 = vmul.f32 0.035714287, %v396_v23  ;;  %v409_v26 = vmul.f32 0.035714287, %v387_v24 }
 0x214   : > { %v420_v27 = vadd.f32 1e-05, %v412_v25  ;;  %v417_v28 = vadd.f32 1e-05, %v409_v26 }
 0x215   : > { %v399_v29 = vpop.xlane.xlu0 %398 }
 0x216   : > { %587 = vrsqrt.f32 %v420_v27  ;;  %v413_v30 = vmul.f32 0.035714287, %v399_v29  ;;  %v390_v31 = vpop.xlane.xlu1 %389 }
 0x217   : > { %589 = vrsqrt.f32 %v417_v28  ;;  %v410_v32 = vmul.f32 0.035714287, %v390_v31 }
 0x218   : > { %v421_v33 = vadd.f32 1e-05, %v413_v30 }
 0x219   : > { %v418_v34 = vadd.f32 1e-05, %v410_v32 }
 0x21a   : > { %591 = vrsqrt.f32 %v421_v33  ;;  %v402_v35 = vpop.xlane.xlu1 %401  ;;  %v405_v36 = vpop.xlane.xlu0 %404 }
 0x21b   : > { %593 = vrsqrt.f32 %v418_v34  ;;  %v414_v37 = vmul.f32 0.035714287, %v402_v35  ;;  %v415_v38 = vmul.f32 0.035714287, %v405_v36 }
 0x21c   : > { %v586_v39 = vpop.eup %585 }
 0x21d   : > { %v435_v41 = vmul.f32 %v586_v39, %v682_v48  ;;  %v422_v42 = vadd.f32 1e-05, %v414_v37  ;;  %v423_v43 = vadd.f32 1e-05, %v415_v38 }
 0x21e   : > { %v408_v45 = vpop.xlane.xlu1 %407 }
 0x21f   : > { %v450_v46 = vmul.f32 %v549_v40, %v435_v41  ;;  %595 = vrsqrt.f32 %v422_v42  ;;  %v416_v47 = vmul.f32 0.035714287, %v408_v45 }
 0x220   : > { %v588_v50 = vpop.eup %587  ;;  %597 = vrsqrt.f32 %v423_v43 }
 0x221   : > { %v590_v48 = vpop.eup %589  ;;  %v465_v51 = vadd.f32 %v550_v44, %v450_v46  ;;  %v436_v52 = vmul.f32 %v588_v50, %v688_v55  ;;  %v424_v53 = vadd.f32 1e-05, %v416_v47 }
 0x222   : > { %v433_v54 = vmul.f32 %v590_v48, %v684_v49 }
 0x223   : > { %473 = vst.msk [vmem:[%s734_s16 + $0x10] sm:$0xff] %vm254_vm1, %v465_v51  ;;  %v451_v56 = vmul.f32 %v549_v40, %v436_v52  ;;  %599 = vrsqrt.f32 %v424_v53 }
 0x224   : > { %v592_v57 = vpop.eup %591  ;;  %v448_v59 = vmul.f32 %v549_v40, %v433_v54 }
 0x225   : > { %v594_v60 = vpop.eup %593  ;;  %v466_v61 = vadd.f32 %v550_v44, %v451_v56  ;;  %v437_v62 = vmul.f32 %v592_v57, %v693_v58 }
 0x226   : > { %v463_v63 = vadd.f32 %v550_v44, %v448_v59  ;;  %v434_v0 = vmul.f32 %v594_v60, %v703_v4 }
 0x227   : > { %474 = vst.msk [vmem:[%s734_s16 + $0x18] sm:$0xff] %vm254_vm1, %v466_v61  ;;  %v452_v55 = vmul.f32 %v549_v40, %v437_v62 }
 0x228   : > { %471 = vst.msk [vmem:[%s734_s16] sm:$0xff] %vm254_vm1, %v463_v63  ;;  %v449_v49 = vmul.f32 %v549_v40, %v434_v0 }
 0x229   : > { %v596_v1 = vpop.eup %595  ;;  %v467_v2 = vadd.f32 %v550_v44, %v452_v55 }
 0x22a   : > { %v598_v5 = vpop.eup %597  ;;  %v464_v6 = vadd.f32 %v550_v44, %v449_v49  ;;  %v438_v7 = vmul.f32 %v596_v1, %v701_v3 }
 0x22b   : > { %475 = vst.msk [vmem:[%s734_s16 + $0x20] sm:$0xff] %vm254_vm1, %v467_v2  ;;  %v439_v58 = vmul.f32 %v598_v5, %v710_v12 }
 0x22c   : > { %472 = vst.msk [vmem:[%s734_s16 + $0x8] sm:$0xff] %vm254_vm1, %v464_v6  ;;  %v453_v4 = vmul.f32 %v549_v40, %v438_v7 }
 0x22d   : > { %v600_v8 = vpop.eup %599  ;;  %v454_v9 = vmul.f32 %v549_v40, %v439_v58 }
 0x22e   : > { %v468_v10 = vadd.f32 %v550_v44, %v453_v4  ;;  %v440_v13 = vmul.f32 %v600_v8, %v708_v11 }
 0x22f   : > { %v469_v14 = vadd.f32 %v550_v44, %v454_v9 }
 0x230   : > { %476 = vst.msk [vmem:[%s734_s16 + $0x28] sm:$0xff] %vm254_vm1, %v468_v10  ;;  %v455_v15 = vmul.f32 %v549_v40, %v440_v13 }
 0x231   : > { %477 = vst.msk [vmem:[%s734_s16 + $0x30] sm:$0xff] %vm254_vm1, %v469_v14 }
 0x232   : > { %v470_v16 = vadd.f32 %v550_v44, %v455_v15 }
 0x234   : > { %478 = vst.msk [vmem:[%s734_s16 + $0x38] sm:$0xff] %vm254_vm1, %v470_v16 }
 0x235 PF: > { %s15_s18 = sadd.s32 1, %s607_s18  }
 0x236   : > { %p12_p4 = scmp.ge.s32.totalorder %s15_s18, 4  }
 0x238   :  { %14 = sbr.rel (!%p12_p4) target bundleno = 1 (0x1), region = 70 }

// kernel: _lambda_.24
= control target key start
LH: loop header
LB: loop body
LE: loop exit
PB: predicated region body
PF: predicated region fallthrough
CT: control target
= control target key end

     0   :  { %s1031_s15 = smov 0   ;;  %s1158_s0 = inlined_call_operand.vmem [shape: f32[8,1,16,28], index: 0, kind: input, shape index: {}]   ;;  %s1159_s1 = inlined_call_operand.vmem [shape: f32[8,1,16,28], index: 1, kind: input, shape index: {}]   ;;  %s1160_s2 = inlined_call_operand.vmem [shape: f32[8,1,16,28], index: 2, kind: input, shape index: {}]   ;;  %s1161_s3 = inlined_call_operand.vmem [shape: f32[1,16,16], index: 3, kind: input, shape index: {}]   ;;  %s1162_s4 = inlined_call_operand.vmem [shape: f32[8,1,16,28], index: 4, kind: output, shape index: {}]  }
   0x1 LB: > { %s859_s16 = sadd.s32 4294967295, %s1002_s15   ;;  %p863_p0 = scmp.ge.s32.totalorder %s1002_s15, 1  ;;  %s1002_s15 = sphi %s1031_s15, %s14_s15  }
   0x2   : > { %p188_p1 = scmp.lt.s32.totalorder %s1002_s15, 3 }
   0x4   : > { %p189_p2 = pnand %p863_p0, %p188_p1 }
   0x5   : > { %s864_s17 = sshll.u32 (!%p189_p2), %s859_s16, 2  ;;  %v1004_v0 = vmov (!%p189_p2), 0.0   ;;  %vm1005_vm0 = vmmov (!%p189_p2), 0   ;;  %vm297_vm1 = vcmask (!%p189_p2), 228352   ;;  %v486_v37 = vld [vmem:[%s1161_s3] sm:$0xff] (!%p189_p2)  ;;  %v487_v39 = vld [vmem:[%s1161_s3 + $0x8] sm:$0xff] (!%p189_p2) }
   0x6   : > { %192 = sbr.rel (%p189_p2) target bundleno = 788 (0x314), region = 36  ;;  %906 = vmatprep.subr.bf16.mxu0 (!%p189_p2), %v1004_v0  ;;  %912 = vmatprep.subr.bf16.mxu1 (!%p189_p2), %v1004_v0  ;;  %p229_p3 = scmp.lt.s32.totalorder (!%p189_p2), %s864_s17, 7  ;;  %vm496_vm2 = vcmask (!%p189_p2), 130048  }
   0x7   : > { %908 = vmatprep.mubr.msk.bf16.mxu0 (!%p189_p2), %vm1005_vm0, %v1004_v0  ;;  %914 = vmatprep.mubr.msk.bf16.mxu1 (!%p189_p2), %vm1005_vm0, %v1004_v0 }
   0xd   : > { %s1164_s17 = smov (!%p229_p3, %s864_s17), 7 }
   0xe   : > { %s1045_s18 = sshll.u32 %s1164_s17, 4 }
   0xf   : > { %s240_s21 = scalar_lea.vmem %s1159_s1, %s1045_s18  ;;  %s1055_s24 = scalar_lea.vmem %s1158_s0, %s1045_s18 }
  0x10   : > { %v273_v1 = vld [vmem:[%s240_s21] sm:$0xff]  ;;  %v274_v2 = vld [vmem:[%s240_s21 + $0x8] sm:$0xff]  ;;  %v275_v3 = vld [vmem:[%s240_s21 + $0x10] sm:$0xff]  ;;  %s1120_s5 = scalar_lea.vmem %s1160_s2, %s1045_s18  ;;  %s254_s8 = scalar_lea.vmem %s1162_s4, %s1045_s18 }
  0x11   : > { %v293_v4 = vpack.c.bf16 %v274_v2, %v273_v1  ;;  %v276_v5 = vld [vmem:[%s240_s21 + $0x18] sm:$0xff]  ;;  %v257_v6 = vld [vmem:[%s1055_s24] sm:$0xff]  ;;  %v258_v7 = vld [vmem:[%s1055_s24 + $0x8] sm:$0xff] }
  0x12   : > { %v294_v8 = vpack.c.bf16 %v276_v5, %v275_v3  ;;  %v265_v9 = vmul.f32 0.18898223, %v257_v6  ;;  %v259_v10 = vld [vmem:[%s1055_s24 + $0x10] sm:$0xff]  ;;  %v260_v11 = vld [vmem:[%s1055_s24 + $0x18] sm:$0xff]  ;;  %v266_v13 = vmul.f32 0.18898223, %v258_v7 }
  0x13   : > { %v302_v12 = vsel %vm297_vm1, %v293_v4, 0  ;;  %v267_v14 = vmul.f32 0.18898223, %v259_v10  ;;  %v277_v15 = vld [vmem:[%s240_s21 + $0x20] sm:$0xff]  ;;  %v268_v17 = vmul.f32 0.18898223, %v260_v11 }
  0x14   : > { %907 = vmatpush3.bf16.xpose.msra.mxu0 %v302_v12  ;;  %v349_v16 = vsel %vm297_vm1, %v294_v8, 0  ;;  %v278_v18 = vld [vmem:[%s240_s21 + $0x28] sm:$0xff]  ;;  %v279_v19 = vld [vmem:[%s240_s21 + $0x30] sm:$0xff]  ;;  %v280_v20 = vld [vmem:[%s240_s21 + $0x38] sm:$0xff]  ;;  %v289_v23 = vpack.c.bf16 %v266_v13, %v265_v9 }
  0x15   : > { %913 = vmatpush3.bf16.xpose.msra.mxu1 %v349_v16  ;;  %918 = vmatprep.subr.bf16.mxu0 %v1004_v0  ;;  %v295_v21 = vpack.c.bf16 %v278_v18, %v277_v15  ;;  %v296_v22 = vpack.c.bf16 %v280_v20, %v279_v19  ;;  %v290_v24 = vpack.c.bf16 %v268_v17, %v267_v14  ;;  %v261_v25 = vld [vmem:[%s1055_s24 + $0x20] sm:$0xff]  ;;  %v262_v26 = vld [vmem:[%s1055_s24 + $0x28] sm:$0xff]  ;;  %v263_v28 = vld [vmem:[%s1055_s24 + $0x30] sm:$0xff] }
  0x16   : > { %924 = vmatprep.subr.bf16.mxu1 %v1004_v0  ;;  %v264_v29 = vld [vmem:[%s1055_s24 + $0x38] sm:$0xff]  ;;  %v269_v31 = vmul.f32 0.18898223, %v261_v25  ;;  %v270_v32 = vmul.f32 0.18898223, %v262_v26 }
  0x17   : > { %v396_v27 = vsel %vm297_vm1, %v295_v21, 0  ;;  %v443_v30 = vsel %vm297_vm1, %v296_v22, 0  ;;  %v271_v33 = vmul.f32 0.18898223, %v263_v28  ;;  %v272_v34 = vmul.f32 0.18898223, %v264_v29 }
  0x18   : > { %v291_v35 = vpack.c.bf16 %v270_v32, %v269_v31 }
  0x19   : > { %v292_v36 = vpack.c.bf16 %v272_v34, %v271_v33 }
  0x1b   : > { %909 = vmatmul.mubr.msk.bf16.vlgmr.msra.gmra.mrb[0].mxu0 %vm297_vm1, %v289_v23 }
  0x1c   : > { %915 = vmatmul.mubr.msk.bf16.vlgmr.msra.gmra.mrb[0].mxu1 %vm297_vm1, %v290_v24  ;;  %919 = vmatpush3.bf16.xpose.msra.mxu0 %v396_v27 }
  0x1d   : > { %925 = vmatpush3.bf16.xpose.msra.mxu1 %v443_v30  ;;  %920 = vmatprep.mubr.msk.bf16.mxu0 %vm1005_vm0, %v1004_v0 }
  0x1e   : > { %926 = vmatprep.mubr.msk.bf16.mxu1 %vm1005_vm0, %v1004_v0  ;;  %930 = vmatprep.subr.bf16.mxu0 %v1004_v0 }
  0x1f   : > { %936 = vmatprep.subr.bf16.mxu1 %v1004_v0 }
  0x23   : > { %921 = vmatmul.mubr.msk.bf16.vlgmr.msra.gmra.mrb[4].mxu0 %vm297_vm1, %v291_v35 }
  0x24   : > { %927 = vmatmul.mubr.msk.bf16.vlgmr.msra.gmra.mrb[4].mxu1 %vm297_vm1, %v292_v36  ;;  %932 = vmatprep.mubr.msk.bf16.mxu0 %vm1005_vm0, %v1004_v0 }
  0x25   : > { %938 = vmatprep.mubr.msk.bf16.mxu1 %vm1005_vm0, %v1004_v0 }
  0xee   : > { %v338_v38 = vpop.f32.mrb[0].mxu0 }
  0xef   : > { %v488_v40 = vadd.f32 %v486_v37, %v338_v38  ;;  %v385_v41 = vpop.f32.mrb[0].mxu1  ;;  %v910_v42 = vpop.f32.mrb[1].mxu0 }
  0xf0   : > { %v490_v43 = vadd.f32 %v486_v37, %v385_v41  ;;  %v341_v44 = vpop.f32.mrb[2].mxu0  ;;  %v916_v45 = vpop.f32.mrb[1].mxu1 }
  0xf1   : > { %v489_v46 = vadd.f32 %v487_v39, %v341_v44  ;;  %v911_v47 = vpop.f32.mrb[3].mxu0  ;;  %v388_v48 = vpop.f32.mrb[2].mxu1  ;;  %v497_v49 = vsel %vm496_vm2, %v488_v40, -inf }
  0xf2   : > { %v491_v50 = vadd.f32 %v487_v39, %v388_v48  ;;  %v503_v51 = vsel %vm496_vm2, %v490_v43, -inf  ;;  %v917_v52 = vpop.f32.mrb[3].mxu1  ;;  %498 = vmax.xlane.f32.xlu0 %v497_v49  ;;  %v281_v48 = vld [vmem:[%s1120_s5] sm:$0xff]  ;;  %v282_v49 = vld [vmem:[%s1120_s5 + $0x8] sm:$0xff] }
  0xf3   : > { %504 = vmax.xlane.f32.xlu1 %v503_v51  ;;  %v500_v54 = vsel %vm496_vm2, %v489_v46, -inf  ;;  %v283_v51 = vld [vmem:[%s1120_s5 + $0x10] sm:$0xff]  ;;  %v284_v52 = vld [vmem:[%s1120_s5 + $0x18] sm:$0xff] }
  0xf4   : > { %v506_v53 = vsel %vm496_vm2, %v491_v50, -inf }
  0xf6   : > { %501 = vmax.xlane.f32.xlu0 %v500_v54  ;;  %v432_v55 = vpop.f32.mrb[4].mxu0 }
  0xf7   : > { %507 = vmax.xlane.f32.xlu1 %v506_v53  ;;  %v492_v56 = vadd.f32 %v486_v37, %v432_v55  ;;  %v922_v57 = vpop.f32.mrb[5].mxu0  ;;  %v479_v58 = vpop.f32.mrb[4].mxu1  ;;  %v590_v53 = vpack.c.bf16 %v284_v52, %v283_v51 }
  0xf8   : > { %v435_v59 = vpop.f32.mrb[6].mxu0  ;;  %v494_v60 = vadd.f32 %v486_v37, %v479_v58  ;;  %v928_v61 = vpop.f32.mrb[5].mxu1 }
  0xf9   : > { %v493_v62 = vadd.f32 %v487_v39, %v435_v59  ;;  %v923_v63 = vpop.f32.mrb[7].mxu0  ;;  %v509_v1 = vsel %vm496_vm2, %v492_v56, -inf  ;;  %v482_v2 = vpop.f32.mrb[6].mxu1  ;;  %937 = vmatpush3.bf16.msra.mxu1 %v590_v53 }
  0xfa   : > { %510 = vmax.xlane.f32.xlu0 %v509_v1  ;;  %v495_v3 = vadd.f32 %v487_v39, %v482_v2  ;;  %v929_v4 = vpop.f32.mrb[7].mxu1  ;;  %v515_v6 = vsel %vm496_vm2, %v494_v60, -inf  ;;  %948 = vmatprep.subr.bf16.mxu1 %v1004_v0  ;;  %v286_v63 = vld [vmem:[%s1120_s5 + $0x28] sm:$0xff] }
  0xfb   : > { %v512_v5 = vsel %vm496_vm2, %v493_v62, -inf }
  0xfc   : > { %513 = vmax.xlane.f32.xlu1 %v512_v5  ;;  %v518_v7 = vsel %vm496_vm2, %v495_v3, -inf }
  0xfe   : > { %516 = vmax.xlane.f32.xlu0 %v515_v6 }
 0x100   : > { %519 = vmax.xlane.f32.xlu1 %v518_v7 }
 0x17f   : > { %v499_v8 = vpop.xlane.xlu0 %498 }
 0x180   : > { %v505_v9 = vpop.xlane.xlu1 %504  ;;  %v521_v10 = vsub.f32 %v488_v40, %v499_v8  ;;  %v287_v8 = vld [vmem:[%s1120_s5 + $0x30] sm:$0xff] }
 0x181   : > { %v523_v11 = vsub.f32 %v490_v43, %v505_v9  ;;  %v288_v9 = vld [vmem:[%s1120_s5 + $0x38] sm:$0xff] }
 0x182   : > { %v529_v12 = vmul.f32 1.442695, %v521_v10 }
 0x183   : > { %v533_v13 = vmul.f32 1.442695, %v523_v11  ;;  %v502_v14 = vpop.xlane.xlu0 %501 }
 0x184   : > { %964 = vpow2.f32 %v529_v12  ;;  %v508_v15 = vpop.xlane.xlu1 %507  ;;  %v522_v16 = vsub.f32 %v489_v46, %v502_v14  ;;  %v592_v14 = vpack.c.bf16 %v288_v9, %v287_v8 }
 0x185   : > { %v524_v17 = vsub.f32 %v491_v50, %v508_v15  ;;  %966 = vpow2.f32 %v533_v13  ;;  %v589_v50 = vpack.c.bf16 %v282_v49, %v281_v48 }
 0x186   : > { %v531_v18 = vmul.f32 1.442695, %v522_v16 }
 0x187   : > { %v535_v19 = vmul.f32 1.442695, %v524_v17  ;;  %v511_v20 = vpop.xlane.xlu0 %510  ;;  %931 = vmatpush3.bf16.msra.mxu0 %v589_v50 }
 0x188   : > { %968 = vpow2.f32 %v531_v18  ;;  %v525_v21 = vsub.f32 %v492_v56, %v511_v20  ;;  %942 = vmatprep.subr.bf16.mxu0 %v1004_v0 }
 0x189   : > { %v514_v22 = vpop.xlane.xlu1 %513  ;;  %970 = vpow2.f32 %v535_v19 }
 0x18a   : > { %v537_v23 = vmul.f32 1.442695, %v525_v21  ;;  %v526_v24 = vsub.f32 %v493_v62, %v514_v22  ;;  %v285_v62 = vld [vmem:[%s1120_s5 + $0x20] sm:$0xff] }
 0x18b   : > { %v517_v25 = vpop.xlane.xlu0 %516  ;;  %v591_v6 = vpack.c.bf16 %v286_v63, %v285_v62 }
 0x18c   : > { %972 = vpow2.f32 %v537_v23  ;;  %v539_v26 = vmul.f32 1.442695, %v526_v24  ;;  %v527_v27 = vsub.f32 %v494_v60, %v517_v25 }
 0x18d   : > { %v520_v28 = vpop.xlane.xlu1 %519 }
 0x18e   : > { %v965_v29 = vpop.eup %964  ;;  %974 = vpow2.f32 %v539_v26  ;;  %v541_v30 = vmul.f32 1.442695, %v527_v27  ;;  %v528_v31 = vsub.f32 %v495_v3, %v520_v28 }
 0x18f   : > { %v545_v32 = vsel %vm496_vm2, %v965_v29, 0.0  ;;  %v1100_v33 = vpop.eup %966 }
 0x190   : > { %976 = vpow2.f32 %v541_v30  ;;  %v543_v34 = vmul.f32 1.442695, %v528_v31  ;;  %546 = vadd.xlane.f32.xlu0 %v545_v32  ;;  %v551_v36 = vsel %vm496_vm2, %v1100_v33, 0.0 }
 0x192   : > { %v969_v35 = vpop.eup %968  ;;  %978 = vpow2.f32 %v543_v34 }
 0x193   : > { %v548_v37 = vsel %vm496_vm2, %v969_v35, 0.0  ;;  %v971_v38 = vpop.eup %970 }
 0x194   : > { %552 = vadd.xlane.f32.xlu0 %v551_v36  ;;  %549 = vadd.xlane.f32.xlu1 %v548_v37  ;;  %v554_v41 = vsel %vm496_vm2, %v971_v38, 0.0 }
 0x196   : > { %v1105_v39 = vpop.eup %972 }
 0x197   : > { %v557_v40 = vsel %vm496_vm2, %v1105_v39, 0.0 }
 0x198   : > { %v975_v42 = vpop.eup %974  ;;  %558 = vadd.xlane.f32.xlu0 %v557_v40  ;;  %555 = vadd.xlane.f32.xlu1 %v554_v41 }
 0x199   : > { %v560_v45 = vsel %vm496_vm2, %v975_v42, 0.0 }
 0x19a   : > { %v1110_v43 = vpop.eup %976 }
 0x19b   : > { %v563_v44 = vsel %vm496_vm2, %v1110_v43, 0.0 }
 0x19c   : > { %v979_v46 = vpop.eup %978  ;;  %564 = vadd.xlane.f32.xlu0 %v563_v44  ;;  %561 = vadd.xlane.f32.xlu1 %v560_v45 }
 0x19d   : > { %v566_v47 = vsel %vm496_vm2, %v979_v46, 0.0 }
 0x1a0   : > { %567 = vadd.xlane.f32.xlu1 %v566_v47 }
 0x21d   : > { %v547_v54 = vpop.xlane.xlu0 %546 }
 0x21e   : > { %980 = vrcp.f32 %v547_v54 }
 0x221   : > { %v553_v55 = vpop.xlane.xlu0 %552  ;;  %v550_v56 = vpop.xlane.xlu1 %549 }
 0x222   : > { %982 = vrcp.f32 %v550_v56 }
 0x223   : > { %984 = vrcp.f32 %v553_v55 }
 0x225   : > { %v559_v57 = vpop.xlane.xlu0 %558  ;;  %v556_v58 = vpop.xlane.xlu1 %555 }
 0x226   : > { %986 = vrcp.f32 %v556_v58 }
 0x227   : > { %988 = vrcp.f32 %v559_v57 }
 0x228   : > { %v981_v61 = vpop.eup %980 }
 0x229   : > { %v565_v59 = vpop.xlane.xlu0 %564  ;;  %v562_v60 = vpop.xlane.xlu1 %561  ;;  %v577_v3 = vmul.f32 %v981_v61, %v965_v29 }
 0x22a   : > { %990 = vrcp.f32 %v562_v60 }
 0x22b   : > { %992 = vrcp.f32 %v565_v59 }
 0x22c   : > { %v983_v1 = vpop.eup %982 }
 0x22d   : > { %v568_v2 = vpop.xlane.xlu1 %567  ;;  %v578_v4 = vmul.f32 %v983_v1, %v969_v35  ;;  %v985_v5 = vpop.eup %984 }
 0x22e   : > { %994 = vrcp.f32 %v568_v2  ;;  %v579_v11 = vmul.f32 %v985_v5, %v1100_v33 }
 0x22f   : > { %v585_v7 = vpack.c.bf16 %v578_v4, %v577_v3 }
 0x230   : > { %v987_v10 = vpop.eup %986 }
 0x231   : > { %v580_v12 = vmul.f32 %v987_v10, %v971_v38  ;;  %933 = vmatmul.mubr.msk.bf16.vlgmr.msra.gmra.mrb[8].mxu0 %vm496_vm2, %v585_v7  ;;  %v989_v13 = vpop.eup %988 }
 0x232   : > { %943 = vmatpush3.bf16.msra.mxu0 %v591_v6  ;;  %944 = vmatprep.mubr.msk.bf16.mxu0 %vm1005_vm0, %v1004_v0  ;;  %v581_v18 = vmul.f32 %v989_v13, %v1105_v39 }
 0x233   : > { %v586_v15 = vpack.c.bf16 %v580_v12, %v579_v11 }
 0x234   : > { %v991_v16 = vpop.eup %990 }
 0x235   : > { %v993_v17 = vpop.eup %992  ;;  %v582_v19 = vmul.f32 %v991_v16, %v975_v42  ;;  %939 = vmatmul.mubr.msk.bf16.vlgmr.msra.gmra.mrb[8].mxu1 %vm496_vm2, %v586_v15 }
 0x236   : > { %949 = vmatpush3.bf16.msra.mxu1 %v592_v14  ;;  %950 = vmatprep.mubr.msk.bf16.mxu1 %vm1005_vm0, %v1004_v0  ;;  %v583_v22 = vmul.f32 %v993_v17, %v1110_v43 }
 0x237   : > { %v587_v21 = vpack.c.bf16 %v582_v19, %v581_v18 }
 0x238   : > { %v995_v20 = vpop.eup %994 }
 0x239   : > { %v584_v23 = vmul.f32 %v995_v20, %v979_v46  ;;  %945 = vmatmul.mubr.msk.bf16.vlgmr.msra.gmra.mrb[12].mxu0 %vm496_vm2, %v587_v21 }
 0x23b   : > { %v588_v24 = vpack.c.bf16 %v584_v23, %v583_v22 }
 0x23d   : > { %951 = vmatmul.mubr.msk.bf16.vlgmr.msra.gmra.mrb[12].mxu1 %vm496_vm2, %v588_v24 }
 0x304   : > { %v630_v25 = vpop.f32.mrb[8].mxu0 }
 0x305   : > { %769 = vst.msk [vmem:[%s254_s8] sm:$0xff] %vm297_vm1, %v630_v25  ;;  %v934_v26 = vpop.f32.mrb[9].mxu0 }
 0x306   : > { %v633_v27 = vpop.f32.mrb[10].mxu0 }
 0x307   : > { %770 = vst.msk [vmem:[%s254_s8 + $0x8] sm:$0xff] %vm297_vm1, %v633_v27  ;;  %v935_v0 = vpop.f32.mrb[11].mxu0 }
 0x308   : > { %v674_v28 = vpop.f32.mrb[8].mxu1 }
 0x309   : > { %771 = vst.msk [vmem:[%s254_s8 + $0x10] sm:$0xff] %vm297_vm1, %v674_v28  ;;  %v940_v29 = vpop.f32.mrb[9].mxu1 }
 0x30a   : > { %v677_v30 = vpop.f32.mrb[10].mxu1 }
 0x30b   : > { %772 = vst.msk [vmem:[%s254_s8 + $0x18] sm:$0xff] %vm297_vm1, %v677_v30  ;;  %v941_v31 = vpop.f32.mrb[11].mxu1 }
 0x30c   : > { %v718_v32 = vpop.f32.mrb[12].mxu0 }
 0x30d   : > { %773 = vst.msk [vmem:[%s254_s8 + $0x20] sm:$0xff] %vm297_vm1, %v718_v32  ;;  %v946_v33 = vpop.f32.mrb[13].mxu0 }
 0x30e   : > { %v721_v34 = vpop.f32.mrb[14].mxu0 }
 0x30f   : > { %774 = vst.msk [vmem:[%s254_s8 + $0x28] sm:$0xff] %vm297_vm1, %v721_v34  ;;  %v947_v35 = vpop.f32.mrb[15].mxu0 }
 0x310   : > { %v762_v36 = vpop.f32.mrb[12].mxu1 }
 0x311   : > { %775 = vst.msk [vmem:[%s254_s8 + $0x30] sm:$0xff] %vm297_vm1, %v762_v36  ;;  %v952_v37 = vpop.f32.mrb[13].mxu1 }
 0x312   : > { %v765_v38 = vpop.f32.mrb[14].mxu1 }
 0x313   : > { %776 = vst.msk [vmem:[%s254_s8 + $0x38] sm:$0xff] %vm297_vm1, %v765_v38  ;;  %v953_v39 = vpop.f32.mrb[15].mxu1 }
 0x314 PF: > { %s14_s15 = sadd.s32 1, %s1002_s15  }
 0x315   : > { %p11_p4 = scmp.ge.s32.totalorder %s14_s15, 4  }
 0x317   :  { %13 = sbr.rel (!%p11_p4) target bundleno = 1 (0x1), region = 72 }

// kernel: _lambda_.26
= control target key start
LH: loop header
LB: loop body
LE: loop exit
PB: predicated region body
PF: predicated region fallthrough
CT: control target
= control target key end

     0   :  { %s1006_s23 = smov 0   ;;  %s1220_s0 = inlined_call_operand.vmem [shape: f32[128,28], index: 0, kind: input, shape index: {}]   ;;  %s1221_s1 = inlined_call_operand.vmem [shape: f32[128,28], index: 1, kind: input, shape index: {}]   ;;  %s1222_s2 = inlined_call_operand.vmem [shape: f32[28,3], index: 2, kind: input, shape index: {}]   ;;  %s1223_s3 = inlined_call_operand.vmem [shape: f32[1,3], index: 3, kind: input, shape index: {}]   ;;  %s1224_s4 = inlined_call_operand.vmem [shape: f32[1,3], index: 4, kind: input, shape index: {}]   ;;  %s1225_s5 = inlined_call_operand.<no memory space> [shape: f32[1,1], index: 5, kind: input, shape index: {}]   ;;  %s1226_s6 = inlined_call_operand.vmem [shape: f32[128,28], index: 6, kind: output, shape index: {}]  }
   0x1   :  { %v11_v0 = vstv %s1225_s5 }
   0x2   :  { %12 = vst [vmem:[#allocation2] sm:$0x1] %v11_v0 }
   0x3 LB: > { %s838_s24 = sadd.s32 4294967295, %s964_s23   ;;  %p842_p0 = scmp.ge.s32.totalorder %s964_s23, 1  ;;  %s964_s23 = sphi %s1006_s23, %s18_s23  }
   0x4   : > { %p226_p1 = scmp.lt.s32.totalorder %s964_s23, 3 }
   0x6   : > { %p227_p2 = pnand %p842_p0, %p226_p1 }
   0x7   : > { %v292_v1 = vld [vmem:[%s1222_s2] sm:$0xff] (!%p227_p2)  ;;  %v293_v2 = vld [vmem:[%s1222_s2 + $0x8] sm:$0xff] (!%p227_p2)  ;;  %v294_v3 = vld [vmem:[%s1222_s2 + $0x10] sm:$0xff] (!%p227_p2)  ;;  %s843_s30 = sshll.u32 (!%p227_p2), %s838_s24, 3  ;;  %vm318_vm0 = vcmask (!%p227_p2), 1045504   ;;  %vm305_vm1 = vcmask (!%p227_p2), 228352  }
   0x8   : > { %230 = sbr.rel (%p227_p2) target bundleno = 628 (0x274), region = 44  ;;  %v296_v4 = vpack.c.bf16 (!%p227_p2), %v293_v2, %v292_v1  ;;  %v295_v5 = vld [vmem:[%s1222_s2 + $0x18] sm:$0xf] (!%p227_p2)  ;;  %p262_p3 = scmp.lt.s32.totalorder (!%p227_p2), %s843_s30, 15  ;;  %v849_v20 = vld [vmem:[%s1223_s3] ss:$0 sm:$0xff] (!%p227_p2) }
   0x9   : > { %v297_v6 = vpack.c.bf16 (!%p227_p2), %v295_v5, %v294_v3  ;;  %v966_v2 = vmov (!%p227_p2), -1.0   ;;  %vm618_vm7 = vcmask (!%p227_p2), 23552  }
   0xa   : > { %864 = vmatprep.subr.bf16.mxu0 (!%p227_p2), %v296_v4  ;;  %876 = vmatprep.subr.bf16.mxu1 (!%p227_p2), %v296_v4 }
   0xb   : > { %865 = vmatpush3.bf16.msra.mxu0 (!%p227_p2), %v296_v4  ;;  %878 = vmatpush3.bf16.msra.mxu1 (!%p227_p2), %v296_v4  ;;  %v320_v7 = vsel (!%p227_p2), %vm318_vm0, %v297_v6, 0 }
   0xc   : > { %880 = vmatprep.subr.msk.bf16.mxu0 (!%p227_p2), %vm318_vm0, %v297_v6  ;;  %881 = vmatprep.subr.msk.bf16.mxu1 (!%p227_p2), %vm318_vm0, %v297_v6 }
   0xf   : > { %s1228_s30 = smov (!%p262_p3, %s843_s30), 15  ;;  %867 = vmatpush3.bf16.msra.mxu0 %v320_v7  ;;  %879 = vmatpush3.bf16.msra.mxu1 %v320_v7 }
  0x10   : > { %s1026_s9 = sshll.u32 %s1228_s30, 3 }
  0x11   : > { %s265_s12 = scalar_lea.vmem %s1220_s0, %s1026_s9  ;;  %s271_s19 = scalar_lea.vmem %s1221_s1, %s1026_s9 }
  0x12   : > { %v280_v8 = vld [vmem:[%s265_s12] sm:$0xff]  ;;  %v281_v9 = vld [vmem:[%s265_s12 + $0x8] sm:$0xff]  ;;  %v282_v13 = vld [vmem:[%s265_s12 + $0x10] sm:$0xff]  ;;  %s1199_s22 = scalar_lea.vmem %s1226_s6, %s1026_s9 }
  0x13   : > { %v284_v10 = vld [vmem:[%s265_s12 + $0x20] sm:$0xff]  ;;  %v288_v11 = vpack.c.bf16 %v281_v9, %v280_v8  ;;  %v285_v12 = vld [vmem:[%s265_s12 + $0x28] sm:$0xff]  ;;  %v283_v14 = vld [vmem:[%s265_s12 + $0x18] sm:$0xff] }
  0x14   : > { %v290_v15 = vpack.c.bf16 %v285_v12, %v284_v10  ;;  %v289_v16 = vpack.c.bf16 %v283_v14, %v282_v13  ;;  %v286_v17 = vld [vmem:[%s265_s12 + $0x30] sm:$0xff]  ;;  %v287_v18 = vld [vmem:[%s265_s12 + $0x38] sm:$0xff] }
  0x15   : > { %868 = vmatprep.mubr.msk.bf16.mxu0 %vm305_vm1, %v288_v11  ;;  %v291_v19 = vpack.c.bf16 %v287_v18, %v286_v17 }
  0x16   : > { %872 = vmatprep.mubr.msk.bf16.mxu1 %vm305_vm1, %v290_v15  ;;  %869 = vmatmul.mubr.msk.bf16.vlgmr.msra.gmra.mrb[0].mxu0 %vm305_vm1, %v289_v16 }
  0x17   : > { %873 = vmatmul.mubr.msk.bf16.vlgmr.msra.gmra.mrb[0].mxu1 %vm305_vm1, %v291_v19 }
  0xe9   : > { %v870_v21 = vpop.f32.mrb[0].mxu0 }
  0xea   : > { %v365_v22 = vadd.f32 %v870_v21, %v849_v20  ;;  %v874_v23 = vpop.f32.mrb[0].mxu1  ;;  %v356_v24 = vpop.f32.mrb[1].mxu0 }
  0xeb   : > { %v1039_v25 = vadd.f32 %v874_v23, %v849_v20  ;;  %v357_v26 = vadd.f32 %v849_v20, %v356_v24  ;;  %v372_v27 = vpop.f32.mrb[1].mxu1  ;;  %v871_v28 = vpop.f32.mrb[2].mxu0 }
  0xec   : > { %v397_v29 = vmul.f32 0.70710677, %v365_v22  ;;  %v373_v30 = vadd.f32 %v849_v20, %v372_v27  ;;  %v875_v31 = vpop.f32.mrb[2].mxu1  ;;  %v359_v32 = vpop.f32.mrb[3].mxu0  ;;  %v1044_v46 = vadd.f32 %v871_v28, %v849_v20  ;;  %v1056_v55 = vmul.f32 0.5, %v365_v22 }
  0xed   : > { %v401_v33 = vmul.f32 0.70710677, %v1039_v25  ;;  %v395_v34 = vmul.f32 0.70710677, %v357_v26  ;;  %v375_v38 = vpop.f32.mrb[3].mxu1  ;;  %v1050_v52 = vadd.f32 %v875_v31, %v849_v20  ;;  %v1052_v53 = vadd.f32 %v849_v20, %v359_v32 }
  0xee   : > { %v421_v35 = vand.u32 2147483647, %v397_v29  ;;  %v399_v36 = vmul.f32 0.70710677, %v373_v30  ;;  %v1048_v51 = vmul.f32 0.70710677, %v1044_v46  ;;  %v1054_v54 = vadd.f32 %v849_v20, %v375_v38 }
  0xef   : > { %v425_v37 = vand.u32 2147483647, %v401_v33  ;;  %v419_v41 = vand.u32 2147483647, %v395_v34  ;;  %vm405_vm2 = vcmp.ge.f32.partialorder %v397_v29, 0.0  ;;  %vm409_vm3 = vcmp.ge.f32.partialorder %v401_v33, 0.0 }
  0xf0   : > { %v429_v39 = vmul.f32 0.3275911, %v421_v35  ;;  %v1042_v43 = vand.u32 2147483647, %v399_v36  ;;  %v533_v50 = vsub.f32 0.0, %v421_v35  ;;  %v1062_v60 = vmul.f32 0.5, %v357_v26 }
  0xf1   : > { %v433_v40 = vmul.f32 0.3275911, %v425_v37  ;;  %v427_v45 = vmul.f32 0.3275911, %v419_v41  ;;  %v537_v56 = vsub.f32 0.0, %v425_v37  ;;  %vm403_vm4 = vcmp.ge.f32.partialorder %v395_v34, 0.0 }
  0xf2   : > { %v437_v42 = vadd.f32 1.0, %v429_v39  ;;  %v431_v47 = vmul.f32 0.3275911, %v1042_v43  ;;  %v422_v57 = vand.u32 2147483647, %v1048_v51  ;;  %v541_v59 = vmul.f32 %v533_v50, %v421_v35 }
  0xf3   : > { %v441_v44 = vadd.f32 1.0, %v433_v40  ;;  %v435_v48 = vadd.f32 1.0, %v427_v45  ;;  %v1060_v58 = vmul.f32 0.70710677, %v1050_v52  ;;  %v1065_v62 = vmul.f32 0.70710677, %v1052_v53 }
  0xf4   : > { %v439_v49 = vadd.f32 1.0, %v431_v47  ;;  %v430_v61 = vmul.f32 0.3275911, %v422_v57  ;;  %v1067_v63 = vmul.f32 0.5, %v373_v30  ;;  %v1071_v1 = vmul.f32 0.70710677, %v1054_v54 }
  0xf5   : > { %894 = vrcp.f32 %v441_v44  ;;  %v426_v0 = vand.u32 2147483647, %v1060_v58  ;;  %v1074_v3 = vsel %vm405_vm2, 1.0, %v966_v2  ;;  %v1077_v4 = vsel %vm409_vm3, 1.0, %v966_v2 }
  0xf6   : > { %896 = vrcp.f32 %v437_v42  ;;  %v545_v5 = vmul.f32 %v537_v56, %v425_v37  ;;  %v438_v6 = vadd.f32 1.0, %v430_v61  ;;  %v531_v7 = vsub.f32 0.0, %v419_v41 }
  0xf7   : > { %898 = vrcp.f32 %v435_v48  ;;  %vm407_vm5 = vcmp.ge.f32.partialorder %v399_v36, 0.0  ;;  %v434_v8 = vmul.f32 0.3275911, %v426_v0  ;;  %v420_v9 = vand.u32 2147483647, %v1065_v62 }
  0xf8   : > { %900 = vrcp.f32 %v439_v49  ;;  %v551_v11 = vmul.f32 1.442695, %v541_v59  ;;  %v1083_v12 = vsel %vm403_vm4, 1.0, %v966_v2  ;;  %v1086_v13 = vand.u32 2147483647, %v1071_v1 }
  0xf9   : > { %902 = vrcp.f32 %v438_v6  ;;  %v535_v16 = vsub.f32 0.0, %v1042_v43  ;;  %v442_v17 = vadd.f32 1.0, %v434_v8  ;;  %v428_v18 = vmul.f32 0.3275911, %v420_v9 }
  0xfa   : > { %v559_v19 = vmul.f32 1.442695, %v545_v5  ;;  %v1093_v20 = vsel %vm407_vm5, 1.0, %v966_v2  ;;  %v534_v21 = vsub.f32 0.0, %v422_v57  ;;  %v432_v22 = vmul.f32 0.3275911, %v1086_v13 }
  0xfb   : > { %v539_v26 = vmul.f32 %v531_v7, %v419_v41  ;;  %904 = vrcp.f32 %v442_v17  ;;  %v436_v27 = vadd.f32 1.0, %v428_v18  ;;  %v538_v28 = vsub.f32 0.0, %v426_v0 }
  0xfc   : > { %906 = vpow2.f32 %v551_v11  ;;  %v440_v29 = vadd.f32 1.0, %v432_v22  ;;  %v543_v33 = vmul.f32 %v535_v16, %v1042_v43  ;;  %vm406_vm6 = vcmp.ge.f32.partialorder %v1048_v51, 0.0 }
  0xfd   : > { %v542_v36 = vmul.f32 %v534_v21, %v422_v57  ;;  %908 = vrcp.f32 %v436_v27  ;;  %v532_v37 = vsub.f32 0.0, %v420_v9  ;;  %v547_v41 = vmul.f32 1.442695, %v539_v26 }
  0xfe   : > { %910 = vrcp.f32 %v440_v29  ;;  %v1107_v44 = vmul.f32 0.5, %v1044_v46  ;;  %v546_v45 = vmul.f32 %v538_v28, %v426_v0  ;;  %v555_v47 = vmul.f32 1.442695, %v543_v33 }
  0xff   : > { %v1080_v10 = vpop.eup %894  ;;  %912 = vpow2.f32 %v559_v19  ;;  %v1118_v57 = vsel %vm406_vm6, 1.0, %v966_v2  ;;  %v553_v46 = vmul.f32 1.442695, %v542_v36  ;;  %v540_v0 = vmul.f32 %v532_v37, %v420_v9 }
 0x100   : > { %v1088_v14 = vpop.eup %896  ;;  %v465_v15 = vmul.f32 1.0614054, %v1080_v10  ;;  %914 = vpow2.f32 %v547_v41  ;;  %v561_v7 = vmul.f32 1.442695, %v546_v45  ;;  %v536_v16 = vsub.f32 0.0, %v1086_v13 }
 0x101   : > { %v1096_v23 = vpop.eup %898  ;;  %v461_v30 = vmul.f32 1.0614054, %v1088_v14  ;;  %916 = vpow2.f32 %v555_v47  ;;  %vm410_vm8 = vcmp.ge.f32.partialorder %v1060_v58, 0.0  ;;  %vm404_vm9 = vcmp.ge.f32.partialorder %v1065_v62, 0.0 }
 0x102   : > { %v473_v24 = vadd.f32 -1.4531521, %v465_v15  ;;  %v1099_v31 = vpop.eup %900  ;;  %v459_v34 = vmul.f32 1.0614054, %v1096_v23  ;;  %918 = vpow2.f32 %v553_v46  ;;  %vm408_vm10 = vcmp.ge.f32.partialorder %v1071_v1, 0.0 }
 0x103   : > { %v463_v35 = vmul.f32 1.0614054, %v1099_v31  ;;  %v469_v39 = vadd.f32 -1.4531521, %v461_v30  ;;  %v1112_v50 = vpop.eup %902  ;;  %920 = vpow2.f32 %v561_v7 }
 0x104   : > { %v481_v32 = vmul.f32 %v1080_v10, %v473_v24  ;;  %v467_v40 = vadd.f32 -1.4531521, %v459_v34  ;;  %v462_v61 = vmul.f32 1.0614054, %v1112_v50  ;;  %v549_v24 = vmul.f32 1.442695, %v540_v0 }
 0x105   : > { %v471_v42 = vadd.f32 -1.4531521, %v463_v35  ;;  %v477_v48 = vmul.f32 %v1088_v14, %v469_v39  ;;  %v1121_v11 = vpop.eup %904  ;;  %v544_v35 = vmul.f32 %v536_v16, %v1086_v13 }
 0x106   : > { %v489_v38 = vadd.f32 1.4214138, %v481_v32  ;;  %v475_v49 = vmul.f32 %v1096_v23, %v467_v40  ;;  %v470_v15 = vadd.f32 -1.4531521, %v462_v61  ;;  %v907_v17 = vpop.eup %906  ;;  %v466_v19 = vmul.f32 1.0614054, %v1121_v11 }
 0x107   : > { %v479_v56 = vmul.f32 %v1099_v31, %v471_v42  ;;  %v485_v5 = vadd.f32 1.4214138, %v477_v48  ;;  %v1130_v27 = vpop.eup %908  ;;  %922 = vpow2.f32 %v549_v24 }
 0x108   : > { %v497_v43 = vmul.f32 %v1080_v10, %v489_v38  ;;  %v483_v8 = vadd.f32 1.4214138, %v475_v49  ;;  %v478_v22 = vmul.f32 %v1112_v50, %v470_v15  ;;  %v474_v29 = vadd.f32 -1.4531521, %v466_v19  ;;  %v1132_v32 = vpop.eup %910 }
 0x109   : > { %v487_v6 = vadd.f32 1.4214138, %v479_v56  ;;  %v493_v51 = vmul.f32 %v1088_v14, %v485_v5  ;;  %v460_v34 = vmul.f32 1.0614054, %v1130_v27  ;;  %v464_v39 = vmul.f32 1.0614054, %v1132_v32  ;;  %v913_v47 = vpop.eup %912 }
 0x10a   : > { %v505_v59 = vadd.f32 -0.28449672, %v497_v43  ;;  %v491_v9 = vmul.f32 %v1096_v23, %v483_v8  ;;  %v486_v33 = vadd.f32 1.4214138, %v478_v22  ;;  %v482_v38 = vmul.f32 %v1121_v11, %v474_v29  ;;  %v915_v0 = vpop.eup %914 }
 0x10b   : > { %v495_v18 = vmul.f32 %v1099_v31, %v487_v6  ;;  %v501_v26 = vadd.f32 -0.28449672, %v493_v51  ;;  %v468_v45 = vadd.f32 -1.4531521, %v460_v34  ;;  %v472_v13 = vadd.f32 -1.4531521, %v464_v39  ;;  %v917_v15 = vpop.eup %916 }
 0x10c   : > { %v513_v21 = vmul.f32 %v1080_v10, %v505_v59  ;;  %v499_v30 = vadd.f32 -0.28449672, %v491_v9  ;;  %v494_v42 = vmul.f32 %v1112_v50, %v486_v33  ;;  %v490_v49 = vadd.f32 1.4214138, %v482_v38  ;;  %v919_v9 = vpop.eup %918 }
 0x10d   : > { %v503_v28 = vadd.f32 -0.28449672, %v495_v18  ;;  %v509_v36 = vmul.f32 %v1088_v14, %v501_v26  ;;  %v476_v46 = vmul.f32 %v1130_v27, %v468_v45  ;;  %v557_v59 = vmul.f32 1.442695, %v544_v35  ;;  %v921_v29 = vpop.eup %920 }
 0x10e   : > { %v507_v40 = vmul.f32 %v1096_v23, %v499_v30  ;;  %v521_v41 = vadd.f32 0.2548296, %v513_v21  ;;  %v502_v56 = vadd.f32 -0.28449672, %v494_v42  ;;  %v498_v6 = vmul.f32 %v1121_v11, %v490_v49 }
 0x10f   : > { %v511_v37 = vmul.f32 %v1099_v31, %v503_v28  ;;  %v517_v43 = vadd.f32 0.2548296, %v509_v36  ;;  %v480_v7 = vmul.f32 %v1132_v32, %v472_v13  ;;  %v484_v18 = vadd.f32 1.4214138, %v476_v46 }
 0x110   : > { %v515_v8 = vadd.f32 0.2548296, %v507_v40  ;;  %v529_v16 = vmul.f32 %v1080_v10, %v521_v41  ;;  %v510_v51 = vmul.f32 %v1112_v50, %v502_v56  ;;  %v506_v22 = vadd.f32 -0.28449672, %v498_v6 }
 0x111   : > { %v519_v48 = vadd.f32 0.2548296, %v511_v37  ;;  %v525_v61 = vmul.f32 %v1088_v14, %v517_v43  ;;  %v488_v24 = vadd.f32 1.4214138, %v480_v7  ;;  %v492_v26 = vmul.f32 %v1130_v27, %v484_v18  ;;  %v923_v43 = vpop.eup %922 }
 0x112   : > { %v523_v14 = vmul.f32 %v1096_v23, %v515_v8  ;;  %924 = vpow2.f32 %v557_v59  ;;  %v514_v10 = vmul.f32 %v1121_v11, %v506_v22  ;;  %v418_v46 = vsel %vm410_vm8, 1.0, %v966_v2 }
 0x113   : > { %v527_v5 = vmul.f32 %v1099_v31, %v519_v48  ;;  %v565_v19 = vmul.f32 %v907_v17, %v525_v61  ;;  %v518_v31 = vadd.f32 0.2548296, %v510_v51  ;;  %v496_v33 = vmul.f32 %v1132_v32, %v488_v24 }
 0x114   : > { %v563_v34 = vmul.f32 %v915_v0, %v523_v14  ;;  %v569_v17 = vmul.f32 %v913_v47, %v529_v16  ;;  %v500_v36 = vadd.f32 -0.28449672, %v492_v26  ;;  %v522_v38 = vadd.f32 0.2548296, %v514_v10 }
 0x115   : > { %v567_v21 = vmul.f32 %v917_v15, %v527_v5  ;;  %v573_v28 = vsub.f32 1.0, %v565_v19  ;;  %v526_v35 = vmul.f32 %v1112_v50, %v518_v31  ;;  %v504_v39 = vadd.f32 -0.28449672, %v496_v33 }
 0x116   : > { %v571_v40 = vsub.f32 1.0, %v563_v34  ;;  %v508_v42 = vmul.f32 %v1130_v27, %v500_v36  ;;  %v530_v48 = vmul.f32 %v1121_v11, %v522_v38  ;;  %v577_v49 = vsub.f32 1.0, %v569_v17 }
 0x117   : > { %v575_v30 = vsub.f32 1.0, %v567_v21  ;;  %v581_v37 = vmul.f32 %v573_v28, %v1074_v3  ;;  %v566_v41 = vmul.f32 %v919_v9, %v526_v35  ;;  %v512_v47 = vmul.f32 %v1132_v32, %v504_v39  ;;  %v854_v3 = vld [vmem:[%s1224_s4] ss:$0 sm:$0xff] }
 0x118   : > { %v516_v56 = vadd.f32 0.2548296, %v508_v42  ;;  %v570_v59 = vmul.f32 %v921_v29, %v530_v48  ;;  %v585_v16 = vmul.f32 %v577_v49, %v1077_v4  ;;  %v416_v14 = vsel %vm408_vm10, 1.0, %v966_v2  ;;  %v855_v42 = vld [vmem:[#allocation2] ss:$0 sm:$0xff] }
 0x119   : > { %v583_v23 = vmul.f32 %v575_v30, %v1093_v20  ;;  %v589_v45 = vadd.f32 1.0, %v581_v37  ;;  %v579_v20 = vmul.f32 %v571_v40, %v1083_v12  ;;  %v574_v13 = vsub.f32 1.0, %v566_v41 }
 0x11a   : > { %v520_v61 = vadd.f32 0.2548296, %v512_v47  ;;  %v524_v5 = vmul.f32 %v1130_v27, %v516_v56  ;;  %v578_v7 = vsub.f32 1.0, %v570_v59  ;;  %v593_v1 = vadd.f32 1.0, %v585_v16 }
 0x11b   : > { %v591_v50 = vadd.f32 1.0, %v583_v23  ;;  %v597_v58 = vmul.f32 %v589_v45, %v1056_v55  ;;  %v587_v0 = vadd.f32 1.0, %v579_v20  ;;  %v582_v11 = vmul.f32 %v574_v13, %v1118_v57 }
 0x11c   : > { %v528_v12 = vmul.f32 %v1132_v32, %v520_v61  ;;  %v925_v55 = vpop.eup %924  ;;  %v564_v51 = vmul.f32 %v923_v43, %v524_v5  ;;  %v586_v57 = vmul.f32 %v578_v7, %v418_v46  ;;  %v393_v29 = vmul.f32 0.5, %v1039_v25 }
 0x11d   : > { %v612_v6 = vmul.f32 %v854_v3, %v597_v58  ;;  %v595_v8 = vmul.f32 %v587_v0, %v1062_v60  ;;  %v599_v15 = vmul.f32 %v591_v50, %v1067_v63  ;;  %v590_v19 = vadd.f32 1.0, %v582_v11 }
 0x11e   : > { %v568_v9 = vmul.f32 %v925_v55, %v528_v12  ;;  %v572_v21 = vsub.f32 1.0, %v564_v51  ;;  %v412_v60 = vsel %vm404_vm9, 1.0, %v966_v2  ;;  %v594_v28 = vadd.f32 1.0, %v586_v57 }
 0x11f   : > { %v625_v18 = vsel %vm618_vm7, %v612_v6, 0.0  ;;  %v610_v27 = vmul.f32 %v854_v3, %v595_v8  ;;  %v598_v32 = vmul.f32 %v590_v19, %v1107_v44  ;;  %v614_v22 = vmul.f32 %v854_v3, %v599_v15 }
 0x120   : > { %626 = vadd.xlane.f32.xlu1 %v625_v18  ;;  %v576_v63 = vsub.f32 1.0, %v568_v9  ;;  %v580_v24 = vmul.f32 %v572_v21, %v412_v60  ;;  %v388_v44 = vmul.f32 0.5, %v1052_v53  ;;  %v394_v10 = vmul.f32 0.5, %v1050_v52 }
 0x121   : > { %v619_v4 = vsel %vm618_vm7, %v610_v27, 0.0  ;;  %v613_v31 = vmul.f32 %v854_v3, %v598_v32  ;;  %v392_v33 = vmul.f32 0.5, %v1054_v54  ;;  %v631_v34 = vsel %vm618_vm7, %v614_v22, 0.0 }
 0x122   : > { %620 = vadd.xlane.f32.xlu0 %v619_v4  ;;  %v584_v26 = vmul.f32 %v576_v63, %v416_v14  ;;  %v588_v62 = vadd.f32 1.0, %v580_v24  ;;  %v601_v35 = vmul.f32 %v593_v1, %v393_v29  ;;  %v602_v37 = vmul.f32 %v594_v28, %v394_v10 }
 0x123   : > { %v628_v30 = vsel %vm618_vm7, %v613_v31, 0.0  ;;  %v967_v41 = vmov 0  }
 0x124   : > { %629 = vadd.xlane.f32.xlu1 %v628_v30  ;;  %v592_v2 = vadd.f32 1.0, %v584_v26  ;;  %v596_v17 = vmul.f32 %v588_v62, %v388_v44  ;;  %v616_v38 = vmul.f32 %v854_v3, %v601_v35  ;;  %v617_v52 = vmul.f32 %v854_v3, %v602_v37  ;;  %892 = vset.pattern.permute.xlu0 %v967_v41 }
 0x125   : > { %893 = vset.pattern.permute.xlu1 %v967_v41  ;;  %v712_v41 = vld [vmem:[%s271_s19 + $0x30] sm:$0xff] }
 0x126   : > { %632 = vadd.xlane.f32.xlu0 %v631_v34  ;;  %v600_v36 = vmul.f32 %v592_v2, %v392_v33  ;;  %v611_v23 = vmul.f32 %v854_v3, %v596_v17  ;;  %v637_v54 = vsel %vm618_vm7, %v616_v38, 0.0  ;;  %v640_v40 = vsel %vm618_vm7, %v617_v52, 0.0  ;;  %v706_v52 = vld [vmem:[%s271_s19] sm:$0xff] }
 0x128   : > { %v615_v25 = vmul.f32 %v854_v3, %v600_v36  ;;  %v622_v53 = vsel %vm618_vm7, %v611_v23, 0.0 }
 0x12a   : > { %v634_v39 = vsel %vm618_vm7, %v615_v25, 0.0  ;;  %623 = vadd.xlane.f32.xlu0 %v622_v53  ;;  %v708_v53 = vld [vmem:[%s271_s19 + $0x10] sm:$0xff] }
 0x12b   : > { %635 = vadd.xlane.f32.xlu1 %v634_v39 }
 0x12e   : > { %638 = vadd.xlane.f32.xlu0 %v637_v54 }
 0x12f   : > { %641 = vadd.xlane.f32.xlu1 %v640_v40 }
 0x1ad   : > { %v627_v45 = vpop.xlane.xlu1 %626 }
 0x1ae   : > { %v652_v43 = vadd.f32 %v855_v42, %v627_v45 }
 0x1af   : > { %v621_v47 = vpop.xlane.xlu0 %620 }
 0x1b0   : > { %v660_v48 = vsub.f32 0.0, %v652_v43  ;;  %v650_v20 = vadd.f32 %v855_v42, %v621_v47  ;;  %v710_v43 = vld [vmem:[%s271_s19 + $0x20] sm:$0xff] }
 0x1b1   : > { %v630_v46 = vpop.xlane.xlu1 %629 }
 0x1b2   : > { %v670_v50 = vmul.f32 1.442695, %v660_v48  ;;  %v658_v49 = vsub.f32 0.0, %v650_v20  ;;  %v653_v11 = vadd.f32 %v855_v42, %v630_v46  ;;  %v709_v20 = vld [vmem:[%s271_s19 + $0x18] sm:$0xff] }
 0x1b3   : > { %v633_v3 = vpop.xlane.xlu0 %632 }
 0x1b4   : > { %926 = vpow2.f32 %v670_v50  ;;  %v666_v13 = vmul.f32 1.442695, %v658_v49  ;;  %v654_v56 = vadd.f32 %v855_v42, %v633_v3  ;;  %v661_v16 = vsub.f32 0.0, %v653_v11  ;;  %v707_v3 = vld [vmem:[%s271_s19 + $0x8] sm:$0xff] }
 0x1b6   : > { %928 = vpow2.f32 %v666_v13  ;;  %v662_v59 = vsub.f32 0.0, %v654_v56  ;;  %v672_v19 = vmul.f32 1.442695, %v661_v16 }
 0x1b7   : > { %v624_v58 = vpop.xlane.xlu0 %623 }
 0x1b8   : > { %v674_v8 = vmul.f32 1.442695, %v662_v59  ;;  %v636_v15 = vpop.xlane.xlu1 %635  ;;  %v651_v51 = vadd.f32 %v855_v42, %v624_v58  ;;  %v711_v58 = vld [vmem:[%s271_s19 + $0x28] sm:$0xff] }
 0x1b9   : > { %v655_v57 = vadd.f32 %v855_v42, %v636_v15 }
 0x1ba   : > { %v659_v9 = vsub.f32 0.0, %v651_v51 }
 0x1bb   : > { %v639_v61 = vpop.xlane.xlu0 %638  ;;  %v663_v21 = vsub.f32 0.0, %v655_v57 }
 0x1bc   : > { %v656_v5 = vadd.f32 %v855_v42, %v639_v61  ;;  %v642_v27 = vpop.xlane.xlu1 %641  ;;  %v668_v32 = vmul.f32 1.442695, %v659_v9  ;;  %v713_v61 = vld [vmem:[%s271_s19 + $0x38] sm:$0xff] }
 0x1bd   : > { %v657_v60 = vadd.f32 %v855_v42, %v642_v27  ;;  %v676_v22 = vmul.f32 1.442695, %v663_v21 }
 0x1be   : > { %v927_v0 = vpop.eup %926  ;;  %v664_v7 = vsub.f32 0.0, %v656_v5 }
 0x1bf   : > { %v684_v6 = vadd.f32 1.0, %v927_v0  ;;  %v665_v24 = vsub.f32 0.0, %v657_v60 }
 0x1c0   : > { %v929_v12 = vpop.eup %928  ;;  %v678_v18 = vmul.f32 1.442695, %v664_v7 }
 0x1c1   : > { %930 = vrcp.f32 %v684_v6  ;;  %v682_v55 = vadd.f32 1.0, %v929_v12  ;;  %v680_v26 = vmul.f32 1.442695, %v665_v24 }
 0x1c3   : > { %932 = vrcp.f32 %v682_v55 }
 0x1c4   : > { %934 = vpow2.f32 %v674_v8 }
 0x1c5   : > { %936 = vpow2.f32 %v678_v18 }
 0x1c6   : > { %938 = vpow2.f32 %v672_v19 }
 0x1c7   : > { %940 = vpow2.f32 %v668_v32 }
 0x1c8   : > { %942 = vpow2.f32 %v676_v22 }
 0x1cb   : > { %v931_v63 = vpop.eup %930 }
 0x1cc   : > { %726 = vperm.xlu1 %893, %v931_v63  }
 0x1cd   : > { %v933_v4 = vpop.eup %932 }
 0x1ce   : > { %v935_v14 = vpop.eup %934  ;;  %716 = vperm.xlu0 %892, %v933_v4  }
 0x1cf   : > { %v937_v31 = vpop.eup %936  ;;  %v686_v28 = vadd.f32 1.0, %v935_v14 }
 0x1d0   : > { %v688_v1 = vadd.f32 1.0, %v937_v31  ;;  %v939_v29 = vpop.eup %938 }
 0x1d1   : > { %v685_v44 = vadd.f32 1.0, %v939_v29  ;;  %v941_v30 = vpop.eup %940 }
 0x1d2   : > { %944 = vrcp.f32 %v688_v1  ;;  %v683_v62 = vadd.f32 1.0, %v941_v30  ;;  %v943_v10 = vpop.eup %942 }
 0x1d3   : > { %946 = vpow2.f32 %v680_v26  ;;  %v687_v34 = vadd.f32 1.0, %v943_v10 }
 0x1d4   : > { %948 = vrcp.f32 %v686_v28 }
 0x1d5   : > { %950 = vrcp.f32 %v685_v44 }
 0x1d6   : > { %952 = vrcp.f32 %v683_v62 }
 0x1d7   : > { %954 = vrcp.f32 %v687_v34 }
 0x1dc   : > { %v945_v33 = vpop.eup %944 }
 0x1dd   : > { %746 = vperm.xlu1 %893, %v945_v33   ;;  %v947_v2 = vpop.eup %946 }
 0x1de   : > { %v949_v17 = vpop.eup %948  ;;  %v689_v35 = vadd.f32 1.0, %v947_v2 }
 0x1df   : > { %v951_v36 = vpop.eup %950 }
 0x1e0   : > { %956 = vrcp.f32 %v689_v35  ;;  %v953_v37 = vpop.eup %952 }
 0x1e1   : > { %736 = vperm.xlu1 %893, %v949_v17   ;;  %v955_v23 = vpop.eup %954 }
 0x1e5   : > { %731 = vperm.xlu1 %893, %v951_v36  }
 0x1e9   : > { %721 = vperm.xlu1 %893, %v953_v37  }
 0x1ea   : > { %v957_v25 = vpop.eup %956 }
 0x1ed   : > { %741 = vperm.xlu1 %893, %v955_v23  }
 0x1f1   : > { %751 = vperm.xlu1 %893, %v957_v25  }
 0x24b   : > { %v727_v38 = vpop.permute.xlu1 %726 }
 0x24c   : > { %v756_v39 = vmul.f32 %v727_v38, %v708_v53 }
 0x24d   : > { %v717_v54 = vpop.permute.xlu0 %716 }
 0x24e   : > { %764 = vst.msk [vmem:[%s1199_s22 + $0x10] sm:$0xff] %vm305_vm1, %v756_v39  ;;  %v754_v40 = vmul.f32 %v717_v54, %v706_v52 }
 0x250   : > { %762 = vst.msk [vmem:[%s1199_s22] sm:$0xff] %vm305_vm1, %v754_v40 }
 0x25c   : > { %v747_v42 = vpop.permute.xlu1 %746 }
 0x25d   : > { %v760_v45 = vmul.f32 %v747_v42, %v712_v41 }
 0x25f   : > { %768 = vst.msk [vmem:[%s1199_s22 + $0x30] sm:$0xff] %vm305_vm1, %v760_v45 }
 0x260   : > { %v737_v48 = vpop.permute.xlu1 %736 }
 0x261   : > { %v758_v47 = vmul.f32 %v737_v48, %v710_v43 }
 0x263   : > { %766 = vst.msk [vmem:[%s1199_s22 + $0x20] sm:$0xff] %vm305_vm1, %v758_v47 }
 0x264   : > { %v732_v50 = vpop.permute.xlu1 %731 }
 0x265   : > { %v757_v49 = vmul.f32 %v732_v50, %v709_v20 }
 0x267   : > { %765 = vst.msk [vmem:[%s1199_s22 + $0x18] sm:$0xff] %vm305_vm1, %v757_v49 }
 0x268   : > { %v722_v13 = vpop.permute.xlu1 %721 }
 0x269   : > { %v755_v56 = vmul.f32 %v722_v13, %v707_v3 }
 0x26b   : > { %763 = vst.msk [vmem:[%s1199_s22 + $0x8] sm:$0xff] %vm305_vm1, %v755_v56 }
 0x26c   : > { %v742_v46 = vpop.permute.xlu1 %741 }
 0x26d   : > { %v759_v59 = vmul.f32 %v742_v46, %v711_v58 }
 0x26f   : > { %767 = vst.msk [vmem:[%s1199_s22 + $0x28] sm:$0xff] %vm305_vm1, %v759_v59 }
 0x270   : > { %v752_v0 = vpop.permute.xlu1 %751 }
 0x271   : > { %v761_v11 = vmul.f32 %v752_v0, %v713_v61 }
 0x273   : > { %769 = vst.msk [vmem:[%s1199_s22 + $0x38] sm:$0xff] %vm305_vm1, %v761_v11 }
 0x274 PF: > { %s18_s23 = sadd.s32 1, %s964_s23  }
 0x275   : > { %p15_p4 = scmp.ge.s32.totalorder %s18_s23, 4  }
 0x277   :  { %17 = sbr.rel (!%p15_p4) target bundleno = 3 (0x3), region = 77 }

// kernel: _lambda_.27
= control target key start
LH: loop header
LB: loop body
LE: loop exit
PB: predicated region body
PF: predicated region fallthrough
CT: control target
= control target key end

     0   :  { %s730_s18 = smov 0   ;;  %s986_s0 = inlined_call_operand.vmem [shape: f32[2,3,10,8,28], index: 0, kind: input, shape index: {}]   ;;  %s987_s1 = inlined_call_operand.vmem [shape: f32[3,3,1,28], index: 1, kind: input, shape index: {}]   ;;  %s988_s2 = inlined_call_operand.vmem [shape: f32[1,28], index: 2, kind: input, shape index: {}]   ;;  %s989_s3 = inlined_call_operand.vmem [shape: f32[28,14], index: 3, kind: input, shape index: {}]   ;;  %s990_s4 = inlined_call_operand.vmem [shape: f32[1,14], index: 4, kind: input, shape index: {}]   ;;  %s991_s5 = inlined_call_operand.vmem [shape: f32[2,8,8,14], index: 5, kind: output, shape index: {}]  }
   0x1 LB: > { %s633_s19 = sadd.s32 4294967295, %s698_s18   ;;  %p637_p0 = scmp.ge.s32.totalorder %s698_s18, 1  ;;  %s698_s18 = sphi %s730_s18, %s15_s18  }
   0x2   : > { %p187_p1 = scmp.lt.s32.totalorder %s698_s18, 3 }
   0x4   : > { %p188_p2 = pnand %p637_p0, %p187_p1 }
   0x5   : > { %v474_v0 = vld [vmem:[%s989_s3] sm:$0xff] (!%p188_p2)  ;;  %v475_v1 = vld [vmem:[%s989_s3 + $0x8] sm:$0xff] (!%p188_p2)  ;;  %v476_v2 = vld [vmem:[%s989_s3 + $0x10] sm:$0xff] (!%p188_p2)  ;;  %p215_p3 = scmp.lt.s32.totalorder (!%p188_p2), %s633_s19, 1  ;;  %vm500_vm0 = vcmask (!%p188_p2), 1045504   ;;  %vm487_vm1 = vcmask (!%p188_p2), 228352  }
   0x6   : > { %191 = sbr.rel (%p188_p2) target bundleno = 281 (0x119), region = 40  ;;  %v478_v3 = vpack.c.bf16 (!%p188_p2), %v475_v1, %v474_v0  ;;  %v477_v4 = vld [vmem:[%s989_s3 + $0x18] sm:$0xf] (!%p188_p2)  ;;  %v756_v7 = vld [vmem:[%s987_s1] ss:$0 sm:$0xff] (!%p188_p2)  ;;  %vm569_vm2 = vcmask (!%p188_p2), 113664  }
   0x7   : > { %v479_v5 = vpack.c.bf16 (!%p188_p2), %v477_v4, %v476_v2  ;;  %v766_v8 = vld [vmem:[%s987_s1 + $0x1] ss:$0 sm:$0xff] (!%p188_p2)  ;;  %v771_v9 = vld [vmem:[%s987_s1 + $0x2] ss:$0 sm:$0xff] (!%p188_p2)  ;;  %v776_v10 = vld [vmem:[%s987_s1 + $0x3] ss:$0 sm:$0xff] (!%p188_p2) }
   0x8   : > { %665 = vmatprep.subr.bf16.mxu0 (!%p188_p2), %v478_v3  ;;  %677 = vmatprep.subr.bf16.mxu1 (!%p188_p2), %v478_v3  ;;  %v786_v16 = vld [vmem:[%s987_s1 + $0x4] ss:$0 sm:$0xff] (!%p188_p2)  ;;  %v816_v40 = vld [vmem:[%s987_s1 + $0x5] ss:$0 sm:$0xff] (!%p188_p2)  ;;  %v825_v46 = vld [vmem:[%s987_s1 + $0x6] ss:$0 sm:$0xff] (!%p188_p2) }
   0x9   : > { %666 = vmatpush3.bf16.msra.mxu0 (!%p188_p2), %v478_v3  ;;  %679 = vmatpush3.bf16.msra.mxu1 (!%p188_p2), %v478_v3  ;;  %v502_v6 = vsel (!%p188_p2), %vm500_vm0, %v479_v5, 0  ;;  %v833_v51 = vld [vmem:[%s987_s1 + $0x7] ss:$0 sm:$0xff] (!%p188_p2)  ;;  %v841_v56 = vld [vmem:[%s987_s1 + $0x8] ss:$0 sm:$0xff] (!%p188_p2) }
   0xa   : > { %681 = vmatprep.subr.msk.bf16.mxu0 (!%p188_p2), %vm500_vm0, %v479_v5  ;;  %682 = vmatprep.subr.msk.bf16.mxu1 (!%p188_p2), %vm500_vm0, %v479_v5 }
   0xd   : > { %s993_s19 = smov (!%p215_p3, %s633_s19), 1  ;;  %668 = vmatpush3.bf16.msra.mxu0 %v502_v6  ;;  %680 = vmatpush3.bf16.msra.mxu1 %v502_v6 }
   0xe   : > { %s683_s28 = smul.u32 240, %s993_s19  ;;  %s658_s29 = sshll.u32 %s993_s19, 6 }
   0xf   : > { %s224_s9 = scalar_lea.vmem %s991_s5, %s658_s29 }
  0x10   : > { %s761_s8 = scalar_lea.vmem %s986_s0, %s683_s28 }
  0x11   : > { %v226_v11 = vld [vmem:[%s761_s8] sm:$0xff]  ;;  %v227_v12 = vld [vmem:[%s761_s8 + $0x8] sm:$0xff]  ;;  %v228_v13 = vld [vmem:[%s761_s8 + $0x10] sm:$0xff] }
  0x12   : > { %v229_v14 = vld [vmem:[%s761_s8 + $0x18] sm:$0xff]  ;;  %v236_v15 = vld [vmem:[%s761_s8 + $0x50] sm:$0xff]  ;;  %v271_v17 = vmul.f32 %v756_v7, %v226_v11  ;;  %v272_v18 = vmul.f32 %v756_v7, %v227_v12  ;;  %v273_v19 = vmul.f32 %v756_v7, %v228_v13  ;;  %v238_v21 = vld [vmem:[%s761_s8 + $0x60] sm:$0xff]  ;;  %v329_v25 = vmul.f32 %v776_v10, %v227_v12 }
  0x13   : > { %v237_v20 = vld [vmem:[%s761_s8 + $0x58] sm:$0xff]  ;;  %v239_v22 = vld [vmem:[%s761_s8 + $0x68] sm:$0xff]  ;;  %v274_v23 = vmul.f32 %v756_v7, %v229_v14  ;;  %v285_v24 = vmul.f32 %v766_v8, %v236_v15  ;;  %v330_v26 = vmul.f32 %v776_v10, %v228_v13  ;;  %v799_v27 = vld [vmem:[%s761_s8 + $0x20] sm:$0xff]  ;;  %v287_v31 = vmul.f32 %v766_v8, %v238_v21 }
  0x14   : > { %v246_v28 = vld [vmem:[%s761_s8 + $0xa0] sm:$0xff]  ;;  %v247_v29 = vld [vmem:[%s761_s8 + $0xa8] sm:$0xff]  ;;  %v286_v30 = vmul.f32 %v766_v8, %v237_v20  ;;  %v288_v32 = vmul.f32 %v766_v8, %v239_v22  ;;  %v331_v33 = vmul.f32 %v776_v10, %v229_v14  ;;  %v248_v34 = vld [vmem:[%s761_s8 + $0xb0] sm:$0xff]  ;;  %v332_v39 = vmul.f32 %v776_v10, %v799_v27 }
  0x15   : > { %v249_v35 = vld [vmem:[%s761_s8 + $0xb8] sm:$0xff]  ;;  %v293_v36 = vadd.f32 %v285_v24, %v271_v17  ;;  %v307_v37 = vmul.f32 %v771_v9, %v246_v28  ;;  %v308_v38 = vmul.f32 %v771_v9, %v247_v29  ;;  %v295_v42 = vadd.f32 %v287_v31, %v273_v19  ;;  %v820_v45 = vld [vmem:[%s761_s8 + $0x70] sm:$0xff]  ;;  %v850_v5 = vld [vmem:[%s761_s8 + $0x28] sm:$0xff] }
  0x16   : > { %v294_v41 = vadd.f32 %v286_v30, %v272_v18  ;;  %v296_v43 = vadd.f32 %v288_v32, %v274_v23  ;;  %v309_v44 = vmul.f32 %v771_v9, %v248_v34  ;;  %v310_v47 = vmul.f32 %v771_v9, %v249_v35  ;;  %v853_v6 = vld [vmem:[%s761_s8 + $0x30] sm:$0xff]  ;;  %v858_v17 = vld [vmem:[%s761_s8 + $0x38] sm:$0xff]  ;;  %v243_v23 = vld [vmem:[%s761_s8 + $0x88] sm:$0xff] }
  0x17   : > { %v315_v48 = vadd.f32 %v307_v37, %v293_v36  ;;  %v351_v49 = vmul.f32 %v786_v16, %v237_v20  ;;  %v352_v50 = vmul.f32 %v786_v16, %v238_v21  ;;  %v353_v54 = vmul.f32 %v786_v16, %v239_v22  ;;  %v861_v18 = vld [vmem:[%s761_s8 + $0x78] sm:$0xff]  ;;  %v869_v24 = vld [vmem:[%s761_s8 + $0xc0] sm:$0xff]  ;;  %v876_v28 = vld [vmem:[%s761_s8 + $0xc8] sm:$0xff] }
  0x18   : > { %v316_v52 = vadd.f32 %v308_v38, %v294_v41  ;;  %v317_v53 = vadd.f32 %v309_v44, %v295_v42  ;;  %v354_v55 = vmul.f32 %v786_v16, %v820_v45  ;;  %v318_v57 = vadd.f32 %v310_v47, %v296_v43  ;;  %v252_v32 = vld [vmem:[%s761_s8 + $0xd0] sm:$0xff]  ;;  %v253_v37 = vld [vmem:[%s761_s8 + $0xd8] sm:$0xff] }
  0x19   : > { %v337_v58 = vadd.f32 %v329_v25, %v315_v48  ;;  %v373_v59 = vmul.f32 %v816_v40, %v247_v29  ;;  %v374_v60 = vmul.f32 %v816_v40, %v248_v34  ;;  %v375_v63 = vmul.f32 %v816_v40, %v249_v35  ;;  %v899_v48 = vld [vmem:[%s988_s2] ss:$0 sm:$0xff] }
  0x1a   : > { %v338_v61 = vadd.f32 %v330_v26, %v316_v52  ;;  %v339_v62 = vadd.f32 %v331_v33, %v317_v53  ;;  %v395_v0 = vmul.f32 %v825_v46, %v228_v13  ;;  %v340_v1 = vadd.f32 %v332_v39, %v318_v57 }
  0x1b   : > { %v359_v2 = vadd.f32 %v351_v49, %v337_v58  ;;  %v396_v3 = vmul.f32 %v825_v46, %v229_v14  ;;  %v417_v4 = vmul.f32 %v833_v51, %v238_v21  ;;  %v418_v15 = vmul.f32 %v833_v51, %v239_v22  ;;  %v242_v21 = vld [vmem:[%s761_s8 + $0x80] sm:$0xff] }
  0x1c   : > { %v360_v11 = vadd.f32 %v352_v50, %v338_v61  ;;  %v361_v12 = vadd.f32 %v353_v54, %v339_v62  ;;  %v439_v13 = vmul.f32 %v841_v56, %v248_v34  ;;  %v863_v19 = vadd.f32 %v354_v55, %v340_v1  ;;  %v234_v49 = vld [vmem:[%s761_s8 + $0x40] sm:$0xff] }
  0x1d   : > { %v381_v14 = vadd.f32 %v373_v59, %v359_v2  ;;  %v440_v20 = vmul.f32 %v841_v56, %v249_v35  ;;  %v275_v22 = vmul.f32 %v756_v7, %v799_v27  ;;  %v276_v29 = vmul.f32 %v756_v7, %v850_v5 }
  0x1e   : > { %v382_v25 = vadd.f32 %v374_v60, %v360_v11  ;;  %v873_v26 = vadd.f32 %v375_v63, %v361_v12  ;;  %v277_v30 = vmul.f32 %v756_v7, %v853_v6  ;;  %v278_v33 = vmul.f32 %v756_v7, %v858_v17 }
  0x1f   : > { %v403_v31 = vadd.f32 %v395_v0, %v381_v14  ;;  %v289_v34 = vmul.f32 %v766_v8, %v820_v45  ;;  %v290_v35 = vmul.f32 %v766_v8, %v861_v18  ;;  %v291_v38 = vmul.f32 %v766_v8, %v242_v21 }
  0x20   : > { %v404_v36 = vadd.f32 %v396_v3, %v382_v25  ;;  %v292_v39 = vmul.f32 %v766_v8, %v243_v23  ;;  %v311_v41 = vmul.f32 %v771_v9, %v869_v24  ;;  %v312_v7 = vmul.f32 %v771_v9, %v876_v28 }
  0x21   : > { %v425_v42 = vadd.f32 %v417_v4, %v403_v31  ;;  %v297_v43 = vadd.f32 %v289_v34, %v275_v22  ;;  %v298_v44 = vadd.f32 %v290_v35, %v276_v29  ;;  %v299_v50 = vadd.f32 %v291_v38, %v277_v30 }
  0x22   : > { %v426_v47 = vadd.f32 %v418_v15, %v404_v36  ;;  %v300_v52 = vadd.f32 %v292_v39, %v278_v33  ;;  %v313_v8 = vmul.f32 %v771_v9, %v252_v32  ;;  %v314_v54 = vmul.f32 %v771_v9, %v253_v37 }
  0x23   : > { %v447_v53 = vadd.f32 %v439_v13, %v425_v42  ;;  %v319_v55 = vadd.f32 %v311_v41, %v297_v43  ;;  %v320_v57 = vadd.f32 %v312_v7, %v298_v44  ;;  %v333_v60 = vmul.f32 %v776_v10, %v850_v5  ;;  %v254_v7 = vld [vmem:[%s761_s8 + $0xe0] sm:$0xff] }
  0x24   : > { %v448_v58 = vadd.f32 %v440_v20, %v426_v47  ;;  %v321_v59 = vadd.f32 %v313_v8, %v299_v50  ;;  %v334_v61 = vmul.f32 %v776_v10, %v853_v6  ;;  %v322_v63 = vadd.f32 %v314_v54, %v300_v52  ;;  %v235_v50 = vld [vmem:[%s761_s8 + $0x48] sm:$0xff]  ;;  %v245_v54 = vld [vmem:[%s761_s8 + $0x98] sm:$0xff] }
  0x25   : > { %v462_v62 = vadd.f32 %v899_v48, %v447_v53  ;;  %v335_v0 = vmul.f32 %v776_v10, %v858_v17  ;;  %v336_v1 = vmul.f32 %v776_v10, %v234_v49  ;;  %v341_v2 = vadd.f32 %v333_v60, %v319_v55 }
  0x26   : > { %v463_v9 = vadd.f32 %v899_v48, %v448_v58  ;;  %v342_v3 = vadd.f32 %v334_v61, %v320_v57  ;;  %v355_v4 = vmul.f32 %v786_v16, %v861_v18  ;;  %v356_v15 = vmul.f32 %v786_v16, %v242_v21 }
  0x27   : > { %v343_v11 = vadd.f32 %v335_v0, %v321_v59  ;;  %v344_v12 = vadd.f32 %v336_v1, %v322_v63  ;;  %v357_v13 = vmul.f32 %v786_v16, %v243_v23  ;;  %v377_v22 = vmul.f32 %v816_v40, %v876_v28  ;;  %v255_v0 = vld [vmem:[%s761_s8 + $0xe8] sm:$0xff] }
  0x28   : > { %v470_v14 = vpack.c.bf16 %v463_v9, %v462_v62  ;;  %v363_v20 = vadd.f32 %v355_v4, %v341_v2  ;;  %v378_v10 = vmul.f32 %v816_v40, %v252_v32  ;;  %v364_v25 = vadd.f32 %v356_v15, %v342_v3 }
  0x29   : > { %v365_v29 = vadd.f32 %v357_v13, %v343_v11  ;;  %v379_v30 = vmul.f32 %v816_v40, %v253_v37  ;;  %v399_v31 = vmul.f32 %v825_v46, %v853_v6  ;;  %v400_v34 = vmul.f32 %v825_v46, %v858_v17 }
  0x2a   : > { %669 = vmatprep.mubr.msk.bf16.mxu0 %vm487_vm1, %v470_v14  ;;  %v385_v33 = vadd.f32 %v377_v22, %v363_v20  ;;  %v421_v35 = vmul.f32 %v833_v51, %v242_v21  ;;  %v422_v36 = vmul.f32 %v833_v51, %v243_v23  ;;  %v386_v38 = vadd.f32 %v378_v10, %v364_v25  ;;  %v244_v21 = vld [vmem:[%s761_s8 + $0x90] sm:$0xff] }
  0x2b   : > { %v387_v39 = vadd.f32 %v379_v30, %v365_v29  ;;  %v443_v41 = vmul.f32 %v841_v56, %v252_v32  ;;  %v444_v42 = vmul.f32 %v841_v56, %v253_v37  ;;  %v376_v6 = vmul.f32 %v816_v40, %v869_v24 }
  0x2c   : > { %v407_v43 = vadd.f32 %v399_v31, %v385_v33  ;;  %v397_v44 = vmul.f32 %v825_v46, %v799_v27  ;;  %v398_v17 = vmul.f32 %v825_v46, %v850_v5  ;;  %v408_v23 = vadd.f32 %v400_v34, %v386_v38 }
  0x2d   : > { %v419_v47 = vmul.f32 %v833_v51, %v820_v45  ;;  %v420_v32 = vmul.f32 %v833_v51, %v861_v18  ;;  %v441_v37 = vmul.f32 %v841_v56, %v869_v24  ;;  %v384_v8 = vadd.f32 %v376_v6, %v863_v19 }
  0x2e   : > { %v429_v52 = vadd.f32 %v421_v35, %v407_v43  ;;  %v405_v27 = vadd.f32 %v397_v44, %v873_v26  ;;  %v442_v5 = vmul.f32 %v841_v56, %v876_v28  ;;  %v430_v53 = vadd.f32 %v422_v36, %v408_v23 }
  0x2f   : > { %v358_v45 = vmul.f32 %v786_v16, %v244_v21  ;;  %v380_v55 = vmul.f32 %v816_v40, %v254_v7  ;;  %v401_v18 = vmul.f32 %v825_v46, %v234_v49  ;;  %v406_v24 = vadd.f32 %v398_v17, %v384_v8 }
  0x30   : > { %v451_v57 = vadd.f32 %v443_v41, %v429_v52  ;;  %v427_v58 = vadd.f32 %v419_v47, %v405_v27  ;;  %v402_v59 = vmul.f32 %v825_v46, %v235_v50  ;;  %v452_v19 = vadd.f32 %v444_v42, %v430_v53 }
  0x31   : > { %v366_v60 = vadd.f32 %v358_v45, %v344_v12  ;;  %v409_v26 = vadd.f32 %v401_v18, %v387_v39  ;;  %v423_v61 = vmul.f32 %v833_v51, %v244_v21  ;;  %v428_v62 = vadd.f32 %v420_v32, %v406_v24 }
  0x32   : > { %v466_v28 = vadd.f32 %v899_v48, %v451_v57  ;;  %v449_v63 = vadd.f32 %v441_v37, %v427_v58  ;;  %v424_v16 = vmul.f32 %v833_v51, %v245_v54  ;;  %v467_v40 = vadd.f32 %v899_v48, %v452_v19 }
  0x33   : > { %v388_v49 = vadd.f32 %v380_v55, %v366_v60  ;;  %v431_v1 = vadd.f32 %v423_v61, %v409_v26  ;;  %v445_v9 = vmul.f32 %v841_v56, %v254_v7  ;;  %v450_v2 = vadd.f32 %v442_v5, %v428_v62 }
  0x34   : > { %v464_v46 = vadd.f32 %v899_v48, %v449_v63  ;;  %v472_v3 = vpack.c.bf16 %v467_v40, %v466_v28  ;;  %v446_v11 = vmul.f32 %v841_v56, %v255_v0  ;;  %v651_v56 = vld [vmem:[%s990_s4] ss:$0 sm:$0xff] }
  0x35   : > { %v410_v4 = vadd.f32 %v402_v59, %v388_v49  ;;  %v453_v12 = vadd.f32 %v445_v9, %v431_v1  ;;  %v465_v15 = vadd.f32 %v899_v48, %v450_v2 }
  0x36   : > { %673 = vmatprep.mubr.msk.bf16.mxu1 %vm487_vm1, %v472_v3 }
  0x37   : > { %v432_v51 = vadd.f32 %v424_v16, %v410_v4  ;;  %v471_v13 = vpack.c.bf16 %v465_v15, %v464_v46  ;;  %v468_v20 = vadd.f32 %v899_v48, %v453_v12 }
  0x39   : > { %v454_v14 = vadd.f32 %v446_v11, %v432_v51  ;;  %670 = vmatmul.mubr.msk.bf16.vlgmr.msra.gmra.mrb[0].mxu0 %vm487_vm1, %v471_v13 }
  0x3b   : > { %v469_v22 = vadd.f32 %v899_v48, %v454_v14 }
  0x3d   : > { %v473_v10 = vpack.c.bf16 %v469_v22, %v468_v20 }
  0x3f   : > { %674 = vmatmul.mubr.msk.bf16.vlgmr.msra.gmra.mrb[0].mxu1 %vm487_vm1, %v473_v10 }
 0x10c   : > { %v671_v25 = vpop.f32.mrb[0].mxu0 }
 0x10d   : > { %v547_v29 = vadd.f32 %v671_v25, %v651_v56  ;;  %v538_v30 = vpop.f32.mrb[1].mxu0 }
 0x10e   : > { %v539_v31 = vadd.f32 %v651_v56, %v538_v30  ;;  %v672_v33 = vpop.f32.mrb[2].mxu0 }
 0x10f   : > { %572 = vst.msk [vmem:[%s224_s9 + $0x10] sm:$0xff] %vm569_vm2, %v547_v29  ;;  %v550_v48 = vadd.f32 %v672_v33, %v651_v56  ;;  %v541_v34 = vpop.f32.mrb[3].mxu0 }
 0x110   : > { %570 = vst.msk [vmem:[%s224_s9] sm:$0xff] %vm569_vm2, %v539_v31  ;;  %v542_v35 = vadd.f32 %v651_v56, %v541_v34 }
 0x111   : > { %573 = vst.msk [vmem:[%s224_s9 + $0x18] sm:$0xff] %vm569_vm2, %v550_v48 }
 0x112   : > { %v675_v36 = vpop.f32.mrb[0].mxu1  ;;  %571 = vst.msk [vmem:[%s224_s9 + $0x8] sm:$0xff] %vm569_vm2, %v542_v35 }
 0x113   : > { %v563_v38 = vadd.f32 %v675_v36, %v651_v56  ;;  %v554_v39 = vpop.f32.mrb[1].mxu1 }
 0x114   : > { %v555_v41 = vadd.f32 %v651_v56, %v554_v39  ;;  %v676_v42 = vpop.f32.mrb[2].mxu1 }
 0x115   : > { %576 = vst.msk [vmem:[%s224_s9 + $0x30] sm:$0xff] %vm569_vm2, %v563_v38  ;;  %v566_v43 = vadd.f32 %v676_v42, %v651_v56  ;;  %v557_v6 = vpop.f32.mrb[3].mxu1 }
 0x116   : > { %574 = vst.msk [vmem:[%s224_s9 + $0x20] sm:$0xff] %vm569_vm2, %v555_v41  ;;  %v558_v44 = vadd.f32 %v651_v56, %v557_v6 }
 0x117   : > { %577 = vst.msk [vmem:[%s224_s9 + $0x38] sm:$0xff] %vm569_vm2, %v566_v43 }
 0x118   : > { %575 = vst.msk [vmem:[%s224_s9 + $0x28] sm:$0xff] %vm569_vm2, %v558_v44 }
 0x119 PF: > { %s15_s18 = sadd.s32 1, %s698_s18  }
 0x11a   : > { %p12_p4 = scmp.ge.s32.totalorder %s15_s18, 4  }
 0x11c   :  { %14 = sbr.rel (!%p12_p4) target bundleno = 1 (0x1), region = 70 }

// kernel: _lambda_.28
= control target key start
LH: loop header
LB: loop body
LE: loop exit
PB: predicated region body
PF: predicated region fallthrough
CT: control target
= control target key end

     0   :  { %s581_s15 = smov 0   ;;  %s583_s16 = smov 0   ;;  %s650_s0 = inlined_call_operand.vmem [shape: f32[2,64,28], index: 0, kind: input, shape index: {}]   ;;  %s651_s1 = inlined_call_operand.vmem [shape: f32[2,1,28], index: 1, kind: input, shape index: {}]   ;;  %s652_s2 = inlined_call_operand.vmem [shape: f32[28,14], index: 2, kind: input, shape index: {}]   ;;  %s653_s3 = inlined_call_operand.vmem [shape: f32[1,14], index: 3, kind: input, shape index: {}]   ;;  %s654_s4 = inlined_call_operand.vmem [shape: f32[2,64,14], index: 4, kind: output, shape index: {}]  }
   0x1   :  { %s585_s17 = smov 0   ;;  %s587_s18 = smov 0  }
   0x2   :  { %s589_s19 = smov 0  }
   0x3 LB: > { %s23_s20 = sadd.s32 1, %s546_s17  ;;  %s26_s21 = sadd.s32 1, %s550_s18  ;;  %s554_s19 = sphi %s589_s19, %s14_s19   ;;  %s550_s18 = sphi %s587_s18, %s658_s18   ;;  %s546_s17 = sphi %s585_s17, %s657_s17   ;;  %s542_s16 = sphi %s583_s16, %s656_s16   ;;  %s538_s15 = sphi %s581_s15, %s655_s15  }
   0x4   : > { %p24_p0 = scmp.ge.s32.totalorder %s23_s20, 2  ;;  %p450_p1 = scmp.ge.s32.totalorder %s554_s19, 1 }
   0x5   : > { %p191_p2 = scmp.lt.s32.totalorder %s554_s19, 5 }
   0x6   : > { %s660_s20 = smov (%p24_p0, %s23_s20), 0  ;;  %s662_s21 = smov (!%p24_p0, %s26_s21), %s550_s18 }
   0x7   : > { %p192_p3 = pnand %p450_p1, %p191_p2  ;;  %p28_p4 = scmp.ge.s32.totalorder %s662_s21, 2 }
   0x8   : > { %v269_v0 = vld [vmem:[%s652_s2] sm:$0xff] (!%p192_p3)  ;;  %v270_v1 = vld [vmem:[%s652_s2 + $0x8] sm:$0xff] (!%p192_p3)  ;;  %v271_v2 = vld [vmem:[%s652_s2 + $0x10] sm:$0xff] (!%p192_p3)  ;;  %s451_s28 = sshll.u32 (!%p192_p3), %s538_s15, 2  ;;  %p229_p5 = scmp.lt.s32.totalorder (!%p192_p3), %s542_s16, 1  ;;  %vm289_vm0 = vcmask (!%p192_p3), 1045504  }
   0x9   : > { %s664_s21 = smov (%p28_p4, %s662_s21), 0  ;;  %195 = sbr.rel (%p192_p3) target bundleno = 245 (0xf5), region = 36 }
   0xa   : > { %v273_v3 = vpack.c.bf16 (!%p192_p3), %v270_v1, %v269_v0  ;;  %v272_v4 = vld [vmem:[%s652_s2 + $0x18] sm:$0xf] (!%p192_p3)  ;;  %p231_p6 = scmp.lt.s32.totalorder (!%p192_p3), %s451_s28, 7  ;;  %vm282_vm1 = vcmask (!%p192_p3), 228352   ;;  %v458_v18 = vld [vmem:[%s653_s3] ss:$0 sm:$0xff] (!%p192_p3) }
   0xb   : > { %v274_v5 = vpack.c.bf16 (!%p192_p3), %v272_v4, %v271_v2  ;;  %vm342_vm2 = vcmask (!%p192_p3), 113664  }
   0xc   : > { %467 = vmatprep.subr.bf16.mxu0 (!%p192_p3), %v273_v3 }
   0xd   : > { %468 = vmatpush3.bf16.msra.mxu0 (!%p192_p3), %v273_v3  ;;  %v291_v6 = vsel (!%p192_p3), %vm289_vm0, %v274_v5, 0 }
   0xe   : > { %475 = vmatprep.subr.msk.bf16.mxu0 (!%p192_p3), %vm289_vm0, %v274_v5 }
  0x10   : > { %s666_s16 = smov (!%p229_p5, %s542_s16), 1  ;;  %s668_s28 = smov (!%p231_p6, %s451_s28), 7 }
  0x11   : > { %s452_s5 = sshll.u32 %s666_s16, 3  ;;  %s240_s8 = scalar_lea.vmem %s651_s1, %s666_s16  ;;  %470 = vmatpush3.bf16.msra.mxu0 %v291_v6 }
  0x12   : > { %s234_s9 = sadd.s32 %s452_s5, %s668_s28  ;;  %v457_v7 = vld [vmem:[%s240_s8] ss:$0 sm:$0xff] }
  0x13   : > { %s453_s10 = sshll.u32 %s234_s9, 3 }
  0x14   : > { %s236_s13 = scalar_lea.vmem %s650_s0, %s453_s10  ;;  %s249_s23 = scalar_lea.vmem %s654_s4, %s453_s10 }
  0x15   : > { %v252_v8 = vld [vmem:[%s236_s13] sm:$0xff]  ;;  %v253_v9 = vld [vmem:[%s236_s13 + $0x8] sm:$0xff]  ;;  %v254_v10 = vld [vmem:[%s236_s13 + $0x10] sm:$0xff] }
  0x16   : > { %v263_v11 = vmul.f32 %v457_v7, %v252_v8  ;;  %v264_v12 = vmul.f32 %v457_v7, %v253_v9  ;;  %v255_v13 = vld [vmem:[%s236_s13 + $0x18] sm:$0xff]  ;;  %v265_v14 = vmul.f32 %v457_v7, %v254_v10 }
  0x17   : > { %v266_v15 = vmul.f32 %v457_v7, %v255_v13 }
  0x18   : > { %v267_v16 = vpack.c.bf16 %v264_v12, %v263_v11 }
  0x19   : > { %v268_v17 = vpack.c.bf16 %v266_v15, %v265_v14 }
  0x1a   : > { %471 = vmatprep.mubr.msk.bf16.mxu0 %vm282_vm1, %v267_v16 }
  0x1b   : > { %472 = vmatmul.mubr.msk.bf16.vlgmr.msra.gmra.mrb[0].mxu0 %vm282_vm1, %v268_v17 }
  0xee   : > { %v473_v19 = vpop.f32.mrb[0].mxu0 }
  0xef   : > { %v336_v20 = vadd.f32 %v473_v19, %v458_v18  ;;  %v327_v21 = vpop.f32.mrb[1].mxu0 }
  0xf0   : > { %v328_v22 = vadd.f32 %v458_v18, %v327_v21  ;;  %v474_v23 = vpop.f32.mrb[2].mxu0 }
  0xf1   : > { %345 = vst.msk [vmem:[%s249_s23 + $0x10] sm:$0xff] %vm342_vm2, %v336_v20  ;;  %v339_v24 = vadd.f32 %v474_v23, %v458_v18  ;;  %v330_v25 = vpop.f32.mrb[3].mxu0 }
  0xf2   : > { %343 = vst.msk [vmem:[%s249_s23] sm:$0xff] %vm342_vm2, %v328_v22  ;;  %v331_v26 = vadd.f32 %v458_v18, %v330_v25 }
  0xf3   : > { %346 = vst.msk [vmem:[%s249_s23 + $0x18] sm:$0xff] %vm342_vm2, %v339_v24 }
  0xf4   : > { %344 = vst.msk [vmem:[%s249_s23 + $0x8] sm:$0xff] %vm342_vm2, %v331_v26 }
  0xf5 PF: > { %s14_s19 = sadd.s32 1, %s554_s19   ;;  %s655_s15 = smov %s546_s17 }
  0xf6   : > { %p11_p7 = scmp.ge.s32.totalorder %s14_s19, 6   ;;  %s656_s16 = smov %s550_s18 }
  0xf7   : > { %s657_s17 = smov %s660_s20  ;;  %s658_s18 = smov %s664_s21 }
  0xf8   :  { %13 = sbr.rel (!%p11_p7) target bundleno = 3 (0x3), region = 69 }

// kernel: _lambda_.21
= control target key start
LH: loop header
LB: loop body
LE: loop exit
PB: predicated region body
PF: predicated region fallthrough
CT: control target
= control target key end

     0   :  { %v219_v0 = vmov 0.0   ;;  %vm220_vm0 = vmmov 0   ;;  %vm40_vm1 = vcmask 1045504   ;;  %vm36_vm2 = vcmask 228352   ;;  %s280_s1 = inlined_call_operand.vmem [shape: f32[28,7], index: 1, kind: input, shape index: {}]   ;;  %s281_s0 = inlined_call_operand.vmem [shape: f32[2,28], index: 0, kind: input, shape index: {}]   ;;  %s282_s3 = inlined_call_operand.vmem [shape: f32[7,28], index: 3, kind: input, shape index: {}]   ;;  %s283_s2 = inlined_call_operand.vmem [shape: f32[1,7], index: 2, kind: input, shape index: {}]   ;;  %s284_s4 = inlined_call_operand.vmem [shape: f32[1,28], index: 4, kind: input, shape index: {}]   ;;  %s285_s5 = inlined_call_operand.vmem [shape: f32[2,28], index: 5, kind: output, shape index: {}]  }
   0x1   :  { %193 = vmatprep.subr.bf16.mxu0 %v219_v0  ;;  %v23_v1 = vld [vmem:[%s280_s1] sm:$0xff]  ;;  %v24_v2 = vld [vmem:[%s280_s1 + $0x8] sm:$0xff]  ;;  %v25_v3 = vld [vmem:[%s280_s1 + $0x10] sm:$0xff]  ;;  %197 = vmatprep.mubr.msk.bf16.mxu0 %vm220_vm0, %v219_v0  ;;  %vm125_vm3 = vcmask 1042432   ;;  %vm126_vm4 = vcmask 1043456   ;;  %v221_v12 = vmov 65535  }
   0x2   :  { %v27_v4 = vpack.c.bf16 %v24_v2, %v23_v1  ;;  %v26_v5 = vld [vmem:[%s280_s1 + $0x18] sm:$0xf]  ;;  %201 = vmatprep.subr.bf16.mxu1 %v219_v0  ;;  %203 = vmatprep.mubr.msk.bf16.mxu1 %vm220_vm0, %v219_v0  ;;  %v21_v7 = vld [vmem:[%s281_s0] sm:$0x3]  ;;  %v127_v13 = vsel %vm125_vm3, 4294967295, %v221_v12  ;;  %v222_v42 = vmov -1.0  }
   0x3   :  { %v28_v6 = vpack.c.bf16 %v26_v5, %v25_v3  ;;  %v22_v9 = vpack.c.bf16 %v21_v7, %v21_v7  ;;  %v112_v10 = vld [vmem:[%s282_s3] sm:$0x7f]  ;;  %v128_v14 = vsel %vm126_vm4, %v127_v13, 0  ;;  %vm121_vm6 = vcmask 56320  }
   0x4   :  { %194 = vmatpush3.bf16.msra.mxu0 %v27_v4  ;;  %v113_v11 = vpack.c.bf16 %v112_v10, %v112_v10  ;;  %v184_v16 = vld [vmem:[%s283_s2] ss:$0 sm:$0xff]  ;;  %vm178_vm7 = vcmask 222208  }
   0x5   :  { %195 = vmatprep.subr.bf16.mxu0 %v219_v0  ;;  %v42_v8 = vsel %vm40_vm1, %v28_v6, 0  ;;  %v186_v49 = vld [vmem:[%s284_s4] ss:$0 sm:$0xff] }
   0x6   :  { %v130_v15 = vand.u32 %v128_v14, %v113_v11 }
   0x8   :  { %196 = vmatpush3.bf16.msra.mxu0 %v42_v8  ;;  %202 = vmatpush3.bf16.msra.mxu1 %v130_v15 }
   0xb   :  { %198 = vmatmul.mubr.msk.bf16.vlgmr.msra.gmra.mrb[0].mxu0 %vm36_vm2, %v22_v9 }
  0xde   :  { %v78_v17 = vpop.f32.mrb[0].mxu0 }
  0xdf   :  { %v79_v18 = vadd.f32 %v184_v16, %v78_v17  ;;  %v199_v19 = vpop.f32.mrb[1].mxu0 }
  0xe0   :  { %v81_v20 = vpop.f32.mrb[2].mxu0 }
  0xe1   :  { %v85_v21 = vmul.f32 0.70710677, %v79_v18  ;;  %v200_v22 = vpop.f32.mrb[3].mxu0  ;;  %v84_v45 = vmul.f32 0.5, %v79_v18 }
  0xe3   :  { %v88_v23 = vand.u32 2147483647, %v85_v21  ;;  %vm86_vm5 = vcmp.ge.f32.partialorder %v85_v21, 0.0 }
  0xe4   :  { %v87_v43 = vsel %vm86_vm5, 1.0, %v222_v42 }
  0xe5   :  { %v89_v24 = vmul.f32 0.3275911, %v88_v23  ;;  %v102_v26 = vsub.f32 0.0, %v88_v23 }
  0xe7   :  { %v90_v25 = vadd.f32 1.0, %v89_v24  ;;  %v103_v28 = vmul.f32 %v102_v26, %v88_v23 }
  0xe9   :  { %211 = vrcp.f32 %v90_v25  ;;  %v104_v31 = vmul.f32 1.442695, %v103_v28 }
  0xeb   :  { %213 = vpow2.f32 %v104_v31 }
  0xf3   :  { %v212_v27 = vpop.eup %211 }
  0xf4   :  { %v93_v29 = vmul.f32 1.0614054, %v212_v27 }
  0xf5   :  { %v214_v39 = vpop.eup %213 }
  0xf6   :  { %v94_v30 = vadd.f32 -1.4531521, %v93_v29 }
  0xf8   :  { %v95_v32 = vmul.f32 %v212_v27, %v94_v30 }
  0xfa   :  { %v96_v33 = vadd.f32 1.4214138, %v95_v32 }
  0xfc   :  { %v97_v34 = vmul.f32 %v212_v27, %v96_v33 }
  0xfe   :  { %v98_v35 = vadd.f32 -0.28449672, %v97_v34 }
 0x100   :  { %v99_v36 = vmul.f32 %v212_v27, %v98_v35 }
 0x102   :  { %v100_v37 = vadd.f32 0.2548296, %v99_v36 }
 0x104   :  { %v101_v38 = vmul.f32 %v212_v27, %v100_v37 }
 0x106   :  { %v106_v40 = vmul.f32 %v214_v39, %v101_v38 }
 0x108   :  { %v107_v41 = vsub.f32 1.0, %v106_v40 }
 0x10a   :  { %v108_v44 = vmul.f32 %v107_v41, %v87_v43 }
 0x10c   :  { %v109_v46 = vadd.f32 1.0, %v108_v44 }
 0x10e   :  { %v110_v47 = vmul.f32 %v109_v46, %v84_v45 }
 0x110   :  { %v111_v48 = vpack.c.bf16 %v110_v47, %v110_v47 }
 0x112   :  { %204 = vmatmul.mubr.msk.bf16.vlgmr.msra.gmra.mrb[0].mxu1 %vm121_vm6, %v111_v48 }
 0x1e5   :  { %v166_v50 = vpop.f32.mrb[0].mxu1 }
 0x1e6   :  { %v167_v51 = vadd.f32 %v186_v49, %v166_v50  ;;  %v205_v52 = vpop.f32.mrb[1].mxu1 }
 0x1e7   :  { %v169_v53 = vpop.f32.mrb[2].mxu1 }
 0x1e8   :  { %v172_v54 = vsub.f32 0.0, %v167_v51  ;;  %v206_v55 = vpop.f32.mrb[3].mxu1 }
 0x1ea   :  { %v173_v56 = vmul.f32 1.442695, %v172_v54 }
 0x1ec   :  { %215 = vpow2.f32 %v173_v56 }
 0x1f6   :  { %v216_v57 = vpop.eup %215 }
 0x1f7   :  { %v175_v58 = vadd.f32 1.0, %v216_v57 }
 0x1f9   :  { %217 = vrcp.f32 %v175_v58 }
 0x203   :  { %v218_v59 = vpop.eup %217 }
 0x204   :  { %179 = vst.msk [vmem:[%s285_s5] sm:$0x3] %vm178_vm7, %v218_v59 }

</bundles_post_ra>
